<compile_context>
chip_gen: v5e
topology: v5e:2x2
jax: 0.10.0
libtpu: 0.0.40
codegen_flags: <defaults>
</compile_context>

<pallas_src>
import jax
import jax.numpy as jnp
import numpy as np
from jax.experimental import pallas as pl
from jax.experimental.pallas import tpu as pltpu

KH, KW = 3, 3          # kernel_size of CircularConv2d h (must be odd, >= 3)
N_TAYLOR = 2           # taylor_nb_iterations
NB_ITER = 3            # nb_iterations (unfolding depth)


# ---------------------------------------------------------------------------
# Fused Pallas kernel: all iterations + normalize, single invocation (no grid)
# ---------------------------------------------------------------------------
def _make_fused_kernel(H, W, kh, kw, n_taylor, nb_iter, decim_row, decim_col):
    assert kh % 2 == 1 and kw % 2 == 1 and kh >= 3 and kw >= 3
    n, m = kh // 2, kw // 2
    # conv-tap positions that coincide with the laplacian's +-1 shifts
    lap_idx = {(n - 1, m), (n + 1, m), (n, m - 1), (n, m + 1)}
    need_mask = (decim_row > 1) or (decim_col > 1)

    def roll0(x, s):                       # circular shift along rows (sublanes)
        s = s % H
        return x if s == 0 else pltpu.roll(x, s, axis=0)

    def roll1(x, s):                       # circular shift along cols (lanes)
        s = s % W
        return x if s == 0 else pltpu.roll(x, s, axis=1)

    def kernel(w_ref, s_ref, stg_ref, o_ref,
               dx_ref, dy_ref, bx_ref, by_ref, mask_ref):
        alpha = s_ref[0]
        beta0 = s_ref[1]
        beta1 = s_ref[2]
        sigma = s_ref[3]
        bps = beta0 + sigma                # hoisted out of the Taylor loop
        thr = beta1 / sigma                # shrinkage threshold, hoisted

        # ---- init (straight-line, no pl.when: single invocation) ----
        z = jnp.zeros((H, W), jnp.float32)
        dx_ref[...] = z
        dy_ref[...] = z
        bx_ref[...] = z
        by_ref[...] = z
        if need_mask:
            # S^T S mask built once for the whole kernel (hoisted out of
            # compute(); previously recomputed N_TAYLOR times per iteration).
            ri = jax.lax.broadcasted_iota(jnp.int32, (H, W), 0)
            ci = jax.lax.broadcasted_iota(jnp.int32, (H, W), 1)
            keep = ((ri % decim_row) == 0) & ((ci % decim_col) == 0)
            mask_ref[...] = jnp.where(keep, 1.0, 0.0).astype(jnp.float32)

        f = None
        for it in range(nb_iter):          # fully unrolled unfolding loop
            # per-iteration (kh, kw) weights, read once from SMEM
            w = [[w_ref[it, i * kw + j] for j in range(kw)] for i in range(kh)]

            def conv_t(x, w=w):
                # h.T: the PyTorch module flips dims [0,1] of the (1,H,W)
                # tensor, i.e. rows only -> circular correlation with a
                # row-flipped kernel.  Row roll done per-i to keep liveness low.
                acc = None
                for i in range(kh):
                    row_i = roll0(x, n - i)
                    wi = kh - 1 - i
                    for j in range(kw):
                        term = w[wi][j] * roll1(row_i, m - j)
                        acc = term if acc is None else acc + term
                return acc

            def compute(u, w=w):
                # u - alpha * H^T S^T S H u - (beta0+sigma) * laplacian(u)
                # conv taps are shared with the 5-pt laplacian -> no extra rolls.
                hu = None
                lap_sum = None
                for i in range(kh):
                    row_i = roll0(u, n - i)
                    for j in range(kw):
                        tap = roll1(row_i, m - j)
                        term = w[i][j] * tap
                        hu = term if hu is None else hu + term
                        if (i, j) in lap_idx:
                            lap_sum = tap if lap_sum is None else lap_sum + tap
                if need_mask:
                    hu = hu * mask_ref[...]            # S^T S (precomputed mask)
                ht = conv_t(hu)
                lap_u = 4.0 * u - lap_sum
                return u - alpha * ht - bps * lap_u

            # x0 = sigma * (dxT(d_x - b_x) + dyT(d_y - b_y)) + alpha * h.T(STg)
            tx = dx_ref[...] - bx_ref[...]
            ty = dy_ref[...] - by_ref[...]
            gradT = (roll1(tx, 1) - tx) + (roll0(ty, 1) - ty)
            x0 = sigma * gradT + alpha * conv_t(stg_ref[...])

            # taylor_young_ld
            ld = x0
            for _ in range(n_taylor):
                ld = x0 - compute(ld)
            f = ld

            # isotropic soft-threshold + Bregman updates (state stays in VMEM)
            dxf = roll1(f, -1) - f                       # d_x(f)
            dyf = roll0(f, -1) - f                       # d_y(f)
            vx = dxf + bx_ref[...]
            vy = dyf + by_ref[...]
            n2 = vx * vx + vy * vy
            # max(|v| - thr, 0) / max(|v|, eps)  ==  max(1 - thr/|v|, 0)
            sc = jnp.maximum(1.0 - thr * jax.lax.rsqrt(jnp.maximum(n2, 1e-24)),
                             0.0)
            dx_new = vx * sc
            dy_new = vy * sc
            dx_ref[...] = dx_new
            dy_ref[...] = dy_new
            bx_ref[...] = vx - dx_new                    # == b_x + dxf - d_x
            by_ref[...] = vy - dy_new                    # == b_y + dyf - d_y

        # ---- finalize: min/max normalize (straight-line) ----
        mini = jnp.min(jnp.min(f, axis=1, keepdims=True), axis=0, keepdims=True)
        maxi = jnp.max(jnp.max(f, axis=1, keepdims=True), axis=0, keepdims=True)
        inv = pl.reciprocal(maxi - mini)                 # one recip + vmuls
        o_ref[...] = (f - mini) * inv

    return kernel


def make_fused_call(H, W, nb_iter, kh=KH, kw=KW, n_taylor=N_TAYLOR,
                    decim_row=1, decim_col=1):
    kernel = _make_fused_kernel(H, W, kh, kw, n_taylor, nb_iter,
                                decim_row, decim_col)
    smem = pl.BlockSpec(memory_space=pltpu.MemorySpace.SMEM)
    vmem = pl.BlockSpec(memory_space=pltpu.MemorySpace.VMEM)
    return pl.pallas_call(
        kernel,
        out_shape=jax.ShapeDtypeStruct((H, W), jnp.float32),
        in_specs=[smem,      # stacked per-iteration weights (nb_iter, kh*kw)
                  smem,      # (alpha, beta0, beta1, sigma)
                  vmem],     # STg, resident in VMEM for all iterations
        out_specs=vmem,
        scratch_shapes=[pltpu.VMEM((H, W), jnp.float32)   # dx, dy, bx, by
                        for _ in range(4)]
                       + [pltpu.VMEM((H, W), jnp.float32)],  # S^T S mask
    )


# ---------------------------------------------------------------------------
# Wrapper: Unfolding.forward
# ---------------------------------------------------------------------------
def unfolding_forward(low_res, decim_row, decim_col, weights, alpha, beta0,
                      beta1, sigma):
    N, M = low_res.shape
    H, W = N * decim_row, M * decim_col
    nb_iter = len(weights)
    kh, kw = weights[0].shape

    # decimation_adjoint (S^T g): zero-fill upsample -- tiny setup glue in JAX.
    stg = jnp.zeros((H, W), jnp.float32).at[::decim_row, ::decim_col].set(low_res)
    w_flat = jnp.stack([jnp.asarray(w, jnp.float32).reshape(kh * kw)
                        for w in weights])                       # (nb_iter, kh*kw)
    scal = jnp.array([alpha, beta0, beta1, sigma], dtype=jnp.float32)

    fused = make_fused_call(H, W, nb_iter, kh, kw, N_TAYLOR,
                            decim_row, decim_col)
    return fused(w_flat, scal, stg)


# ---------------------------------------------------------------------------
# Pure-JAX reference (mirrors the module math) for correctness checking
# ---------------------------------------------------------------------------
def unfolding_ref(low_res, dr, dc, weights, alpha, beta0, beta1, sigma,
                  n_taylor=N_TAYLOR):
    N, M = low_res.shape
    H, W = N * dr, M * dc
    stg = jnp.zeros((H, W), jnp.float32).at[::dr, ::dc].set(low_res)
    mask = jnp.zeros((H, W), jnp.float32).at[::dr, ::dc].set(1.0)

    def conv(x, w, flip_rows=False):
        kh, kw = w.shape
        n, m = kh // 2, kw // 2
        acc = jnp.zeros_like(x)
        for i in range(kh):
            wi = (kh - 1 - i) if flip_rows else i
            for j in range(kw):
                acc = acc + w[wi, j] * jnp.roll(jnp.roll(x, n - i, 0), m - j, 1)
        return acc

    dxo = lambda u: jnp.roll(u, -1, 1) - u
    dyo = lambda u: jnp.roll(u, -1, 0) - u
    dxT = lambda v: jnp.roll(v, 1, 1) - v
    dyT = lambda v: jnp.roll(v, 1, 0) - v
    lap = lambda u: dxT(dxo(u)) + dyT(dyo(u))

    d_x = d_y = b_x = b_y = jnp.zeros_like(stg)
    f = stg
    for w in weights:
        x0 = sigma * (dxT(d_x - b_x) + dyT(d_y - b_y)) + alpha * conv(stg, w, True)

        def compute(u):
            return u - alpha * conv(conv(u, w) * mask, w, True) \
                - (beta0 + sigma) * lap(u)

        ld = x0
        for _ in range(n_taylor):
            ld = x0 - compute(ld)
        f = ld
        dxf, dyf = dxo(f), dyo(f)
        vx, vy = dxf + b_x, dyf + b_y
        nrm = jnp.sqrt(vx * vx + vy * vy)
        sc = jnp.maximum(nrm - beta1 / sigma, 0.0) / jnp.maximum(nrm, 1e-12)
        d_x, d_y = vx * sc, vy * sc
        b_x = b_x + dxf - d_x
        b_y = b_y + dyf - d_y
    mini, maxi = jnp.min(f), jnp.max(f)
    return (f - mini) / (maxi - mini)


# ---------------------------------------------------------------------------
if __name__ == "__main__":
    key = jax.random.PRNGKey(0)
    k_img, *k_ws = jax.random.split(key, 1 + NB_ITER)

    # low-resolution image (N, M) and decimation factors -> HR (64, 128)
    N, M = 16, 32
    decim_row, decim_col = 4, 4
    low_res = jax.random.uniform(k_img, (N, M), dtype=jnp.float32)

    # deterministic per-Iteration conv weights (Conv2d-style uniform init)
    bound = 1.0 / np.sqrt(KH * KW)
    weights = [
        jax.random.uniform(k, (KH, KW), minval=-bound, maxval=bound,
                           dtype=jnp.float32)
        for k in k_ws
    ]

    alpha, beta0, beta1, sigma = 0.3, 0.05, 0.02, 0.15

    out = unfolding_forward(low_res, decim_row, decim_col, weights,
                            alpha, beta0, beta1, sigma)
    out = jax.block_until_ready(out)

    ref = unfolding_ref(low_res, decim_row, decim_col, weights,
                        alpha, beta0, beta1, sigma)
    np.testing.assert_allclose(np.asarray(out), np.asarray(ref),
                               rtol=1e-3, atol=1e-3)
    print("KERNEL_OK")
</pallas_src>

<mosaic_0001>
module attributes {stable_mosaic.version = 11 : i64} {
  func.func @kernel(%arg0: memref<3x9xf32, #tpu.memory_space<smem>>, %arg1: memref<4xf32, #tpu.memory_space<smem>>, %arg2: memref<64x128xf32, #tpu.memory_space<vmem>>, %arg3: memref<64x128xf32, #tpu.memory_space<vmem>>, %arg4: memref<64x128xf32, #tpu.memory_space<vmem>>, %arg5: memref<64x128xf32, #tpu.memory_space<vmem>>, %arg6: memref<64x128xf32, #tpu.memory_space<vmem>>, %arg7: memref<64x128xf32, #tpu.memory_space<vmem>>, %arg8: memref<64x128xf32, #tpu.memory_space<vmem>>) attributes {dimension_semantics = [], scalar_prefetch = 0 : i64, scratch_operands = 5 : i64, tpu.core_type = #tpu.core_type<tc>} {
    %c0 = arith.constant 0 : index
    %0 = memref.load %arg1[%c0] : memref<4xf32, #tpu.memory_space<smem>>
    %c1 = arith.constant 1 : index
    %1 = memref.load %arg1[%c1] : memref<4xf32, #tpu.memory_space<smem>>
    %c2 = arith.constant 2 : index
    %2 = memref.load %arg1[%c2] : memref<4xf32, #tpu.memory_space<smem>>
    %c3 = arith.constant 3 : index
    %3 = memref.load %arg1[%c3] : memref<4xf32, #tpu.memory_space<smem>>
    %4 = arith.addf %1, %3 : f32
    %5 = arith.divf %2, %3 : f32
    %cst = arith.constant 0.000000e+00 : f32
    %6 = vector.broadcast %cst : f32 to vector<64x128xf32>
    %c0_0 = arith.constant 0 : index
    %c0_1 = arith.constant 0 : index
    %7 = vector.load %arg4[%c0_0, %c0_1] : memref<64x128xf32, #tpu.memory_space<vmem>>, vector<64x128xf32>
    tpu.vector_store %arg4[%c0_0, %c0_1], %6 {strides = array<i32>} : memref<64x128xf32, #tpu.memory_space<vmem>>, vector<64x128xf32>,
    %c0_2 = arith.constant 0 : index
    %c0_3 = arith.constant 0 : index
    %8 = vector.load %arg5[%c0_2, %c0_3] : memref<64x128xf32, #tpu.memory_space<vmem>>, vector<64x128xf32>
    tpu.vector_store %arg5[%c0_2, %c0_3], %6 {strides = array<i32>} : memref<64x128xf32, #tpu.memory_space<vmem>>, vector<64x128xf32>,
    %c0_4 = arith.constant 0 : index
    %c0_5 = arith.constant 0 : index
    %9 = vector.load %arg6[%c0_4, %c0_5] : memref<64x128xf32, #tpu.memory_space<vmem>>, vector<64x128xf32>
    tpu.vector_store %arg6[%c0_4, %c0_5], %6 {strides = array<i32>} : memref<64x128xf32, #tpu.memory_space<vmem>>, vector<64x128xf32>,
    %c0_6 = arith.constant 0 : index
    %c0_7 = arith.constant 0 : index
    %10 = vector.load %arg7[%c0_6, %c0_7] : memref<64x128xf32, #tpu.memory_space<vmem>>, vector<64x128xf32>
    tpu.vector_store %arg7[%c0_6, %c0_7], %6 {strides = array<i32>} : memref<64x128xf32, #tpu.memory_space<vmem>>, vector<64x128xf32>,
    %11 = tpu.iota {dimensions = array<i32: 0>} : vector<64x128xi32>
    %12 = tpu.iota {dimensions = array<i32: 1>} : vector<64x128xi32>
    %c4_i32 = arith.constant 4 : i32
    %c0_i32 = arith.constant 0 : i32
    %13 = arith.cmpi eq, %c4_i32, %c0_i32 : i32
    %c1_i32 = arith.constant 1 : i32
    %14 = arith.select %13, %c1_i32, %c4_i32 : i32
    %15 = vector.broadcast %14 : i32 to vector<64x128xi32>
    %16 = arith.remsi %11, %15 : vector<64x128xi32>
    %c0_i32_8 = arith.constant 0 : i32
    %17 = vector.broadcast %c0_i32_8 : i32 to vector<64x128xi32>
    %18 = arith.cmpi ne, %16, %17 : vector<64x128xi32>
    %c0_i32_9 = arith.constant 0 : i32
    %19 = vector.broadcast %c0_i32_9 : i32 to vector<64x128xi32>
    %20 = arith.cmpi slt, %16, %19 : vector<64x128xi32>
    %c0_i32_10 = arith.constant 0 : i32
    %21 = arith.cmpi slt, %14, %c0_i32_10 : i32
    %22 = vector.broadcast %21 : i1 to vector<64x128xi1>
    %23 = vector.broadcast %22 : vector<64x128xi1> to vector<64x128xi1>
    %24 = arith.xori %20, %23 : vector<64x128xi1>
    %25 = arith.andi %24, %18 : vector<64x128xi1>
    %26 = vector.broadcast %14 : i32 to vector<64x128xi32>
    %27 = arith.addi %16, %26 : vector<64x128xi32>
    %28 = arith.select %25, %27, %16 : vector<64x128xi1>, vector<64x128xi32>
    %c0_i32_11 = arith.constant 0 : i32
    %29 = vector.broadcast %c0_i32_11 : i32 to vector<64x128xi32>
    %30 = arith.cmpi eq, %28, %29 : vector<64x128xi32>
    %c4_i32_12 = arith.constant 4 : i32
    %c0_i32_13 = arith.constant 0 : i32
    %31 = arith.cmpi eq, %c4_i32_12, %c0_i32_13 : i32
    %c1_i32_14 = arith.constant 1 : i32
    %32 = arith.select %31, %c1_i32_14, %c4_i32_12 : i32
    %33 = vector.broadcast %32 : i32 to vector<64x128xi32>
    %34 = arith.remsi %12, %33 : vector<64x128xi32>
    %c0_i32_15 = arith.constant 0 : i32
    %35 = vector.broadcast %c0_i32_15 : i32 to vector<64x128xi32>
    %36 = arith.cmpi ne, %34, %35 : vector<64x128xi32>
    %c0_i32_16 = arith.constant 0 : i32
    %37 = vector.broadcast %c0_i32_16 : i32 to vector<64x128xi32>
    %38 = arith.cmpi slt, %34, %37 : vector<64x128xi32>
    %c0_i32_17 = arith.constant 0 : i32
    %39 = arith.cmpi slt, %32, %c0_i32_17 : i32
    %40 = vector.broadcast %39 : i1 to vector<64x128xi1>
    %41 = vector.broadcast %40 : vector<64x128xi1> to vector<64x128xi1>
    %42 = arith.xori %38, %41 : vector<64x128xi1>
    %43 = arith.andi %42, %36 : vector<64x128xi1>
    %44 = vector.broadcast %32 : i32 to vector<64x128xi32>
    %45 = arith.addi %34, %44 : vector<64x128xi32>
    %46 = arith.select %43, %45, %34 : vector<64x128xi1>, vector<64x128xi32>
    %c0_i32_18 = arith.constant 0 : i32
    %47 = vector.broadcast %c0_i32_18 : i32 to vector<64x128xi32>
    %48 = arith.cmpi eq, %46, %47 : vector<64x128xi32>
    %49 = arith.andi %30, %48 : vector<64x128xi1>
    %cst_19 = arith.constant 1.000000e+00 : f32
    %cst_20 = arith.constant 0.000000e+00 : f32
    %50 = vector.broadcast %cst_19 : f32 to vector<64x128xf32>
    %51 = vector.broadcast %cst_20 : f32 to vector<64x128xf32>
    %52 = arith.select %49, %50, %51 : vector<64x128xi1>, vector<64x128xf32>
    %c0_21 = arith.constant 0 : index
    %c0_22 = arith.constant 0 : index
    %53 = vector.load %arg8[%c0_21, %c0_22] : memref<64x128xf32, #tpu.memory_space<vmem>>, vector<64x128xf32>
    tpu.vector_store %arg8[%c0_21, %c0_22], %52 {strides = array<i32>} : memref<64x128xf32, #tpu.memory_space<vmem>>, vector<64x128xf32>,
    %c0_23 = arith.constant 0 : index
    %c0_24 = arith.constant 0 : index
    %54 = memref.load %arg0[%c0_23, %c0_24] : memref<3x9xf32, #tpu.memory_space<smem>>
    %c0_25 = arith.constant 0 : index
    %c1_26 = arith.constant 1 : index
    %55 = memref.load %arg0[%c0_25, %c1_26] : memref<3x9xf32, #tpu.memory_space<smem>>
    %c0_27 = arith.constant 0 : index
    %c2_28 = arith.constant 2 : index
    %56 = memref.load %arg0[%c0_27, %c2_28] : memref<3x9xf32, #tpu.memory_space<smem>>
    %c0_29 = arith.constant 0 : index
    %c3_30 = arith.constant 3 : index
    %57 = memref.load %arg0[%c0_29, %c3_30] : memref<3x9xf32, #tpu.memory_space<smem>>
    %c0_31 = arith.constant 0 : index
    %c4 = arith.constant 4 : index
    %58 = memref.load %arg0[%c0_31, %c4] : memref<3x9xf32, #tpu.memory_space<smem>>
    %c0_32 = arith.constant 0 : index
    %c5 = arith.constant 5 : index
    %59 = memref.load %arg0[%c0_32, %c5] : memref<3x9xf32, #tpu.memory_space<smem>>
    %c0_33 = arith.constant 0 : index
    %c6 = arith.constant 6 : index
    %60 = memref.load %arg0[%c0_33, %c6] : memref<3x9xf32, #tpu.memory_space<smem>>
    %c0_34 = arith.constant 0 : index
    %c7 = arith.constant 7 : index
    %61 = memref.load %arg0[%c0_34, %c7] : memref<3x9xf32, #tpu.memory_space<smem>>
    %c0_35 = arith.constant 0 : index
    %c8 = arith.constant 8 : index
    %62 = memref.load %arg0[%c0_35, %c8] : memref<3x9xf32, #tpu.memory_space<smem>>
    %c0_36 = arith.constant 0 : index
    %c0_37 = arith.constant 0 : index
    %63 = vector.load %arg4[%c0_36, %c0_37] : memref<64x128xf32, #tpu.memory_space<vmem>>, vector<64x128xf32>
    %c0_38 = arith.constant 0 : index
    %c0_39 = arith.constant 0 : index
    %64 = vector.load %arg6[%c0_38, %c0_39] : memref<64x128xf32, #tpu.memory_space<vmem>>, vector<64x128xf32>
    %65 = arith.subf %63, %64 : vector<64x128xf32>
    %c0_40 = arith.constant 0 : index
    %c0_41 = arith.constant 0 : index
    %66 = vector.load %arg5[%c0_40, %c0_41] : memref<64x128xf32, #tpu.memory_space<vmem>>, vector<64x128xf32>
    %c0_42 = arith.constant 0 : index
    %c0_43 = arith.constant 0 : index
    %67 = vector.load %arg7[%c0_42, %c0_43] : memref<64x128xf32, #tpu.memory_space<vmem>>, vector<64x128xf32>
    %68 = arith.subf %66, %67 : vector<64x128xf32>
    %c1_i32_44 = arith.constant 1 : i32
    %69 = tpu.dynamic_rotate %65 by %c1_i32_44 dim 1 : vector<64x128xf32>, i32 -> vector<64x128xf32>
    %70 = arith.subf %69, %65 : vector<64x128xf32>
    %c1_i32_45 = arith.constant 1 : i32
    %71 = tpu.dynamic_rotate %68 by %c1_i32_45 dim 0 : vector<64x128xf32>, i32 -> vector<64x128xf32>
    %72 = arith.subf %71, %68 : vector<64x128xf32>
    %73 = arith.addf %70, %72 : vector<64x128xf32>
    %74 = vector.broadcast %3 : f32 to vector<64x128xf32>
    %75 = arith.mulf %74, %73 : vector<64x128xf32>
    %c0_46 = arith.constant 0 : index
    %c0_47 = arith.constant 0 : index
    %76 = vector.load %arg2[%c0_46, %c0_47] : memref<64x128xf32, #tpu.memory_space<vmem>>, vector<64x128xf32>
    %c1_i32_48 = arith.constant 1 : i32
    %77 = tpu.dynamic_rotate %76 by %c1_i32_48 dim 0 : vector<64x128xf32>, i32 -> vector<64x128xf32>
    %c1_i32_49 = arith.constant 1 : i32
    %78 = tpu.dynamic_rotate %77 by %c1_i32_49 dim 1 : vector<64x128xf32>, i32 -> vector<64x128xf32>
    %79 = vector.broadcast %60 : f32 to vector<64x128xf32>
    %80 = arith.mulf %79, %78 : vector<64x128xf32>
    %81 = vector.broadcast %61 : f32 to vector<64x128xf32>
    %82 = arith.mulf %81, %77 : vector<64x128xf32>
    %83 = arith.addf %80, %82 : vector<64x128xf32>
    %c127_i32 = arith.constant 127 : i32
    %84 = tpu.dynamic_rotate %77 by %c127_i32 dim 1 : vector<64x128xf32>, i32 -> vector<64x128xf32>
    %85 = vector.broadcast %62 : f32 to vector<64x128xf32>
    %86 = arith.mulf %85, %84 : vector<64x128xf32>
    %87 = arith.addf %83, %86 : vector<64x128xf32>
    %c1_i32_50 = arith.constant 1 : i32
    %88 = tpu.dynamic_rotate %76 by %c1_i32_50 dim 1 : vector<64x128xf32>, i32 -> vector<64x128xf32>
    %89 = vector.broadcast %57 : f32 to vector<64x128xf32>
    %90 = arith.mulf %89, %88 : vector<64x128xf32>
    %91 = arith.addf %87, %90 : vector<64x128xf32>
    %92 = vector.broadcast %58 : f32 to vector<64x128xf32>
    %93 = arith.mulf %92, %76 : vector<64x128xf32>
    %94 = arith.addf %91, %93 : vector<64x128xf32>
    %c127_i32_51 = arith.constant 127 : i32
    %95 = tpu.dynamic_rotate %76 by %c127_i32_51 dim 1 : vector<64x128xf32>, i32 -> vector<64x128xf32>
    %96 = vector.broadcast %59 : f32 to vector<64x128xf32>
    %97 = arith.mulf %96, %95 : vector<64x128xf32>
    %98 = arith.addf %94, %97 : vector<64x128xf32>
    %c63_i32 = arith.constant 63 : i32
    %99 = tpu.dynamic_rotate %76 by %c63_i32 dim 0 : vector<64x128xf32>, i32 -> vector<64x128xf32>
    %c1_i32_52 = arith.constant 1 : i32
    %100 = tpu.dynamic_rotate %99 by %c1_i32_52 dim 1 : vector<64x128xf32>, i32 -> vector<64x128xf32>
    %101 = vector.broadcast %54 : f32 to vector<64x128xf32>
    %102 = arith.mulf %101, %100 : vector<64x128xf32>
    %103 = arith.addf %98, %102 : vector<64x128xf32>
    %104 = vector.broadcast %55 : f32 to vector<64x128xf32>
    %105 = arith.mulf %104, %99 : vector<64x128xf32>
    %106 = arith.addf %103, %105 : vector<64x128xf32>
    %c127_i32_53 = arith.constant 127 : i32
    %107 = tpu.dynamic_rotate %99 by %c127_i32_53 dim 1 : vector<64x128xf32>, i32 -> vector<64x128xf32>
    %108 = vector.broadcast %56 : f32 to vector<64x128xf32>
    %109 = arith.mulf %108, %107 : vector<64x128xf32>
    %110 = arith.addf %106, %109 : vector<64x128xf32>
    %111 = vector.broadcast %0 : f32 to vector<64x128xf32>
    %112 = arith.mulf %111, %110 : vector<64x128xf32>
    %113 = arith.addf %75, %112 : vector<64x128xf32>
    %c1_i32_54 = arith.constant 1 : i32
    %114 = tpu.dynamic_rotate %113 by %c1_i32_54 dim 0 : vector<64x128xf32>, i32 -> vector<64x128xf32>
    %c1_i32_55 = arith.constant 1 : i32
    %115 = tpu.dynamic_rotate %114 by %c1_i32_55 dim 1 : vector<64x128xf32>, i32 -> vector<64x128xf32>
    %116 = vector.broadcast %54 : f32 to vector<64x128xf32>
    %117 = arith.mulf %116, %115 : vector<64x128xf32>
    %118 = vector.broadcast %55 : f32 to vector<64x128xf32>
    %119 = arith.mulf %118, %114 : vector<64x128xf32>
    %120 = arith.addf %117, %119 : vector<64x128xf32>
    %c127_i32_56 = arith.constant 127 : i32
    %121 = tpu.dynamic_rotate %114 by %c127_i32_56 dim 1 : vector<64x128xf32>, i32 -> vector<64x128xf32>
    %122 = vector.broadcast %56 : f32 to vector<64x128xf32>
    %123 = arith.mulf %122, %121 : vector<64x128xf32>
    %124 = arith.addf %120, %123 : vector<64x128xf32>
    %c1_i32_57 = arith.constant 1 : i32
    %125 = tpu.dynamic_rotate %113 by %c1_i32_57 dim 1 : vector<64x128xf32>, i32 -> vector<64x128xf32>
    %126 = vector.broadcast %57 : f32 to vector<64x128xf32>
    %127 = arith.mulf %126, %125 : vector<64x128xf32>
    %128 = arith.addf %124, %127 : vector<64x128xf32>
    %129 = arith.addf %114, %125 : vector<64x128xf32>
    %130 = vector.broadcast %58 : f32 to vector<64x128xf32>
    %131 = arith.mulf %130, %113 : vector<64x128xf32>
    %132 = arith.addf %128, %131 : vector<64x128xf32>
    %c127_i32_58 = arith.constant 127 : i32
    %133 = tpu.dynamic_rotate %113 by %c127_i32_58 dim 1 : vector<64x128xf32>, i32 -> vector<64x128xf32>
    %134 = vector.broadcast %59 : f32 to vector<64x128xf32>
    %135 = arith.mulf %134, %133 : vector<64x128xf32>
    %136 = arith.addf %132, %135 : vector<64x128xf32>
    %137 = arith.addf %129, %133 : vector<64x128xf32>
    %c63_i32_59 = arith.constant 63 : i32
    %138 = tpu.dynamic_rotate %113 by %c63_i32_59 dim 0 : vector<64x128xf32>, i32 -> vector<64x128xf32>
    %c1_i32_60 = arith.constant 1 : i32
    %139 = tpu.dynamic_rotate %138 by %c1_i32_60 dim 1 : vector<64x128xf32>, i32 -> vector<64x128xf32>
    %140 = vector.broadcast %60 : f32 to vector<64x128xf32>
    %141 = arith.mulf %140, %139 : vector<64x128xf32>
    %142 = arith.addf %136, %141 : vector<64x128xf32>
    %143 = vector.broadcast %61 : f32 to vector<64x128xf32>
    %144 = arith.mulf %143, %138 : vector<64x128xf32>
    %145 = arith.addf %142, %144 : vector<64x128xf32>
    %146 = arith.addf %137, %138 : vector<64x128xf32>
    %c127_i32_61 = arith.constant 127 : i32
    %147 = tpu.dynamic_rotate %138 by %c127_i32_61 dim 1 : vector<64x128xf32>, i32 -> vector<64x128xf32>
    %148 = vector.broadcast %62 : f32 to vector<64x128xf32>
    %149 = arith.mulf %148, %147 : vector<64x128xf32>
    %150 = arith.addf %145, %149 : vector<64x128xf32>
    %c0_62 = arith.constant 0 : index
    %c0_63 = arith.constant 0 : index
    %151 = vector.load %arg8[%c0_62, %c0_63] : memref<64x128xf32, #tpu.memory_space<vmem>>, vector<64x128xf32>
    %152 = arith.mulf %150, %151 : vector<64x128xf32>
    %c1_i32_64 = arith.constant 1 : i32
    %153 = tpu.dynamic_rotate %152 by %c1_i32_64 dim 0 : vector<64x128xf32>, i32 -> vector<64x128xf32>
    %c1_i32_65 = arith.constant 1 : i32
    %154 = tpu.dynamic_rotate %153 by %c1_i32_65 dim 1 : vector<64x128xf32>, i32 -> vector<64x128xf32>
    %155 = vector.broadcast %60 : f32 to vector<64x128xf32>
    %156 = arith.mulf %155, %154 : vector<64x128xf32>
    %157 = vector.broadcast %61 : f32 to vector<64x128xf32>
    %158 = arith.mulf %157, %153 : vector<64x128xf32>
    %159 = arith.addf %156, %158 : vector<64x128xf32>
    %c127_i32_66 = arith.constant 127 : i32
    %160 = tpu.dynamic_rotate %153 by %c127_i32_66 dim 1 : vector<64x128xf32>, i32 -> vector<64x128xf32>
    %161 = vector.broadcast %62 : f32 to vector<64x128xf32>
    %162 = arith.mulf %161, %160 : vector<64x128xf32>
    %163 = arith.addf %159, %162 : vector<64x128xf32>
    %c1_i32_67 = arith.constant 1 : i32
    %164 = tpu.dynamic_rotate %152 by %c1_i32_67 dim 1 : vector<64x128xf32>, i32 -> vector<64x128xf32>
    %165 = vector.broadcast %57 : f32 to vector<64x128xf32>
    %166 = arith.mulf %165, %164 : vector<64x128xf32>
    %167 = arith.addf %163, %166 : vector<64x128xf32>
    %168 = vector.broadcast %58 : f32 to vector<64x128xf32>
    %169 = arith.mulf %168, %152 : vector<64x128xf32>
    %170 = arith.addf %167, %169 : vector<64x128xf32>
    %c127_i32_68 = arith.constant 127 : i32
    %171 = tpu.dynamic_rotate %152 by %c127_i32_68 dim 1 : vector<64x128xf32>, i32 -> vector<64x128xf32>
    %172 = vector.broadcast %59 : f32 to vector<64x128xf32>
    %173 = arith.mulf %172, %171 : vector<64x128xf32>
    %174 = arith.addf %170, %173 : vector<64x128xf32>
    %c63_i32_69 = arith.constant 63 : i32
    %175 = tpu.dynamic_rotate %152 by %c63_i32_69 dim 0 : vector<64x128xf32>, i32 -> vector<64x128xf32>
    %c1_i32_70 = arith.constant 1 : i32
    %176 = tpu.dynamic_rotate %175 by %c1_i32_70 dim 1 : vector<64x128xf32>, i32 -> vector<64x128xf32>
    %177 = vector.broadcast %54 : f32 to vector<64x128xf32>
    %178 = arith.mulf %177, %176 : vector<64x128xf32>
    %179 = arith.addf %174, %178 : vector<64x128xf32>
    %180 = vector.broadcast %55 : f32 to vector<64x128xf32>
    %181 = arith.mulf %180, %175 : vector<64x128xf32>
    %182 = arith.addf %179, %181 : vector<64x128xf32>
    %c127_i32_71 = arith.constant 127 : i32
    %183 = tpu.dynamic_rotate %175 by %c127_i32_71 dim 1 : vector<64x128xf32>, i32 -> vector<64x128xf32>
    %184 = vector.broadcast %56 : f32 to vector<64x128xf32>
    %185 = arith.mulf %184, %183 : vector<64x128xf32>
    %186 = arith.addf %182, %185 : vector<64x128xf32>
    %cst_72 = arith.constant 4.000000e+00 : f32
    %187 = vector.broadcast %cst_72 : f32 to vector<64x128xf32>
    %188 = arith.mulf %187, %113 : vector<64x128xf32>
    %189 = arith.subf %188, %146 : vector<64x128xf32>
    %190 = vector.broadcast %0 : f32 to vector<64x128xf32>
    %191 = arith.mulf %190, %186 : vector<64x128xf32>
    %192 = arith.subf %113, %191 : vector<64x128xf32>
    %193 = vector.broadcast %4 : f32 to vector<64x128xf32>
    %194 = arith.mulf %193, %189 : vector<64x128xf32>
    %195 = arith.subf %192, %194 : vector<64x128xf32>
    %196 = arith.subf %113, %195 : vector<64x128xf32>
    %c1_i32_73 = arith.constant 1 : i32
    %197 = tpu.dynamic_rotate %196 by %c1_i32_73 dim 0 : vector<64x128xf32>, i32 -> vector<64x128xf32>
    %c1_i32_74 = arith.constant 1 : i32
    %198 = tpu.dynamic_rotate %197 by %c1_i32_74 dim 1 : vector<64x128xf32>, i32 -> vector<64x128xf32>
    %199 = vector.broadcast %54 : f32 to vector<64x128xf32>
    %200 = arith.mulf %199, %198 : vector<64x128xf32>
    %201 = vector.broadcast %55 : f32 to vector<64x128xf32>
    %202 = arith.mulf %201, %197 : vector<64x128xf32>
    %203 = arith.addf %200, %202 : vector<64x128xf32>
    %c127_i32_75 = arith.constant 127 : i32
    %204 = tpu.dynamic_rotate %197 by %c127_i32_75 dim 1 : vector<64x128xf32>, i32 -> vector<64x128xf32>
    %205 = vector.broadcast %56 : f32 to vector<64x128xf32>
    %206 = arith.mulf %205, %204 : vector<64x128xf32>
    %207 = arith.addf %203, %206 : vector<64x128xf32>
    %c1_i32_76 = arith.constant 1 : i32
    %208 = tpu.dynamic_rotate %196 by %c1_i32_76 dim 1 : vector<64x128xf32>, i32 -> vector<64x128xf32>
    %209 = vector.broadcast %57 : f32 to vector<64x128xf32>
    %210 = arith.mulf %209, %208 : vector<64x128xf32>
    %211 = arith.addf %207, %210 : vector<64x128xf32>
    %212 = arith.addf %197, %208 : vector<64x128xf32>
    %213 = vector.broadcast %58 : f32 to vector<64x128xf32>
    %214 = arith.mulf %213, %196 : vector<64x128xf32>
    %215 = arith.addf %211, %214 : vector<64x128xf32>
    %c127_i32_77 = arith.constant 127 : i32
    %216 = tpu.dynamic_rotate %196 by %c127_i32_77 dim 1 : vector<64x128xf32>, i32 -> vector<64x128xf32>
    %217 = vector.broadcast %59 : f32 to vector<64x128xf32>
    %218 = arith.mulf %217, %216 : vector<64x128xf32>
    %219 = arith.addf %215, %218 : vector<64x128xf32>
    %220 = arith.addf %212, %216 : vector<64x128xf32>
    %c63_i32_78 = arith.constant 63 : i32
    %221 = tpu.dynamic_rotate %196 by %c63_i32_78 dim 0 : vector<64x128xf32>, i32 -> vector<64x128xf32>
    %c1_i32_79 = arith.constant 1 : i32
    %222 = tpu.dynamic_rotate %221 by %c1_i32_79 dim 1 : vector<64x128xf32>, i32 -> vector<64x128xf32>
    %223 = vector.broadcast %60 : f32 to vector<64x128xf32>
    %224 = arith.mulf %223, %222 : vector<64x128xf32>
    %225 = arith.addf %219, %224 : vector<64x128xf32>
    %226 = vector.broadcast %61 : f32 to vector<64x128xf32>
    %227 = arith.mulf %226, %221 : vector<64x128xf32>
    %228 = arith.addf %225, %227 : vector<64x128xf32>
    %229 = arith.addf %220, %221 : vector<64x128xf32>
    %c127_i32_80 = arith.constant 127 : i32
    %230 = tpu.dynamic_rotate %221 by %c127_i32_80 dim 1 : vector<64x128xf32>, i32 -> vector<64x128xf32>
    %231 = vector.broadcast %62 : f32 to vector<64x128xf32>
    %232 = arith.mulf %231, %230 : vector<64x128xf32>
    %233 = arith.addf %228, %232 : vector<64x128xf32>
    %c0_81 = arith.constant 0 : index
    %c0_82 = arith.constant 0 : index
    %234 = vector.load %arg8[%c0_81, %c0_82] : memref<64x128xf32, #tpu.memory_space<vmem>>, vector<64x128xf32>
    %235 = arith.mulf %233, %234 : vector<64x128xf32>
    %c1_i32_83 = arith.constant 1 : i32
    %236 = tpu.dynamic_rotate %235 by %c1_i32_83 dim 0 : vector<64x128xf32>, i32 -> vector<64x128xf32>
    %c1_i32_84 = arith.constant 1 : i32
    %237 = tpu.dynamic_rotate %236 by %c1_i32_84 dim 1 : vector<64x128xf32>, i32 -> vector<64x128xf32>
    %238 = vector.broadcast %60 : f32 to vector<64x128xf32>
    %239 = arith.mulf %238, %237 : vector<64x128xf32>
    %240 = vector.broadcast %61 : f32 to vector<64x128xf32>
    %241 = arith.mulf %240, %236 : vector<64x128xf32>
    %242 = arith.addf %239, %241 : vector<64x128xf32>
    %c127_i32_85 = arith.constant 127 : i32
    %243 = tpu.dynamic_rotate %236 by %c127_i32_85 dim 1 : vector<64x128xf32>, i32 -> vector<64x128xf32>
    %244 = vector.broadcast %62 : f32 to vector<64x128xf32>
    %245 = arith.mulf %244, %243 : vector<64x128xf32>
    %246 = arith.addf %242, %245 : vector<64x128xf32>
    %c1_i32_86 = arith.constant 1 : i32
    %247 = tpu.dynamic_rotate %235 by %c1_i32_86 dim 1 : vector<64x128xf32>, i32 -> vector<64x128xf32>
    %248 = vector.broadcast %57 : f32 to vector<64x128xf32>
    %249 = arith.mulf %248, %247 : vector<64x128xf32>
    %250 = arith.addf %246, %249 : vector<64x128xf32>
    %251 = vector.broadcast %58 : f32 to vector<64x128xf32>
    %252 = arith.mulf %251, %235 : vector<64x128xf32>
    %253 = arith.addf %250, %252 : vector<64x128xf32>
    %c127_i32_87 = arith.constant 127 : i32
    %254 = tpu.dynamic_rotate %235 by %c127_i32_87 dim 1 : vector<64x128xf32>, i32 -> vector<64x128xf32>
    %255 = vector.broadcast %59 : f32 to vector<64x128xf32>
    %256 = arith.mulf %255, %254 : vector<64x128xf32>
    %257 = arith.addf %253, %256 : vector<64x128xf32>
    %c63_i32_88 = arith.constant 63 : i32
    %258 = tpu.dynamic_rotate %235 by %c63_i32_88 dim 0 : vector<64x128xf32>, i32 -> vector<64x128xf32>
    %c1_i32_89 = arith.constant 1 : i32
    %259 = tpu.dynamic_rotate %258 by %c1_i32_89 dim 1 : vector<64x128xf32>, i32 -> vector<64x128xf32>
    %260 = vector.broadcast %54 : f32 to vector<64x128xf32>
    %261 = arith.mulf %260, %259 : vector<64x128xf32>
    %262 = arith.addf %257, %261 : vector<64x128xf32>
    %263 = vector.broadcast %55 : f32 to vector<64x128xf32>
    %264 = arith.mulf %263, %258 : vector<64x128xf32>
    %265 = arith.addf %262, %264 : vector<64x128xf32>
    %c127_i32_90 = arith.constant 127 : i32
    %266 = tpu.dynamic_rotate %258 by %c127_i32_90 dim 1 : vector<64x128xf32>, i32 -> vector<64x128xf32>
    %267 = vector.broadcast %56 : f32 to vector<64x128xf32>
    %268 = arith.mulf %267, %266 : vector<64x128xf32>
    %269 = arith.addf %265, %268 : vector<64x128xf32>
    %cst_91 = arith.constant 4.000000e+00 : f32
    %270 = vector.broadcast %cst_91 : f32 to vector<64x128xf32>
    %271 = arith.mulf %270, %196 : vector<64x128xf32>
    %272 = arith.subf %271, %229 : vector<64x128xf32>
    %273 = vector.broadcast %0 : f32 to vector<64x128xf32>
    %274 = arith.mulf %273, %269 : vector<64x128xf32>
    %275 = arith.subf %196, %274 : vector<64x128xf32>
    %276 = vector.broadcast %4 : f32 to vector<64x128xf32>
    %277 = arith.mulf %276, %272 : vector<64x128xf32>
    %278 = arith.subf %275, %277 : vector<64x128xf32>
    %279 = arith.subf %113, %278 : vector<64x128xf32>
    %c127_i32_92 = arith.constant 127 : i32
    %280 = tpu.dynamic_rotate %279 by %c127_i32_92 dim 1 : vector<64x128xf32>, i32 -> vector<64x128xf32>
    %281 = arith.subf %280, %279 : vector<64x128xf32>
    %c63_i32_93 = arith.constant 63 : i32
    %282 = tpu.dynamic_rotate %279 by %c63_i32_93 dim 0 : vector<64x128xf32>, i32 -> vector<64x128xf32>
    %283 = arith.subf %282, %279 : vector<64x128xf32>
    %c0_94 = arith.constant 0 : index
    %c0_95 = arith.constant 0 : index
    %284 = vector.load %arg6[%c0_94, %c0_95] : memref<64x128xf32, #tpu.memory_space<vmem>>, vector<64x128xf32>
    %285 = arith.addf %281, %284 : vector<64x128xf32>
    %c0_96 = arith.constant 0 : index
    %c0_97 = arith.constant 0 : index
    %286 = vector.load %arg7[%c0_96, %c0_97] : memref<64x128xf32, #tpu.memory_space<vmem>>, vector<64x128xf32>
    %287 = arith.addf %283, %286 : vector<64x128xf32>
    %288 = arith.mulf %285, %285 : vector<64x128xf32>
    %289 = arith.mulf %287, %287 : vector<64x128xf32>
    %290 = arith.addf %288, %289 : vector<64x128xf32>
    %cst_98 = arith.constant 1.000000e-24 : f32
    %291 = vector.broadcast %cst_98 : f32 to vector<64x128xf32>
    %292 = arith.maximumf %290, %291 : vector<64x128xf32>
    %293 = math.rsqrt %292 : vector<64x128xf32>
    %294 = vector.broadcast %5 : f32 to vector<64x128xf32>
    %295 = arith.mulf %294, %293 : vector<64x128xf32>
    %cst_99 = arith.constant 1.000000e+00 : f32
    %296 = vector.broadcast %cst_99 : f32 to vector<64x128xf32>
    %297 = arith.subf %296, %295 : vector<64x128xf32>
    %cst_100 = arith.constant 0.000000e+00 : f32
    %298 = vector.broadcast %cst_100 : f32 to vector<64x128xf32>
    %299 = arith.maximumf %297, %298 : vector<64x128xf32>
    %300 = arith.mulf %285, %299 : vector<64x128xf32>
    %301 = arith.mulf %287, %299 : vector<64x128xf32>
    %c0_101 = arith.constant 0 : index
    %c0_102 = arith.constant 0 : index
    %302 = vector.load %arg4[%c0_101, %c0_102] : memref<64x128xf32, #tpu.memory_space<vmem>>, vector<64x128xf32>
    tpu.vector_store %arg4[%c0_101, %c0_102], %300 {strides = array<i32>} : memref<64x128xf32, #tpu.memory_space<vmem>>, vector<64x128xf32>,
    %c0_103 = arith.constant 0 : index
    %c0_104 = arith.constant 0 : index
    %303 = vector.load %arg5[%c0_103, %c0_104] : memref<64x128xf32, #tpu.memory_space<vmem>>, vector<64x128xf32>
    tpu.vector_store %arg5[%c0_103, %c0_104], %301 {strides = array<i32>} : memref<64x128xf32, #tpu.memory_space<vmem>>, vector<64x128xf32>,
    %304 = arith.subf %285, %300 : vector<64x128xf32>
    %c0_105 = arith.constant 0 : index
    %c0_106 = arith.constant 0 : index
    %305 = vector.load %arg6[%c0_105, %c0_106] : memref<64x128xf32, #tpu.memory_space<vmem>>, vector<64x128xf32>
    tpu.vector_store %arg6[%c0_105, %c0_106], %304 {strides = array<i32>} : memref<64x128xf32, #tpu.memory_space<vmem>>, vector<64x128xf32>,
    %306 = arith.subf %287, %301 : vector<64x128xf32>
    %c0_107 = arith.constant 0 : index
    %c0_108 = arith.constant 0 : index
    %307 = vector.load %arg7[%c0_107, %c0_108] : memref<64x128xf32, #tpu.memory_space<vmem>>, vector<64x128xf32>
    tpu.vector_store %arg7[%c0_107, %c0_108], %306 {strides = array<i32>} : memref<64x128xf32, #tpu.memory_space<vmem>>, vector<64x128xf32>,
    %c1_109 = arith.constant 1 : index
    %c0_110 = arith.constant 0 : index
    %308 = memref.load %arg0[%c1_109, %c0_110] : memref<3x9xf32, #tpu.memory_space<smem>>
    %c1_111 = arith.constant 1 : index
    %c1_112 = arith.constant 1 : index
    %309 = memref.load %arg0[%c1_111, %c1_112] : memref<3x9xf32, #tpu.memory_space<smem>>
    %c1_113 = arith.constant 1 : index
    %c2_114 = arith.constant 2 : index
    %310 = memref.load %arg0[%c1_113, %c2_114] : memref<3x9xf32, #tpu.memory_space<smem>>
    %c1_115 = arith.constant 1 : index
    %c3_116 = arith.constant 3 : index
    %311 = memref.load %arg0[%c1_115, %c3_116] : memref<3x9xf32, #tpu.memory_space<smem>>
    %c1_117 = arith.constant 1 : index
    %c4_118 = arith.constant 4 : index
    %312 = memref.load %arg0[%c1_117, %c4_118] : memref<3x9xf32, #tpu.memory_space<smem>>
    %c1_119 = arith.constant 1 : index
    %c5_120 = arith.constant 5 : index
    %313 = memref.load %arg0[%c1_119, %c5_120] : memref<3x9xf32, #tpu.memory_space<smem>>
    %c1_121 = arith.constant 1 : index
    %c6_122 = arith.constant 6 : index
    %314 = memref.load %arg0[%c1_121, %c6_122] : memref<3x9xf32, #tpu.memory_space<smem>>
    %c1_123 = arith.constant 1 : index
    %c7_124 = arith.constant 7 : index
    %315 = memref.load %arg0[%c1_123, %c7_124] : memref<3x9xf32, #tpu.memory_space<smem>>
    %c1_125 = arith.constant 1 : index
    %c8_126 = arith.constant 8 : index
    %316 = memref.load %arg0[%c1_125, %c8_126] : memref<3x9xf32, #tpu.memory_space<smem>>
    %c0_127 = arith.constant 0 : index
    %c0_128 = arith.constant 0 : index
    %317 = vector.load %arg4[%c0_127, %c0_128] : memref<64x128xf32, #tpu.memory_space<vmem>>, vector<64x128xf32>
    %c0_129 = arith.constant 0 : index
    %c0_130 = arith.constant 0 : index
    %318 = vector.load %arg6[%c0_129, %c0_130] : memref<64x128xf32, #tpu.memory_space<vmem>>, vector<64x128xf32>
    %319 = arith.subf %317, %318 : vector<64x128xf32>
    %c0_131 = arith.constant 0 : index
    %c0_132 = arith.constant 0 : index
    %320 = vector.load %arg5[%c0_131, %c0_132] : memref<64x128xf32, #tpu.memory_space<vmem>>, vector<64x128xf32>
    %c0_133 = arith.constant 0 : index
    %c0_134 = arith.constant 0 : index
    %321 = vector.load %arg7[%c0_133, %c0_134] : memref<64x128xf32, #tpu.memory_space<vmem>>, vector<64x128xf32>
    %322 = arith.subf %320, %321 : vector<64x128xf32>
    %c1_i32_135 = arith.constant 1 : i32
    %323 = tpu.dynamic_rotate %319 by %c1_i32_135 dim 1 : vector<64x128xf32>, i32 -> vector<64x128xf32>
    %324 = arith.subf %323, %319 : vector<64x128xf32>
    %c1_i32_136 = arith.constant 1 : i32
    %325 = tpu.dynamic_rotate %322 by %c1_i32_136 dim 0 : vector<64x128xf32>, i32 -> vector<64x128xf32>
    %326 = arith.subf %325, %322 : vector<64x128xf32>
    %327 = arith.addf %324, %326 : vector<64x128xf32>
    %328 = vector.broadcast %3 : f32 to vector<64x128xf32>
    %329 = arith.mulf %328, %327 : vector<64x128xf32>
    %c0_137 = arith.constant 0 : index
    %c0_138 = arith.constant 0 : index
    %330 = vector.load %arg2[%c0_137, %c0_138] : memref<64x128xf32, #tpu.memory_space<vmem>>, vector<64x128xf32>
    %c1_i32_139 = arith.constant 1 : i32
    %331 = tpu.dynamic_rotate %330 by %c1_i32_139 dim 0 : vector<64x128xf32>, i32 -> vector<64x128xf32>
    %c1_i32_140 = arith.constant 1 : i32
    %332 = tpu.dynamic_rotate %331 by %c1_i32_140 dim 1 : vector<64x128xf32>, i32 -> vector<64x128xf32>
    %333 = vector.broadcast %314 : f32 to vector<64x128xf32>
    %334 = arith.mulf %333, %332 : vector<64x128xf32>
    %335 = vector.broadcast %315 : f32 to vector<64x128xf32>
    %336 = arith.mulf %335, %331 : vector<64x128xf32>
    %337 = arith.addf %334, %336 : vector<64x128xf32>
    %c127_i32_141 = arith.constant 127 : i32
    %338 = tpu.dynamic_rotate %331 by %c127_i32_141 dim 1 : vector<64x128xf32>, i32 -> vector<64x128xf32>
    %339 = vector.broadcast %316 : f32 to vector<64x128xf32>
    %340 = arith.mulf %339, %338 : vector<64x128xf32>
    %341 = arith.addf %337, %340 : vector<64x128xf32>
    %c1_i32_142 = arith.constant 1 : i32
    %342 = tpu.dynamic_rotate %330 by %c1_i32_142 dim 1 : vector<64x128xf32>, i32 -> vector<64x128xf32>
    %343 = vector.broadcast %311 : f32 to vector<64x128xf32>
    %344 = arith.mulf %343, %342 : vector<64x128xf32>
    %345 = arith.addf %341, %344 : vector<64x128xf32>
    %346 = vector.broadcast %312 : f32 to vector<64x128xf32>
    %347 = arith.mulf %346, %330 : vector<64x128xf32>
    %348 = arith.addf %345, %347 : vector<64x128xf32>
    %c127_i32_143 = arith.constant 127 : i32
    %349 = tpu.dynamic_rotate %330 by %c127_i32_143 dim 1 : vector<64x128xf32>, i32 -> vector<64x128xf32>
    %350 = vector.broadcast %313 : f32 to vector<64x128xf32>
    %351 = arith.mulf %350, %349 : vector<64x128xf32>
    %352 = arith.addf %348, %351 : vector<64x128xf32>
    %c63_i32_144 = arith.constant 63 : i32
    %353 = tpu.dynamic_rotate %330 by %c63_i32_144 dim 0 : vector<64x128xf32>, i32 -> vector<64x128xf32>
    %c1_i32_145 = arith.constant 1 : i32
    %354 = tpu.dynamic_rotate %353 by %c1_i32_145 dim 1 : vector<64x128xf32>, i32 -> vector<64x128xf32>
    %355 = vector.broadcast %308 : f32 to vector<64x128xf32>
    %356 = arith.mulf %355, %354 : vector<64x128xf32>
    %357 = arith.addf %352, %356 : vector<64x128xf32>
    %358 = vector.broadcast %309 : f32 to vector<64x128xf32>
    %359 = arith.mulf %358, %353 : vector<64x128xf32>
    %360 = arith.addf %357, %359 : vector<64x128xf32>
    %c127_i32_146 = arith.constant 127 : i32
    %361 = tpu.dynamic_rotate %353 by %c127_i32_146 dim 1 : vector<64x128xf32>, i32 -> vector<64x128xf32>
    %362 = vector.broadcast %310 : f32 to vector<64x128xf32>
    %363 = arith.mulf %362, %361 : vector<64x128xf32>
    %364 = arith.addf %360, %363 : vector<64x128xf32>
    %365 = vector.broadcast %0 : f32 to vector<64x128xf32>
    %366 = arith.mulf %365, %364 : vector<64x128xf32>
    %367 = arith.addf %329, %366 : vector<64x128xf32>
    %c1_i32_147 = arith.constant 1 : i32
    %368 = tpu.dynamic_rotate %367 by %c1_i32_147 dim 0 : vector<64x128xf32>, i32 -> vector<64x128xf32>
    %c1_i32_148 = arith.constant 1 : i32
    %369 = tpu.dynamic_rotate %368 by %c1_i32_148 dim 1 : vector<64x128xf32>, i32 -> vector<64x128xf32>
    %370 = vector.broadcast %308 : f32 to vector<64x128xf32>
    %371 = arith.mulf %370, %369 : vector<64x128xf32>
    %372 = vector.broadcast %309 : f32 to vector<64x128xf32>
    %373 = arith.mulf %372, %368 : vector<64x128xf32>
    %374 = arith.addf %371, %373 : vector<64x128xf32>
    %c127_i32_149 = arith.constant 127 : i32
    %375 = tpu.dynamic_rotate %368 by %c127_i32_149 dim 1 : vector<64x128xf32>, i32 -> vector<64x128xf32>
    %376 = vector.broadcast %310 : f32 to vector<64x128xf32>
    %377 = arith.mulf %376, %375 : vector<64x128xf32>
    %378 = arith.addf %374, %377 : vector<64x128xf32>
    %c1_i32_150 = arith.constant 1 : i32
    %379 = tpu.dynamic_rotate %367 by %c1_i32_150 dim 1 : vector<64x128xf32>, i32 -> vector<64x128xf32>
    %380 = vector.broadcast %311 : f32 to vector<64x128xf32>
    %381 = arith.mulf %380, %379 : vector<64x128xf32>
    %382 = arith.addf %378, %381 : vector<64x128xf32>
    %383 = arith.addf %368, %379 : vector<64x128xf32>
    %384 = vector.broadcast %312 : f32 to vector<64x128xf32>
    %385 = arith.mulf %384, %367 : vector<64x128xf32>
    %386 = arith.addf %382, %385 : vector<64x128xf32>
    %c127_i32_151 = arith.constant 127 : i32
    %387 = tpu.dynamic_rotate %367 by %c127_i32_151 dim 1 : vector<64x128xf32>, i32 -> vector<64x128xf32>
    %388 = vector.broadcast %313 : f32 to vector<64x128xf32>
    %389 = arith.mulf %388, %387 : vector<64x128xf32>
    %390 = arith.addf %386, %389 : vector<64x128xf32>
    %391 = arith.addf %383, %387 : vector<64x128xf32>
    %c63_i32_152 = arith.constant 63 : i32
    %392 = tpu.dynamic_rotate %367 by %c63_i32_152 dim 0 : vector<64x128xf32>, i32 -> vector<64x128xf32>
    %c1_i32_153 = arith.constant 1 : i32
    %393 = tpu.dynamic_rotate %392 by %c1_i32_153 dim 1 : vector<64x128xf32>, i32 -> vector<64x128xf32>
    %394 = vector.broadcast %314 : f32 to vector<64x128xf32>
    %395 = arith.mulf %394, %393 : vector<64x128xf32>
    %396 = arith.addf %390, %395 : vector<64x128xf32>
    %397 = vector.broadcast %315 : f32 to vector<64x128xf32>
    %398 = arith.mulf %397, %392 : vector<64x128xf32>
    %399 = arith.addf %396, %398 : vector<64x128xf32>
    %400 = arith.addf %391, %392 : vector<64x128xf32>
    %c127_i32_154 = arith.constant 127 : i32
    %401 = tpu.dynamic_rotate %392 by %c127_i32_154 dim 1 : vector<64x128xf32>, i32 -> vector<64x128xf32>
    %402 = vector.broadcast %316 : f32 to vector<64x128xf32>
    %403 = arith.mulf %402, %401 : vector<64x128xf32>
    %404 = arith.addf %399, %403 : vector<64x128xf32>
    %c0_155 = arith.constant 0 : index
    %c0_156 = arith.constant 0 : index
    %405 = vector.load %arg8[%c0_155, %c0_156] : memref<64x128xf32, #tpu.memory_space<vmem>>, vector<64x128xf32>
    %406 = arith.mulf %404, %405 : vector<64x128xf32>
    %c1_i32_157 = arith.constant 1 : i32
    %407 = tpu.dynamic_rotate %406 by %c1_i32_157 dim 0 : vector<64x128xf32>, i32 -> vector<64x128xf32>
    %c1_i32_158 = arith.constant 1 : i32
    %408 = tpu.dynamic_rotate %407 by %c1_i32_158 dim 1 : vector<64x128xf32>, i32 -> vector<64x128xf32>
    %409 = vector.broadcast %314 : f32 to vector<64x128xf32>
    %410 = arith.mulf %409, %408 : vector<64x128xf32>
    %411 = vector.broadcast %315 : f32 to vector<64x128xf32>
    %412 = arith.mulf %411, %407 : vector<64x128xf32>
    %413 = arith.addf %410, %412 : vector<64x128xf32>
    %c127_i32_159 = arith.constant 127 : i32
    %414 = tpu.dynamic_rotate %407 by %c127_i32_159 dim 1 : vector<64x128xf32>, i32 -> vector<64x128xf32>
    %415 = vector.broadcast %316 : f32 to vector<64x128xf32>
    %416 = arith.mulf %415, %414 : vector<64x128xf32>
    %417 = arith.addf %413, %416 : vector<64x128xf32>
    %c1_i32_160 = arith.constant 1 : i32
    %418 = tpu.dynamic_rotate %406 by %c1_i32_160 dim 1 : vector<64x128xf32>, i32 -> vector<64x128xf32>
    %419 = vector.broadcast %311 : f32 to vector<64x128xf32>
    %420 = arith.mulf %419, %418 : vector<64x128xf32>
    %421 = arith.addf %417, %420 : vector<64x128xf32>
    %422 = vector.broadcast %312 : f32 to vector<64x128xf32>
    %423 = arith.mulf %422, %406 : vector<64x128xf32>
    %424 = arith.addf %421, %423 : vector<64x128xf32>
    %c127_i32_161 = arith.constant 127 : i32
    %425 = tpu.dynamic_rotate %406 by %c127_i32_161 dim 1 : vector<64x128xf32>, i32 -> vector<64x128xf32>
    %426 = vector.broadcast %313 : f32 to vector<64x128xf32>
    %427 = arith.mulf %426, %425 : vector<64x128xf32>
    %428 = arith.addf %424, %427 : vector<64x128xf32>
    %c63_i32_162 = arith.constant 63 : i32
    %429 = tpu.dynamic_rotate %406 by %c63_i32_162 dim 0 : vector<64x128xf32>, i32 -> vector<64x128xf32>
    %c1_i32_163 = arith.constant 1 : i32
    %430 = tpu.dynamic_rotate %429 by %c1_i32_163 dim 1 : vector<64x128xf32>, i32 -> vector<64x128xf32>
    %431 = vector.broadcast %308 : f32 to vector<64x128xf32>
    %432 = arith.mulf %431, %430 : vector<64x128xf32>
    %433 = arith.addf %428, %432 : vector<64x128xf32>
    %434 = vector.broadcast %309 : f32 to vector<64x128xf32>
    %435 = arith.mulf %434, %429 : vector<64x128xf32>
    %436 = arith.addf %433, %435 : vector<64x128xf32>
    %c127_i32_164 = arith.constant 127 : i32
    %437 = tpu.dynamic_rotate %429 by %c127_i32_164 dim 1 : vector<64x128xf32>, i32 -> vector<64x128xf32>
    %438 = vector.broadcast %310 : f32 to vector<64x128xf32>
    %439 = arith.mulf %438, %437 : vector<64x128xf32>
    %440 = arith.addf %436, %439 : vector<64x128xf32>
    %cst_165 = arith.constant 4.000000e+00 : f32
    %441 = vector.broadcast %cst_165 : f32 to vector<64x128xf32>
    %442 = arith.mulf %441, %367 : vector<64x128xf32>
    %443 = arith.subf %442, %400 : vector<64x128xf32>
    %444 = vector.broadcast %0 : f32 to vector<64x128xf32>
    %445 = arith.mulf %444, %440 : vector<64x128xf32>
    %446 = arith.subf %367, %445 : vector<64x128xf32>
    %447 = vector.broadcast %4 : f32 to vector<64x128xf32>
    %448 = arith.mulf %447, %443 : vector<64x128xf32>
    %449 = arith.subf %446, %448 : vector<64x128xf32>
    %450 = arith.subf %367, %449 : vector<64x128xf32>
    %c1_i32_166 = arith.constant 1 : i32
    %451 = tpu.dynamic_rotate %450 by %c1_i32_166 dim 0 : vector<64x128xf32>, i32 -> vector<64x128xf32>
    %c1_i32_167 = arith.constant 1 : i32
    %452 = tpu.dynamic_rotate %451 by %c1_i32_167 dim 1 : vector<64x128xf32>, i32 -> vector<64x128xf32>
    %453 = vector.broadcast %308 : f32 to vector<64x128xf32>
    %454 = arith.mulf %453, %452 : vector<64x128xf32>
    %455 = vector.broadcast %309 : f32 to vector<64x128xf32>
    %456 = arith.mulf %455, %451 : vector<64x128xf32>
    %457 = arith.addf %454, %456 : vector<64x128xf32>
    %c127_i32_168 = arith.constant 127 : i32
    %458 = tpu.dynamic_rotate %451 by %c127_i32_168 dim 1 : vector<64x128xf32>, i32 -> vector<64x128xf32>
    %459 = vector.broadcast %310 : f32 to vector<64x128xf32>
    %460 = arith.mulf %459, %458 : vector<64x128xf32>
    %461 = arith.addf %457, %460 : vector<64x128xf32>
    %c1_i32_169 = arith.constant 1 : i32
    %462 = tpu.dynamic_rotate %450 by %c1_i32_169 dim 1 : vector<64x128xf32>, i32 -> vector<64x128xf32>
    %463 = vector.broadcast %311 : f32 to vector<64x128xf32>
    %464 = arith.mulf %463, %462 : vector<64x128xf32>
    %465 = arith.addf %461, %464 : vector<64x128xf32>
    %466 = arith.addf %451, %462 : vector<64x128xf32>
    %467 = vector.broadcast %312 : f32 to vector<64x128xf32>
    %468 = arith.mulf %467, %450 : vector<64x128xf32>
    %469 = arith.addf %465, %468 : vector<64x128xf32>
    %c127_i32_170 = arith.constant 127 : i32
    %470 = tpu.dynamic_rotate %450 by %c127_i32_170 dim 1 : vector<64x128xf32>, i32 -> vector<64x128xf32>
    %471 = vector.broadcast %313 : f32 to vector<64x128xf32>
    %472 = arith.mulf %471, %470 : vector<64x128xf32>
    %473 = arith.addf %469, %472 : vector<64x128xf32>
    %474 = arith.addf %466, %470 : vector<64x128xf32>
    %c63_i32_171 = arith.constant 63 : i32
    %475 = tpu.dynamic_rotate %450 by %c63_i32_171 dim 0 : vector<64x128xf32>, i32 -> vector<64x128xf32>
    %c1_i32_172 = arith.constant 1 : i32
    %476 = tpu.dynamic_rotate %475 by %c1_i32_172 dim 1 : vector<64x128xf32>, i32 -> vector<64x128xf32>
    %477 = vector.broadcast %314 : f32 to vector<64x128xf32>
    %478 = arith.mulf %477, %476 : vector<64x128xf32>
    %479 = arith.addf %473, %478 : vector<64x128xf32>
    %480 = vector.broadcast %315 : f32 to vector<64x128xf32>
    %481 = arith.mulf %480, %475 : vector<64x128xf32>
    %482 = arith.addf %479, %481 : vector<64x128xf32>
    %483 = arith.addf %474, %475 : vector<64x128xf32>
    %c127_i32_173 = arith.constant 127 : i32
    %484 = tpu.dynamic_rotate %475 by %c127_i32_173 dim 1 : vector<64x128xf32>, i32 -> vector<64x128xf32>
    %485 = vector.broadcast %316 : f32 to vector<64x128xf32>
    %486 = arith.mulf %485, %484 : vector<64x128xf32>
    %487 = arith.addf %482, %486 : vector<64x128xf32>
    %c0_174 = arith.constant 0 : index
    %c0_175 = arith.constant 0 : index
    %488 = vector.load %arg8[%c0_174, %c0_175] : memref<64x128xf32, #tpu.memory_space<vmem>>, vector<64x128xf32>
    %489 = arith.mulf %487, %488 : vector<64x128xf32>
    %c1_i32_176 = arith.constant 1 : i32
    %490 = tpu.dynamic_rotate %489 by %c1_i32_176 dim 0 : vector<64x128xf32>, i32 -> vector<64x128xf32>
    %c1_i32_177 = arith.constant 1 : i32
    %491 = tpu.dynamic_rotate %490 by %c1_i32_177 dim 1 : vector<64x128xf32>, i32 -> vector<64x128xf32>
    %492 = vector.broadcast %314 : f32 to vector<64x128xf32>
    %493 = arith.mulf %492, %491 : vector<64x128xf32>
    %494 = vector.broadcast %315 : f32 to vector<64x128xf32>
    %495 = arith.mulf %494, %490 : vector<64x128xf32>
    %496 = arith.addf %493, %495 : vector<64x128xf32>
    %c127_i32_178 = arith.constant 127 : i32
    %497 = tpu.dynamic_rotate %490 by %c127_i32_178 dim 1 : vector<64x128xf32>, i32 -> vector<64x128xf32>
    %498 = vector.broadcast %316 : f32 to vector<64x128xf32>
    %499 = arith.mulf %498, %497 : vector<64x128xf32>
    %500 = arith.addf %496, %499 : vector<64x128xf32>
    %c1_i32_179 = arith.constant 1 : i32
    %501 = tpu.dynamic_rotate %489 by %c1_i32_179 dim 1 : vector<64x128xf32>, i32 -> vector<64x128xf32>
    %502 = vector.broadcast %311 : f32 to vector<64x128xf32>
    %503 = arith.mulf %502, %501 : vector<64x128xf32>
    %504 = arith.addf %500, %503 : vector<64x128xf32>
    %505 = vector.broadcast %312 : f32 to vector<64x128xf32>
    %506 = arith.mulf %505, %489 : vector<64x128xf32>
    %507 = arith.addf %504, %506 : vector<64x128xf32>
    %c127_i32_180 = arith.constant 127 : i32
    %508 = tpu.dynamic_rotate %489 by %c127_i32_180 dim 1 : vector<64x128xf32>, i32 -> vector<64x128xf32>
    %509 = vector.broadcast %313 : f32 to vector<64x128xf32>
    %510 = arith.mulf %509, %508 : vector<64x128xf32>
    %511 = arith.addf %507, %510 : vector<64x128xf32>
    %c63_i32_181 = arith.constant 63 : i32
    %512 = tpu.dynamic_rotate %489 by %c63_i32_181 dim 0 : vector<64x128xf32>, i32 -> vector<64x128xf32>
    %c1_i32_182 = arith.constant 1 : i32
    %513 = tpu.dynamic_rotate %512 by %c1_i32_182 dim 1 : vector<64x128xf32>, i32 -> vector<64x128xf32>
    %514 = vector.broadcast %308 : f32 to vector<64x128xf32>
    %515 = arith.mulf %514, %513 : vector<64x128xf32>
    %516 = arith.addf %511, %515 : vector<64x128xf32>
    %517 = vector.broadcast %309 : f32 to vector<64x128xf32>
    %518 = arith.mulf %517, %512 : vector<64x128xf32>
    %519 = arith.addf %516, %518 : vector<64x128xf32>
    %c127_i32_183 = arith.constant 127 : i32
    %520 = tpu.dynamic_rotate %512 by %c127_i32_183 dim 1 : vector<64x128xf32>, i32 -> vector<64x128xf32>
    %521 = vector.broadcast %310 : f32 to vector<64x128xf32>
    %522 = arith.mulf %521, %520 : vector<64x128xf32>
    %523 = arith.addf %519, %522 : vector<64x128xf32>
    %cst_184 = arith.constant 4.000000e+00 : f32
    %524 = vector.broadcast %cst_184 : f32 to vector<64x128xf32>
    %525 = arith.mulf %524, %450 : vector<64x128xf32>
    %526 = arith.subf %525, %483 : vector<64x128xf32>
    %527 = vector.broadcast %0 : f32 to vector<64x128xf32>
    %528 = arith.mulf %527, %523 : vector<64x128xf32>
    %529 = arith.subf %450, %528 : vector<64x128xf32>
    %530 = vector.broadcast %4 : f32 to vector<64x128xf32>
    %531 = arith.mulf %530, %526 : vector<64x128xf32>
    %532 = arith.subf %529, %531 : vector<64x128xf32>
    %533 = arith.subf %367, %532 : vector<64x128xf32>
    %c127_i32_185 = arith.constant 127 : i32
    %534 = tpu.dynamic_rotate %533 by %c127_i32_185 dim 1 : vector<64x128xf32>, i32 -> vector<64x128xf32>
    %535 = arith.subf %534, %533 : vector<64x128xf32>
    %c63_i32_186 = arith.constant 63 : i32
    %536 = tpu.dynamic_rotate %533 by %c63_i32_186 dim 0 : vector<64x128xf32>, i32 -> vector<64x128xf32>
    %537 = arith.subf %536, %533 : vector<64x128xf32>
    %c0_187 = arith.constant 0 : index
    %c0_188 = arith.constant 0 : index
    %538 = vector.load %arg6[%c0_187, %c0_188] : memref<64x128xf32, #tpu.memory_space<vmem>>, vector<64x128xf32>
    %539 = arith.addf %535, %538 : vector<64x128xf32>
    %c0_189 = arith.constant 0 : index
    %c0_190 = arith.constant 0 : index
    %540 = vector.load %arg7[%c0_189, %c0_190] : memref<64x128xf32, #tpu.memory_space<vmem>>, vector<64x128xf32>
    %541 = arith.addf %537, %540 : vector<64x128xf32>
    %542 = arith.mulf %539, %539 : vector<64x128xf32>
    %543 = arith.mulf %541, %541 : vector<64x128xf32>
    %544 = arith.addf %542, %543 : vector<64x128xf32>
    %cst_191 = arith.constant 1.000000e-24 : f32
    %545 = vector.broadcast %cst_191 : f32 to vector<64x128xf32>
    %546 = arith.maximumf %544, %545 : vector<64x128xf32>
    %547 = math.rsqrt %546 : vector<64x128xf32>
    %548 = vector.broadcast %5 : f32 to vector<64x128xf32>
    %549 = arith.mulf %548, %547 : vector<64x128xf32>
    %cst_192 = arith.constant 1.000000e+00 : f32
    %550 = vector.broadcast %cst_192 : f32 to vector<64x128xf32>
    %551 = arith.subf %550, %549 : vector<64x128xf32>
    %cst_193 = arith.constant 0.000000e+00 : f32
    %552 = vector.broadcast %cst_193 : f32 to vector<64x128xf32>
    %553 = arith.maximumf %551, %552 : vector<64x128xf32>
    %554 = arith.mulf %539, %553 : vector<64x128xf32>
    %555 = arith.mulf %541, %553 : vector<64x128xf32>
    %c0_194 = arith.constant 0 : index
    %c0_195 = arith.constant 0 : index
    %556 = vector.load %arg4[%c0_194, %c0_195] : memref<64x128xf32, #tpu.memory_space<vmem>>, vector<64x128xf32>
    tpu.vector_store %arg4[%c0_194, %c0_195], %554 {strides = array<i32>} : memref<64x128xf32, #tpu.memory_space<vmem>>, vector<64x128xf32>,
    %c0_196 = arith.constant 0 : index
    %c0_197 = arith.constant 0 : index
    %557 = vector.load %arg5[%c0_196, %c0_197] : memref<64x128xf32, #tpu.memory_space<vmem>>, vector<64x128xf32>
    tpu.vector_store %arg5[%c0_196, %c0_197], %555 {strides = array<i32>} : memref<64x128xf32, #tpu.memory_space<vmem>>, vector<64x128xf32>,
    %558 = arith.subf %539, %554 : vector<64x128xf32>
    %c0_198 = arith.constant 0 : index
    %c0_199 = arith.constant 0 : index
    %559 = vector.load %arg6[%c0_198, %c0_199] : memref<64x128xf32, #tpu.memory_space<vmem>>, vector<64x128xf32>
    tpu.vector_store %arg6[%c0_198, %c0_199], %558 {strides = array<i32>} : memref<64x128xf32, #tpu.memory_space<vmem>>, vector<64x128xf32>,
    %560 = arith.subf %541, %555 : vector<64x128xf32>
    %c0_200 = arith.constant 0 : index
    %c0_201 = arith.constant 0 : index
    %561 = vector.load %arg7[%c0_200, %c0_201] : memref<64x128xf32, #tpu.memory_space<vmem>>, vector<64x128xf32>
    tpu.vector_store %arg7[%c0_200, %c0_201], %560 {strides = array<i32>} : memref<64x128xf32, #tpu.memory_space<vmem>>, vector<64x128xf32>,
    %c2_202 = arith.constant 2 : index
    %c0_203 = arith.constant 0 : index
    %562 = memref.load %arg0[%c2_202, %c0_203] : memref<3x9xf32, #tpu.memory_space<smem>>
    %c2_204 = arith.constant 2 : index
    %c1_205 = arith.constant 1 : index
    %563 = memref.load %arg0[%c2_204, %c1_205] : memref<3x9xf32, #tpu.memory_space<smem>>
    %c2_206 = arith.constant 2 : index
    %c2_207 = arith.constant 2 : index
    %564 = memref.load %arg0[%c2_206, %c2_207] : memref<3x9xf32, #tpu.memory_space<smem>>
    %c2_208 = arith.constant 2 : index
    %c3_209 = arith.constant 3 : index
    %565 = memref.load %arg0[%c2_208, %c3_209] : memref<3x9xf32, #tpu.memory_space<smem>>
    %c2_210 = arith.constant 2 : index
    %c4_211 = arith.constant 4 : index
    %566 = memref.load %arg0[%c2_210, %c4_211] : memref<3x9xf32, #tpu.memory_space<smem>>
    %c2_212 = arith.constant 2 : index
    %c5_213 = arith.constant 5 : index
    %567 = memref.load %arg0[%c2_212, %c5_213] : memref<3x9xf32, #tpu.memory_space<smem>>
    %c2_214 = arith.constant 2 : index
    %c6_215 = arith.constant 6 : index
    %568 = memref.load %arg0[%c2_214, %c6_215] : memref<3x9xf32, #tpu.memory_space<smem>>
    %c2_216 = arith.constant 2 : index
    %c7_217 = arith.constant 7 : index
    %569 = memref.load %arg0[%c2_216, %c7_217] : memref<3x9xf32, #tpu.memory_space<smem>>
    %c2_218 = arith.constant 2 : index
    %c8_219 = arith.constant 8 : index
    %570 = memref.load %arg0[%c2_218, %c8_219] : memref<3x9xf32, #tpu.memory_space<smem>>
    %c0_220 = arith.constant 0 : index
    %c0_221 = arith.constant 0 : index
    %571 = vector.load %arg4[%c0_220, %c0_221] : memref<64x128xf32, #tpu.memory_space<vmem>>, vector<64x128xf32>
    %c0_222 = arith.constant 0 : index
    %c0_223 = arith.constant 0 : index
    %572 = vector.load %arg6[%c0_222, %c0_223] : memref<64x128xf32, #tpu.memory_space<vmem>>, vector<64x128xf32>
    %573 = arith.subf %571, %572 : vector<64x128xf32>
    %c0_224 = arith.constant 0 : index
    %c0_225 = arith.constant 0 : index
    %574 = vector.load %arg5[%c0_224, %c0_225] : memref<64x128xf32, #tpu.memory_space<vmem>>, vector<64x128xf32>
    %c0_226 = arith.constant 0 : index
    %c0_227 = arith.constant 0 : index
    %575 = vector.load %arg7[%c0_226, %c0_227] : memref<64x128xf32, #tpu.memory_space<vmem>>, vector<64x128xf32>
    %576 = arith.subf %574, %575 : vector<64x128xf32>
    %c1_i32_228 = arith.constant 1 : i32
    %577 = tpu.dynamic_rotate %573 by %c1_i32_228 dim 1 : vector<64x128xf32>, i32 -> vector<64x128xf32>
    %578 = arith.subf %577, %573 : vector<64x128xf32>
    %c1_i32_229 = arith.constant 1 : i32
    %579 = tpu.dynamic_rotate %576 by %c1_i32_229 dim 0 : vector<64x128xf32>, i32 -> vector<64x128xf32>
    %580 = arith.subf %579, %576 : vector<64x128xf32>
    %581 = arith.addf %578, %580 : vector<64x128xf32>
    %582 = vector.broadcast %3 : f32 to vector<64x128xf32>
    %583 = arith.mulf %582, %581 : vector<64x128xf32>
    %c0_230 = arith.constant 0 : index
    %c0_231 = arith.constant 0 : index
    %584 = vector.load %arg2[%c0_230, %c0_231] : memref<64x128xf32, #tpu.memory_space<vmem>>, vector<64x128xf32>
    %c1_i32_232 = arith.constant 1 : i32
    %585 = tpu.dynamic_rotate %584 by %c1_i32_232 dim 0 : vector<64x128xf32>, i32 -> vector<64x128xf32>
    %c1_i32_233 = arith.constant 1 : i32
    %586 = tpu.dynamic_rotate %585 by %c1_i32_233 dim 1 : vector<64x128xf32>, i32 -> vector<64x128xf32>
    %587 = vector.broadcast %568 : f32 to vector<64x128xf32>
    %588 = arith.mulf %587, %586 : vector<64x128xf32>
    %589 = vector.broadcast %569 : f32 to vector<64x128xf32>
    %590 = arith.mulf %589, %585 : vector<64x128xf32>
    %591 = arith.addf %588, %590 : vector<64x128xf32>
    %c127_i32_234 = arith.constant 127 : i32
    %592 = tpu.dynamic_rotate %585 by %c127_i32_234 dim 1 : vector<64x128xf32>, i32 -> vector<64x128xf32>
    %593 = vector.broadcast %570 : f32 to vector<64x128xf32>
    %594 = arith.mulf %593, %592 : vector<64x128xf32>
    %595 = arith.addf %591, %594 : vector<64x128xf32>
    %c1_i32_235 = arith.constant 1 : i32
    %596 = tpu.dynamic_rotate %584 by %c1_i32_235 dim 1 : vector<64x128xf32>, i32 -> vector<64x128xf32>
    %597 = vector.broadcast %565 : f32 to vector<64x128xf32>
    %598 = arith.mulf %597, %596 : vector<64x128xf32>
    %599 = arith.addf %595, %598 : vector<64x128xf32>
    %600 = vector.broadcast %566 : f32 to vector<64x128xf32>
    %601 = arith.mulf %600, %584 : vector<64x128xf32>
    %602 = arith.addf %599, %601 : vector<64x128xf32>
    %c127_i32_236 = arith.constant 127 : i32
    %603 = tpu.dynamic_rotate %584 by %c127_i32_236 dim 1 : vector<64x128xf32>, i32 -> vector<64x128xf32>
    %604 = vector.broadcast %567 : f32 to vector<64x128xf32>
    %605 = arith.mulf %604, %603 : vector<64x128xf32>
    %606 = arith.addf %602, %605 : vector<64x128xf32>
    %c63_i32_237 = arith.constant 63 : i32
    %607 = tpu.dynamic_rotate %584 by %c63_i32_237 dim 0 : vector<64x128xf32>, i32 -> vector<64x128xf32>
    %c1_i32_238 = arith.constant 1 : i32
    %608 = tpu.dynamic_rotate %607 by %c1_i32_238 dim 1 : vector<64x128xf32>, i32 -> vector<64x128xf32>
    %609 = vector.broadcast %562 : f32 to vector<64x128xf32>
    %610 = arith.mulf %609, %608 : vector<64x128xf32>
    %611 = arith.addf %606, %610 : vector<64x128xf32>
    %612 = vector.broadcast %563 : f32 to vector<64x128xf32>
    %613 = arith.mulf %612, %607 : vector<64x128xf32>
    %614 = arith.addf %611, %613 : vector<64x128xf32>
    %c127_i32_239 = arith.constant 127 : i32
    %615 = tpu.dynamic_rotate %607 by %c127_i32_239 dim 1 : vector<64x128xf32>, i32 -> vector<64x128xf32>
    %616 = vector.broadcast %564 : f32 to vector<64x128xf32>
    %617 = arith.mulf %616, %615 : vector<64x128xf32>
    %618 = arith.addf %614, %617 : vector<64x128xf32>
    %619 = vector.broadcast %0 : f32 to vector<64x128xf32>
    %620 = arith.mulf %619, %618 : vector<64x128xf32>
    %621 = arith.addf %583, %620 : vector<64x128xf32>
    %c1_i32_240 = arith.constant 1 : i32
    %622 = tpu.dynamic_rotate %621 by %c1_i32_240 dim 0 : vector<64x128xf32>, i32 -> vector<64x128xf32>
    %c1_i32_241 = arith.constant 1 : i32
    %623 = tpu.dynamic_rotate %622 by %c1_i32_241 dim 1 : vector<64x128xf32>, i32 -> vector<64x128xf32>
    %624 = vector.broadcast %562 : f32 to vector<64x128xf32>
    %625 = arith.mulf %624, %623 : vector<64x128xf32>
    %626 = vector.broadcast %563 : f32 to vector<64x128xf32>
    %627 = arith.mulf %626, %622 : vector<64x128xf32>
    %628 = arith.addf %625, %627 : vector<64x128xf32>
    %c127_i32_242 = arith.constant 127 : i32
    %629 = tpu.dynamic_rotate %622 by %c127_i32_242 dim 1 : vector<64x128xf32>, i32 -> vector<64x128xf32>
    %630 = vector.broadcast %564 : f32 to vector<64x128xf32>
    %631 = arith.mulf %630, %629 : vector<64x128xf32>
    %632 = arith.addf %628, %631 : vector<64x128xf32>
    %c1_i32_243 = arith.constant 1 : i32
    %633 = tpu.dynamic_rotate %621 by %c1_i32_243 dim 1 : vector<64x128xf32>, i32 -> vector<64x128xf32>
    %634 = vector.broadcast %565 : f32 to vector<64x128xf32>
    %635 = arith.mulf %634, %633 : vector<64x128xf32>
    %636 = arith.addf %632, %635 : vector<64x128xf32>
    %637 = arith.addf %622, %633 : vector<64x128xf32>
    %638 = vector.broadcast %566 : f32 to vector<64x128xf32>
    %639 = arith.mulf %638, %621 : vector<64x128xf32>
    %640 = arith.addf %636, %639 : vector<64x128xf32>
    %c127_i32_244 = arith.constant 127 : i32
    %641 = tpu.dynamic_rotate %621 by %c127_i32_244 dim 1 : vector<64x128xf32>, i32 -> vector<64x128xf32>
    %642 = vector.broadcast %567 : f32 to vector<64x128xf32>
    %643 = arith.mulf %642, %641 : vector<64x128xf32>
    %644 = arith.addf %640, %643 : vector<64x128xf32>
    %645 = arith.addf %637, %641 : vector<64x128xf32>
    %c63_i32_245 = arith.constant 63 : i32
    %646 = tpu.dynamic_rotate %621 by %c63_i32_245 dim 0 : vector<64x128xf32>, i32 -> vector<64x128xf32>
    %c1_i32_246 = arith.constant 1 : i32
    %647 = tpu.dynamic_rotate %646 by %c1_i32_246 dim 1 : vector<64x128xf32>, i32 -> vector<64x128xf32>
    %648 = vector.broadcast %568 : f32 to vector<64x128xf32>
    %649 = arith.mulf %648, %647 : vector<64x128xf32>
    %650 = arith.addf %644, %649 : vector<64x128xf32>
    %651 = vector.broadcast %569 : f32 to vector<64x128xf32>
    %652 = arith.mulf %651, %646 : vector<64x128xf32>
    %653 = arith.addf %650, %652 : vector<64x128xf32>
    %654 = arith.addf %645, %646 : vector<64x128xf32>
    %c127_i32_247 = arith.constant 127 : i32
    %655 = tpu.dynamic_rotate %646 by %c127_i32_247 dim 1 : vector<64x128xf32>, i32 -> vector<64x128xf32>
    %656 = vector.broadcast %570 : f32 to vector<64x128xf32>
    %657 = arith.mulf %656, %655 : vector<64x128xf32>
    %658 = arith.addf %653, %657 : vector<64x128xf32>
    %c0_248 = arith.constant 0 : index
    %c0_249 = arith.constant 0 : index
    %659 = vector.load %arg8[%c0_248, %c0_249] : memref<64x128xf32, #tpu.memory_space<vmem>>, vector<64x128xf32>
    %660 = arith.mulf %658, %659 : vector<64x128xf32>
    %c1_i32_250 = arith.constant 1 : i32
    %661 = tpu.dynamic_rotate %660 by %c1_i32_250 dim 0 : vector<64x128xf32>, i32 -> vector<64x128xf32>
    %c1_i32_251 = arith.constant 1 : i32
    %662 = tpu.dynamic_rotate %661 by %c1_i32_251 dim 1 : vector<64x128xf32>, i32 -> vector<64x128xf32>
    %663 = vector.broadcast %568 : f32 to vector<64x128xf32>
    %664 = arith.mulf %663, %662 : vector<64x128xf32>
    %665 = vector.broadcast %569 : f32 to vector<64x128xf32>
    %666 = arith.mulf %665, %661 : vector<64x128xf32>
    %667 = arith.addf %664, %666 : vector<64x128xf32>
    %c127_i32_252 = arith.constant 127 : i32
    %668 = tpu.dynamic_rotate %661 by %c127_i32_252 dim 1 : vector<64x128xf32>, i32 -> vector<64x128xf32>
    %669 = vector.broadcast %570 : f32 to vector<64x128xf32>
    %670 = arith.mulf %669, %668 : vector<64x128xf32>
    %671 = arith.addf %667, %670 : vector<64x128xf32>
    %c1_i32_253 = arith.constant 1 : i32
    %672 = tpu.dynamic_rotate %660 by %c1_i32_253 dim 1 : vector<64x128xf32>, i32 -> vector<64x128xf32>
    %673 = vector.broadcast %565 : f32 to vector<64x128xf32>
    %674 = arith.mulf %673, %672 : vector<64x128xf32>
    %675 = arith.addf %671, %674 : vector<64x128xf32>
    %676 = vector.broadcast %566 : f32 to vector<64x128xf32>
    %677 = arith.mulf %676, %660 : vector<64x128xf32>
    %678 = arith.addf %675, %677 : vector<64x128xf32>
    %c127_i32_254 = arith.constant 127 : i32
    %679 = tpu.dynamic_rotate %660 by %c127_i32_254 dim 1 : vector<64x128xf32>, i32 -> vector<64x128xf32>
    %680 = vector.broadcast %567 : f32 to vector<64x128xf32>
    %681 = arith.mulf %680, %679 : vector<64x128xf32>
    %682 = arith.addf %678, %681 : vector<64x128xf32>
    %c63_i32_255 = arith.constant 63 : i32
    %683 = tpu.dynamic_rotate %660 by %c63_i32_255 dim 0 : vector<64x128xf32>, i32 -> vector<64x128xf32>
    %c1_i32_256 = arith.constant 1 : i32
    %684 = tpu.dynamic_rotate %683 by %c1_i32_256 dim 1 : vector<64x128xf32>, i32 -> vector<64x128xf32>
    %685 = vector.broadcast %562 : f32 to vector<64x128xf32>
    %686 = arith.mulf %685, %684 : vector<64x128xf32>
    %687 = arith.addf %682, %686 : vector<64x128xf32>
    %688 = vector.broadcast %563 : f32 to vector<64x128xf32>
    %689 = arith.mulf %688, %683 : vector<64x128xf32>
    %690 = arith.addf %687, %689 : vector<64x128xf32>
    %c127_i32_257 = arith.constant 127 : i32
    %691 = tpu.dynamic_rotate %683 by %c127_i32_257 dim 1 : vector<64x128xf32>, i32 -> vector<64x128xf32>
    %692 = vector.broadcast %564 : f32 to vector<64x128xf32>
    %693 = arith.mulf %692, %691 : vector<64x128xf32>
    %694 = arith.addf %690, %693 : vector<64x128xf32>
    %cst_258 = arith.constant 4.000000e+00 : f32
    %695 = vector.broadcast %cst_258 : f32 to vector<64x128xf32>
    %696 = arith.mulf %695, %621 : vector<64x128xf32>
    %697 = arith.subf %696, %654 : vector<64x128xf32>
    %698 = vector.broadcast %0 : f32 to vector<64x128xf32>
    %699 = arith.mulf %698, %694 : vector<64x128xf32>
    %700 = arith.subf %621, %699 : vector<64x128xf32>
    %701 = vector.broadcast %4 : f32 to vector<64x128xf32>
    %702 = arith.mulf %701, %697 : vector<64x128xf32>
    %703 = arith.subf %700, %702 : vector<64x128xf32>
    %704 = arith.subf %621, %703 : vector<64x128xf32>
    %c1_i32_259 = arith.constant 1 : i32
    %705 = tpu.dynamic_rotate %704 by %c1_i32_259 dim 0 : vector<64x128xf32>, i32 -> vector<64x128xf32>
    %c1_i32_260 = arith.constant 1 : i32
    %706 = tpu.dynamic_rotate %705 by %c1_i32_260 dim 1 : vector<64x128xf32>, i32 -> vector<64x128xf32>
    %707 = vector.broadcast %562 : f32 to vector<64x128xf32>
    %708 = arith.mulf %707, %706 : vector<64x128xf32>
    %709 = vector.broadcast %563 : f32 to vector<64x128xf32>
    %710 = arith.mulf %709, %705 : vector<64x128xf32>
    %711 = arith.addf %708, %710 : vector<64x128xf32>
    %c127_i32_261 = arith.constant 127 : i32
    %712 = tpu.dynamic_rotate %705 by %c127_i32_261 dim 1 : vector<64x128xf32>, i32 -> vector<64x128xf32>
    %713 = vector.broadcast %564 : f32 to vector<64x128xf32>
    %714 = arith.mulf %713, %712 : vector<64x128xf32>
    %715 = arith.addf %711, %714 : vector<64x128xf32>
    %c1_i32_262 = arith.constant 1 : i32
    %716 = tpu.dynamic_rotate %704 by %c1_i32_262 dim 1 : vector<64x128xf32>, i32 -> vector<64x128xf32>
    %717 = vector.broadcast %565 : f32 to vector<64x128xf32>
    %718 = arith.mulf %717, %716 : vector<64x128xf32>
    %719 = arith.addf %715, %718 : vector<64x128xf32>
    %720 = arith.addf %705, %716 : vector<64x128xf32>
    %721 = vector.broadcast %566 : f32 to vector<64x128xf32>
    %722 = arith.mulf %721, %704 : vector<64x128xf32>
    %723 = arith.addf %719, %722 : vector<64x128xf32>
    %c127_i32_263 = arith.constant 127 : i32
    %724 = tpu.dynamic_rotate %704 by %c127_i32_263 dim 1 : vector<64x128xf32>, i32 -> vector<64x128xf32>
    %725 = vector.broadcast %567 : f32 to vector<64x128xf32>
    %726 = arith.mulf %725, %724 : vector<64x128xf32>
    %727 = arith.addf %723, %726 : vector<64x128xf32>
    %728 = arith.addf %720, %724 : vector<64x128xf32>
    %c63_i32_264 = arith.constant 63 : i32
    %729 = tpu.dynamic_rotate %704 by %c63_i32_264 dim 0 : vector<64x128xf32>, i32 -> vector<64x128xf32>
    %c1_i32_265 = arith.constant 1 : i32
    %730 = tpu.dynamic_rotate %729 by %c1_i32_265 dim 1 : vector<64x128xf32>, i32 -> vector<64x128xf32>
    %731 = vector.broadcast %568 : f32 to vector<64x128xf32>
    %732 = arith.mulf %731, %730 : vector<64x128xf32>
    %733 = arith.addf %727, %732 : vector<64x128xf32>
    %734 = vector.broadcast %569 : f32 to vector<64x128xf32>
    %735 = arith.mulf %734, %729 : vector<64x128xf32>
    %736 = arith.addf %733, %735 : vector<64x128xf32>
    %737 = arith.addf %728, %729 : vector<64x128xf32>
    %c127_i32_266 = arith.constant 127 : i32
    %738 = tpu.dynamic_rotate %729 by %c127_i32_266 dim 1 : vector<64x128xf32>, i32 -> vector<64x128xf32>
    %739 = vector.broadcast %570 : f32 to vector<64x128xf32>
    %740 = arith.mulf %739, %738 : vector<64x128xf32>
    %741 = arith.addf %736, %740 : vector<64x128xf32>
    %c0_267 = arith.constant 0 : index
    %c0_268 = arith.constant 0 : index
    %742 = vector.load %arg8[%c0_267, %c0_268] : memref<64x128xf32, #tpu.memory_space<vmem>>, vector<64x128xf32>
    %743 = arith.mulf %741, %742 : vector<64x128xf32>
    %c1_i32_269 = arith.constant 1 : i32
    %744 = tpu.dynamic_rotate %743 by %c1_i32_269 dim 0 : vector<64x128xf32>, i32 -> vector<64x128xf32>
    %c1_i32_270 = arith.constant 1 : i32
    %745 = tpu.dynamic_rotate %744 by %c1_i32_270 dim 1 : vector<64x128xf32>, i32 -> vector<64x128xf32>
    %746 = vector.broadcast %568 : f32 to vector<64x128xf32>
    %747 = arith.mulf %746, %745 : vector<64x128xf32>
    %748 = vector.broadcast %569 : f32 to vector<64x128xf32>
    %749 = arith.mulf %748, %744 : vector<64x128xf32>
    %750 = arith.addf %747, %749 : vector<64x128xf32>
    %c127_i32_271 = arith.constant 127 : i32
    %751 = tpu.dynamic_rotate %744 by %c127_i32_271 dim 1 : vector<64x128xf32>, i32 -> vector<64x128xf32>
    %752 = vector.broadcast %570 : f32 to vector<64x128xf32>
    %753 = arith.mulf %752, %751 : vector<64x128xf32>
    %754 = arith.addf %750, %753 : vector<64x128xf32>
    %c1_i32_272 = arith.constant 1 : i32
    %755 = tpu.dynamic_rotate %743 by %c1_i32_272 dim 1 : vector<64x128xf32>, i32 -> vector<64x128xf32>
    %756 = vector.broadcast %565 : f32 to vector<64x128xf32>
    %757 = arith.mulf %756, %755 : vector<64x128xf32>
    %758 = arith.addf %754, %757 : vector<64x128xf32>
    %759 = vector.broadcast %566 : f32 to vector<64x128xf32>
    %760 = arith.mulf %759, %743 : vector<64x128xf32>
    %761 = arith.addf %758, %760 : vector<64x128xf32>
    %c127_i32_273 = arith.constant 127 : i32
    %762 = tpu.dynamic_rotate %743 by %c127_i32_273 dim 1 : vector<64x128xf32>, i32 -> vector<64x128xf32>
    %763 = vector.broadcast %567 : f32 to vector<64x128xf32>
    %764 = arith.mulf %763, %762 : vector<64x128xf32>
    %765 = arith.addf %761, %764 : vector<64x128xf32>
    %c63_i32_274 = arith.constant 63 : i32
    %766 = tpu.dynamic_rotate %743 by %c63_i32_274 dim 0 : vector<64x128xf32>, i32 -> vector<64x128xf32>
    %c1_i32_275 = arith.constant 1 : i32
    %767 = tpu.dynamic_rotate %766 by %c1_i32_275 dim 1 : vector<64x128xf32>, i32 -> vector<64x128xf32>
    %768 = vector.broadcast %562 : f32 to vector<64x128xf32>
    %769 = arith.mulf %768, %767 : vector<64x128xf32>
    %770 = arith.addf %765, %769 : vector<64x128xf32>
    %771 = vector.broadcast %563 : f32 to vector<64x128xf32>
    %772 = arith.mulf %771, %766 : vector<64x128xf32>
    %773 = arith.addf %770, %772 : vector<64x128xf32>
    %c127_i32_276 = arith.constant 127 : i32
    %774 = tpu.dynamic_rotate %766 by %c127_i32_276 dim 1 : vector<64x128xf32>, i32 -> vector<64x128xf32>
    %775 = vector.broadcast %564 : f32 to vector<64x128xf32>
    %776 = arith.mulf %775, %774 : vector<64x128xf32>
    %777 = arith.addf %773, %776 : vector<64x128xf32>
    %cst_277 = arith.constant 4.000000e+00 : f32
    %778 = vector.broadcast %cst_277 : f32 to vector<64x128xf32>
    %779 = arith.mulf %778, %704 : vector<64x128xf32>
    %780 = arith.subf %779, %737 : vector<64x128xf32>
    %781 = vector.broadcast %0 : f32 to vector<64x128xf32>
    %782 = arith.mulf %781, %777 : vector<64x128xf32>
    %783 = arith.subf %704, %782 : vector<64x128xf32>
    %784 = vector.broadcast %4 : f32 to vector<64x128xf32>
    %785 = arith.mulf %784, %780 : vector<64x128xf32>
    %786 = arith.subf %783, %785 : vector<64x128xf32>
    %787 = arith.subf %621, %786 : vector<64x128xf32>
    %c127_i32_278 = arith.constant 127 : i32
    %788 = tpu.dynamic_rotate %787 by %c127_i32_278 dim 1 : vector<64x128xf32>, i32 -> vector<64x128xf32>
    %789 = arith.subf %788, %787 : vector<64x128xf32>
    %c63_i32_279 = arith.constant 63 : i32
    %790 = tpu.dynamic_rotate %787 by %c63_i32_279 dim 0 : vector<64x128xf32>, i32 -> vector<64x128xf32>
    %791 = arith.subf %790, %787 : vector<64x128xf32>
    %c0_280 = arith.constant 0 : index
    %c0_281 = arith.constant 0 : index
    %792 = vector.load %arg6[%c0_280, %c0_281] : memref<64x128xf32, #tpu.memory_space<vmem>>, vector<64x128xf32>
    %793 = arith.addf %789, %792 : vector<64x128xf32>
    %c0_282 = arith.constant 0 : index
    %c0_283 = arith.constant 0 : index
    %794 = vector.load %arg7[%c0_282, %c0_283] : memref<64x128xf32, #tpu.memory_space<vmem>>, vector<64x128xf32>
    %795 = arith.addf %791, %794 : vector<64x128xf32>
    %796 = arith.mulf %793, %793 : vector<64x128xf32>
    %797 = arith.mulf %795, %795 : vector<64x128xf32>
    %798 = arith.addf %796, %797 : vector<64x128xf32>
    %cst_284 = arith.constant 1.000000e-24 : f32
    %799 = vector.broadcast %cst_284 : f32 to vector<64x128xf32>
    %800 = arith.maximumf %798, %799 : vector<64x128xf32>
    %801 = math.rsqrt %800 : vector<64x128xf32>
    %802 = vector.broadcast %5 : f32 to vector<64x128xf32>
    %803 = arith.mulf %802, %801 : vector<64x128xf32>
    %cst_285 = arith.constant 1.000000e+00 : f32
    %804 = vector.broadcast %cst_285 : f32 to vector<64x128xf32>
    %805 = arith.subf %804, %803 : vector<64x128xf32>
    %cst_286 = arith.constant 0.000000e+00 : f32
    %806 = vector.broadcast %cst_286 : f32 to vector<64x128xf32>
    %807 = arith.maximumf %805, %806 : vector<64x128xf32>
    %808 = arith.mulf %793, %807 : vector<64x128xf32>
    %809 = arith.mulf %795, %807 : vector<64x128xf32>
    %c0_287 = arith.constant 0 : index
    %c0_288 = arith.constant 0 : index
    %810 = vector.load %arg4[%c0_287, %c0_288] : memref<64x128xf32, #tpu.memory_space<vmem>>, vector<64x128xf32>
    tpu.vector_store %arg4[%c0_287, %c0_288], %808 {strides = array<i32>} : memref<64x128xf32, #tpu.memory_space<vmem>>, vector<64x128xf32>,
    %c0_289 = arith.constant 0 : index
    %c0_290 = arith.constant 0 : index
    %811 = vector.load %arg5[%c0_289, %c0_290] : memref<64x128xf32, #tpu.memory_space<vmem>>, vector<64x128xf32>
    tpu.vector_store %arg5[%c0_289, %c0_290], %809 {strides = array<i32>} : memref<64x128xf32, #tpu.memory_space<vmem>>, vector<64x128xf32>,
    %812 = arith.subf %793, %808 : vector<64x128xf32>
    %c0_291 = arith.constant 0 : index
    %c0_292 = arith.constant 0 : index
    %813 = vector.load %arg6[%c0_291, %c0_292] : memref<64x128xf32, #tpu.memory_space<vmem>>, vector<64x128xf32>
    tpu.vector_store %arg6[%c0_291, %c0_292], %812 {strides = array<i32>} : memref<64x128xf32, #tpu.memory_space<vmem>>, vector<64x128xf32>,
    %814 = arith.subf %795, %809 : vector<64x128xf32>
    %c0_293 = arith.constant 0 : index
    %c0_294 = arith.constant 0 : index
    %815 = vector.load %arg7[%c0_293, %c0_294] : memref<64x128xf32, #tpu.memory_space<vmem>>, vector<64x128xf32>
    tpu.vector_store %arg7[%c0_293, %c0_294], %814 {strides = array<i32>} : memref<64x128xf32, #tpu.memory_space<vmem>>, vector<64x128xf32>,
    %cst_295 = arith.constant dense<0x7F800000> : vector<64xf32>
    %816 = vector.multi_reduction <minimumf>, %787, %cst_295 [1] : vector<64x128xf32> to vector<64xf32>
    %817 = vector.shape_cast %816 : vector<64xf32> to vector<64x1xf32>
    %cst_296 = arith.constant dense<0x7F800000> : vector<1xf32>
    %818 = vector.multi_reduction <minimumf>, %817, %cst_296 [0] : vector<64x1xf32> to vector<1xf32>
    %819 = vector.shape_cast %818 : vector<1xf32> to vector<1x1xf32>
    %cst_297 = arith.constant dense<0xFF800000> : vector<64xf32>
    %820 = vector.multi_reduction <maximumf>, %787, %cst_297 [1] : vector<64x128xf32> to vector<64xf32>
    %821 = vector.shape_cast %820 : vector<64xf32> to vector<64x1xf32>
    %cst_298 = arith.constant dense<0xFF800000> : vector<1xf32>
    %822 = vector.multi_reduction <maximumf>, %821, %cst_298 [0] : vector<64x1xf32> to vector<1xf32>
    %823 = vector.shape_cast %822 : vector<1xf32> to vector<1x1xf32>
    %824 = arith.subf %823, %819 : vector<1x1xf32>
    %825 = tpu.reciprocal %824 : vector<1x1xf32> -> vector<1x1xf32>
    %826 = vector.broadcast %819 : vector<1x1xf32> to vector<64x128xf32>
    %827 = arith.subf %787, %826 : vector<64x128xf32>
    %828 = vector.broadcast %825 : vector<1x1xf32> to vector<64x128xf32>
    %829 = arith.mulf %827, %828 : vector<64x128xf32>
    %c0_299 = arith.constant 0 : index
    %c0_300 = arith.constant 0 : index
    %830 = vector.load %arg3[%c0_299, %c0_300] : memref<64x128xf32, #tpu.memory_space<vmem>>, vector<64x128xf32>
    tpu.vector_store %arg3[%c0_299, %c0_300], %829 {strides = array<i32>} : memref<64x128xf32, #tpu.memory_space<vmem>>, vector<64x128xf32>,
    return
  }
}

</mosaic_0001>

<bundles_post_ra>
// kernel: tpu_custom_call.1
= control target key start
LH: loop header
LB: loop body
LE: loop exit
PB: predicated region body
PF: predicated region fallthrough
CT: control target
= control target key end

     0   :  { %8 = vsyncpa [#allocation10], 0  ;;  %s13732_s0 = inlined_call_operand.hbm [shape: f32[3,9], index: 0, kind: input, shape index: {}]   ;;  %s13733_s1 = inlined_call_operand.hbm [shape: f32[4], index: 1, kind: input, shape index: {}]   ;;  %s13734_s2 = inlined_call_operand.hbm [shape: f32[64,128], index: 2, kind: input, shape index: {}]   ;;  %s13735_s3 = inlined_call_operand.hbm [shape: f32[64,128], index: 3, kind: output, shape index: {}]  }
   0x1   :  { %9 = vsyncpa [#allocation12], 0 }
   0x2   :  { %10 = vsyncpa [#allocation8], 0 }
   0x3   :  { %11 = vsyncpa [#allocation9], 0  ;;  %s17_s14 = sshll.u32 %s13732_s0, 4  ;;  %s26_s17 = sshll.u32 %s13733_s1, 4  ;;  %s18_s14 = int_to_ptr.hbm [resolvable:$true] %s17_s14  ;;  %s27_s17 = int_to_ptr.hbm [resolvable:$true] %s26_s17 }
   0x4   :  { %s6354_s18 = smov [#allocation7]   ;;  %s6355_s19 = smov [#allocation11]  }
   0x5   :  { %20 = dma.hbm_to_smem %s18_s14, 64, %s6354_s18, [#allocation10]  }
   0x6   :  { %29 = dma.hbm_to_smem %s27_s17, 16, %s6355_s19, [#allocation12]  }
   0x7   :  { %s34_s22 = sshll.u32 %s13734_s2, 4  ;;  %s6356_s23 = smov [#allocation13]   ;;  %s35_s22 = int_to_ptr.hbm [resolvable:$true] %s34_s22 }
   0x8   :  { %s36_s24 = sshll.u32 %s6356_s23, 4  ;;  %s6357_s25 = smov 128   ;;  %s37_s24 = int_to_ptr.vmem [resolvable:$true] %s36_s24 }
   0x9   :  { %s6358_s0 = smov 8  }
   0xa   :  { %42 = dma.hbm_to_vmem [thread:$0]  %s35_s22, 1024, %s37_s24, [#allocation8], %s6357_s25, %s6357_s25, %s6358_s0  }
   0xb   :  { %6346 = dma.done.wait [#allocation10], 64  }
   0xc   :  { %6347 = vsyncadd [#allocation10], 4294967232 }
   0xd   :  { %6348 = dma.done.wait [#allocation12], 16  }
   0xe   :  { %6349 = vsyncadd [#allocation12], 4294967280 }
   0xf   :  { %6350 = dma.done.wait [#allocation8], 1024  }
  0x10   :  { %6351 = vsyncadd [#allocation8], 4294966272 }
  0x11   :  { %55 = sfence }
  0x12   :  { %v13736_v0 = vlaneseq  ;;  %v6395_v1 = vld [vmem:[#allocation13] sm:$0xff]  ;;  %v6397_v2 = vld [vmem:[#allocation13 + $0x38] sm:$0xff]  ;;  %v13737_v6 = vmov 0.0   ;;  %s6360_s1 = smov 1   ;;  %v6415_v8 = vld [vmem:[#allocation13 + $0x8] sm:$0xff]  ;;  %s6361_s2 = smov 127  }
  0x13   :  { %14228 = vst [vmem:[#allocation19_spill] sm:$0xff] %v6397_v2  ;;  %v393_v4 = vrot.slane %v6395_v1, 7  ;;  %v400_v5 = vrot.slane %v6397_v2, 7  ;;  %6203 = vrot.lane.b32.xlu1 %v13737_v6, %s6360_s1  ;;  %6193 = vrot.lane.b32.xlu0 %v13737_v6, %s6360_s1  ;;  %v6417_v9 = vld [vmem:[#allocation13 + $0x10] sm:$0xff]  ;;  %v394_v10 = vrot.slane %v6415_v8, 7  ;;  %v6420_v11 = vld [vmem:[#allocation13 + $0x18] sm:$0xff] }
  0x14   :  { %v6400_v3 = vshrl.u32 %v13736_v0, 7  ;;  %v395_v13 = vrot.slane %v6417_v9, 7  ;;  %v396_v14 = vrot.slane %v6420_v11, 7  ;;  %v6434_v15 = vld [vmem:[#allocation13 + $0x20] sm:$0xff]  ;;  %v6444_v18 = vld [vmem:[#allocation13 + $0x28] sm:$0xff]  ;;  %v6447_v20 = vld [vmem:[#allocation13 + $0x30] sm:$0xff] }
  0x15   :  { %v397_v19 = vrot.slane %v6434_v15, 7  ;;  %14230 = vst [vmem:[#allocation21_spill] sm:$0xff] %v6447_v20  ;;  %v398_v22 = vrot.slane %v6444_v18, 7  ;;  %v399_v23 = vrot.slane %v6447_v20, 7  ;;  %v567_v27 = vrot.slane %v6395_v1, 1  ;;  %s6161_s26 = sld [smem:[#allocation7 + $0x7]] }
  0x16   :  { %14229 = vst [vmem:[#allocation20_spill] sm:$0xff] %v6400_v3  ;;  %vm351_vm0 = vcmp.lt.s32.totalorder %v6400_v3, 1  ;;  %v568_v28 = vrot.slane %v6415_v8, 1  ;;  %v569_v29 = vrot.slane %v6417_v9, 1  ;;  %vm575_vm1 = vcmp.lt.s32.totalorder %v6400_v3, 7  ;;  %s6160_s27 = sld [smem:[#allocation7 + $0x6]] }
  0x17   :  { %v6411_v7 = vsel %vm351_vm0, %v400_v5, %v393_v4  ;;  %v6428_v12 = vsel %vm351_vm0, %v393_v4, %v394_v10  ;;  %v6438_v16 = vsel %vm351_vm0, %v394_v10, %v395_v13  ;;  %v6442_v17 = vsel %vm351_vm0, %v395_v13, %v396_v14  ;;  %s6162_s28 = sld [smem:[#allocation7 + $0x8]] }
  0x18   :  { %409 = vrot.lane.b32.xlu2 %v6411_v7, %s6360_s1  ;;  %v6455_v21 = vsel %vm351_vm0, %v396_v14, %v397_v19  ;;  %v6463_v24 = vsel %vm351_vm0, %v397_v19, %v398_v22  ;;  %v6467_v25 = vsel %vm351_vm0, %v398_v22, %v399_v23  ;;  %v6475_v26 = vsel %vm351_vm0, %v399_v23, %v400_v5  ;;  %s6157_s29 = sld [smem:[#allocation7 + $0x3]] }
  0x19   :  { %v6533_v30 = vsel %vm575_vm1, %v567_v27, %v568_v28  ;;  %v6537_v31 = vsel %vm575_vm1, %v568_v28, %v569_v29  ;;  %v570_v33 = vrot.slane %v6420_v11, 1  ;;  %v571_v35 = vrot.slane %v6434_v15, 1  ;;  %s6158_s30 = sld [smem:[#allocation7 + $0x4]] }
  0x1a   :  { %v572_v36 = vrot.slane %v6444_v18, 1  ;;  %v573_v40 = vrot.slane %v6447_v20, 1  ;;  %v574_v42 = vrot.slane %v6397_v2, 1  ;;  %s262_s4 = sld [smem:[#allocation7]] }
  0x1b   :  { %6208 = vrot.lane.b32.xlu1 %v13737_v6, %s6360_s1  ;;  %6198 = vrot.lane.b32.xlu0 %v13737_v6, %s6360_s1  ;;  %v6548_v34 = vsel %vm575_vm1, %v569_v29, %v570_v33  ;;  %v6556_v37 = vsel %vm575_vm1, %v570_v33, %v571_v35  ;;  %v6638_v22 = vstv %s6161_s26  ;;  %s6155_s5 = sld [smem:[#allocation7 + $0x1]] }
  0x1c   :  { %14231 = vst [vmem:[#allocation22_spill] sm:$0xff] %v6556_v37  ;;  %v6560_v38 = vsel %vm575_vm1, %v571_v35, %v572_v36  ;;  %v6571_v41 = vsel %vm575_vm1, %v572_v36, %v573_v40  ;;  %v6578_v43 = vsel %vm575_vm1, %v573_v40, %v574_v42  ;;  %v6582_v44 = vsel %vm575_vm1, %v574_v42, %v567_v27  ;;  %s6159_s6 = sld [smem:[#allocation7 + $0x5]] }
  0x1d   :  { %14232 = vst [vmem:[#allocation23_spill] sm:$0xff] %v6560_v38  ;;  %v6640_v23 = vstv %s6160_s27  ;;  %v437_v29 = vmul.f32 %v6638_v22, %v6438_v16  ;;  %v6649_v36 = vstv %s6162_s28  ;;  %s6156_s7 = sld [smem:[#allocation7 + $0x2]] }
  0x1e   :  { %14233 = vst [vmem:[#allocation24_spill] sm:$0xff] %v6578_v43  ;;  %v6652_v0 = vstv %s6157_s29  ;;  %s56_s8 = sld [smem:[#allocation11]] }
  0x1f   :  { %14234 = vst [vmem:[#allocation25_spill] sm:$0xff] %v6582_v44  ;;  %s6775_s9 = sld [smem:[#allocation11 + $0x3]] }
  0x20   :  { %411 = vrot.lane.b32.xlu2 %v6428_v12, %s6360_s1  ;;  %14240 = vst [vmem:[#allocation31_spill] sm:$0xff] %v6638_v22  ;;  %s6152_s10 = sld [smem:[#allocation11 + $0x1]] }
  0x21   :  { %s8994_s12 = sld [smem:[#allocation11 + $0x2]] }
  0x22   :  { %s6169_s15 = sld [smem:[#allocation7 + $0x86]] }
  0x23   :  { %413 = vrot.lane.b32.xlu0 %v6438_v16, %s6360_s1  ;;  %415 = vrot.lane.b32.xlu1 %v6442_v17, %s6360_s1  ;;  %s6170_s16 = sld [smem:[#allocation7 + $0x87]] }
  0x24   :  { %s6171_s17 = sld [smem:[#allocation7 + $0x88]] }
  0x25   :  { %s6166_s18 = sld [smem:[#allocation7 + $0x83]] }
  0x26   :  { %s60_s11 = sadd.f32 %s6775_s9, %s6152_s10 }
  0x27   :  { %s6164_s19 = sld [smem:[#allocation7 + $0x81]] }
  0x28   :  { %417 = vrot.lane.b32.xlu2 %v6455_v21, %s6360_s1  ;;  %s6167_s20 = sld [smem:[#allocation7 + $0x84]] }
  0x29   :  { %s9488_s21 = sld [smem:[#allocation7 + $0x85]] }
  0x2a   :  { %s9498_s22 = sld [smem:[#allocation7 + $0x80]] }
  0x2b   :  { %419 = vrot.lane.b32.xlu0 %v6463_v24, %s6360_s1  ;;  %421 = vrot.lane.b32.xlu1 %v6467_v25, %s6360_s1  ;;  %s9535_s23 = sld [smem:[#allocation7 + $0x82]] }
  0x2c   :  { %s6178_s24 = sld [smem:[#allocation7 + $0x106]] }
  0x2d   :  { %s6179_s26 = sld [smem:[#allocation7 + $0x107]] }
  0x2e   :  { %s6180_s27 = sld [smem:[#allocation7 + $0x108]] }
  0x2f   :  { %s6175_s28 = sld [smem:[#allocation7 + $0x103]] }
  0x30   :  { %423 = vrot.lane.b32.xlu2 %v6475_v26, %s6360_s1  ;;  %s6176_s29 = sld [smem:[#allocation7 + $0x104]] }
  0x33   :  { %451 = vrot.lane.b32.xlu0 %v6411_v7, %s6361_s2  ;;  %453 = vrot.lane.b32.xlu1 %v6428_v12, %s6361_s2 }
  0x38   :  { %455 = vrot.lane.b32.xlu2 %v6438_v16, %s6361_s2 }
  0x3b   :  { %457 = vrot.lane.b32.xlu0 %v6442_v17, %s6361_s2  ;;  %459 = vrot.lane.b32.xlu1 %v6455_v21, %s6361_s2 }
  0x40   :  { %461 = vrot.lane.b32.xlu2 %v6463_v24, %s6361_s2 }
  0x43   :  { %463 = vrot.lane.b32.xlu0 %v6467_v25, %s6361_s2  ;;  %465 = vrot.lane.b32.xlu1 %v6475_v26, %s6361_s2 }
  0x48   :  { %484 = vrot.lane.b32.xlu2 %v6395_v1, %s6360_s1 }
  0x4b   :  { %486 = vrot.lane.b32.xlu0 %v6415_v8, %s6360_s1  ;;  %488 = vrot.lane.b32.xlu1 %v6417_v9, %s6360_s1 }
  0x50   :  { %490 = vrot.lane.b32.xlu2 %v6420_v11, %s6360_s1 }
  0x53   :  { %492 = vrot.lane.b32.xlu0 %v6434_v15, %s6360_s1  ;;  %494 = vrot.lane.b32.xlu1 %v6444_v18, %s6360_s1 }
  0x58   :  { %496 = vrot.lane.b32.xlu2 %v6447_v20, %s6360_s1 }
  0x5b   :  { %498 = vrot.lane.b32.xlu0 %v6397_v2, %s6360_s1  ;;  %534 = vrot.lane.b32.xlu1 %v6395_v1, %s6361_s2 }
  0x60   :  { %536 = vrot.lane.b32.xlu2 %v6415_v8, %s6361_s2 }
  0x63   :  { %538 = vrot.lane.b32.xlu0 %v6417_v9, %s6361_s2  ;;  %540 = vrot.lane.b32.xlu1 %v6420_v11, %s6361_s2 }
  0x68   :  { %542 = vrot.lane.b32.xlu2 %v6434_v15, %s6361_s2 }
  0x6b   :  { %544 = vrot.lane.b32.xlu0 %v6444_v18, %s6361_s2  ;;  %546 = vrot.lane.b32.xlu1 %v6447_v20, %s6361_s2 }
  0x70   :  { %548 = vrot.lane.b32.xlu2 %v6397_v2, %s6361_s2 }
  0x72   :  { %v6539_v32 = vpop.permute.xlu2 %409 }
  0x73   :  { %584 = vrot.lane.b32.xlu0 %v6533_v30, %s6360_s1  ;;  %586 = vrot.lane.b32.xlu1 %v6537_v31, %s6360_s1 }
  0x78   :  { %588 = vrot.lane.b32.xlu2 %v6548_v34, %s6360_s1 }
  0x7a   :  { %v6562_v39 = vpop.permute.xlu2 %411 }
  0x7b   :  { %590 = vrot.lane.b32.xlu0 %v6556_v37, %s6360_s1  ;;  %592 = vrot.lane.b32.xlu1 %v6560_v38, %s6360_s1 }
  0x80   :  { %594 = vrot.lane.b32.xlu2 %v6571_v41, %s6360_s1 }
  0x82   :  { %v6584_v45 = vpop.permute.xlu2 %417 }
  0x83   :  { %596 = vrot.lane.b32.xlu0 %v6578_v43, %s6360_s1  ;;  %598 = vrot.lane.b32.xlu1 %v6582_v44, %s6360_s1 }
  0x85   :  { %v6590_v46 = vpop.permute.xlu1 %6203  ;;  %v6592_v47 = vpop.permute.xlu0 %6193 }
  0x86   :  { %14235 = vst [vmem:[#allocation26_spill] sm:$0xff] %v6590_v46 }
  0x87   :  { %14236 = vst [vmem:[#allocation27_spill] sm:$0xff] %v6592_v47  ;;  %v436_v47 = vmul.f32 %v6638_v22, %v6428_v12 }
  0x88   :  { %634 = vrot.lane.b32.xlu2 %v6533_v30, %s6361_s2 }
  0x8a   :  { %v6596_v48 = vpop.permute.xlu2 %423 }
  0x8b   :  { %636 = vrot.lane.b32.xlu0 %v6537_v31, %s6361_s2  ;;  %638 = vrot.lane.b32.xlu1 %v6548_v34, %s6361_s2 }
  0x8d   :  { %v6602_v49 = vpop.permute.xlu1 %6208  ;;  %v6604_v50 = vpop.permute.xlu0 %6198 }
  0x8e   :  { %14237 = vst [vmem:[#allocation28_spill] sm:$0xff] %v6602_v49 }
  0x8f   :  { %14238 = vst [vmem:[#allocation29_spill] sm:$0xff] %v6604_v50  ;;  %v6662_v50 = vstv %s6158_s30  ;;  %s6177_s30 = sld [smem:[#allocation7 + $0x105]] }
  0x90   :  { %640 = vrot.lane.b32.xlu2 %v6556_v37, %s6361_s2 }
  0x92   :  { %v456_v51 = vpop.permute.xlu2 %455 }
  0x93   :  { %642 = vrot.lane.b32.xlu0 %v6560_v38, %s6361_s2  ;;  %644 = vrot.lane.b32.xlu1 %v6571_v41, %s6361_s2  ;;  %v470_v42 = vmul.f32 %v6649_v36, %v456_v51  ;;  %v520_v51 = vmul.f32 %v6662_v50, %v6417_v9  ;;  %v6679_v9 = vstv %s6159_s6  ;;  %s6174_s6 = sld [smem:[#allocation7 + $0x102]] }
  0x95   :  { %v414_v52 = vpop.permute.xlu0 %413  ;;  %v6612_v53 = vpop.permute.xlu1 %415 }
  0x96   :  { %v428_v33 = vmul.f32 %v6640_v23, %v414_v52  ;;  %v440_v52 = vmul.f32 %v6638_v22, %v6463_v24 }
  0x98   :  { %646 = vrot.lane.b32.xlu2 %v6578_v43, %s6361_s2  ;;  %v445_v40 = vadd.f32 %v437_v29, %v428_v33  ;;  %v6672_v43 = vstv %s6155_s5  ;;  %s6173_s5 = sld [smem:[#allocation7 + $0x101]] }
  0x9a   :  { %v462_v54 = vpop.permute.xlu2 %461  ;;  %v478_v49 = vadd.f32 %v470_v42, %v445_v40  ;;  %v435_v40 = vmul.f32 %v6638_v22, %v6411_v7 }
  0x9b   :  { %648 = vrot.lane.b32.xlu0 %v6582_v44, %s6361_s2  ;;  %v427_v44 = vmul.f32 %v6640_v23, %v6562_v39 }
  0x9d   :  { %v420_v55 = vpop.permute.xlu0 %419  ;;  %v6618_v56 = vpop.permute.xlu1 %421 }
  0x9e   :  { %v431_v46 = vmul.f32 %v6640_v23, %v420_v55  ;;  %v473_v55 = vmul.f32 %v6649_v36, %v462_v54  ;;  %v620_v54 = vmul.f32 %v6672_v43, %v6548_v34  ;;  %v430_v34 = vmul.f32 %v6640_v23, %v6584_v45 }
  0xa0   :  { %v448_v24 = vadd.f32 %v440_v52, %v431_v46  ;;  %v444_v52 = vadd.f32 %v436_v47, %v427_v44 }
  0xa2   :  { %v6620_v57 = vpop.permute.xlu2 %484  ;;  %v481_v7 = vadd.f32 %v473_v55, %v448_v24 }
  0xa5   :  { %v452_v58 = vpop.permute.xlu0 %451  ;;  %v454_v59 = vpop.permute.xlu1 %453 }
  0xa6   :  { %v468_v20 = vmul.f32 %v6649_v36, %v452_v58 }
  0xaa   :  { %v6622_v60 = vpop.permute.xlu2 %490 }
  0xad   :  { %v6624_v61 = vpop.permute.xlu0 %457  ;;  %v6626_v62 = vpop.permute.xlu1 %459 }
  0xae   :  { %v471_v55 = vmul.f32 %v6649_v36, %v6624_v61 }
  0xb2   :  { %v6628_v63 = vpop.permute.xlu2 %496 }
  0xb3   :  { %14239 = vst [vmem:[#allocation30_spill] sm:$0xff] %v6628_v63 }
  0xb5   :  { %v6630_v4 = vpop.permute.xlu0 %463  ;;  %v6632_v5 = vpop.permute.xlu1 %465 }
  0xba   :  { %v6634_v10 = vpop.permute.xlu2 %536 }
  0xbb   :  { %v552_v61 = vmul.f32 %v6679_v9, %v6634_v10 }
  0xbd   :  { %v487_v13 = vpop.permute.xlu0 %486  ;;  %v489_v14 = vpop.permute.xlu1 %488 }
  0xbe   :  { %v503_v16 = vmul.f32 %v6652_v0, %v489_v14  ;;  %v6670_v14 = vstv %s262_s4  ;;  %v502_v37 = vmul.f32 %v6652_v0, %v487_v13  ;;  %s6172_s4 = sld [smem:[#allocation7 + $0x100]] }
  0xc0   :  { %v511_v33 = vadd.f32 %v503_v16, %v478_v49  ;;  %v426_v49 = vmul.f32 %v6640_v23, %v6539_v32  ;;  %v469_v32 = vmul.f32 %v6649_v36, %v454_v59  ;;  %v501_v59 = vmul.f32 %v6652_v0, %v6620_v57 }
  0xc2   :  { %v6636_v19 = vpop.permute.xlu2 %542  ;;  %v528_v16 = vadd.f32 %v520_v51, %v511_v33  ;;  %v443_v38 = vadd.f32 %v435_v40, %v426_v49  ;;  %v523_v33 = vmul.f32 %v6662_v50, %v6444_v18  ;;  %v477_v58 = vadd.f32 %v469_v32, %v444_v52 }
  0xc3   :  { %v429_v18 = vmul.f32 %v6640_v23, %v6612_v53  ;;  %v623_v53 = vmul.f32 %v6672_v43, %v6571_v41  ;;  %v518_v40 = vmul.f32 %v6662_v50, %v6395_v1  ;;  %v522_v32 = vmul.f32 %v6662_v50, %v6434_v15 }
  0xc4   :  { %v476_v47 = vadd.f32 %v468_v20, %v443_v38  ;;  %v510_v45 = vadd.f32 %v502_v37, %v477_v58 }
  0xc5   :  { %v6642_v27 = vpop.permute.xlu0 %492  ;;  %v495_v28 = vpop.permute.xlu1 %494 }
  0xc6   :  { %v506_v39 = vmul.f32 %v6652_v0, %v495_v28 }
  0xc8   :  { %v514_v63 = vadd.f32 %v506_v39, %v481_v7 }
  0xca   :  { %v6647_v35 = vpop.permute.xlu2 %548  ;;  %v531_v20 = vadd.f32 %v523_v33, %v514_v63  ;;  %v442_v63 = vmul.f32 %v6638_v22, %v6475_v26  ;;  %v504_v26 = vmul.f32 %v6652_v0, %v6622_v60 }
  0xcb   :  { %14241 = vst [vmem:[#allocation32_spill] sm:$0xff] %v6647_v35 }
  0xcd   :  { %v6654_v6 = vpop.permute.xlu0 %498  ;;  %v6656_v3 = vpop.permute.xlu1 %534 }
  0xd2   :  { %v589_v29 = vpop.permute.xlu2 %588 }
  0xd3   :  { %v603_v46 = vmul.f32 %v6670_v14, %v589_v29  ;;  %v439_v29 = vmul.f32 %v6638_v22, %v6455_v21  ;;  %v519_v21 = vmul.f32 %v6662_v50, %v6415_v8  ;;  %v509_v8 = vadd.f32 %v501_v59, %v476_v47 }
  0xd4   :  { %v475_v47 = vmul.f32 %v6649_v36, %v6632_v5 }
  0xd5   :  { %v539_v42 = vpop.permute.xlu0 %538  ;;  %v6681_v12 = vpop.permute.xlu1 %540  ;;  %v447_v24 = vadd.f32 %v439_v29, %v430_v34  ;;  %v527_v39 = vadd.f32 %v519_v21, %v510_v45  ;;  %v526_v52 = vadd.f32 %v518_v40, %v509_v8  ;;  %v508_v21 = vmul.f32 %v6652_v0, %v6654_v6  ;;  %v14245_v8 = vld [vmem:[#allocation19_spill] sm:$0xff] }
  0xd6   :  { %v553_v35 = vmul.f32 %v6679_v9, %v539_v42  ;;  %v505_v42 = vmul.f32 %v6652_v0, %v6642_v27  ;;  %v618_v27 = vmul.f32 %v6672_v43, %v6533_v30  ;;  %v525_v6 = vmul.f32 %v6662_v50, %v14245_v8 }
  0xd7   :  { %v560_v33 = vadd.f32 %v552_v61, %v527_v39 }
  0xd8   :  { %v561_v2 = vadd.f32 %v553_v35, %v528_v16  ;;  %v433_v16 = vmul.f32 %v6640_v23, %v6596_v48  ;;  %v432_v48 = vmul.f32 %v6640_v23, %v6618_v56  ;;  %v474_v56 = vmul.f32 %v6649_v36, %v6630_v4 }
  0xda   :  { %v611_v28 = vadd.f32 %v603_v46, %v561_v2  ;;  %v595_v44 = vpop.permute.xlu2 %594  ;;  %v438_v2 = vmul.f32 %v6638_v22, %v6442_v17  ;;  %v472_v17 = vmul.f32 %v6649_v36, %v6626_v62  ;;  %v551_v62 = vmul.f32 %v6679_v9, %v6656_v3 }
  0xdb   :  { %v606_v57 = vmul.f32 %v6670_v14, %v595_v44  ;;  %v619_v3 = vmul.f32 %v6672_v43, %v6537_v31  ;;  %v450_v34 = vadd.f32 %v442_v63, %v433_v16  ;;  %v521_v31 = vmul.f32 %v6662_v50, %v6420_v11 }
  0xdc   :  { %v6699_v35 = vadd.f32 %v620_v54, %v611_v28  ;;  %v446_v49 = vadd.f32 %v438_v2, %v429_v18  ;;  %v480_v46 = vadd.f32 %v472_v17, %v447_v24  ;;  %v441_v54 = vmul.f32 %v6638_v22, %v6467_v25  ;;  %v14243_v24 = vld [vmem:[#allocation22_spill] sm:$0xff]  ;;  %v14244_v17 = vld [vmem:[#allocation23_spill] sm:$0xff] }
  0xdd   :  { %v545_v13 = vpop.permute.xlu0 %544  ;;  %v6707_v51 = vpop.permute.xlu1 %546  ;;  %v559_v25 = vadd.f32 %v551_v62, %v526_v52  ;;  %v555_v18 = vmul.f32 %v6679_v9, %v6636_v19  ;;  %v554_v11 = vmul.f32 %v6679_v9, %v6681_v12  ;;  %v622_v19 = vmul.f32 %v6672_v43, %v14244_v17  ;;  %v14246_v62 = vld [vmem:[#allocation21_spill] sm:$0xff] }
  0xde   :  { %v556_v38 = vmul.f32 %v6679_v9, %v545_v13  ;;  %v479_v1 = vadd.f32 %v471_v55, %v446_v49  ;;  %v513_v7 = vadd.f32 %v505_v42, %v480_v46  ;;  %v449_v59 = vadd.f32 %v441_v54, %v432_v48  ;;  %v14247_v46 = vld [vmem:[#allocation32_spill] sm:$0xff] }
  0xdf   :  { %v621_v55 = vmul.f32 %v6672_v43, %v14243_v24  ;;  %v6771_v54 = vstv %s6156_s7  ;;  %v557_v52 = vmul.f32 %v6679_v9, %v6707_v51 }
  0xe0   :  { %v564_v37 = vadd.f32 %v556_v38, %v531_v20  ;;  %v512_v44 = vadd.f32 %v504_v26, %v479_v1  ;;  %v530_v2 = vadd.f32 %v522_v32, %v513_v7  ;;  %v482_v4 = vadd.f32 %v474_v56, %v449_v59  ;;  %v14242_v38 = vld [vmem:[#allocation30_spill] sm:$0xff]  ;;  %v14249_v32 = vld [vmem:[#allocation24_spill] sm:$0xff] }
  0xe1   :  { %v483_v20 = vadd.f32 %v475_v47, %v450_v34  ;;  %v507_v5 = vmul.f32 %v6652_v0, %v14242_v38  ;;  %v558_v26 = vmul.f32 %v6679_v9, %v14247_v46  ;;  %14248 = vst [vmem:[#allocation30_spill] sm:$0xff] %v6771_v54  ;;  %v14251_v56 = vmov 0.0  }
  0xe2   :  { %v614_v41 = vadd.f32 %v606_v57, %v564_v37  ;;  %v529_v57 = vadd.f32 %v521_v31, %v512_v44  ;;  %v635_v49 = vpop.permute.xlu2 %634  ;;  %v6785_v47 = vrot.slane %v14251_v56, 7  ;;  %v6790_v38 = vstv %s56_s8 }
  0xe3   :  { %v516_v37 = vadd.f32 %v508_v21, %v483_v20  ;;  %v515_v61 = vadd.f32 %v507_v5, %v482_v4  ;;  %v14253_v4 = vld [vmem:[#allocation29_spill] sm:$0xff]  ;;  %14254 = vst [vmem:[#allocation22_spill] sm:$0xff] %v6790_v38 }
  0xe4   :  { %v6735_v10 = vadd.f32 %v623_v53, %v614_v41  ;;  %v563_v53 = vadd.f32 %v555_v18, %v530_v2  ;;  %v562_v63 = vadd.f32 %v554_v11, %v529_v57  ;;  %v524_v41 = vmul.f32 %v6662_v50, %v14246_v62 }
  0xe5   :  { %v585_v60 = vpop.permute.xlu0 %584  ;;  %v587_v28 = vpop.permute.xlu1 %586  ;;  %v6200_v20 = vunpack.i.l.bf16 %v14253_v4 }
  0xe6   :  { %v601_v29 = vmul.f32 %v6670_v14, %v585_v60  ;;  %v602_v30 = vmul.f32 %v6670_v14, %v587_v28  ;;  %v532_v7 = vadd.f32 %v524_v41, %v515_v61  ;;  %v624_v60 = vmul.f32 %v6672_v43, %v14249_v32  ;;  %v14250_v28 = vld [vmem:[#allocation25_spill] sm:$0xff] }
  0xe8   :  { %v609_v15 = vadd.f32 %v601_v29, %v559_v25  ;;  %v610_v58 = vadd.f32 %v602_v30, %v560_v33  ;;  %v625_v33 = vmul.f32 %v6672_v43, %v14250_v28  ;;  %v651_v25 = vmul.f32 %v6771_v54, %v635_v49  ;;  %v14256_v49 = vld [vmem:[#allocation26_spill] sm:$0xff] }
  0xe9   :  { %v565_v44 = vadd.f32 %v557_v52, %v532_v7  ;;  %v6206_v62 = vunpack.i.h.bf16 %v14256_v49 }
  0xea   :  { %v626_v13 = vadd.f32 %v618_v27, %v609_v15  ;;  %v627_v45 = vadd.f32 %v619_v3, %v610_v58  ;;  %v533_v27 = vadd.f32 %v525_v6, %v516_v37  ;;  %v14252_v15 = vld [vmem:[#allocation27_spill] sm:$0xff]  ;;  %v641_v59 = vpop.permute.xlu2 %640 }
  0xeb   :  { %v6195_v58 = vunpack.i.l.bf16 %v14252_v15  ;;  %v6196_v21 = vunpack.i.h.bf16 %v14252_v15 }
  0xec   :  { %v566_v34 = vadd.f32 %v558_v26, %v533_v27  ;;  %v659_v11 = vadd.f32 %v651_v25, %v626_v13  ;;  %v370_v13 = vadd.f32 %v6200_v20, %v6785_v47 }
  0xed   :  { %v591_v40 = vpop.permute.xlu0 %590  ;;  %v593_v12 = vpop.permute.xlu1 %592  ;;  %v368_v24 = vadd.f32 %v6195_v58, %v6785_v47  ;;  %v369_v6 = vadd.f32 %v6196_v21, %v6785_v47 }
  0xee   :  { %v604_v42 = vmul.f32 %v6670_v14, %v591_v40  ;;  %v605_v39 = vmul.f32 %v6670_v14, %v593_v12  ;;  %v668_v17 = vmul.f32 %v6790_v38, %v659_v11 }
  0xf0   :  { %v612_v16 = vadd.f32 %v604_v42, %v562_v63  ;;  %v613_v1 = vadd.f32 %v605_v39, %v563_v53  ;;  %v6201_v63 = vunpack.i.h.bf16 %v14253_v4  ;;  %v6205_v42 = vunpack.i.l.bf16 %v14256_v49 }
  0xf2   :  { %v629_v3 = vadd.f32 %v621_v55, %v612_v16  ;;  %v630_v48 = vadd.f32 %v622_v19, %v613_v1  ;;  %v6796_v55 = vstv %s6775_s9  ;;  %v654_v19 = vmul.f32 %v6771_v54, %v641_v59  ;;  %v647_v26 = vpop.permute.xlu2 %646  ;;  %s6137_s9 = sshll.u32 %s13735_s3, 4  ;;  %s6138_s9 = int_to_ptr.hbm [resolvable:$true] %s6137_s9 }
  0xf3   :  { %14255 = vst [vmem:[#allocation23_spill] sm:$0xff] %v6796_v55  ;;  %v377_v37 = vmul.f32 %v368_v24, %v6796_v55  ;;  %v378_v1 = vmul.f32 %v369_v6, %v6796_v55  ;;  %v379_v46 = vmul.f32 %v370_v13, %v6796_v55  ;;  %v371_v7 = vadd.f32 %v6201_v63, %v6785_v47 }
  0xf4   :  { %v662_v16 = vadd.f32 %v654_v19, %v629_v3  ;;  %v657_v28 = vmul.f32 %v6771_v54, %v647_v26 }
  0xf5   :  { %v597_v29 = vpop.permute.xlu0 %596  ;;  %v599_v30 = vpop.permute.xlu1 %598  ;;  %v6809_v41 = vadd.f32 %v668_v17, %v377_v37  ;;  %v380_v58 = vmul.f32 %v371_v7, %v6796_v55 }
  0xf6   :  { %v607_v51 = vmul.f32 %v6670_v14, %v597_v29  ;;  %v608_v31 = vmul.f32 %v6670_v14, %v599_v30  ;;  %v671_v3 = vmul.f32 %v6790_v38, %v662_v16 }
  0xf7   :  { %14257 = vst [vmem:[#allocation19_spill] sm:$0xff] %v6809_v41  ;;  %v684_v29 = vrot.slane %v6809_v41, 7 }
  0xf8   :  { %v615_v2 = vadd.f32 %v607_v51, %v565_v44  ;;  %v616_v18 = vadd.f32 %v608_v31, %v566_v34  ;;  %v14260_v31 = vld [vmem:[#allocation28_spill] sm:$0xff]  ;;  %v6842_v24 = vadd.f32 %v671_v3, %v380_v58  ;;  %v868_v3 = vrot.slane %v6809_v41, 1 }
  0xf9   :  { %v6210_v15 = vunpack.i.l.bf16 %v14260_v31  ;;  %v6211_v20 = vunpack.i.h.bf16 %v14260_v31 }
  0xfa   :  { %v632_v5 = vadd.f32 %v624_v60, %v615_v2  ;;  %v6792_v57 = vadd.f32 %v625_v33, %v616_v18  ;;  %v373_v60 = vadd.f32 %v6206_v62, %v6785_v47  ;;  %v14261_v18 = vld [vmem:[#allocation20_spill] sm:$0xff]  ;;  %14263 = vst [vmem:[#allocation25_spill] sm:$0xff] %v6842_v24 }
  0xfb   :  { %v375_v13 = vadd.f32 %v6211_v20, %v6785_v47 }
  0xfd   :  { %v637_v53 = vpop.permute.xlu0 %636  ;;  %v639_v8 = vpop.permute.xlu1 %638  ;;  %v384_v62 = vmul.f32 %v375_v13, %v6796_v55 }
  0xfe   :  { %v652_v40 = vmul.f32 %v6771_v54, %v637_v53  ;;  %v653_v12 = vmul.f32 %v6771_v54, %v639_v8  ;;  %v374_v53 = vadd.f32 %v6210_v15, %v6785_v47 }
 0x100   :  { %v660_v39 = vadd.f32 %v652_v40, %v627_v45  ;;  %v661_v61 = vadd.f32 %v653_v12, %v6699_v35  ;;  %v372_v45 = vadd.f32 %v6205_v42, %v6785_v47  ;;  %v687_v12 = vrot.slane %v6842_v24, 7 }
 0x101   :  { %v383_v42 = vmul.f32 %v374_v53, %v6796_v55 }
 0x102   :  { %v669_v27 = vmul.f32 %v6790_v38, %v660_v39  ;;  %v670_v52 = vmul.f32 %v6790_v38, %v661_v61  ;;  %v381_v4 = vmul.f32 %v372_v45, %v6796_v55 }
 0x104   :  { %v6817_v32 = vadd.f32 %v669_v27, %v378_v1  ;;  %v6819_v35 = vadd.f32 %v670_v52, %v379_v46 }
 0x105   :  { %v643_v33 = vpop.permute.xlu0 %642  ;;  %v645_v25 = vpop.permute.xlu1 %644 }
 0x106   :  { %14258 = vst [vmem:[#allocation21_spill] sm:$0xff] %v6817_v32  ;;  %v655_v30 = vmul.f32 %v6771_v54, %v643_v33  ;;  %v656_v34 = vmul.f32 %v6771_v54, %v645_v25  ;;  %v685_v44 = vrot.slane %v6817_v32, 7  ;;  %v686_v51 = vrot.slane %v6819_v35, 7 }
 0x107   :  { %14259 = vst [vmem:[#allocation32_spill] sm:$0xff] %v6819_v35  ;;  %v870_v25 = vrot.slane %v6819_v35, 1 }
 0x108   :  { %v663_v59 = vadd.f32 %v655_v30, %v630_v48  ;;  %v664_v2 = vadd.f32 %v656_v34, %v6735_v10  ;;  %v6834_v21 = vsel %vm351_vm0, %v685_v44, %v686_v51  ;;  %v6838_v11 = vsel %vm351_vm0, %v684_v29, %v685_v44 }
 0x109   :  { %14262 = vst [vmem:[#allocation24_spill] sm:$0xff] %v6834_v21  ;;  %704 = vrot.lane.b32.xlu0 %v6834_v21, %s6360_s1  ;;  %702 = vrot.lane.b32.xlu2 %v6838_v11, %s6360_s1  ;;  %v382_v10 = vmul.f32 %v373_v60, %v6796_v55  ;;  %v665_v48 = vadd.f32 %v657_v28, %v632_v5  ;;  %v869_v60 = vrot.slane %v6817_v32, 1 }
 0x10a   :  { %v672_v17 = vmul.f32 %v6790_v38, %v663_v59  ;;  %v673_v19 = vmul.f32 %v6790_v38, %v664_v2  ;;  %v6900_v7 = vsel %vm351_vm0, %v686_v51, %v687_v12 }
 0x10b   :  { %v674_v37 = vmul.f32 %v6790_v38, %v665_v48  ;;  %14271 = vst [vmem:[#allocation36_spill] sm:$0xff] %v6900_v7  ;;  %v6952_v28 = vsel %vm575_vm1, %v868_v3, %v869_v60 }
 0x10c   :  { %v6852_v8 = vadd.f32 %v672_v17, %v381_v4  ;;  %v6854_v6 = vadd.f32 %v673_v19, %v382_v10  ;;  %14273 = vst [vmem:[#allocation38_spill] sm:$0xff] %v6952_v28  ;;  %v6998_v4 = vsel %vm575_vm1, %v869_v60, %v870_v25 }
 0x10d   :  { %v649_v40 = vpop.permute.xlu0 %648  ;;  %v6877_v16 = vadd.f32 %v674_v37, %v383_v42  ;;  %14278 = vst [vmem:[#allocation43_spill] sm:$0xff] %v6998_v4 }
 0x10e   :  { %14264 = vst [vmem:[#allocation27_spill] sm:$0xff] %v6852_v8  ;;  %v658_v63 = vmul.f32 %v6771_v54, %v649_v40  ;;  %v688_v5 = vrot.slane %v6852_v8, 7  ;;  %v689_v49 = vrot.slane %v6854_v6, 7  ;;  %v872_v33 = vrot.slane %v6852_v8, 1 }
 0x10f   :  { %14265 = vst [vmem:[#allocation29_spill] sm:$0xff] %v6854_v6  ;;  %v690_v26 = vrot.slane %v6877_v16, 7  ;;  %v873_v31 = vrot.slane %v6854_v6, 1  ;;  %v874_v15 = vrot.slane %v6877_v16, 1 }
 0x110   :  { %v666_v39 = vadd.f32 %v658_v63, %v6792_v57  ;;  %v6866_v61 = vsel %vm351_vm0, %v688_v5, %v689_v49  ;;  %v6870_v47 = vsel %vm351_vm0, %v687_v12, %v688_v5  ;;  %14268 = vst [vmem:[#allocation33_spill] sm:$0xff] %v6877_v16 }
 0x111   :  { %14266 = vst [vmem:[#allocation26_spill] sm:$0xff] %v6866_v61  ;;  %710 = vrot.lane.b32.xlu0 %v6866_v61, %s6360_s1  ;;  %708 = vrot.lane.b32.xlu2 %v6870_v47, %s6360_s1  ;;  %v6910_v45 = vsel %vm351_vm0, %v689_v49, %v690_v26  ;;  %v6990_v59 = vsel %vm575_vm1, %v873_v31, %v874_v15 }
 0x112   :  { %14267 = vst [vmem:[#allocation28_spill] sm:$0xff] %v6870_v47  ;;  %v675_v57 = vmul.f32 %v6790_v38, %v666_v39  ;;  %v7010_v10 = vsel %vm575_vm1, %v872_v33, %v873_v31 }
 0x113   :  { %14272 = vst [vmem:[#allocation37_spill] sm:$0xff] %v6910_v45 }
 0x114   :  { %v6880_v1 = vadd.f32 %v675_v57, %v384_v62  ;;  %14277 = vst [vmem:[#allocation42_spill] sm:$0xff] %v6990_v59 }
 0x115   :  { %14279 = vst [vmem:[#allocation44_spill] sm:$0xff] %v7010_v10 }
 0x116   :  { %14269 = vst [vmem:[#allocation34_spill] sm:$0xff] %v6880_v1  ;;  %v691_v46 = vrot.slane %v6880_v1, 7  ;;  %v875_v51 = vrot.slane %v6880_v1, 1 }
 0x118   :  { %v6886_v27 = vsel %vm351_vm0, %v691_v46, %v684_v29  ;;  %v6890_v52 = vsel %vm351_vm0, %v690_v26, %v691_v46  ;;  %v871_v29 = vrot.slane %v6842_v24, 1  ;;  %v6982_v58 = vsel %vm575_vm1, %v874_v15, %v875_v51 }
 0x119   :  { %14270 = vst [vmem:[#allocation35_spill] sm:$0xff] %v6886_v27  ;;  %740 = vrot.lane.b32.xlu0 %v6886_v27, %s6361_s2  ;;  %700 = vrot.lane.b32.xlu1 %v6886_v27, %s6360_s1  ;;  %v7024_v19 = vsel %vm575_vm1, %v875_v51, %v868_v3 }
 0x11a   :  { %714 = vrot.lane.b32.xlu2 %v6890_v52, %s6360_s1  ;;  %v6965_v30 = vsel %vm575_vm1, %v871_v29, %v872_v33  ;;  %v6973_v34 = vsel %vm575_vm1, %v870_v25, %v871_v29  ;;  %14276 = vst [vmem:[#allocation41_spill] sm:$0xff] %v6982_v58 }
 0x11b   :  { %14274 = vst [vmem:[#allocation39_spill] sm:$0xff] %v6965_v30 }
 0x11c   :  { %14275 = vst [vmem:[#allocation40_spill] sm:$0xff] %v6973_v34 }
 0x11d   :  { %14280 = vst [vmem:[#allocation45_spill] sm:$0xff] %v7024_v19 }
 0x121   :  { %746 = vrot.lane.b32.xlu0 %v6900_v7, %s6361_s2  ;;  %706 = vrot.lane.b32.xlu1 %v6900_v7, %s6360_s1 }
 0x122   :  { %744 = vrot.lane.b32.xlu2 %v6834_v21, %s6361_s2 }
 0x129   :  { %752 = vrot.lane.b32.xlu0 %v6910_v45, %s6361_s2  ;;  %712 = vrot.lane.b32.xlu1 %v6910_v45, %s6360_s1 }
 0x12a   :  { %750 = vrot.lane.b32.xlu2 %v6866_v61, %s6361_s2 }
 0x131   :  { %774 = vrot.lane.b32.xlu0 %v6817_v32, %s6360_s1  ;;  %742 = vrot.lane.b32.xlu1 %v6838_v11, %s6361_s2 }
 0x132   :  { %772 = vrot.lane.b32.xlu2 %v6809_v41, %s6360_s1 }
 0x139   :  { %780 = vrot.lane.b32.xlu0 %v6852_v8, %s6360_s1  ;;  %748 = vrot.lane.b32.xlu1 %v6870_v47, %s6361_s2 }
 0x13a   :  { %778 = vrot.lane.b32.xlu2 %v6842_v24, %s6360_s1 }
 0x141   :  { %786 = vrot.lane.b32.xlu0 %v6880_v1, %s6360_s1  ;;  %754 = vrot.lane.b32.xlu1 %v6890_v52, %s6361_s2 }
 0x142   :  { %784 = vrot.lane.b32.xlu2 %v6877_v16, %s6360_s1 }
 0x149   :  { %832 = vrot.lane.b32.xlu0 %v6819_v35, %s6361_s2  ;;  %776 = vrot.lane.b32.xlu1 %v6819_v35, %s6360_s1 }
 0x14a   :  { %830 = vrot.lane.b32.xlu2 %v6817_v32, %s6361_s2 }
 0x151   :  { %838 = vrot.lane.b32.xlu0 %v6854_v6, %s6361_s2  ;;  %782 = vrot.lane.b32.xlu1 %v6854_v6, %s6360_s1  ;;  %v724_v6 = vmul.f32 %v6886_v27, %v6672_v43 }
 0x152   :  { %836 = vrot.lane.b32.xlu2 %v6852_v8, %s6361_s2 }
 0x159   :  { %884 = vrot.lane.b32.xlu0 %v6952_v28, %s6360_s1  ;;  %828 = vrot.lane.b32.xlu1 %v6809_v41, %s6361_s2 }
 0x15a   :  { %842 = vrot.lane.b32.xlu2 %v6880_v1, %s6361_s2 }
 0x161   :  { %890 = vrot.lane.b32.xlu0 %v6965_v30, %s6360_s1  ;;  %834 = vrot.lane.b32.xlu1 %v6842_v24, %s6361_s2 }
 0x162   :  { %888 = vrot.lane.b32.xlu2 %v6973_v34, %s6360_s1 }
 0x163   :  { %v703_v44 = vpop.permute.xlu2 %702 }
 0x169   :  { %896 = vrot.lane.b32.xlu0 %v6982_v58, %s6360_s1  ;;  %840 = vrot.lane.b32.xlu1 %v6877_v16, %s6361_s2 }
 0x16a   :  { %894 = vrot.lane.b32.xlu2 %v6990_v59, %s6360_s1 }
 0x16b   :  { %v6994_v2 = vpop.permute.xlu2 %708 }
 0x171   :  { %942 = vrot.lane.b32.xlu0 %v6998_v4, %s6361_s2  ;;  %886 = vrot.lane.b32.xlu1 %v6998_v4, %s6360_s1 }
 0x172   :  { %940 = vrot.lane.b32.xlu2 %v6952_v28, %s6361_s2 }
 0x174   :  { %v7006_v20 = vpop.permute.xlu2 %714 }
 0x179   :  { %948 = vrot.lane.b32.xlu0 %v7010_v10, %s6361_s2  ;;  %892 = vrot.lane.b32.xlu1 %v7010_v10, %s6360_s1 }
 0x17a   :  { %946 = vrot.lane.b32.xlu2 %v6965_v30, %s6361_s2 }
 0x17b   :  { %v7018_v48 = vpop.permute.xlu0 %704 }
 0x17c   :  { %v7020_v17 = vpop.permute.xlu2 %744 }
 0x181   :  { %954 = vrot.lane.b32.xlu0 %v7024_v19, %s6361_s2  ;;  %898 = vrot.lane.b32.xlu1 %v7024_v19, %s6360_s1 }
 0x182   :  { %952 = vrot.lane.b32.xlu2 %v6982_v58, %s6361_s2 }
 0x183   :  { %v7032_v53 = vpop.permute.xlu0 %710 }
 0x184   :  { %v7034_v13 = vpop.permute.xlu2 %750 }
 0x185   :  { %14281 = vst [vmem:[#allocation46_spill] sm:$0xff] %v7034_v13 }
 0x189   :  { %944 = vrot.lane.b32.xlu1 %v6973_v34, %s6361_s2 }
 0x18b   :  { %v741_v40 = vpop.permute.xlu0 %740  ;;  %v701_v12 = vpop.permute.xlu1 %700 }
 0x18c   :  { %v7038_v37 = vpop.permute.xlu2 %772 }
 0x18d   :  { %14282 = vst [vmem:[#allocation47_spill] sm:$0xff] %v7038_v37 }
 0x191   :  { %950 = vrot.lane.b32.xlu1 %v6990_v59, %s6361_s2  ;;  %v716_v59 = vmul.f32 %v701_v12, %v6670_v14  ;;  %v727_v12 = vmul.f32 %v6900_v7, %v6672_v43  ;;  %v916_v7 = vmul.f32 %v6952_v28, %v6638_v22 }
 0x193   :  { %v747_v63 = vpop.permute.xlu0 %746  ;;  %v707_v5 = vpop.permute.xlu1 %706  ;;  %v732_v19 = vadd.f32 %v724_v6, %v716_v59  ;;  %v812_v6 = vmul.f32 %v6809_v41, %v6662_v50  ;;  %v815_v59 = vmul.f32 %v6842_v24, %v6662_v50  ;;  %v725_v41 = vmul.f32 %v6838_v11, %v6672_v43 }
 0x194   :  { %v7042_v49 = vpop.permute.xlu2 %778 }
 0x195   :  { %14283 = vst [vmem:[#allocation48_spill] sm:$0xff] %v7042_v49 }
 0x19b   :  { %v7044_v42 = vpop.permute.xlu0 %752  ;;  %v713_v39 = vpop.permute.xlu1 %712 }
 0x19c   :  { %v7046_v62 = vpop.permute.xlu2 %784  ;;  %v722_v27 = vmul.f32 %v713_v39, %v6670_v14 }
 0x1a3   :  { %v7048_v57 = vpop.permute.xlu0 %774  ;;  %v743_v46 = vpop.permute.xlu1 %742 }
 0x1a4   :  { %14284 = vst [vmem:[#allocation49_spill] sm:$0xff] %v7048_v57  ;;  %v7050_v26 = vpop.permute.xlu2 %830 }
 0x1ab   :  { %v7052_v60 = vpop.permute.xlu0 %780  ;;  %v749_v3 = vpop.permute.xlu1 %748 }
 0x1ac   :  { %v7058_v29 = vpop.permute.xlu2 %836 }
 0x1ad   :  { %14285 = vst [vmem:[#allocation50_spill] sm:$0xff] %v7058_v29 }
 0x1b3   :  { %v7054_v33 = vpop.permute.xlu0 %786  ;;  %v7056_v25 = vpop.permute.xlu1 %754 }
 0x1b4   :  { %v7064_v15 = vpop.permute.xlu2 %842 }
 0x1b5   :  { %14288 = vst [vmem:[#allocation53_spill] sm:$0xff] %v7064_v15  ;;  %v719_v15 = vmul.f32 %v707_v5, %v6670_v14  ;;  %v813_v5 = vmul.f32 %v6817_v32, %v6662_v50  ;;  %v728_v32 = vmul.f32 %v6870_v47, %v6672_v43  ;;  %v791_v47 = vmul.f32 %v7042_v49, %v6652_v0 }
 0x1b6   :  { %v758_v49 = vmul.f32 %v7020_v17, %v6771_v54 }
 0x1bb   :  { %v7060_v51 = vpop.permute.xlu0 %832  ;;  %v7062_v31 = vpop.permute.xlu1 %776 }
 0x1bc   :  { %14286 = vst [vmem:[#allocation51_spill] sm:$0xff] %v7060_v51  ;;  %v7071_v34 = vpop.permute.xlu2 %888  ;;  %v756_v51 = vmul.f32 %v741_v40, %v6771_v54 }
 0x1bd   :  { %14287 = vst [vmem:[#allocation52_spill] sm:$0xff] %v7062_v31 }
 0x1be   :  { %14291 = vst [vmem:[#allocation56_spill] sm:$0xff] %v7071_v34  ;;  %v764_v31 = vadd.f32 %v756_v51, %v732_v19  ;;  %v717_v34 = vmul.f32 %v703_v44, %v6670_v14  ;;  %v735_v19 = vadd.f32 %v727_v12, %v719_v15  ;;  %v7098_v44 = vmul.f32 %v6877_v16, %v6662_v50 }
 0x1bf   :  { %v7109_v15 = vmul.f32 %v6998_v4, %v6638_v22  ;;  %v759_v12 = vmul.f32 %v747_v63, %v6771_v54  ;;  %v7114_v16 = vmul.f32 %v6819_v35, %v6662_v50  ;;  %v7127_v63 = vmul.f32 %v6965_v30, %v6638_v22 }
 0x1c0   :  { %v733_v28 = vadd.f32 %v725_v41, %v717_v34  ;;  %v7131_v35 = vmul.f32 %v7010_v10, %v6638_v22  ;;  %v7135_v41 = vmul.f32 %v6866_v61, %v6672_v43  ;;  %v730_v34 = vmul.f32 %v6910_v45, %v6672_v43 }
 0x1c1   :  { %v767_v4 = vadd.f32 %v759_v12, %v735_v19  ;;  %v720_v30 = vmul.f32 %v6994_v2, %v6670_v14  ;;  %v7146_v19 = vmul.f32 %v6880_v1, %v6662_v50  ;;  %v760_v12 = vmul.f32 %v749_v3, %v6771_v54 }
 0x1c3   :  { %v7066_v55 = vpop.permute.xlu0 %838  ;;  %v7068_v38 = vpop.permute.xlu1 %782  ;;  %v799_v2 = vadd.f32 %v791_v47, %v767_v4  ;;  %v731_v47 = vmul.f32 %v6890_v52, %v6672_v43  ;;  %v723_v4 = vmul.f32 %v7006_v20, %v6670_v14  ;;  %v763_v20 = vmul.f32 %v7056_v25, %v6771_v54 }
 0x1c4   :  { %14289 = vst [vmem:[#allocation54_spill] sm:$0xff] %v7066_v55  ;;  %v788_v55 = vmul.f32 %v7038_v37, %v6652_v0  ;;  %v845_v25 = vmul.f32 %v7050_v26, %v6679_v9 }
 0x1c5   :  { %14290 = vst [vmem:[#allocation55_spill] sm:$0xff] %v7068_v38  ;;  %v7084_v38 = vpop.permute.xlu2 %894 }
 0x1c6   :  { %v796_v40 = vadd.f32 %v788_v55, %v764_v31  ;;  %v726_v55 = vmul.f32 %v6834_v21, %v6672_v43  ;;  %v757_v31 = vmul.f32 %v743_v46, %v6771_v54  ;;  %v7123_v46 = vmul.f32 %v6852_v8, %v6662_v50 }
 0x1c7   :  { %v14293_v8 = vlaneseq }
 0x1c8   :  { %v765_v39 = vadd.f32 %v757_v31, %v733_v28  ;;  %v718_v28 = vmul.f32 %v7018_v48, %v6670_v14  ;;  %v738_v31 = vadd.f32 %v730_v34, %v722_v27  ;;  %v125_v27 = vand.u32 3, %v14261_v18 }
 0x1c9   :  { %v120_v21 = vand.u32 127, %v14293_v8  ;;  %v789_v8 = vmul.f32 %v7048_v57, %v6652_v0  ;;  %v736_v34 = vadd.f32 %v728_v32, %v720_v30  ;;  %v823_v30 = vadd.f32 %v815_v59, %v799_v2 }
 0x1ca   :  { %v734_v10 = vadd.f32 %v726_v55, %v718_v28  ;;  %vm7178_vm2 = vcmp.eq.s32.totalorder %v125_v27, 0  ;;  %v739_v55 = vadd.f32 %v731_v47, %v723_v4  ;;  %v114_v59 = vadd.s32 24, %v14261_v18 }
 0x1cb   :  { %v885_v13 = vpop.permute.xlu0 %884  ;;  %v7075_v29 = vpop.permute.xlu1 %828  ;;  %v229_v48 = vand.u32 3, %v120_v21  ;;  %v794_v21 = vmul.f32 %v7046_v62, %v6652_v0  ;;  %v768_v32 = vadd.f32 %v760_v12, %v736_v34  ;;  %v721_v34 = vmul.f32 %v7032_v53, %v6670_v14 }
 0x1cc   :  { %14292 = vst [vmem:[#allocation57_spill] sm:$0xff] %v7075_v29  ;;  %v844_v24 = vmul.f32 %v7075_v29, %v6679_v9  ;;  %v820_v29 = vadd.f32 %v812_v6, %v796_v40  ;;  %v7150_v40 = vmul.f32 %v6982_v58, %v6638_v22  ;;  %v900_v45 = vmul.f32 %v885_v13, %v6640_v23 }
 0x1cd   :  { %v797_v58 = vadd.f32 %v789_v8, %v765_v39  ;;  %v941_v3 = vpop.permute.xlu2 %940  ;;  %vm7182_vm3 = vcmp.eq.s32.totalorder %v229_v48, 0  ;;  %v795_v47 = vmul.f32 %v7054_v33, %v6652_v0 }
 0x1ce   :  { %v852_v6 = vadd.f32 %v844_v24, %v820_v29  ;;  %v112_v24 = vadd.s32 8, %v14261_v18  ;;  %v762_v29 = vmul.f32 %v7044_v42, %v6771_v54  ;;  %vm238_vm4 = vmand %vm7178_vm2, %vm7182_vm3  ;;  %v956_v12 = vmul.f32 %v941_v3, %v6649_v36 }
 0x1cf   :  { %v821_v8 = vadd.f32 %v813_v5, %v797_v58  ;;  %v7209_v3 = vsel %vm238_vm4, 1.0, %v14251_v56 }
 0x1d0   :  { %v908_v13 = vadd.f32 %v900_v45, %v852_v6  ;;  %v770_v57 = vadd.f32 %v762_v29, %v738_v31  ;;  %v132_v39 = vand.u32 3, %v112_v24  ;;  %v792_v6 = vmul.f32 %v7052_v60, %v6652_v0  ;;  %14301 = vst [vmem:[#allocation59_spill] sm:$0xff] %v7209_v3  ;;  %v14303_v45 = vld [vmem:[#allocation50_spill] sm:$0xff] }
 0x1d1   :  { %v766_v31 = vadd.f32 %v758_v49, %v734_v10  ;;  %v115_v10 = vadd.s32 32, %v14261_v18  ;;  %v853_v49 = vadd.f32 %v845_v25, %v821_v8 }
 0x1d2   :  { %v924_v28 = vadd.f32 %v916_v7, %v908_v13  ;;  %v802_v58 = vadd.f32 %v794_v21, %v770_v57  ;;  %v800_v2 = vadd.f32 %v792_v6, %v768_v32  ;;  %vm7196_vm5 = vcmp.eq.s32.totalorder %v132_v39, 0  ;;  %v14302_v32 = vld [vmem:[#allocation52_spill] sm:$0xff] }
 0x1d3   :  { %v7092_v51 = vpop.permute.xlu0 %890  ;;  %v7094_v37 = vpop.permute.xlu1 %834  ;;  %v771_v57 = vadd.f32 %v763_v20, %v739_v55  ;;  %v146_v13 = vand.u32 3, %v114_v59  ;;  %vm239_vm6 = vmand %vm7196_vm5, %vm7182_vm3  ;;  %v153_v20 = vand.u32 3, %v115_v10  ;;  %v848_v55 = vmul.f32 %v14303_v45, %v6679_v9 }
 0x1d4   :  { %v847_v42 = vmul.f32 %v7094_v37, %v6679_v9  ;;  %v903_v27 = vmul.f32 %v7092_v51, %v6640_v23  ;;  %v964_v4 = vadd.f32 %v956_v12, %v924_v28  ;;  %v824_v53 = vadd.f32 %v7123_v46, %v800_v2  ;;  %v14313_v46 = vld [vmem:[#allocation51_spill] sm:$0xff] }
 0x1d5   :  { %v947_v39 = vpop.permute.xlu2 %946  ;;  %v826_v8 = vadd.f32 %v7098_v44, %v802_v58  ;;  %v803_v6 = vadd.f32 %v795_v47, %v771_v57  ;;  %vm7228_vm7 = vcmp.eq.s32.totalorder %v146_v13, 0  ;;  %v7234_v44 = vsel %vm239_vm6, 1.0, %v14251_v56  ;;  %v14307_v58 = vld [vmem:[#allocation46_spill] sm:$0xff] }
 0x1d6   :  { %v855_v5 = vadd.f32 %v847_v42, %v823_v30  ;;  %v790_v30 = vmul.f32 %v14302_v32, %v6652_v0  ;;  %v7226_v25 = vmul.f32 %v964_v4, %v7209_v3  ;;  %14306 = vst [vmem:[#allocation52_spill] sm:$0xff] %v7234_v44  ;;  %v761_v2 = vmul.f32 %v14307_v58, %v6771_v54  ;;  %vm241_vm9 = vmand %vm7228_vm7, %vm7182_vm3 }
 0x1d7   :  { %vm7239_vm8 = vcmp.eq.s32.totalorder %v153_v20, 0  ;;  %v737_v4 = vadd.f32 %v7135_v41, %v721_v34  ;;  %v827_v13 = vadd.f32 %v7146_v19, %v803_v6  ;;  %v113_v19 = vadd.s32 16, %v14261_v18  ;;  %v14311_v34 = vld [vmem:[#allocation55_spill] sm:$0xff] }
 0x1d8   :  { %v911_v42 = vadd.f32 %v903_v27, %v855_v5  ;;  %v117_v5 = vadd.s32 48, %v14261_v18  ;;  %v118_v27 = vadd.s32 56, %v14261_v18  ;;  %vm242_vm10 = vmand %vm7239_vm8, %vm7182_vm3  ;;  %v793_v20 = vmul.f32 %v14311_v34, %v6652_v0 }
 0x1d9   :  { %v116_v58 = vadd.s32 40, %v14261_v18 }
 0x1da   :  { %v927_v12 = vadd.f32 %v7127_v63, %v911_v42  ;;  %v167_v42 = vand.u32 3, %v117_v5  ;;  %v174_v41 = vand.u32 3, %v118_v27  ;;  %v846_v5 = vmul.f32 %v14313_v46, %v6679_v9 }
 0x1db   :  { %v7158_v61 = vpop.permute.xlu0 %896  ;;  %v7160_v1 = vpop.permute.xlu1 %840 }
 0x1dc   :  { %14294 = vst [vmem:[#allocation58_spill] sm:$0xff] %v7160_v1  ;;  %v850_v21 = vmul.f32 %v7160_v1, %v6679_v9  ;;  %v906_v63 = vmul.f32 %v7158_v61, %v6640_v23  ;;  %vm7284_vm11 = vcmp.eq.s32.totalorder %v167_v42, 0  ;;  %vm7297_vm12 = vcmp.eq.s32.totalorder %v174_v41, 0  ;;  %v14320_v42 = vld [vmem:[#allocation56_spill] sm:$0xff] }
 0x1dd   :  { %vm244_vm13 = vmand %vm7284_vm11, %vm7182_vm3 }
 0x1de   :  { %vm245_vm14 = vmand %vm7297_vm12, %vm7182_vm3 }
 0x1e3   :  { %v943_v24 = vpop.permute.xlu0 %942  ;;  %v887_v7 = vpop.permute.xlu1 %886 }
 0x1e4   :  { %v901_v48 = vmul.f32 %v887_v7, %v6640_v23  ;;  %v957_v28 = vmul.f32 %v943_v24, %v6649_v36  ;;  %v858_v24 = vadd.f32 %v850_v21, %v826_v8  ;;  %v798_v7 = vadd.f32 %v790_v30, %v766_v31 }
 0x1e5   :  { %v988_v21 = vrot.slane %v7226_v25, 7  ;;  %v7265_v8 = vsel %vm241_vm9, 1.0, %v14251_v56 }
 0x1e6   :  { %v909_v51 = vadd.f32 %v901_v48, %v853_v49  ;;  %v959_v48 = vmul.f32 %v947_v39, %v6649_v36  ;;  %v822_v39 = vadd.f32 %v7114_v16, %v798_v7  ;;  %14310 = vst [vmem:[#allocation50_spill] sm:$0xff] %v7265_v8 }
 0x1e8   :  { %v925_v59 = vadd.f32 %v7109_v15, %v909_v51  ;;  %v856_v15 = vadd.f32 %v848_v55, %v824_v53  ;;  %v967_v51 = vadd.f32 %v959_v48, %v927_v12  ;;  %v914_v53 = vadd.f32 %v906_v63, %v858_v24  ;;  %v953_v12 = vpop.permute.xlu2 %952 }
 0x1e9   :  { %v769_v24 = vadd.f32 %v761_v2, %v737_v4  ;;  %v854_v49 = vadd.f32 %v846_v5, %v822_v39  ;;  %v139_v48 = vand.u32 3, %v113_v19  ;;  %v962_v2 = vmul.f32 %v953_v12, %v6649_v36  ;;  %v14319_v4 = vld [vmem:[#allocation45_spill] sm:$0xff] }
 0x1ea   :  { %v965_v29 = vadd.f32 %v957_v28, %v925_v59  ;;  %v14312_v28 = vld [vmem:[#allocation53_spill] sm:$0xff] }
 0x1eb   :  { %v949_v10 = vpop.permute.xlu0 %948  ;;  %v893_v57 = vpop.permute.xlu1 %892  ;;  %v851_v59 = vmul.f32 %v14312_v28, %v6679_v9  ;;  %v801_v63 = vadd.f32 %v793_v20, %v769_v24  ;;  %vm7325_vm15 = vcmp.eq.s32.totalorder %v139_v48, 0 }
 0x1ec   :  { %v7252_v31 = vmul.f32 %v965_v29, %v7234_v44  ;;  %v904_v47 = vmul.f32 %v893_v57, %v6640_v23  ;;  %v960_v55 = vmul.f32 %v949_v10, %v6649_v36  ;;  %v7294_v29 = vmul.f32 %v967_v51, %v7265_v8  ;;  %vm240_vm2 = vmand %vm7325_vm15, %vm7182_vm3 }
 0x1ed   :  { %v859_v10 = vadd.f32 %v851_v59, %v827_v13  ;;  %v923_v13 = vmul.f32 %v14319_v4, %v6638_v22  ;;  %v902_v51 = vmul.f32 %v14320_v42, %v6640_v23  ;;  %v7323_v59 = vsel %vm244_vm13, 1.0, %v14251_v56 }
 0x1ee   :  { %v912_v61 = vadd.f32 %v904_v47, %v856_v15  ;;  %v989_v30 = vrot.slane %v7252_v31, 7  ;;  %v930_v15 = vadd.f32 %v7150_v40, %v914_v53  ;;  %v14321_v53 = vld [vmem:[#allocation29_spill] sm:$0xff]  ;;  %v991_v20 = vrot.slane %v7294_v29, 7  ;;  %14322 = vst [vmem:[#allocation55_spill] sm:$0xff] %v7323_v59 }
 0x1f0   :  { %v928_v6 = vadd.f32 %v7131_v35, %v912_v61  ;;  %v7278_v16 = vsel %vm351_vm0, %v988_v21, %v989_v30  ;;  %v7289_v35 = vsel %vm242_vm10, 1.0, %v14251_v56  ;;  %v817_v61 = vmul.f32 %v14321_v53, %v6662_v50 }
 0x1f1   :  { %14316 = vst [vmem:[#allocation46_spill] sm:$0xff] %v7289_v35  ;;  %1006 = vrot.lane.b32.xlu2 %v7278_v16, %s6360_s1  ;;  %v970_v41 = vadd.f32 %v962_v2, %v930_v15 }
 0x1f2   :  { %v968_v7 = vadd.f32 %v960_v55, %v928_v6  ;;  %v910_v6 = vadd.f32 %v902_v51, %v854_v49  ;;  %v825_v12 = vadd.f32 %v817_v61, %v801_v63  ;;  %v14327_v49 = vld [vmem:[#allocation40_spill] sm:$0xff] }
 0x1f3   :  { %v899_v27 = vpop.permute.xlu1 %898  ;;  %v955_v39 = vpop.permute.xlu0 %954  ;;  %v918_v57 = vmul.f32 %v14327_v49, %v6638_v22  ;;  %v7345_v63 = vmul.f32 %v970_v41, %v7323_v59  ;;  %v905_v41 = vmul.f32 %v7084_v38, %v6640_v23  ;;  %v14333_v38 = vld [vmem:[#allocation42_spill] sm:$0xff] }
 0x1f4   :  { %v7307_v47 = vmul.f32 %v968_v7, %v7289_v35  ;;  %v907_v40 = vmul.f32 %v899_v27, %v6640_v23  ;;  %v963_v24 = vmul.f32 %v955_v39, %v6649_v36  ;;  %v14328_v27 = vld [vmem:[#allocation54_spill] sm:$0xff] }
 0x1f5   :  { %v849_v48 = vmul.f32 %v14328_v27, %v6679_v9  ;;  %v926_v61 = vadd.f32 %v918_v57, %v910_v6  ;;  %v994_v5 = vrot.slane %v7345_v63, 7 }
 0x1f6   :  { %v915_v19 = vadd.f32 %v907_v40, %v859_v10  ;;  %v992_v55 = vrot.slane %v7307_v47, 7  ;;  %v7336_v10 = vsel %vm245_vm14, 1.0, %v14251_v56 }
 0x1f7   :  { %14326 = vst [vmem:[#allocation51_spill] sm:$0xff] %v7336_v10  ;;  %v857_v42 = vadd.f32 %v849_v48, %v825_v12  ;;  %v921_v48 = vmul.f32 %v14333_v38, %v6638_v22 }
 0x1f8   :  { %v931_v15 = vadd.f32 %v923_v13, %v915_v19  ;;  %v7333_v7 = vsel %vm351_vm0, %v991_v20, %v992_v55  ;;  %v160_v13 = vand.u32 3, %v116_v58  ;;  %v7356_v19 = vsel %vm240_vm2, 1.0, %v14251_v56 }
 0x1f9   :  { %14325 = vst [vmem:[#allocation53_spill] sm:$0xff] %v7333_v7  ;;  %1012 = vrot.lane.b32.xlu2 %v7333_v7, %s6360_s1  ;;  %v913_v58 = vadd.f32 %v905_v41, %v857_v42 }
 0x1fa   :  { %v971_v2 = vadd.f32 %v963_v24, %v931_v15  ;;  %14330 = vst [vmem:[#allocation40_spill] sm:$0xff] %v7356_v19  ;;  %vm222_vm4 = vcmp.eq.s32.totalorder %v160_v13, 0 }
 0x1fb   :  { %v945_v40 = vpop.permute.xlu1 %944  ;;  %vm243_vm5 = vmand %vm222_vm4, %vm7182_vm3 }
 0x1fc   :  { %v7352_v51 = vmul.f32 %v971_v2, %v7336_v10  ;;  %v958_v39 = vmul.f32 %v945_v40, %v6649_v36  ;;  %v929_v40 = vadd.f32 %v921_v48, %v913_v58  ;;  %v1162_v48 = vrot.slane %v7345_v63, 1 }
 0x1fe   :  { %14329 = vst [vmem:[#allocation56_spill] sm:$0xff] %v7352_v51  ;;  %v966_v24 = vadd.f32 %v958_v39, %v926_v61  ;;  %v995_v15 = vrot.slane %v7352_v51, 7  ;;  %v7392_v61 = vsel %vm243_vm5, 1.0, %v14251_v56 }
 0x1ff   :  { %14334 = vst [vmem:[#allocation61_spill] sm:$0xff] %v7392_v61 }
 0x200   :  { %v7363_v12 = vmul.f32 %v966_v24, %v7356_v19  ;;  %v7369_v6 = vsel %vm351_vm0, %v995_v15, %v988_v21  ;;  %v7373_v57 = vsel %vm351_vm0, %v994_v5, %v995_v15 }
 0x201   :  { %14332 = vst [vmem:[#allocation60_spill] sm:$0xff] %v7373_v57  ;;  %1004 = vrot.lane.b32.xlu1 %v7369_v6, %s6360_s1  ;;  %1018 = vrot.lane.b32.xlu2 %v7373_v57, %s6360_s1 }
 0x202   :  { %14331 = vst [vmem:[#allocation54_spill] sm:$0xff] %v7363_v12  ;;  %v990_v2 = vrot.slane %v7363_v12, 7 }
 0x203   :  { %v951_v21 = vpop.permute.xlu1 %950 }
 0x204   :  { %v961_v13 = vmul.f32 %v951_v21, %v6649_v36  ;;  %v7389_v42 = vsel %vm351_vm0, %v989_v30, %v990_v2  ;;  %v7401_v41 = vsel %vm351_vm0, %v990_v2, %v991_v20  ;;  %v1158_v20 = vrot.slane %v7363_v12, 1 }
 0x205   :  { %1008 = vrot.lane.b32.xlu0 %v7389_v42, %s6360_s1  ;;  %v1157_v21 = vrot.slane %v7252_v31, 1 }
 0x206   :  { %v969_v17 = vadd.f32 %v961_v13, %v929_v40  ;;  %v1156_v40 = vrot.slane %v7226_v25, 1 }
 0x208   :  { %v7397_v39 = vmul.f32 %v969_v17, %v7392_v61  ;;  %v7488_v13 = vsel %vm575_vm1, %v1156_v40, %v1157_v21  ;;  %v1160_v61 = vrot.slane %v7307_v47, 1 }
 0x209   :  { %1010 = vrot.lane.b32.xlu1 %v7401_v41, %s6360_s1  ;;  %1048 = vrot.lane.b32.xlu2 %v7389_v42, %s6361_s2 }
 0x20a   :  { %14335 = vst [vmem:[#allocation62_spill] sm:$0xff] %v7397_v39  ;;  %v993_v56 = vrot.slane %v7397_v39, 7  ;;  %v1161_v58 = vrot.slane %v7397_v39, 1 }
 0x20c   :  { %v7410_v30 = vsel %vm351_vm0, %v992_v55, %v993_v56  ;;  %v7416_v24 = vsel %vm351_vm0, %v993_v56, %v994_v5  ;;  %v1159_v55 = vrot.slane %v7294_v29, 1  ;;  %v7478_v2 = vsel %vm575_vm1, %v1161_v58, %v1162_v48 }
 0x20d   :  { %14336 = vst [vmem:[#allocation63_spill] sm:$0xff] %v7410_v30  ;;  %1014 = vrot.lane.b32.xlu0 %v7410_v30, %s6360_s1  ;;  %v7496_v56 = vsel %vm575_vm1, %v1157_v21, %v1158_v20  ;;  %v1163_v21 = vrot.slane %v7352_v51, 1 }
 0x20e   :  { %v7464_v15 = vsel %vm575_vm1, %v1158_v20, %v1159_v55  ;;  %14338 = vst [vmem:[#allocation65_spill] sm:$0xff] %v7478_v2  ;;  %v7505_v19 = vsel %vm575_vm1, %v1159_v55, %v1160_v61  ;;  %v7513_v20 = vsel %vm575_vm1, %v1160_v61, %v1161_v58 }
 0x20f   :  { %14337 = vst [vmem:[#allocation64_spill] sm:$0xff] %v7464_v15  ;;  %v7522_v55 = vsel %vm575_vm1, %v1162_v48, %v1163_v21  ;;  %v7528_v59 = vsel %vm575_vm1, %v1163_v21, %v1156_v40 }
 0x210   :  { %14340 = vst [vmem:[#allocation67_spill] sm:$0xff] %v7496_v56 }
 0x211   :  { %1016 = vrot.lane.b32.xlu1 %v7416_v24, %s6360_s1  ;;  %1054 = vrot.lane.b32.xlu2 %v7410_v30, %s6361_s2  ;;  %14341 = vst [vmem:[#allocation68_spill] sm:$0xff] %v7505_v19 }
 0x212   :  { %14343 = vst [vmem:[#allocation70_spill] sm:$0xff] %v7513_v20 }
 0x213   :  { %14344 = vst [vmem:[#allocation71_spill] sm:$0xff] %v7522_v55 }
 0x214   :  { %14345 = vst [vmem:[#allocation72_spill] sm:$0xff] %v7528_v59 }
 0x215   :  { %1044 = vrot.lane.b32.xlu0 %v7369_v6, %s6361_s2 }
 0x219   :  { %1046 = vrot.lane.b32.xlu1 %v7278_v16, %s6361_s2  ;;  %1076 = vrot.lane.b32.xlu2 %v7226_v25, %s6360_s1 }
 0x21d   :  { %1050 = vrot.lane.b32.xlu0 %v7401_v41, %s6361_s2 }
 0x221   :  { %1052 = vrot.lane.b32.xlu1 %v7333_v7, %s6361_s2  ;;  %1082 = vrot.lane.b32.xlu2 %v7294_v29, %s6360_s1 }
 0x225   :  { %1056 = vrot.lane.b32.xlu0 %v7416_v24, %s6361_s2 }
 0x229   :  { %1058 = vrot.lane.b32.xlu1 %v7373_v57, %s6361_s2  ;;  %1088 = vrot.lane.b32.xlu2 %v7345_v63, %s6360_s1 }
 0x22d   :  { %1078 = vrot.lane.b32.xlu0 %v7252_v31, %s6360_s1 }
 0x231   :  { %1080 = vrot.lane.b32.xlu1 %v7363_v12, %s6360_s1  ;;  %1126 = vrot.lane.b32.xlu2 %v7252_v31, %s6361_s2 }
 0x235   :  { %1084 = vrot.lane.b32.xlu0 %v7307_v47, %s6360_s1 }
 0x239   :  { %1086 = vrot.lane.b32.xlu1 %v7397_v39, %s6360_s1  ;;  %1132 = vrot.lane.b32.xlu2 %v7307_v47, %s6361_s2 }
 0x23d   :  { %1090 = vrot.lane.b32.xlu0 %v7352_v51, %s6360_s1 }
 0x241   :  { %1124 = vrot.lane.b32.xlu1 %v7226_v25, %s6361_s2  ;;  %1138 = vrot.lane.b32.xlu2 %v7352_v51, %s6361_s2 }
 0x245   :  { %1128 = vrot.lane.b32.xlu0 %v7363_v12, %s6361_s2 }
 0x249   :  { %1130 = vrot.lane.b32.xlu1 %v7294_v29, %s6361_s2  ;;  %1176 = vrot.lane.b32.xlu2 %v7464_v15, %s6360_s1 }
 0x24b   :  { %v7470_v5 = vpop.permute.xlu2 %1006 }
 0x24d   :  { %1134 = vrot.lane.b32.xlu0 %v7397_v39, %s6361_s2 }
 0x251   :  { %1136 = vrot.lane.b32.xlu1 %v7345_v63, %s6361_s2  ;;  %1182 = vrot.lane.b32.xlu2 %v7478_v2, %s6360_s1 }
 0x253   :  { %v7492_v17 = vpop.permute.xlu2 %1012 }
 0x254   :  { %14339 = vst [vmem:[#allocation66_spill] sm:$0xff] %v7492_v17 }
 0x255   :  { %1172 = vrot.lane.b32.xlu0 %v7488_v13, %s6360_s1 }
 0x259   :  { %1174 = vrot.lane.b32.xlu1 %v7496_v56, %s6360_s1  ;;  %1220 = vrot.lane.b32.xlu2 %v7488_v13, %s6361_s2 }
 0x25b   :  { %v7509_v10 = vpop.permute.xlu2 %1018 }
 0x25c   :  { %14342 = vst [vmem:[#allocation69_spill] sm:$0xff] %v7509_v10 }
 0x25d   :  { %1178 = vrot.lane.b32.xlu0 %v7505_v19, %s6360_s1 }
 0x261   :  { %1180 = vrot.lane.b32.xlu1 %v7513_v20, %s6360_s1  ;;  %1226 = vrot.lane.b32.xlu2 %v7505_v19, %s6361_s2  ;;  %v7622_v19 = vstv %s60_s11 }
 0x263   :  { %v7534_v61 = vpop.permute.xlu2 %1048 }
 0x264   :  { %14346 = vst [vmem:[#allocation73_spill] sm:$0xff] %v7534_v61  ;;  %v14363_v61 = vld [vmem:[#allocation35_spill] sm:$0xff] }
 0x265   :  { %1184 = vrot.lane.b32.xlu0 %v7522_v55, %s6360_s1 }
 0x269   :  { %1186 = vrot.lane.b32.xlu1 %v7528_v59, %s6360_s1  ;;  %1232 = vrot.lane.b32.xlu2 %v7522_v55, %s6361_s2 }
 0x26b   :  { %v7540_v48 = vpop.permute.xlu2 %1054 }
 0x26c   :  { %14347 = vst [vmem:[#allocation74_spill] sm:$0xff] %v7540_v48 }
 0x26d   :  { %1222 = vrot.lane.b32.xlu0 %v7496_v56, %s6361_s2 }
 0x271   :  { %1224 = vrot.lane.b32.xlu1 %v7464_v15, %s6361_s2 }
 0x273   :  { %v1005_v58 = vpop.permute.xlu1 %1004  ;;  %v1077_v35 = vpop.permute.xlu2 %1076 }
 0x275   :  { %1228 = vrot.lane.b32.xlu0 %v7513_v20, %s6361_s2 }
 0x277   :  { %v7544_v40 = vpop.permute.xlu0 %1008 }
 0x279   :  { %1230 = vrot.lane.b32.xlu1 %v7478_v2, %s6361_s2 }
 0x27b   :  { %v7548_v21 = vpop.permute.xlu1 %1010  ;;  %v7556_v18 = vpop.permute.xlu2 %1082 }
 0x27d   :  { %1234 = vrot.lane.b32.xlu0 %v7528_v59, %s6361_s2 }
 0x27f   :  { %v7552_v8 = vpop.permute.xlu0 %1014 }
 0x280   :  { %14348 = vst [vmem:[#allocation75_spill] sm:$0xff] %v7552_v8 }
 0x283   :  { %v7554_v44 = vpop.permute.xlu1 %1016  ;;  %v7562_v20 = vpop.permute.xlu2 %1088 }
 0x284   :  { %14349 = vst [vmem:[#allocation76_spill] sm:$0xff] %v7562_v20 }
 0x287   :  { %v1045_v3 = vpop.permute.xlu0 %1044 }
 0x28b   :  { %v7558_v4 = vpop.permute.xlu1 %1046  ;;  %v7570_v59 = vpop.permute.xlu2 %1126 }
 0x28c   :  { %14352 = vst [vmem:[#allocation79_spill] sm:$0xff] %v7570_v59  ;;  %v14360_v59 = vld [vmem:[#allocation28_spill] sm:$0xff] }
 0x28d   :  { %v808_v30 = vadd.f32 %v7052_v60, %v14360_v59  ;;  %v1020_v59 = vmul.f32 %v1005_v58, %v6640_v23  ;;  %v14374_v58 = vld [vmem:[#allocation38_spill] sm:$0xff] }
 0x28f   :  { %v7560_v38 = vpop.permute.xlu0 %1050  ;;  %v864_v8 = vadd.f32 %v14303_v45, %v808_v30  ;;  %v1060_v45 = vmul.f32 %v1045_v3, %v6649_v36 }
 0x293   :  { %v7564_v2 = vpop.permute.xlu1 %1052  ;;  %v7576_v39 = vpop.permute.xlu2 %1132 }
 0x294   :  { %14350 = vst [vmem:[#allocation77_spill] sm:$0xff] %v7564_v2 }
 0x295   :  { %14354 = vst [vmem:[#allocation81_spill] sm:$0xff] %v7576_v39  ;;  %v14362_v39 = vld [vmem:[#allocation24_spill] sm:$0xff] }
 0x297   :  { %v7566_v15 = vpop.permute.xlu0 %1056 }
 0x29b   :  { %v7568_v51 = vpop.permute.xlu1 %1058  ;;  %v7584_v10 = vpop.permute.xlu2 %1138 }
 0x29c   :  { %14351 = vst [vmem:[#allocation78_spill] sm:$0xff] %v7568_v51  ;;  %v14359_v51 = vld [vmem:[#allocation49_spill] sm:$0xff] }
 0x29d   :  { %14358 = vst [vmem:[#allocation85_spill] sm:$0xff] %v7584_v10  ;;  %v805_v20 = vadd.f32 %v14359_v51, %v6838_v11  ;;  %v14367_v51 = vld [vmem:[#allocation57_spill] sm:$0xff] }
 0x29f   :  { %v7572_v55 = vpop.permute.xlu0 %1078 }
 0x2a3   :  { %v7574_v1 = vpop.permute.xlu1 %1080  ;;  %v7597_v10 = vpop.permute.xlu2 %1176 }
 0x2a4   :  { %14353 = vst [vmem:[#allocation80_spill] sm:$0xff] %v7574_v1 }
 0x2a5   :  { %14365 = vst [vmem:[#allocation28_spill] sm:$0xff] %v7597_v10 }
 0x2a7   :  { %v7578_v56 = vpop.permute.xlu0 %1084 }
 0x2a8   :  { %14355 = vst [vmem:[#allocation82_spill] sm:$0xff] %v7578_v56  ;;  %v806_v56 = vadd.f32 %v14302_v32, %v14362_v39  ;;  %v14369_v32 = vld [vmem:[#allocation36_spill] sm:$0xff] }
 0x2a9   :  { %v14370_v39 = vld [vmem:[#allocation48_spill] sm:$0xff] }
 0x2aa   :  { %v862_v11 = vadd.f32 %v14313_v46, %v806_v56  ;;  %v14373_v46 = vld [vmem:[#allocation21_spill] sm:$0xff] }
 0x2ab   :  { %v7580_v48 = vpop.permute.xlu1 %1086  ;;  %v1253_v56 = vmul.f32 4.0, %v14373_v46 }
 0x2ac   :  { %14356 = vst [vmem:[#allocation83_spill] sm:$0xff] %v7580_v48  ;;  %v14364_v48 = vld [vmem:[#allocation47_spill] sm:$0xff] }
 0x2ad   :  { %v804_v12 = vadd.f32 %v14364_v48, %v14363_v61  ;;  %v807_v61 = vadd.f32 %v14370_v39, %v14369_v32  ;;  %v14371_v48 = vld [vmem:[#allocation44_spill] sm:$0xff]  ;;  %14378 = vst [vmem:[#allocation47_spill] sm:$0xff] %v7622_v19 }
 0x2af   :  { %v7582_v54 = vpop.permute.xlu0 %1090  ;;  %v860_v60 = vadd.f32 %v14367_v51, %v804_v12  ;;  %v934_v12 = vadd.f32 %v14327_v49, %v862_v11  ;;  %v863_v10 = vadd.f32 %v7094_v37, %v807_v61  ;;  %v811_v49 = vadd.f32 %v7054_v33, %v6890_v52 }
 0x2b0   :  { %14357 = vst [vmem:[#allocation84_spill] sm:$0xff] %v7582_v54  ;;  %v861_v54 = vadd.f32 %v7050_v26, %v805_v20  ;;  %v936_v26 = vadd.f32 %v14371_v48, %v864_v8  ;;  %v1028_v20 = vmul.f32 %v7369_v6, %v6638_v22  ;;  %v14376_v8 = vld [vmem:[#allocation32_spill] sm:$0xff] }
 0x2b1   :  { %v932_v51 = vadd.f32 %v14374_v58, %v860_v60  ;;  %v1254_v48 = vmul.f32 4.0, %v14376_v8  ;;  %v14379_v60 = vld [vmem:[#allocation26_spill] sm:$0xff] }
 0x2b2   :  { %v1036_v32 = vadd.f32 %v1028_v20, %v1020_v59  ;;  %v809_v58 = vadd.f32 %v14311_v34, %v14379_v60  ;;  %v7630_v59 = vpop.permute.xlu2 %1182  ;;  %v14381_v20 = vld [vmem:[#allocation39_spill] sm:$0xff]  ;;  %v7649_v34 = vmul.f32 4.0, %v14321_v53 }
 0x2b3   :  { %v1125_v2 = vpop.permute.xlu1 %1124  ;;  %v1262_v11 = vsub.f32 %v1254_v48, %v934_v12  ;;  %v14383_v12 = vld [vmem:[#allocation33_spill] sm:$0xff] }
 0x2b4   :  { %v1140_v60 = vmul.f32 %v1125_v2, %v6679_v9 }
 0x2b5   :  { %v7665_v48 = vmul.f32 %v7622_v19, %v1262_v11  ;;  %v7686_v11 = vmul.f32 %v7345_v63, %v6662_v50  ;;  %v1061_v63 = vmul.f32 %v7558_v4, %v6649_v36  ;;  %v1093_v4 = vmul.f32 %v7572_v55, %v6652_v0  ;;  %v14389_v55 = vld [vmem:[#allocation75_spill] sm:$0xff] }
 0x2b7   :  { %v7590_v1 = vpop.permute.xlu0 %1128 }
 0x2b8   :  { %14361 = vst [vmem:[#allocation49_spill] sm:$0xff] %v7590_v1  ;;  %v14368_v1 = vld [vmem:[#allocation43_spill] sm:$0xff] }
 0x2b9   :  { %v933_v17 = vadd.f32 %v14368_v1, %v861_v54  ;;  %v14375_v54 = vld [vmem:[#allocation27_spill] sm:$0xff] }
 0x2ba   :  { %v1256_v1 = vmul.f32 4.0, %v14375_v54 }
 0x2bb   :  { %v7600_v57 = vpop.permute.xlu1 %1130  ;;  %v1261_v39 = vsub.f32 %v1253_v56, %v933_v17  ;;  %v14380_v17 = vld [vmem:[#allocation25_spill] sm:$0xff]  ;;  %v7636_v56 = vadd.f32 %v14381_v20, %v863_v10 }
 0x2bc   :  { %14366 = vst [vmem:[#allocation24_spill] sm:$0xff] %v7600_v57  ;;  %v14377_v57 = vld [vmem:[#allocation19_spill] sm:$0xff]  ;;  %v1264_v3 = vsub.f32 %v1256_v1, %v936_v26  ;;  %v7633_v61 = vmul.f32 4.0, %v14380_v17  ;;  %v1092_v26 = vmul.f32 %v1077_v35, %v6652_v0  ;;  %v14382_v1 = vld [vmem:[#allocation37_spill] sm:$0xff]  ;;  %v1031_v35 = vmul.f32 %v7401_v41, %v6638_v22 }
 0x2bd   :  { %v1252_v6 = vmul.f32 4.0, %v14377_v57  ;;  %v7643_v52 = vadd.f32 %v7046_v62, %v14382_v1  ;;  %v7646_v33 = vmul.f32 %v7622_v19, %v1261_v39  ;;  %v1063_v62 = vmul.f32 %v7560_v38, %v6649_v36 }
 0x2be   :  { %v7655_v10 = vmul.f32 %v7622_v19, %v1264_v3  ;;  %v7662_v39 = vadd.f32 %v14312_v28, %v811_v49  ;;  %v1108_v38 = vmul.f32 %v7226_v25, %v6662_v50  ;;  %v1021_v28 = vmul.f32 %v7470_v5, %v6640_v23 }
 0x2bf   :  { %v7613_v30 = vpop.permute.xlu0 %1134  ;;  %v1260_v37 = vsub.f32 %v1252_v6, %v932_v51  ;;  %v7652_v51 = vmul.f32 4.0, %v14383_v12  ;;  %v7668_v6 = vadd.f32 %v14328_v27, %v809_v58  ;;  %v1109_v49 = vmul.f32 %v7252_v31, %v6662_v50  ;;  %v14396_v12 = vld [vmem:[#allocation77_spill] sm:$0xff] }
 0x2c0   :  { %14372 = vst [vmem:[#allocation35_spill] sm:$0xff] %v7613_v30  ;;  %v1068_v30 = vadd.f32 %v1060_v45, %v1036_v32  ;;  %v1023_v45 = vmul.f32 %v7548_v21, %v6640_v23  ;;  %v1111_v27 = vmul.f32 %v7294_v29, %v6662_v50  ;;  %v1029_v58 = vmul.f32 %v7278_v16, %v6638_v22 }
 0x2c1   :  { %14384 = vst [vmem:[#allocation57_spill] sm:$0xff] %v7655_v10  ;;  %v7671_v3 = vmul.f32 %v7622_v19, %v1260_v37  ;;  %v1204_v5 = vmul.f32 %v7488_v13, %v6672_v43  ;;  %v1022_v31 = vmul.f32 %v7544_v40, %v6640_v23  ;;  %v1026_v29 = vmul.f32 %v7554_v44, %v6640_v23  ;;  %v14395_v10 = vld [vmem:[#allocation76_spill] sm:$0xff] }
 0x2c2   :  { %v1100_v21 = vadd.f32 %v1092_v26, %v1068_v30  ;;  %v1039_v30 = vadd.f32 %v1031_v35, %v1023_v45  ;;  %v1030_v16 = vmul.f32 %v7389_v42, %v6638_v22  ;;  %v1095_v26 = vmul.f32 %v7556_v18, %v6652_v0  ;;  %v1221_v35 = vpop.permute.xlu2 %1220  ;;  %v14385_v42 = vld [vmem:[#allocation53_spill] sm:$0xff]  ;;  %v14386_v18 = vld [vmem:[#allocation68_spill] sm:$0xff] }
 0x2c3   :  { %v7624_v7 = vpop.permute.xlu1 %1136  ;;  %v7705_v45 = vmul.f32 %v7307_v47, %v6662_v50  ;;  %v1034_v40 = vmul.f32 %v7416_v24, %v6638_v22  ;;  %v1037_v1 = vadd.f32 %v1029_v58, %v1021_v28  ;;  %v1066_v44 = vmul.f32 %v7566_v15, %v6649_v36  ;;  %v14388_v15 = vld [vmem:[#allocation60_spill] sm:$0xff] }
 0x2c4   :  { %v1071_v37 = vadd.f32 %v1063_v62, %v1039_v30  ;;  %v1116_v25 = vadd.f32 %v1108_v38, %v1100_v21  ;;  %v1032_v21 = vmul.f32 %v14385_v42, %v6638_v22  ;;  %v1207_v62 = vmul.f32 %v14386_v18, %v6672_v43  ;;  %v14387_v38 = vld [vmem:[#allocation66_spill] sm:$0xff]  ;;  %v14391_v18 = vld [vmem:[#allocation24_spill] sm:$0xff] }
 0x2c5   :  { %v1024_v24 = vmul.f32 %v14387_v38, %v6640_v23  ;;  %v1042_v28 = vadd.f32 %v1034_v40, %v1026_v29  ;;  %v1069_v58 = vadd.f32 %v1061_v63, %v1037_v1  ;;  %v1025_v41 = vmul.f32 %v14389_v55, %v6640_v23  ;;  %v14390_v42 = vld [vmem:[#allocation54_spill] sm:$0xff]  ;;  %v14394_v63 = vld [vmem:[#allocation63_spill] sm:$0xff] }
 0x2c6   :  { %v1148_v13 = vadd.f32 %v1140_v60, %v1116_v25  ;;  %v1103_v47 = vadd.f32 %v1095_v26, %v1071_v37  ;;  %v1038_v60 = vadd.f32 %v1030_v16, %v1022_v31  ;;  %v1035_v25 = vmul.f32 %v14388_v15, %v6638_v22  ;;  %v14393_v31 = vld [vmem:[#allocation80_spill] sm:$0xff] }
 0x2c7   :  { %v1173_v32 = vpop.permute.xlu0 %1172  ;;  %v1110_v53 = vmul.f32 %v14390_v42, %v6662_v50  ;;  %v1143_v37 = vmul.f32 %v14391_v18, %v6679_v9  ;;  %v1101_v38 = vadd.f32 %v1093_v4, %v1069_v58  ;;  %v1094_v29 = vmul.f32 %v14393_v31, %v6652_v0  ;;  %v14397_v4 = vld [vmem:[#allocation69_spill] sm:$0xff]  ;;  %v14398_v31 = vld [vmem:[#allocation30_spill] sm:$0xff] }
 0x2c8   :  { %v1188_v2 = vmul.f32 %v1173_v32, %v6670_v14  ;;  %v1033_v16 = vmul.f32 %v14394_v63, %v6638_v22  ;;  %v1119_v40 = vadd.f32 %v1111_v27, %v1103_v47  ;;  %v1040_v42 = vadd.f32 %v1032_v21, %v1024_v24  ;;  %v14401_v24 = vld [vmem:[#allocation83_spill] sm:$0xff] }
 0x2c9   :  { %v1098_v18 = vmul.f32 %v14395_v10, %v6652_v0  ;;  %v1236_v54 = vmul.f32 %v1221_v35, %v14398_v31 }
 0x2ca   :  { %v1196_v32 = vadd.f32 %v1188_v2, %v1148_v13  ;;  %v14392_v2 = vld [vmem:[#allocation73_spill] sm:$0xff]  ;;  %v1074_v13 = vadd.f32 %v1066_v44, %v1042_v28  ;;  %v1027_v28 = vmul.f32 %v14397_v4, %v6640_v23  ;;  %v1041_v58 = vadd.f32 %v1033_v16, %v1025_v41  ;;  %v14402_v41 = vld [vmem:[#allocation79_spill] sm:$0xff] }
 0x2cb   :  { %v1175_v20 = vpop.permute.xlu1 %1174  ;;  %v1062_v26 = vmul.f32 %v14392_v2, %v6649_v36  ;;  %v1064_v2 = vmul.f32 %v14396_v12, %v6649_v36  ;;  %v1151_v63 = vadd.f32 %v1143_v37, %v1119_v40  ;;  %v1097_v12 = vmul.f32 %v14401_v24, %v6652_v0  ;;  %v14403_v37 = vld [vmem:[#allocation49_spill] sm:$0xff] }
 0x2cc   :  { %v1212_v1 = vadd.f32 %v1204_v5, %v1196_v32  ;;  %v1106_v27 = vadd.f32 %v1098_v18, %v1074_v13  ;;  %v1117_v5 = vadd.f32 %v1109_v49, %v1101_v38  ;;  %v14399_v32 = vld [vmem:[#allocation82_spill] sm:$0xff]  ;;  %v1141_v16 = vmul.f32 %v14402_v41, %v6679_v9  ;;  %v1227_v13 = vpop.permute.xlu2 %1226 }
 0x2cd   :  { %v1070_v44 = vadd.f32 %v1062_v26, %v1038_v60  ;;  %v1096_v21 = vmul.f32 %v14399_v32, %v6652_v0  ;;  %v1072_v35 = vadd.f32 %v1064_v2, %v1040_v42  ;;  %v1142_v49 = vmul.f32 %v14403_v37, %v6679_v9  ;;  %v14405_v18 = vld [vmem:[#allocation78_spill] sm:$0xff] }
 0x2ce   :  { %v1244_v60 = vadd.f32 %v1236_v54, %v1212_v1  ;;  %v1189_v38 = vmul.f32 %v1175_v20, %v6670_v14  ;;  %v1146_v54 = vmul.f32 %v7624_v7, %v6679_v9  ;;  %v1122_v42 = vadd.f32 %v7686_v11, %v1106_v27  ;;  %v14406_v32 = vld [vmem:[#allocation22_spill] sm:$0xff]  ;;  %v14408_v7 = vld [vmem:[#allocation81_spill] sm:$0xff] }
 0x2cf   :  { %v1179_v30 = vpop.permute.xlu0 %1178  ;;  %v1102_v47 = vadd.f32 %v1094_v29, %v1070_v44  ;;  %v14404_v29 = vld [vmem:[#allocation67_spill] sm:$0xff]  ;;  %v1067_v44 = vmul.f32 %v14405_v18, %v6649_v36  ;;  %v1104_v1 = vadd.f32 %v1096_v21, %v1072_v35  ;;  %v1149_v2 = vadd.f32 %v1141_v16, %v1117_v5  ;;  %v14407_v18 = vld [vmem:[#allocation62_spill] sm:$0xff] }
 0x2d0   :  { %v1191_v15 = vmul.f32 %v1179_v30, %v6670_v14  ;;  %v14400_v30 = vld [vmem:[#allocation74_spill] sm:$0xff]  ;;  %v1205_v40 = vmul.f32 %v14404_v29, %v6672_v43  ;;  %v1043_v37 = vadd.f32 %v1035_v25, %v1027_v28  ;;  %v1144_v21 = vmul.f32 %v14408_v7, %v6679_v9  ;;  %v14411_v28 = vld [vmem:[#allocation35_spill] sm:$0xff] }
 0x2d1   :  { %v1065_v10 = vmul.f32 %v14400_v30, %v6649_v36  ;;  %v1268_v30 = vmul.f32 %v1244_v60, %v14406_v32  ;;  %v1239_v27 = vmul.f32 %v1227_v13, %v14398_v31  ;;  %v1154_v5 = vadd.f32 %v1146_v54, %v1122_v42  ;;  %v14412_v54 = vld [vmem:[#allocation58_spill] sm:$0xff]  ;;  %v14414_v42 = vld [vmem:[#allocation56_spill] sm:$0xff] }
 0x2d2   :  { %v1199_v26 = vadd.f32 %v1191_v15, %v1151_v63  ;;  %v1118_v15 = vadd.f32 %v1110_v53, %v1102_v47  ;;  %v14409_v53 = vld [vmem:[#allocation84_spill] sm:$0xff]  ;;  %v1075_v47 = vadd.f32 %v1067_v44, %v1043_v37  ;;  %v1120_v25 = vadd.f32 %v7705_v45, %v1104_v1  ;;  %v14413_v45 = vld [vmem:[#allocation71_spill] sm:$0xff] }
 0x2d3   :  { %v1181_v55 = vpop.permute.xlu1 %1180  ;;  %v1073_v4 = vadd.f32 %v1065_v10, %v1041_v58  ;;  %v1113_v58 = vmul.f32 %v14407_v18, %v6662_v50  ;;  %v1197_v10 = vadd.f32 %v1189_v38, %v1149_v2  ;;  %v1099_v11 = vmul.f32 %v14409_v53, %v6652_v0 }
 0x2d4   :  { %v1215_v24 = vadd.f32 %v1207_v62, %v1199_v26  ;;  %v1150_v29 = vadd.f32 %v1142_v49, %v1118_v15  ;;  %v14410_v62 = vld [vmem:[#allocation28_spill] sm:$0xff]  ;;  %v1276_v26 = vsub.f32 %v14377_v57, %v1268_v30  ;;  %v866_v15 = vadd.f32 %v14412_v54, %v7643_v52  ;;  %v1233_v37 = vpop.permute.xlu2 %1232 }
 0x2d5   :  { %v1105_v63 = vadd.f32 %v1097_v12, %v1073_v4  ;;  %v1145_v12 = vmul.f32 %v14411_v28, %v6679_v9  ;;  %v1192_v4 = vmul.f32 %v1181_v55, %v6670_v14  ;;  %v1213_v13 = vadd.f32 %v1205_v40, %v1197_v10  ;;  %v14415_v30 = vld [vmem:[#allocation64_spill] sm:$0xff] }
 0x2d6   :  { %v1247_v16 = vadd.f32 %v1239_v27, %v1215_v24  ;;  %v1210_v1 = vmul.f32 %v14413_v45, %v6672_v43  ;;  %v1115_v2 = vmul.f32 %v14414_v42, %v6662_v50  ;;  %v1206_v24 = vmul.f32 %v14415_v30, %v6672_v43  ;;  %v14420_v45 = vld [vmem:[#allocation42_spill] sm:$0xff] }
 0x2d7   :  { %v1185_v22 = vpop.permute.xlu0 %1184  ;;  %v1121_v60 = vadd.f32 %v1113_v58, %v1105_v63  ;;  %v1107_v63 = vadd.f32 %v1099_v11, %v1075_v47  ;;  %v1193_v40 = vmul.f32 %v7630_v59, %v6670_v14  ;;  %v1293_v18 = vsub.f32 %v1276_v26, %v7671_v3  ;;  %v14418_v3 = vld [vmem:[#allocation85_spill] sm:$0xff] }
 0x2d8   :  { %v1194_v20 = vmul.f32 %v1185_v22, %v6670_v14  ;;  %v1190_v22 = vmul.f32 %v14410_v62, %v6670_v14  ;;  %v1271_v52 = vmul.f32 %v1247_v16, %v14406_v32  ;;  %v1242_v59 = vmul.f32 %v1233_v37, %v14398_v31 }
 0x2d9   :  { %v7799_v26 = vsub.f32 %v14377_v57, %v1293_v18  ;;  %v14421_v42 = vsub.f32 %v7633_v61, %v7636_v56 }
 0x2da   :  { %v1202_v35 = vadd.f32 %v1194_v20, %v1154_v5  ;;  %v1198_v38 = vadd.f32 %v1190_v22, %v1150_v29  ;;  %v1153_v20 = vadd.f32 %v1145_v12, %v1121_v60  ;;  %v1152_v29 = vadd.f32 %v1144_v21, %v1120_v25  ;;  %v14416_v5 = vld [vmem:[#allocation65_spill] sm:$0xff]  ;;  %v14417_v21 = vld [vmem:[#allocation70_spill] sm:$0xff] }
 0x2db   :  { %v1187_v41 = vpop.permute.xlu1 %1186  ;;  %v1209_v47 = vmul.f32 %v14416_v5, %v6672_v43  ;;  %v1208_v62 = vmul.f32 %v14417_v21, %v6672_v43  ;;  %v1123_v22 = vadd.f32 %v1115_v2, %v1107_v63  ;;  %v1147_v25 = vmul.f32 %v14418_v3, %v6679_v9  ;;  %14419 = vst [vmem:[#allocation43_spill] sm:$0xff] %v7799_v26  ;;  %v14422_v63 = vld [vmem:[#allocation41_spill] sm:$0xff] }
 0x2dc   :  { %v1218_v58 = vadd.f32 %v1210_v1, %v1202_v35  ;;  %v1200_v7 = vadd.f32 %v1192_v4, %v1152_v29  ;;  %v1214_v11 = vadd.f32 %v1206_v24, %v1198_v38  ;;  %v1201_v28 = vadd.f32 %v1193_v40, %v1153_v20 }
 0x2dd   :  { %v1279_v16 = vsub.f32 %v14380_v17, %v1271_v52  ;;  %v937_v1 = vadd.f32 %v14420_v45, %v7668_v6  ;;  %v1288_v2 = vmul.f32 %v7622_v19, %v14421_v42  ;;  %v938_v30 = vadd.f32 %v14422_v63, %v866_v15 }
 0x2de   :  { %v1250_v35 = vadd.f32 %v1242_v59, %v1218_v58  ;;  %v1155_v24 = vadd.f32 %v1147_v25, %v1123_v22  ;;  %v1217_v37 = vadd.f32 %v1209_v47, %v1201_v28  ;;  %v1309_v18 = vrot.slane %v7799_v26, 7  ;;  %v14423_v58 = vld [vmem:[#allocation45_spill] sm:$0xff]  ;;  %v14429_v59 = vld [vmem:[#allocation34_spill] sm:$0xff] }
 0x2df   :  { %v1223_v49 = vpop.permute.xlu0 %1222  ;;  %v1296_v29 = vsub.f32 %v1279_v16, %v1288_v2  ;;  %v1259_v3 = vmul.f32 4.0, %v14429_v59 }
 0x2e0   :  { %v1237_v44 = vmul.f32 %v1223_v49, %v14398_v31  ;;  %v1195_v49 = vmul.f32 %v1187_v41, %v6670_v14 }
 0x2e2   :  { %v1245_v55 = vadd.f32 %v1237_v44, %v1213_v13  ;;  %v1216_v44 = vadd.f32 %v1208_v62, %v1200_v7  ;;  %v1203_v40 = vadd.f32 %v1195_v49, %v1155_v24  ;;  %v1265_v7 = vsub.f32 %v7649_v34, %v937_v1  ;;  %v14430_v34 = vld [vmem:[#allocation33_spill] sm:$0xff] }
 0x2e3   :  { %v1225_v10 = vpop.permute.xlu1 %1224 }
 0x2e4   :  { %v1269_v53 = vmul.f32 %v1245_v55, %v14406_v32  ;;  %v1238_v27 = vmul.f32 %v1225_v10, %v14398_v31  ;;  %v1274_v55 = vmul.f32 %v1250_v35, %v14406_v32  ;;  %v939_v10 = vadd.f32 %v14423_v58, %v7662_v39 }
 0x2e5   :  { %v7839_v39 = vsub.f32 %v14380_v17, %v1296_v29 }
 0x2e6   :  { %v1277_v12 = vsub.f32 %v14373_v46, %v1269_v53  ;;  %v1246_v60 = vadd.f32 %v1238_v27, %v1214_v11  ;;  %v1266_v53 = vsub.f32 %v7652_v51, %v938_v30  ;;  %v14424_v11 = vld [vmem:[#allocation72_spill] sm:$0xff]  ;;  %v1282_v51 = vsub.f32 %v14430_v34, %v1274_v55 }
 0x2e7   :  { %v1229_v38 = vpop.permute.xlu0 %1228  ;;  %v1211_v27 = vmul.f32 %v14424_v11, %v6672_v43  ;;  %v1312_v2 = vrot.slane %v7839_v39, 7 }
 0x2e8   :  { %v1294_v4 = vsub.f32 %v1277_v12, %v7646_v33  ;;  %v1270_v13 = vmul.f32 %v1246_v60, %v14406_v32  ;;  %v1240_v54 = vmul.f32 %v1229_v38, %v14398_v31  ;;  %v14431_v12 = vld [vmem:[#allocation57_spill] sm:$0xff]  ;;  %v1267_v38 = vsub.f32 %v1259_v3, %v939_v10 }
 0x2e9   :  { %v1219_v25 = vadd.f32 %v1211_v27, %v1203_v40  ;;  %v1493_v27 = vrot.slane %v7799_v26, 1  ;;  %v1496_v3 = vrot.slane %v7839_v39, 1 }
 0x2ea   :  { %v7814_v41 = vsub.f32 %v14373_v46, %v1294_v4  ;;  %v1278_v33 = vsub.f32 %v14376_v8, %v1270_v13  ;;  %v1248_v20 = vadd.f32 %v1240_v54, %v1216_v44  ;;  %v1290_v4 = vmul.f32 %v7622_v19, %v1265_v7  ;;  %v14433_v54 = vld [vmem:[#allocation29_spill] sm:$0xff] }
 0x2eb   :  { %v1231_v6 = vpop.permute.xlu1 %1230  ;;  %v1291_v13 = vmul.f32 %v7622_v19, %v1266_v53 }
 0x2ec   :  { %v1295_v61 = vsub.f32 %v1278_v33, %v7665_v48  ;;  %v1272_v56 = vmul.f32 %v1248_v20, %v14406_v32  ;;  %v1241_v15 = vmul.f32 %v1231_v6, %v14398_v31  ;;  %v1310_v52 = vrot.slane %v7814_v41, 7  ;;  %v14426_v48 = vld [vmem:[#allocation27_spill] sm:$0xff] }
 0x2ed   :  { %v1299_v63 = vsub.f32 %v1282_v51, %v1291_v13  ;;  %v1292_v20 = vmul.f32 %v7622_v19, %v1267_v38  ;;  %v1494_v11 = vrot.slane %v7814_v41, 1 }
 0x2ee   :  { %v7830_v5 = vsub.f32 %v14376_v8, %v1295_v61  ;;  %v1280_v47 = vsub.f32 %v14426_v48, %v1272_v56  ;;  %v1249_v21 = vadd.f32 %v1241_v15, %v1217_v37  ;;  %v7835_v22 = vsel %vm351_vm0, %v1309_v18, %v1310_v52 }
 0x2ef   :  { %14428 = vst [vmem:[#allocation48_spill] sm:$0xff] %v7835_v22  ;;  %1327 = vrot.lane.b32.xlu2 %v7835_v22, %s6360_s1  ;;  %v1235_v28 = vpop.permute.xlu0 %1234  ;;  %v7875_v40 = vsub.f32 %v14430_v34, %v1299_v63 }
 0x2f0   :  { %14425 = vst [vmem:[#allocation36_spill] sm:$0xff] %v7830_v5  ;;  %v1297_v60 = vsub.f32 %v1280_v47, %v14431_v12  ;;  %v1273_v16 = vmul.f32 %v1249_v21, %v14406_v32  ;;  %v1243_v35 = vmul.f32 %v1235_v28, %v14398_v31  ;;  %v1311_v49 = vrot.slane %v7830_v5, 7 }
 0x2f1   :  { %v1315_v58 = vrot.slane %v7875_v40, 7  ;;  %v7961_v47 = vsel %vm575_vm1, %v1493_v27, %v1494_v11  ;;  %v1495_v21 = vrot.slane %v7830_v5, 1 }
 0x2f2   :  { %v7851_v44 = vsub.f32 %v14426_v48, %v1297_v60  ;;  %v1281_v45 = vsub.f32 %v14433_v54, %v1273_v16  ;;  %v1251_v1 = vadd.f32 %v1243_v35, %v1219_v25  ;;  %v7856_v42 = vsel %vm351_vm0, %v1310_v52, %v1311_v49  ;;  %14442 = vst [vmem:[#allocation75_spill] sm:$0xff] %v7961_v47 }
 0x2f3   :  { %14434 = vst [vmem:[#allocation38_spill] sm:$0xff] %v7856_v42  ;;  %1329 = vrot.lane.b32.xlu0 %v7856_v42, %s6360_s1  ;;  %v7905_v53 = vsel %vm351_vm0, %v1311_v49, %v1312_v2  ;;  %v7969_v51 = vsel %vm575_vm1, %v1495_v21, %v1496_v3  ;;  %v1499_v16 = vrot.slane %v7875_v40, 1  ;;  %v8005_v13 = vsel %vm575_vm1, %v1494_v11, %v1495_v21 }
 0x2f4   :  { %14432 = vst [vmem:[#allocation44_spill] sm:$0xff] %v7851_v44  ;;  %v1298_v30 = vsub.f32 %v1281_v45, %v1290_v4  ;;  %v1275_v24 = vmul.f32 %v1251_v1, %v14406_v32  ;;  %v1313_v33 = vrot.slane %v7851_v44, 7  ;;  %v1497_v25 = vrot.slane %v7851_v44, 1 }
 0x2f5   :  { %14443 = vst [vmem:[#allocation54_spill] sm:$0xff] %v7969_v51 }
 0x2f6   :  { %v7865_v37 = vsub.f32 %v14433_v54, %v1298_v30  ;;  %v1283_v29 = vsub.f32 %v14429_v59, %v1275_v24  ;;  %v7870_v55 = vsel %vm351_vm0, %v1312_v2, %v1313_v33  ;;  %v7980_v12 = vsel %vm575_vm1, %v1496_v3, %v1497_v25  ;;  %14446 = vst [vmem:[#allocation80_spill] sm:$0xff] %v8005_v13 }
 0x2f7   :  { %14436 = vst [vmem:[#allocation39_spill] sm:$0xff] %v7870_v55  ;;  %1333 = vrot.lane.b32.xlu2 %v7870_v55, %s6360_s1 }
 0x2f8   :  { %14435 = vst [vmem:[#allocation26_spill] sm:$0xff] %v7865_v37  ;;  %v1300_v6 = vsub.f32 %v1283_v29, %v1292_v20  ;;  %v1314_v61 = vrot.slane %v7865_v37, 7  ;;  %v1498_v60 = vrot.slane %v7865_v37, 1 }
 0x2fa   :  { %v7879_v56 = vsub.f32 %v14429_v59, %v1300_v6  ;;  %v7883_v15 = vsel %vm351_vm0, %v1313_v33, %v1314_v61  ;;  %v7988_v35 = vsel %vm575_vm1, %v1498_v60, %v1499_v16  ;;  %v8017_v1 = vsel %vm575_vm1, %v1497_v25, %v1498_v60 }
 0x2fb   :  { %14438 = vst [vmem:[#allocation53_spill] sm:$0xff] %v7883_v15  ;;  %1335 = vrot.lane.b32.xlu0 %v7883_v15, %s6360_s1 }
 0x2fc   :  { %14437 = vst [vmem:[#allocation37_spill] sm:$0xff] %v7879_v56  ;;  %v1316_v52 = vrot.slane %v7879_v56, 7  ;;  %v1500_v49 = vrot.slane %v7879_v56, 1 }
 0x2fd   :  { %14444 = vst [vmem:[#allocation24_spill] sm:$0xff] %v7988_v35 }
 0x2fe   :  { %v7891_v10 = vsel %vm351_vm0, %v1316_v52, %v1309_v18  ;;  %v7895_v7 = vsel %vm351_vm0, %v1315_v58, %v1316_v52  ;;  %v7915_v18 = vsel %vm351_vm0, %v1314_v61, %v1315_v58  ;;  %v7999_v4 = vsel %vm575_vm1, %v1499_v16, %v1500_v49  ;;  %14447 = vst [vmem:[#allocation63_spill] sm:$0xff] %v8017_v1 }
 0x2ff   :  { %14439 = vst [vmem:[#allocation68_spill] sm:$0xff] %v7891_v10  ;;  %1325 = vrot.lane.b32.xlu1 %v7891_v10, %s6360_s1  ;;  %1339 = vrot.lane.b32.xlu2 %v7895_v7, %s6360_s1  ;;  %v8031_v30 = vsel %vm575_vm1, %v1500_v49, %v1493_v27  ;;  %v1349_v19 = vmul.f32 %v7891_v10, %v6672_v43 }
 0x300   :  { %14440 = vst [vmem:[#allocation66_spill] sm:$0xff] %v7895_v7 }
 0x301   :  { %14441 = vst [vmem:[#allocation60_spill] sm:$0xff] %v7915_v18 }
 0x302   :  { %14445 = vst [vmem:[#allocation73_spill] sm:$0xff] %v7999_v4 }
 0x303   :  { %1365 = vrot.lane.b32.xlu0 %v7891_v10, %s6361_s2  ;;  %14448 = vst [vmem:[#allocation76_spill] sm:$0xff] %v8031_v30 }
 0x307   :  { %1369 = vrot.lane.b32.xlu2 %v7856_v42, %s6361_s2  ;;  %1331 = vrot.lane.b32.xlu1 %v7905_v53, %s6360_s1 }
 0x30b   :  { %1371 = vrot.lane.b32.xlu0 %v7905_v53, %s6361_s2 }
 0x30f   :  { %1375 = vrot.lane.b32.xlu2 %v7883_v15, %s6361_s2  ;;  %1337 = vrot.lane.b32.xlu1 %v7915_v18, %s6360_s1 }
 0x313   :  { %1377 = vrot.lane.b32.xlu0 %v7915_v18, %s6361_s2 }
 0x317   :  { %1397 = vrot.lane.b32.xlu2 %v7799_v26, %s6360_s1  ;;  %1367 = vrot.lane.b32.xlu1 %v7835_v22, %s6361_s2 }
 0x31b   :  { %1399 = vrot.lane.b32.xlu0 %v7814_v41, %s6360_s1 }
 0x31f   :  { %1403 = vrot.lane.b32.xlu2 %v7839_v39, %s6360_s1  ;;  %1373 = vrot.lane.b32.xlu1 %v7870_v55, %s6361_s2 }
 0x323   :  { %1405 = vrot.lane.b32.xlu0 %v7851_v44, %s6360_s1 }
 0x327   :  { %1409 = vrot.lane.b32.xlu2 %v7875_v40, %s6360_s1  ;;  %1379 = vrot.lane.b32.xlu1 %v7895_v7, %s6361_s2 }
 0x32b   :  { %1411 = vrot.lane.b32.xlu0 %v7879_v56, %s6360_s1 }
 0x32f   :  { %1455 = vrot.lane.b32.xlu2 %v7814_v41, %s6361_s2  ;;  %1401 = vrot.lane.b32.xlu1 %v7830_v5, %s6360_s1 }
 0x333   :  { %1457 = vrot.lane.b32.xlu0 %v7830_v5, %s6361_s2 }
 0x337   :  { %1461 = vrot.lane.b32.xlu2 %v7851_v44, %s6361_s2  ;;  %1407 = vrot.lane.b32.xlu1 %v7865_v37, %s6360_s1 }
 0x33b   :  { %1463 = vrot.lane.b32.xlu0 %v7865_v37, %s6361_s2 }
 0x33f   :  { %1467 = vrot.lane.b32.xlu2 %v7879_v56, %s6361_s2  ;;  %1453 = vrot.lane.b32.xlu1 %v7799_v26, %s6361_s2 }
 0x343   :  { %1509 = vrot.lane.b32.xlu0 %v7961_v47, %s6360_s1 }
 0x347   :  { %1513 = vrot.lane.b32.xlu2 %v7969_v51, %s6360_s1  ;;  %1459 = vrot.lane.b32.xlu1 %v7839_v39, %s6361_s2 }
 0x349   :  { %v7976_v28 = vpop.permute.xlu2 %1327 }
 0x34b   :  { %1515 = vrot.lane.b32.xlu0 %v7980_v12, %s6360_s1 }
 0x34f   :  { %1519 = vrot.lane.b32.xlu2 %v7988_v35, %s6360_s1  ;;  %1465 = vrot.lane.b32.xlu1 %v7875_v40, %s6361_s2 }
 0x351   :  { %v7995_v38 = vpop.permute.xlu2 %1333 }
 0x353   :  { %1521 = vrot.lane.b32.xlu0 %v7999_v4, %s6360_s1 }
 0x357   :  { %1565 = vrot.lane.b32.xlu2 %v7961_v47, %s6361_s2  ;;  %1511 = vrot.lane.b32.xlu1 %v8005_v13, %s6360_s1 }
 0x359   :  { %v8011_v45 = vpop.permute.xlu2 %1339 }
 0x35b   :  { %1567 = vrot.lane.b32.xlu0 %v8005_v13, %s6361_s2 }
 0x35f   :  { %1571 = vrot.lane.b32.xlu2 %v7980_v12, %s6361_s2  ;;  %1517 = vrot.lane.b32.xlu1 %v8017_v1, %s6360_s1 }
 0x361   :  { %v8023_v2 = vpop.permute.xlu2 %1369 }
 0x363   :  { %1573 = vrot.lane.b32.xlu0 %v8017_v1, %s6361_s2 }
 0x365   :  { %v8027_v63 = vpop.permute.xlu0 %1329 }
 0x367   :  { %1577 = vrot.lane.b32.xlu2 %v7999_v4, %s6361_s2  ;;  %1523 = vrot.lane.b32.xlu1 %v8031_v30, %s6360_s1 }
 0x369   :  { %v8037_v24 = vpop.permute.xlu2 %1375 }
 0x36b   :  { %1579 = vrot.lane.b32.xlu0 %v8031_v30, %s6361_s2 }
 0x36d   :  { %v8041_v33 = vpop.permute.xlu0 %1335 }
 0x36f   :  { %1569 = vrot.lane.b32.xlu1 %v7969_v51, %s6361_s2 }
 0x371   :  { %v1326_v20 = vpop.permute.xlu1 %1325  ;;  %v8045_v29 = vpop.permute.xlu2 %1397 }
 0x372   :  { %14449 = vst [vmem:[#allocation77_spill] sm:$0xff] %v8045_v29  ;;  %v1341_v57 = vmul.f32 %v1326_v20, %v6670_v14  ;;  %v1437_v20 = vmul.f32 %v7799_v26, %v6662_v50 }
 0x374   :  { %v1357_v51 = vadd.f32 %v1349_v19, %v1341_v57 }
 0x375   :  { %v1366_v6 = vpop.permute.xlu0 %1365 }
 0x376   :  { %v1381_v32 = vmul.f32 %v1366_v6, %v14398_v31 }
 0x377   :  { %1575 = vrot.lane.b32.xlu1 %v7988_v35, %s6361_s2 }
 0x378   :  { %v1389_v37 = vadd.f32 %v1381_v32, %v1357_v51  ;;  %v14463_v51 = vld [vmem:[#allocation31_spill] sm:$0xff] }
 0x379   :  { %v8049_v61 = vpop.permute.xlu2 %1403  ;;  %v1332_v52 = vpop.permute.xlu1 %1331 }
 0x37d   :  { %v1372_v58 = vpop.permute.xlu0 %1371 }
 0x381   :  { %v8051_v11 = vpop.permute.xlu2 %1409  ;;  %v1338_v27 = vpop.permute.xlu1 %1337 }
 0x382   :  { %14450 = vst [vmem:[#allocation69_spill] sm:$0xff] %v8051_v11 }
 0x385   :  { %v1378_v21 = vpop.permute.xlu0 %1377 }
 0x389   :  { %v8053_v3 = vpop.permute.xlu2 %1455  ;;  %v1368_v25 = vpop.permute.xlu1 %1367 }
 0x38a   :  { %14451 = vst [vmem:[#allocation30_spill] sm:$0xff] %v8053_v3 }
 0x38d   :  { %v8055_v60 = vpop.permute.xlu0 %1399 }
 0x391   :  { %v8057_v16 = vpop.permute.xlu2 %1461  ;;  %v1374_v49 = vpop.permute.xlu1 %1373 }
 0x392   :  { %14452 = vst [vmem:[#allocation82_spill] sm:$0xff] %v8057_v16 }
 0x395   :  { %v8059_v59 = vpop.permute.xlu0 %1405 }
 0x396   :  { %14453 = vst [vmem:[#allocation74_spill] sm:$0xff] %v8059_v59 }
 0x399   :  { %v8061_v54 = vpop.permute.xlu2 %1467  ;;  %v8063_v48 = vpop.permute.xlu1 %1379 }
 0x39a   :  { %14454 = vst [vmem:[#allocation83_spill] sm:$0xff] %v8061_v54 }
 0x39d   :  { %v8065_v8 = vpop.permute.xlu0 %1411 }
 0x39e   :  { %14455 = vst [vmem:[#allocation79_spill] sm:$0xff] %v8065_v8 }
 0x3a1   :  { %v8067_v46 = vpop.permute.xlu1 %1401  ;;  %v8069_v34 = vpop.permute.xlu2 %1513 }
 0x3a2   :  { %14456 = vst [vmem:[#allocation49_spill] sm:$0xff] %v8067_v46 }
 0x3a3   :  { %14457 = vst [vmem:[#allocation67_spill] sm:$0xff] %v8069_v34  ;;  %v1413_v34 = vmul.f32 %v8045_v29, %v6652_v0 }
 0x3a5   :  { %v8071_v17 = vpop.permute.xlu0 %1457  ;;  %v1421_v62 = vadd.f32 %v1413_v34, %v1389_v37  ;;  %v1342_v34 = vmul.f32 %v7976_v28, %v6670_v14  ;;  %v1344_v37 = vmul.f32 %v1332_v52, %v6670_v14  ;;  %v1414_v28 = vmul.f32 %v8055_v60, %v6652_v0  ;;  %v14464_v52 = vld [vmem:[#allocation59_spill] sm:$0xff] }
 0x3a6   :  { %14458 = vst [vmem:[#allocation78_spill] sm:$0xff] %v8071_v17 }
 0x3a7   :  { %v1445_v10 = vadd.f32 %v1437_v20, %v1421_v62  ;;  %v1350_v62 = vmul.f32 %v7835_v22, %v6672_v43  ;;  %v1382_v20 = vmul.f32 %v1368_v25, %v14398_v31 }
 0x3a9   :  { %v8077_v35 = vpop.permute.xlu1 %1407  ;;  %v8079_v30 = vpop.permute.xlu2 %1519 }
 0x3aa   :  { %14459 = vst [vmem:[#allocation62_spill] sm:$0xff] %v8077_v35 }
 0x3ab   :  { %14460 = vst [vmem:[#allocation81_spill] sm:$0xff] %v8079_v30  ;;  %v1541_v30 = vmul.f32 %v7961_v47, %v14463_v51 }
 0x3ad   :  { %v8081_v54 = vpop.permute.xlu0 %1463 }
 0x3ae   :  { %14461 = vst [vmem:[#allocation84_spill] sm:$0xff] %v8081_v54 }
 0x3b1   :  { %v8085_v17 = vpop.permute.xlu1 %1453  ;;  %v1566_v32 = vpop.permute.xlu2 %1565 }
 0x3b2   :  { %14462 = vst [vmem:[#allocation28_spill] sm:$0xff] %v8085_v17  ;;  %v1469_v6 = vmul.f32 %v8085_v17, %v6679_v9  ;;  %v1581_v26 = vmul.f32 %v1566_v32, %v6649_v36 }
 0x3b4   :  { %v1477_v19 = vadd.f32 %v1469_v6, %v1445_v10  ;;  %v1352_v10 = vmul.f32 %v7905_v53, %v6672_v43 }
 0x3b5   :  { %v1510_v35 = vpop.permute.xlu0 %1509 }
 0x3b6   :  { %v1525_v57 = vmul.f32 %v1510_v35, %v6640_v23  ;;  %v1384_v35 = vmul.f32 %v1372_v58, %v14398_v31  ;;  %v1360_v47 = vadd.f32 %v1352_v10, %v1344_v37  ;;  %v1345_v58 = vmul.f32 %v7995_v38, %v6670_v14 }
 0x3b7   :  { %v1387_v10 = vmul.f32 %v1378_v21, %v14398_v31  ;;  %v1438_v38 = vmul.f32 %v7814_v41, %v6662_v50  ;;  %v1348_v21 = vmul.f32 %v8011_v45, %v6670_v14  ;;  %v1356_v45 = vmul.f32 %v7895_v7, %v6672_v43 }
 0x3b8   :  { %v1533_v54 = vadd.f32 %v1525_v57, %v1477_v19  ;;  %v1358_v57 = vadd.f32 %v1350_v62, %v1342_v34  ;;  %v1353_v34 = vmul.f32 %v7870_v55, %v6672_v43  ;;  %v1355_v62 = vmul.f32 %v7915_v18, %v6672_v43 }
 0x3b9   :  { %v8094_v29 = vpop.permute.xlu1 %1459  ;;  %v1388_v7 = vmul.f32 %v8063_v48, %v14398_v31 }
 0x3ba   :  { %v1549_v17 = vadd.f32 %v1541_v30, %v1533_v54  ;;  %v1392_v54 = vadd.f32 %v1384_v35, %v1360_v47  ;;  %v1390_v30 = vadd.f32 %v1382_v20, %v1358_v57  ;;  %v1385_v47 = vmul.f32 %v1374_v49, %v14398_v31 }
 0x3bb   :  { %v1361_v35 = vadd.f32 %v1353_v34, %v1345_v58  ;;  %v1417_v20 = vmul.f32 %v8059_v59, %v6652_v0  ;;  %v1472_v49 = vmul.f32 %v8094_v29, %v6679_v9  ;;  %v1441_v59 = vmul.f32 %v7851_v44, %v6662_v50 }
 0x3bc   :  { %v1589_v6 = vadd.f32 %v1581_v26, %v1549_v17  ;;  %v1416_v17 = vmul.f32 %v8049_v61, %v6652_v0  ;;  %v1347_v26 = vmul.f32 %v1338_v27, %v6670_v14  ;;  %v1422_v25 = vadd.f32 %v1414_v28, %v1390_v30 }
 0x3bd   :  { %v1516_v19 = vpop.permute.xlu0 %1515  ;;  %v1440_v27 = vmul.f32 %v7839_v39, %v6662_v50  ;;  %v1343_v30 = vmul.f32 %v8027_v63, %v6670_v14  ;;  %v1393_v58 = vadd.f32 %v1385_v47, %v1361_v35  ;;  %v1351_v63 = vmul.f32 %v7856_v42, %v6672_v43 }
 0x3be   :  { %v8109_v32 = vmul.f32 %v1589_v6, %v14464_v52  ;;  %v1424_v37 = vadd.f32 %v1416_v17, %v1392_v54  ;;  %v1363_v57 = vadd.f32 %v1355_v62, %v1347_v26  ;;  %v1446_v28 = vadd.f32 %v1438_v38, %v1422_v25 }
 0x3bf   :  { %v1443_v54 = vmul.f32 %v7875_v40, %v6662_v50  ;;  %v1439_v17 = vmul.f32 %v7830_v5, %v6662_v50  ;;  %v1470_v26 = vmul.f32 %v8053_v3, %v6679_v9  ;;  %v1528_v62 = vmul.f32 %v1516_v19, %v6640_v23 }
 0x3c0   :  { %1693 = vrot.lane.b32.xlu2 %v8109_v32, %s6360_s1  ;;  %v1395_v34 = vadd.f32 %v1387_v10, %v1363_v57  ;;  %v1448_v25 = vadd.f32 %v1440_v27, %v1424_v37  ;;  %v1542_v38 = vmul.f32 %v8005_v13, %v14463_v51  ;;  %v1425_v47 = vadd.f32 %v1417_v20, %v1393_v58 }
 0x3c1   :  { %v8115_v22 = vpop.permute.xlu1 %1465  ;;  %v1419_v10 = vmul.f32 %v8051_v11, %v6652_v0  ;;  %v1478_v52 = vadd.f32 %v1470_v26, %v1446_v28  ;;  %v1544_v19 = vmul.f32 %v7980_v12, %v14463_v51  ;;  %v1359_v27 = vadd.f32 %v1351_v63, %v1343_v30 }
 0x3c2   :  { %14465 = vst [vmem:[#allocation35_spill] sm:$0xff] %v8115_v22  ;;  %v1480_v57 = vadd.f32 %v1472_v49, %v1448_v25  ;;  %v1364_v42 = vadd.f32 %v1356_v45, %v1348_v21  ;;  %v1383_v49 = vmul.f32 %v8023_v2, %v14398_v31  ;;  %v1449_v28 = vadd.f32 %v1441_v59, %v1425_v47  ;;  %v1572_v25 = vpop.permute.xlu2 %1571 }
 0x3c3   :  { %v1427_v20 = vadd.f32 %v1419_v10, %v1395_v34  ;;  %v1420_v26 = vmul.f32 %v8065_v8, %v6652_v0  ;;  %v1415_v30 = vmul.f32 %v8067_v46, %v6652_v0  ;;  %v1475_v48 = vmul.f32 %v8115_v22, %v6679_v9  ;;  %v8456_v22 = vld [vmem:[#allocation13 + $0x18] sm:$0xff] }
 0x3c4   :  { %v1536_v58 = vadd.f32 %v1528_v62, %v1480_v57  ;;  %v1391_v34 = vadd.f32 %v1383_v49, %v1359_v27  ;;  %v1346_v59 = vmul.f32 %v8041_v33, %v6670_v14  ;;  %v1473_v2 = vmul.f32 %v8057_v16, %v6679_v9  ;;  %v14466_v33 = vld [vmem:[#allocation52_spill] sm:$0xff]  ;;  %14506 = vst [vmem:[#allocation92_spill] sm:$0xff] %v8456_v22 }
 0x3c5   :  { %v1522_v6 = vpop.permute.xlu0 %1521  ;;  %v1396_v62 = vadd.f32 %v1388_v7, %v1364_v42  ;;  %v1451_v47 = vadd.f32 %v1443_v54, %v1427_v20  ;;  %v1584_v27 = vmul.f32 %v1572_v25, %v6649_v36  ;;  %v1547_v7 = vmul.f32 %v7999_v4, %v14463_v51  ;;  %v8439_v16 = vld [vmem:[#allocation13 + $0x8] sm:$0xff] }
 0x3c6   :  { %v1552_v45 = vadd.f32 %v1544_v19, %v1536_v58  ;;  %v1531_v10 = vmul.f32 %v1522_v6, %v6640_v23  ;;  %v1444_v54 = vmul.f32 %v7879_v56, %v6662_v50  ;;  %v1605_v19 = vrot.slane %v8109_v32, 7  ;;  %14502 = vst [vmem:[#allocation88_spill] sm:$0xff] %v8439_v16 }
 0x3c7   :  { %v1428_v8 = vadd.f32 %v1420_v26, %v1396_v62  ;;  %v1483_v49 = vadd.f32 %v1475_v48, %v1451_v47  ;;  %v14467_v48 = vld [vmem:[#allocation78_spill] sm:$0xff]  ;;  %v2320_v46 = vrot.slane %v8439_v16, 7  ;;  %v2322_v16 = vrot.slane %v8456_v22, 7 }
 0x3c8   :  { %v1592_v20 = vadd.f32 %v1584_v27, %v1552_v45 }
 0x3c9   :  { %v1512_v35 = vpop.permute.xlu1 %1511  ;;  %v1539_v58 = vadd.f32 %v1531_v10, %v1483_v49 }
 0x3ca   :  { %v1526_v37 = vmul.f32 %v1512_v35, %v6640_v23  ;;  %v1354_v35 = vmul.f32 %v7883_v15, %v6672_v43 }
 0x3cc   :  { %v1534_v55 = vadd.f32 %v1526_v37, %v1478_v52  ;;  %v1545_v37 = vmul.f32 %v8017_v1, %v14463_v51  ;;  %v1362_v6 = vadd.f32 %v1354_v35, %v1346_v59  ;;  %v1452_v59 = vadd.f32 %v1444_v54, %v1428_v8  ;;  %v14472_v54 = vld [vmem:[#allocation46_spill] sm:$0xff] }
 0x3cd   :  { %v1568_v63 = vpop.permute.xlu0 %1567  ;;  %v1555_v8 = vadd.f32 %v1547_v7, %v1539_v58  ;;  %v14475_v7 = vld [vmem:[#allocation26_spill] sm:$0xff] }
 0x3ce   :  { %v1550_v21 = vadd.f32 %v1542_v38, %v1534_v55  ;;  %v1582_v52 = vmul.f32 %v1568_v63, %v6649_v36  ;;  %v1423_v55 = vadd.f32 %v1415_v30, %v1391_v34  ;;  %v1481_v38 = vadd.f32 %v1473_v2, %v1449_v28 }
 0x3cf   :  { %v1386_v30 = vmul.f32 %v8037_v24, %v14398_v31  ;;  %v1578_v24 = vpop.permute.xlu2 %1577  ;;  %v1442_v58 = vmul.f32 %v14475_v7, %v6662_v50 }
 0x3d0   :  { %v1590_v57 = vadd.f32 %v1582_v52, %v1550_v21  ;;  %v1447_v25 = vadd.f32 %v1439_v17, %v1423_v55  ;;  %v1471_v21 = vmul.f32 %v14467_v48, %v6679_v9  ;;  %v14468_v52 = vld [vmem:[#allocation62_spill] sm:$0xff]  ;;  %v14470_v17 = vld [vmem:[#allocation83_spill] sm:$0xff] }
 0x3d1   :  { %v1518_v63 = vpop.permute.xlu1 %1517  ;;  %v1418_v35 = vmul.f32 %v14468_v52, %v6652_v0  ;;  %v1394_v10 = vadd.f32 %v1386_v30, %v1362_v6  ;;  %v14471_v55 = vld [vmem:[#allocation50_spill] sm:$0xff]  ;;  %v8437_v48 = vld [vmem:[#allocation13] sm:$0xff] }
 0x3d2   :  { %v8180_v15 = vmul.f32 %v1590_v57, %v14466_v33  ;;  %v1529_v42 = vmul.f32 %v1518_v63, %v6640_v23  ;;  %v1476_v57 = vmul.f32 %v14470_v17, %v6679_v9  ;;  %v1479_v63 = vadd.f32 %v1471_v21, %v1447_v25  ;;  %v14474_v33 = vld [vmem:[#allocation67_spill] sm:$0xff]  ;;  %14501 = vst [vmem:[#allocation87_spill] sm:$0xff] %v8437_v48 }
 0x3d3   :  { %v1426_v27 = vadd.f32 %v1418_v35, %v1394_v10 }
 0x3d4   :  { %v1537_v28 = vadd.f32 %v1529_v42, %v1481_v38  ;;  %v13871_v26 = vrot.slane %v8180_v15, 7  ;;  %v8207_v38 = vmul.f32 %v1592_v20, %v14471_v55  ;;  %v1587_v42 = vmul.f32 %v1578_v24, %v6649_v36  ;;  %v14476_v24 = vld [vmem:[#allocation84_spill] sm:$0xff]  ;;  %v14481_v55 = vld [vmem:[#allocation81_spill] sm:$0xff] }
 0x3d5   :  { %v1574_v34 = vpop.permute.xlu0 %1573  ;;  %v1484_v6 = vadd.f32 %v1476_v57, %v1452_v59  ;;  %v1527_v20 = vmul.f32 %v14474_v33, %v6640_v23  ;;  %v1450_v10 = vadd.f32 %v1442_v58, %v1426_v27  ;;  %v1474_v57 = vmul.f32 %v14476_v24, %v6679_v9  ;;  %v14480_v58 = vld [vmem:[#allocation51_spill] sm:$0xff] }
 0x3d6   :  { %v1553_v2 = vadd.f32 %v1545_v37, %v1537_v28  ;;  %v1585_v62 = vmul.f32 %v1574_v34, %v6649_v36  ;;  %v8200_v47 = vsel %vm351_vm0, %v1605_v19, %v13871_v26  ;;  %v14473_v34 = vld [vmem:[#allocation76_spill] sm:$0xff]  ;;  %v1595_v25 = vadd.f32 %v1587_v42, %v1555_v8  ;;  %v14477_v8 = vld [vmem:[#allocation54_spill] sm:$0xff] }
 0x3d7   :  { %1623 = vrot.lane.b32.xlu2 %v8200_v47, %s6360_s1  ;;  %v1548_v26 = vmul.f32 %v14473_v34, %v14463_v51  ;;  %v1608_v35 = vrot.slane %v8207_v38, 7  ;;  %v1543_v42 = vmul.f32 %v14477_v8, %v14463_v51 }
 0x3d8   :  { %v1593_v37 = vadd.f32 %v1585_v62, %v1553_v2  ;;  %v1535_v62 = vadd.f32 %v1527_v20, %v1479_v63  ;;  %v1482_v20 = vadd.f32 %v1474_v57, %v1450_v10 }
 0x3d9   :  { %v1524_v49 = vpop.permute.xlu1 %1523 }
 0x3da   :  { %v8211_v28 = vmul.f32 %v1593_v37, %v14472_v54  ;;  %v1532_v30 = vmul.f32 %v1524_v49, %v6640_v23  ;;  %v1530_v54 = vmul.f32 %v14481_v55, %v6640_v23  ;;  %v14484_v55 = vld [vmem:[#allocation24_spill] sm:$0xff] }
 0x3dc   :  { %v1540_v21 = vadd.f32 %v1532_v30, %v1484_v6  ;;  %v1609_v2 = vrot.slane %v8211_v28, 7  ;;  %v14478_v6 = vld [vmem:[#allocation55_spill] sm:$0xff]  ;;  %v1538_v17 = vadd.f32 %v1530_v54, %v1482_v20  ;;  %v1546_v54 = vmul.f32 %v14484_v55, %v14463_v51 }
 0x3dd   :  { %v1580_v59 = vpop.permute.xlu0 %1579  ;;  %v8234_v63 = vmul.f32 %v1595_v25, %v14478_v6  ;;  %v14482_v25 = vld [vmem:[#allocation40_spill] sm:$0xff] }
 0x3de   :  { %v1556_v37 = vadd.f32 %v1548_v26, %v1540_v21  ;;  %v1588_v49 = vmul.f32 %v1580_v59, %v6649_v36  ;;  %v8227_v33 = vsel %vm351_vm0, %v1608_v35, %v1609_v2  ;;  %v1551_v21 = vadd.f32 %v1543_v42, %v1535_v62 }
 0x3df   :  { %1629 = vrot.lane.b32.xlu2 %v8227_v33, %s6360_s1  ;;  %14479 = vst [vmem:[#allocation58_spill] sm:$0xff] %v8234_v63  ;;  %v1611_v7 = vrot.slane %v8234_v63, 7 }
 0x3e0   :  { %v1596_v27 = vadd.f32 %v1588_v49, %v1556_v37  ;;  %v1554_v37 = vadd.f32 %v1546_v54, %v1538_v17  ;;  %v14485_v49 = vrot.slane %v8180_v15, 7 }
 0x3e1   :  { %v1570_v30 = vpop.permute.xlu1 %1569 }
 0x3e2   :  { %v8237_v26 = vmul.f32 %v1596_v27, %v14480_v58  ;;  %v1583_v59 = vmul.f32 %v1570_v30, %v6649_v36  ;;  %v14487_v27 = vld [vmem:[#allocation61_spill] sm:$0xff]  ;;  %v1777_v58 = vrot.slane %v8211_v28, 1 }
 0x3e4   :  { %v1591_v56 = vadd.f32 %v1583_v59, %v1551_v21  ;;  %v1612_v34 = vrot.slane %v8237_v26, 7  ;;  %v1780_v24 = vrot.slane %v8237_v26, 1 }
 0x3e6   :  { %v8245_v6 = vmul.f32 %v1591_v56, %v14482_v25  ;;  %v8249_v10 = vsel %vm351_vm0, %v1612_v34, %v1605_v19  ;;  %v8253_v62 = vsel %vm351_vm0, %v1611_v7, %v1612_v34 }
 0x3e7   :  { %1621 = vrot.lane.b32.xlu1 %v8249_v10, %s6360_s1  ;;  %1635 = vrot.lane.b32.xlu2 %v8253_v62, %s6360_s1 }
 0x3e8   :  { %14483 = vst [vmem:[#allocation71_spill] sm:$0xff] %v8245_v6  ;;  %v1607_v56 = vrot.slane %v8245_v6, 7 }
 0x3e9   :  { %v1576_v57 = vpop.permute.xlu1 %1575 }
 0x3ea   :  { %v1586_v19 = vmul.f32 %v1576_v57, %v6649_v36  ;;  %v8267_v34 = vsel %vm351_vm0, %v14485_v49, %v1607_v56  ;;  %v8276_v20 = vsel %vm351_vm0, %v1607_v56, %v1608_v35  ;;  %v1776_v35 = vrot.slane %v8207_v38, 1 }
 0x3eb   :  { %14486 = vst [vmem:[#allocation56_spill] sm:$0xff] %v8267_v34  ;;  %1625 = vrot.lane.b32.xlu0 %v8267_v34, %s6360_s1  ;;  %v1779_v57 = vrot.slane %v8234_v63, 1 }
 0x3ec   :  { %v1594_v42 = vadd.f32 %v1586_v19, %v1554_v37  ;;  %v1774_v19 = vrot.slane %v8180_v15, 1  ;;  %v8376_v55 = vsel %vm575_vm1, %v1776_v35, %v1777_v58 }
 0x3ed   :  { %14493 = vst [vmem:[#allocation41_spill] sm:$0xff] %v8376_v55 }
 0x3ee   :  { %v8272_v30 = vmul.f32 %v1594_v42, %v14487_v27  ;;  %v1773_v42 = vrot.slane %v8109_v32, 1 }
 0x3ef   :  { %1627 = vrot.lane.b32.xlu1 %v8276_v20, %s6360_s1  ;;  %1665 = vrot.lane.b32.xlu2 %v8267_v34, %s6361_s2 }
 0x3f0   :  { %14488 = vst [vmem:[#allocation64_spill] sm:$0xff] %v8272_v30  ;;  %v1610_v17 = vrot.slane %v8272_v30, 7  ;;  %v1778_v54 = vrot.slane %v8272_v30, 1 }
 0x3f2   :  { %v8285_v21 = vsel %vm351_vm0, %v1609_v2, %v1610_v17  ;;  %v8291_v59 = vsel %vm351_vm0, %v1610_v17, %v1611_v7  ;;  %v1775_v7 = vrot.slane %v8245_v6, 1  ;;  %v8347_v37 = vsel %vm575_vm1, %v1778_v54, %v1779_v57 }
 0x3f3   :  { %14489 = vst [vmem:[#allocation65_spill] sm:$0xff] %v8285_v21  ;;  %1631 = vrot.lane.b32.xlu0 %v8285_v21, %s6360_s1  ;;  %v8359_v17 = vsel %vm575_vm1, %v1773_v42, %v1774_v19  ;;  %v8387_v52 = vsel %vm575_vm1, %v1777_v58, %v1778_v54 }
 0x3f4   :  { %v8333_v2 = vsel %vm575_vm1, %v1775_v7, %v1776_v35  ;;  %14491 = vst [vmem:[#allocation85_spill] sm:$0xff] %v8347_v37  ;;  %v8372_v25 = vsel %vm575_vm1, %v1774_v19, %v1775_v7  ;;  %v8391_v7 = vsel %vm575_vm1, %v1779_v57, %v1780_v24  ;;  %v8403_v19 = vsel %vm575_vm1, %v1780_v24, %v1773_v42 }
 0x3f5   :  { %14490 = vst [vmem:[#allocation70_spill] sm:$0xff] %v8333_v2 }
 0x3f6   :  { %14492 = vst [vmem:[#allocation42_spill] sm:$0xff] %v8372_v25 }
 0x3f7   :  { %1633 = vrot.lane.b32.xlu1 %v8291_v59, %s6360_s1  ;;  %1671 = vrot.lane.b32.xlu2 %v8285_v21, %s6361_s2  ;;  %14494 = vst [vmem:[#allocation45_spill] sm:$0xff] %v8387_v52 }
 0x3f8   :  { %14495 = vst [vmem:[#allocation72_spill] sm:$0xff] %v8391_v7 }
 0x3f9   :  { %14496 = vst [vmem:[#allocation57_spill] sm:$0xff] %v8403_v19 }
 0x3fb   :  { %1661 = vrot.lane.b32.xlu0 %v8249_v10, %s6361_s2 }
 0x3ff   :  { %1663 = vrot.lane.b32.xlu1 %v8200_v47, %s6361_s2  ;;  %1699 = vrot.lane.b32.xlu2 %v8207_v38, %s6360_s1 }
 0x403   :  { %1667 = vrot.lane.b32.xlu0 %v8276_v20, %s6361_s2 }
 0x407   :  { %1669 = vrot.lane.b32.xlu1 %v8227_v33, %s6361_s2  ;;  %1705 = vrot.lane.b32.xlu2 %v8234_v63, %s6360_s1 }
 0x40b   :  { %1673 = vrot.lane.b32.xlu0 %v8291_v59, %s6361_s2 }
 0x40f   :  { %1675 = vrot.lane.b32.xlu1 %v8253_v62, %s6361_s2  ;;  %1743 = vrot.lane.b32.xlu2 %v8180_v15, %s6361_s2 }
 0x413   :  { %1695 = vrot.lane.b32.xlu0 %v8180_v15, %s6360_s1 }
 0x417   :  { %1697 = vrot.lane.b32.xlu1 %v8245_v6, %s6360_s1  ;;  %1749 = vrot.lane.b32.xlu2 %v8211_v28, %s6361_s2 }
 0x41a   :  { %v8340_v56 = vpop.permute.xlu2 %1693 }
 0x41b   :  { %1701 = vrot.lane.b32.xlu0 %v8211_v28, %s6360_s1 }
 0x41f   :  { %1703 = vrot.lane.b32.xlu1 %v8272_v30, %s6360_s1  ;;  %1755 = vrot.lane.b32.xlu2 %v8237_v26, %s6361_s2 }
 0x423   :  { %1707 = vrot.lane.b32.xlu0 %v8237_v26, %s6360_s1 }
 0x427   :  { %1741 = vrot.lane.b32.xlu1 %v8109_v32, %s6361_s2  ;;  %1793 = vrot.lane.b32.xlu2 %v8333_v2, %s6360_s1 }
 0x42b   :  { %1745 = vrot.lane.b32.xlu0 %v8245_v6, %s6361_s2 }
 0x42f   :  { %1747 = vrot.lane.b32.xlu1 %v8207_v38, %s6361_s2  ;;  %1799 = vrot.lane.b32.xlu2 %v8347_v37, %s6360_s1 }
 0x431   :  { %v1624_v49 = vpop.permute.xlu2 %1623 }
 0x432   :  { %v1638_v22 = vmul.f32 %v1624_v49, %v6640_v23 }
 0x433   :  { %1751 = vrot.lane.b32.xlu0 %v8272_v30, %s6361_s2 }
 0x437   :  { %1753 = vrot.lane.b32.xlu1 %v8234_v63, %s6361_s2  ;;  %1837 = vrot.lane.b32.xlu2 %v8359_v17, %s6361_s2 }
 0x439   :  { %v8368_v27 = vpop.permute.xlu2 %1629 }
 0x43b   :  { %1789 = vrot.lane.b32.xlu0 %v8359_v17, %s6360_s1 }
 0x43f   :  { %1791 = vrot.lane.b32.xlu1 %v8372_v25, %s6360_s1  ;;  %1843 = vrot.lane.b32.xlu2 %v8376_v55, %s6361_s2 }
 0x441   :  { %v8393_v35 = vpop.permute.xlu2 %1635 }
 0x443   :  { %1795 = vrot.lane.b32.xlu0 %v8376_v55, %s6360_s1 }
 0x447   :  { %1797 = vrot.lane.b32.xlu1 %v8387_v52, %s6360_s1  ;;  %1849 = vrot.lane.b32.xlu2 %v8391_v7, %s6361_s2 }
 0x449   :  { %v8407_v58 = vpop.permute.xlu2 %1665 }
 0x44a   :  { %14497 = vst [vmem:[#allocation31_spill] sm:$0xff] %v8407_v58  ;;  %v8482_v58 = vld [vmem:[#allocation13 + $0x38] sm:$0xff] }
 0x44b   :  { %1801 = vrot.lane.b32.xlu0 %v8391_v7, %s6360_s1  ;;  %14512 = vst [vmem:[#allocation98_spill] sm:$0xff] %v8482_v58  ;;  %v2326_v18 = vrot.slane %v8482_v58, 7 }
 0x44f   :  { %1803 = vrot.lane.b32.xlu1 %v8403_v19, %s6360_s1 }
 0x451   :  { %v8415_v57 = vpop.permute.xlu2 %1671 }
 0x452   :  { %14498 = vst [vmem:[#allocation67_spill] sm:$0xff] %v8415_v57  ;;  %v8451_v57 = vld [vmem:[#allocation13 + $0x10] sm:$0xff] }
 0x453   :  { %1839 = vrot.lane.b32.xlu0 %v8372_v25, %s6361_s2  ;;  %14504 = vst [vmem:[#allocation90_spill] sm:$0xff] %v8451_v57  ;;  %v2321_v21 = vrot.slane %v8451_v57, 7 }
 0x455   :  { %v8463_v63 = vsel %vm351_vm0, %v2320_v46, %v2321_v21 }
 0x456   :  { %14508 = vst [vmem:[#allocation94_spill] sm:$0xff] %v8463_v63 }
 0x457   :  { %1841 = vrot.lane.b32.xlu1 %v8333_v2, %s6361_s2 }
 0x459   :  { %v8413_v54 = vpop.permute.xlu1 %1621  ;;  %v8427_v1 = vpop.permute.xlu2 %1699 }
 0x45b   :  { %1845 = vrot.lane.b32.xlu0 %v8387_v52, %s6361_s2 }
 0x45d   :  { %v8419_v24 = vpop.permute.xlu0 %1625 }
 0x45f   :  { %1847 = vrot.lane.b32.xlu1 %v8347_v37, %s6361_s2  ;;  %v2319_v37 = vrot.slane %v8437_v48, 7  ;;  %v8458_v48 = vld [vmem:[#allocation13 + $0x20] sm:$0xff] }
 0x460   :  { %14507 = vst [vmem:[#allocation93_spill] sm:$0xff] %v8458_v48 }
 0x461   :  { %v8423_v42 = vpop.permute.xlu1 %1627  ;;  %v8435_v25 = vpop.permute.xlu2 %1705  ;;  %v8447_v7 = vsel %vm351_vm0, %v2319_v37, %v2320_v46 }
 0x462   :  { %14500 = vst [vmem:[#allocation86_spill] sm:$0xff] %v8435_v25  ;;  %v1646_v25 = vmul.f32 %v8200_v47, %v14463_v51 }
 0x463   :  { %1851 = vrot.lane.b32.xlu0 %v8403_v19, %s6361_s2  ;;  %14503 = vst [vmem:[#allocation89_spill] sm:$0xff] %v8447_v7 }
 0x465   :  { %v8429_v2 = vpop.permute.xlu0 %1631 }
 0x466   :  { %14499 = vst [vmem:[#allocation81_spill] sm:$0xff] %v8429_v2  ;;  %v2323_v2 = vrot.slane %v8458_v48, 7  ;;  %v8480_v48 = vld [vmem:[#allocation13 + $0x30] sm:$0xff] }
 0x467   :  { %2339 = vrot.lane.b32.xlu1 %v8463_v63, %s6360_s1  ;;  %14511 = vst [vmem:[#allocation97_spill] sm:$0xff] %v8480_v48  ;;  %v2325_v3 = vrot.slane %v8480_v48, 7 }
 0x468   :  { %v8472_v57 = vsel %vm351_vm0, %v2322_v16, %v2323_v2 }
 0x469   :  { %v8431_v8 = vpop.permute.xlu1 %1633  ;;  %v8453_v4 = vpop.permute.xlu2 %1743  ;;  %14509 = vst [vmem:[#allocation95_spill] sm:$0xff] %v8472_v57  ;;  %v8499_v47 = vsel %vm351_vm0, %v2325_v3, %v2326_v18 }
 0x46a   :  { %14505 = vst [vmem:[#allocation91_spill] sm:$0xff] %v8453_v4  ;;  %v8477_v4 = vld [vmem:[#allocation13 + $0x28] sm:$0xff] }
 0x46b   :  { %2337 = vrot.lane.b32.xlu0 %v8447_v7, %s6360_s1  ;;  %14510 = vst [vmem:[#allocation96_spill] sm:$0xff] %v8477_v4  ;;  %v2324_v55 = vrot.slane %v8477_v4, 7  ;;  %v1654_v4 = vadd.f32 %v1646_v25, %v1638_v22  ;;  %v1726_v22 = vmul.f32 %v8180_v15, %v6662_v50 }
 0x46c   :  { %14515 = vst [vmem:[#allocation101_spill] sm:$0xff] %v8499_v47 }
 0x46d   :  { %v8433_v30 = vpop.permute.xlu0 %1661  ;;  %v8492_v49 = vsel %vm351_vm0, %v2323_v2, %v2324_v55  ;;  %v1641_v2 = vmul.f32 %v8368_v27, %v6640_v23 }
 0x46e   :  { %14514 = vst [vmem:[#allocation100_spill] sm:$0xff] %v8492_v49 }
 0x46f   :  { %2345 = vrot.lane.b32.xlu1 %v8492_v49, %s6360_s1 }
 0x471   :  { %v1664_v52 = vpop.permute.xlu1 %1663  ;;  %v8488_v11 = vpop.permute.xlu2 %1749 }
 0x472   :  { %v1678_v44 = vmul.f32 %v1664_v52, %v6649_v36  ;;  %14513 = vst [vmem:[#allocation99_spill] sm:$0xff] %v8488_v11  ;;  %v1649_v11 = vmul.f32 %v8227_v33, %v14463_v51 }
 0x473   :  { %2343 = vrot.lane.b32.xlu0 %v8472_v57, %s6360_s1 }
 0x474   :  { %v1686_v52 = vadd.f32 %v1678_v44, %v1654_v4  ;;  %v1657_v4 = vadd.f32 %v1649_v11, %v1641_v2 }
 0x475   :  { %v8443_v19 = vpop.permute.xlu0 %1667 }
 0x479   :  { %v1670_v6 = vpop.permute.xlu1 %1669  ;;  %v8523_v15 = vpop.permute.xlu2 %1755 }
 0x47a   :  { %v1681_v34 = vmul.f32 %v1670_v6, %v6649_v36  ;;  %v1729_v6 = vmul.f32 %v8211_v28, %v6662_v50 }
 0x47b   :  { %2349 = vrot.lane.b32.xlu0 %v8499_v47, %s6360_s1 }
 0x47c   :  { %v1689_v27 = vadd.f32 %v1681_v34, %v1657_v4 }
 0x47d   :  { %v8468_v13 = vpop.permute.xlu0 %1673 }
 0x481   :  { %v1676_v46 = vpop.permute.xlu1 %1675 }
 0x482   :  { %v1684_v2 = vmul.f32 %v1676_v46, %v6649_v36 }
 0x483   :  { %2381 = vrot.lane.b32.xlu0 %v8463_v63, %s6361_s2  ;;  %v14532_v63 = vld [vmem:[#allocation22_spill] sm:$0xff] }
 0x485   :  { %v1696_v5 = vpop.permute.xlu0 %1695 }
 0x486   :  { %v1710_v48 = vmul.f32 %v1696_v5, %v6652_v0  ;;  %v8517_v5 = vsel %vm351_vm0, %v2326_v18, %v2319_v37  ;;  %v1644_v18 = vmul.f32 %v8393_v35, %v6640_v23 }
 0x487   :  { %14516 = vst [vmem:[#allocation102_spill] sm:$0xff] %v8517_v5  ;;  %2335 = vrot.lane.b32.xlu2 %v8517_v5, %s6360_s1  ;;  %2377 = vrot.lane.b32.xlu1 %v8517_v5, %s6361_s2 }
 0x488   :  { %v1718_v25 = vadd.f32 %v1710_v48, %v1686_v52  ;;  %v1652_v52 = vmul.f32 %v8253_v62, %v14463_v51  ;;  %v8550_v62 = vpop.permute.xlu2 %1793 }
 0x489   :  { %v8508_v58 = vpop.permute.xlu1 %1697 }
 0x48a   :  { %v8513_v44 = vadd.f32 %v1726_v22, %v1718_v25  ;;  %v8541_v22 = vsel %vm351_vm0, %v2321_v21, %v2322_v16  ;;  %v1660_v25 = vadd.f32 %v1652_v52, %v1644_v18  ;;  %v1732_v16 = vmul.f32 %v8237_v26, %v6662_v50 }
 0x48b   :  { %14517 = vst [vmem:[#allocation103_spill] sm:$0xff] %v8541_v22  ;;  %2387 = vrot.lane.b32.xlu0 %v8492_v49, %s6361_s2  ;;  %v1637_v18 = vmul.f32 %v8413_v54, %v6640_v23  ;;  %v1645_v26 = vmul.f32 %v8249_v10, %v14463_v51  ;;  %v1640_v54 = vmul.f32 %v8423_v42, %v6640_v23 }
 0x48c   :  { %v1692_v35 = vadd.f32 %v1684_v2, %v1660_v25  ;;  %v1709_v25 = vmul.f32 %v8340_v56, %v6652_v0  ;;  %v1648_v10 = vmul.f32 %v8276_v20, %v14463_v51 }
 0x48d   :  { %v1702_v48 = vpop.permute.xlu0 %1701 }
 0x48e   :  { %v1713_v33 = vmul.f32 %v1702_v48, %v6652_v0 }
 0x48f   :  { %2383 = vrot.lane.b32.xlu1 %v8541_v22, %s6361_s2  ;;  %2341 = vrot.lane.b32.xlu2 %v8541_v22, %s6360_s1 }
 0x490   :  { %v1721_v37 = vadd.f32 %v1713_v33, %v1689_v27  ;;  %v8558_v27 = vsel %vm351_vm0, %v2324_v55, %v2325_v3  ;;  %v1653_v55 = vadd.f32 %v1645_v26, %v1637_v18  ;;  %v1656_v18 = vadd.f32 %v1648_v10, %v1640_v54 }
 0x491   :  { %v8532_v11 = vpop.permute.xlu1 %1703  ;;  %14518 = vst [vmem:[#allocation104_spill] sm:$0xff] %v8558_v27  ;;  %v1725_v26 = vmul.f32 %v8109_v32, %v6662_v50  ;;  %v1712_v54 = vmul.f32 %v8427_v1, %v6652_v0  ;;  %v1643_v32 = vmul.f32 %v8431_v8, %v6640_v23  ;;  %v1683_v1 = vmul.f32 %v8468_v13, %v6649_v36 }
 0x492   :  { %v8537_v34 = vadd.f32 %v1729_v6, %v1721_v37  ;;  %v1677_v6 = vmul.f32 %v8433_v30, %v6649_v36  ;;  %v8572_v37 = vpop.permute.xlu2 %1799 }
 0x494   :  { %v1685_v52 = vadd.f32 %v1677_v6, %v1653_v55  ;;  %v14521_v6 = vld [vmem:[#allocation28_spill] sm:$0xff] }
 0x495   :  { %v1708_v28 = vpop.permute.xlu0 %1707 }
 0x496   :  { %v1716_v4 = vmul.f32 %v1708_v28, %v6652_v0  ;;  %v1717_v30 = vadd.f32 %v1709_v25, %v1685_v52  ;;  %v1680_v28 = vmul.f32 %v8443_v19, %v6649_v36  ;;  %v1432_v19 = vadd.f32 %v8049_v61, %v7905_v53  ;;  %v14522_v52 = vld [vmem:[#allocation43_spill] sm:$0xff] }
 0x497   :  { %2389 = vrot.lane.b32.xlu1 %v8558_v27, %s6361_s2  ;;  %2347 = vrot.lane.b32.xlu2 %v8558_v27, %s6360_s1  ;;  %v1869_v25 = vmul.f32 4.0, %v14522_v52  ;;  %v1821_v53 = vmul.f32 %v8359_v17, %v6672_v43  ;;  %v1651_v61 = vmul.f32 %v8291_v59, %v14463_v51  ;;  %v1728_v17 = vmul.f32 %v8207_v38, %v6662_v50 }
 0x498   :  { %v1724_v21 = vadd.f32 %v1716_v4, %v1692_v35  ;;  %v14519_v35 = vld [vmem:[#allocation68_spill] sm:$0xff]  ;;  %v14520_v4 = vld [vmem:[#allocation77_spill] sm:$0xff]  ;;  %v1688_v27 = vadd.f32 %v1680_v28, %v1656_v18  ;;  %v1733_v20 = vadd.f32 %v1725_v26, %v1717_v30  ;;  %v14523_v28 = vld [vmem:[#allocation75_spill] sm:$0xff] }
 0x499   :  { %v1742_v46 = vpop.permute.xlu1 %1741  ;;  %v14524_v26 = vld [vmem:[#allocation48_spill] sm:$0xff] }
 0x49a   :  { %v8554_v48 = vadd.f32 %v1732_v16, %v1724_v21  ;;  %v1429_v16 = vadd.f32 %v14520_v4, %v14519_v35  ;;  %v1757_v56 = vmul.f32 %v1742_v46, %v6679_v9  ;;  %v1838_v55 = vpop.permute.xlu2 %1837  ;;  %v1872_v4 = vmul.f32 4.0, %v7839_v39 }
 0x49b   :  { %v1720_v18 = vadd.f32 %v1712_v54, %v1688_v27  ;;  %v1853_v59 = vmul.f32 %v1838_v55, %v14398_v31  ;;  %v14525_v54 = vld [vmem:[#allocation56_spill] sm:$0xff]  ;;  %v14528_v55 = vld [vmem:[#allocation69_spill] sm:$0xff] }
 0x49c   :  { %v1485_v42 = vadd.f32 %v14521_v6, %v1429_v16  ;;  %v1765_v46 = vadd.f32 %v1757_v56, %v1733_v20  ;;  %v1488_v16 = vadd.f32 %v8094_v29, %v1432_v19  ;;  %v1430_v56 = vadd.f32 %v8055_v60, %v14524_v26 }
 0x49d   :  { %v8564_v33 = vpop.permute.xlu0 %1745  ;;  %v8616_v6 = vmul.f32 4.0, %v7875_v40  ;;  %v1639_v29 = vmul.f32 %v8419_v24, %v6640_v23  ;;  %v1659_v20 = vadd.f32 %v1651_v61, %v1643_v32  ;;  %v8625_v19 = vmul.f32 4.0, %v7814_v41  ;;  %v14526_v24 = vld [vmem:[#allocation36_spill] sm:$0xff] }
 0x49e   :  { %v1557_v30 = vadd.f32 %v14523_v28, %v1485_v42  ;;  %v1736_v28 = vadd.f32 %v1728_v17, %v1720_v18  ;;  %v14527_v61 = vld [vmem:[#allocation60_spill] sm:$0xff] }
 0x49f   :  { %2379 = vrot.lane.b32.xlu2 %v8447_v7, %s6361_s2  ;;  %v1691_v38 = vadd.f32 %v1683_v1, %v1659_v20  ;;  %v1435_v26 = vadd.f32 %v14528_v55, %v14527_v61  ;;  %v14533_v1 = vld [vmem:[#allocation47_spill] sm:$0xff] }
 0x4a0   :  { %v1877_v60 = vsub.f32 %v1869_v25, %v1557_v30 }
 0x4a1   :  { %v1748_v3 = vpop.permute.xlu1 %1747 }
 0x4a2   :  { %v1760_v27 = vmul.f32 %v1748_v3, %v6679_v9  ;;  %v14529_v3 = vld [vmem:[#allocation30_spill] sm:$0xff]  ;;  %v1844_v30 = vpop.permute.xlu2 %1843  ;;  %v1901_v17 = vmul.f32 %v1877_v60, %v14533_v1 }
 0x4a4   :  { %v1768_v22 = vadd.f32 %v1760_v27, %v1736_v28  ;;  %v14536_v28 = vld [vmem:[#allocation80_spill] sm:$0xff] }
 0x4a5   :  { %v8576_v2 = vpop.permute.xlu0 %1751 }
 0x4a7   :  { %2385 = vrot.lane.b32.xlu2 %v8472_v57, %s6361_s2 }
 0x4a9   :  { %v8588_v21 = vpop.permute.xlu1 %1753 }
 0x4ad   :  { %v1790_v35 = vpop.permute.xlu0 %1789 }
 0x4ae   :  { %v1805_v10 = vmul.f32 %v1790_v35, %v6670_v14  ;;  %v1560_v35 = vadd.f32 %v7980_v12, %v1488_v16  ;;  %v14531_v16 = vld [vmem:[#allocation86_spill] sm:$0xff] }
 0x4b0   :  { %v1813_v8 = vadd.f32 %v1805_v10, %v1765_v46  ;;  %v1647_v46 = vmul.f32 %v14525_v54, %v14463_v51  ;;  %v8631_v10 = vmul.f32 4.0, %v14526_v24  ;;  %v1715_v54 = vmul.f32 %v14531_v16, %v6652_v0 }
 0x4b1   :  { %v1792_v42 = vpop.permute.xlu1 %1791  ;;  %v1880_v20 = vsub.f32 %v1872_v4, %v1560_v35  ;;  %v14538_v35 = vld [vmem:[#allocation58_spill] sm:$0xff] }
 0x4b2   :  { %v1829_v13 = vadd.f32 %v1821_v53, %v1813_v8  ;;  %v1486_v53 = vadd.f32 %v14529_v3, %v1430_v56  ;;  %v14530_v8 = vld [vmem:[#allocation44_spill] sm:$0xff]  ;;  %v1655_v25 = vadd.f32 %v1647_v46, %v1639_v29  ;;  %v14535_v29 = vld [vmem:[#allocation41_spill] sm:$0xff]  ;;  %v1723_v61 = vadd.f32 %v1715_v54, %v1691_v38  ;;  %v14539_v54 = vld [vmem:[#allocation39_spill] sm:$0xff] }
 0x4b3   :  { %v8637_v49 = vmul.f32 4.0, %v14530_v8  ;;  %v1824_v46 = vmul.f32 %v14535_v29, %v6672_v43  ;;  %v14537_v3 = vld [vmem:[#allocation81_spill] sm:$0xff] }
 0x4b4   :  { %v1861_v32 = vadd.f32 %v1853_v59, %v1829_v13  ;;  %v14534_v59 = vld [vmem:[#allocation31_spill] sm:$0xff]  ;;  %v1711_v13 = vmul.f32 %v8508_v58, %v6652_v0  ;;  %v1642_v60 = vmul.f32 %v14537_v3, %v6640_v23  ;;  %v1856_v58 = vmul.f32 %v1844_v30, %v14398_v31  ;;  %v14542_v29 = vld [vmem:[#allocation65_spill] sm:$0xff] }
 0x4b5   :  { %v1796_v12 = vpop.permute.xlu0 %1795  ;;  %v1679_v56 = vmul.f32 %v14534_v59, %v6649_v36  ;;  %v1763_v59 = vmul.f32 %v8588_v21, %v6679_v9  ;;  %v1650_v23 = vmul.f32 %v14542_v29, %v14463_v51  ;;  %v14544_v21 = vld [vmem:[#allocation91_spill] sm:$0xff] }
 0x4b6   :  { %v1885_v5 = vmul.f32 %v1861_v32, %v14532_v63  ;;  %v1808_v18 = vmul.f32 %v1796_v12, %v6670_v14  ;;  %v8652_v32 = vadd.f32 %v14536_v28, %v1486_v53  ;;  %v1731_v12 = vmul.f32 %v14538_v35, %v6662_v50  ;;  %v14541_v53 = vld [vmem:[#allocation35_spill] sm:$0xff] }
 0x4b7   :  { %v1687_v4 = vadd.f32 %v1679_v56, %v1655_v25  ;;  %v1904_v56 = vmul.f32 %v1880_v20, %v14533_v1  ;;  %v14543_v35 = vld [vmem:[#allocation19_spill] sm:$0xff]  ;;  %v1658_v57 = vadd.f32 %v1650_v23, %v1642_v60  ;;  %v14546_v60 = vld [vmem:[#allocation73_spill] sm:$0xff] }
 0x4b8   :  { %v1816_v55 = vadd.f32 %v1808_v18, %v1768_v22  ;;  %v1893_v27 = vsub.f32 %v14522_v52, %v1885_v5  ;;  %v14540_v5 = vld [vmem:[#allocation74_spill] sm:$0xff]  ;;  %v1491_v18 = vadd.f32 %v14541_v53, %v1435_v26  ;;  %v1739_v28 = vadd.f32 %v1731_v12, %v1723_v61  ;;  %v14547_v12 = vld [vmem:[#allocation67_spill] sm:$0xff]  ;;  %v14550_v23 = vld [vmem:[#allocation49_spill] sm:$0xff] }
 0x4b9   :  { %v1798_v16 = vpop.permute.xlu1 %1797  ;;  %v1433_v52 = vadd.f32 %v14540_v5, %v14539_v54  ;;  %v1719_v25 = vadd.f32 %v1711_v13, %v1687_v4  ;;  %v1759_v26 = vmul.f32 %v8564_v33, %v6679_v9  ;;  %v1806_v13 = vmul.f32 %v1792_v42, %v6670_v14 }
 0x4ba   :  { %v1832_v38 = vadd.f32 %v1824_v46, %v1816_v55  ;;  %v1909_v22 = vsub.f32 %v1893_v27, %v1901_v17  ;;  %v1758_v17 = vmul.f32 %v14544_v21, %v6679_v9  ;;  %v14545_v46 = vld [vmem:[#allocation71_spill] sm:$0xff]  ;;  %v1771_v51 = vadd.f32 %v1763_v59, %v1739_v28  ;;  %v14548_v59 = vld [vmem:[#allocation72_spill] sm:$0xff] }
 0x4bb   :  { %v1727_v55 = vmul.f32 %v14545_v46, %v6662_v50  ;;  %v1563_v4 = vadd.f32 %v14546_v60, %v1491_v18  ;;  %v1827_v42 = vmul.f32 %v14548_v59, %v6672_v43  ;;  %v1878_v29 = vsub.f32 %v8625_v19, %v8652_v32  ;;  %v14549_v18 = vld [vmem:[#allocation38_spill] sm:$0xff] }
 0x4bc   :  { %v1864_v3 = vadd.f32 %v1856_v58, %v1832_v38  ;;  %v8668_v30 = vsub.f32 %v14543_v35, %v1909_v22  ;;  %v1682_v58 = vmul.f32 %v14547_v12, %v6649_v36  ;;  %v1714_v38 = vmul.f32 %v8532_v11, %v6652_v0  ;;  %v1850_v22 = vpop.permute.xlu2 %1849  ;;  %v14551_v46 = vld [vmem:[#allocation82_spill] sm:$0xff] }
 0x4bd   :  { %v1802_v27 = vpop.permute.xlu0 %1801  ;;  %v1735_v33 = vadd.f32 %v1727_v55, %v1719_v25  ;;  %v1766_v54 = vadd.f32 %v1758_v17, %v8513_v44  ;;  %v1431_v28 = vadd.f32 %v14550_v23, %v14549_v18  ;;  %v1859_v0 = vmul.f32 %v1850_v22, %v14398_v31  ;;  %v14552_v44 = vld [vmem:[#allocation78_spill] sm:$0xff]  ;;  %v14559_v18 = vld [vmem:[#allocation63_spill] sm:$0xff] }
 0x4be   :  { %v1888_v20 = vmul.f32 %v1864_v3, %v14532_v63  ;;  %v1811_v61 = vmul.f32 %v1802_v27, %v6670_v14  ;;  %1925 = vrot.lane.b32.xlu1 %v8668_v30, %s6361_s2  ;;  %v1690_v36 = vadd.f32 %v1682_v58, %v1658_v57  ;;  %v1489_v55 = vadd.f32 %v14551_v46, %v1433_v52  ;;  %v14553_v32 = vld [vmem:[#allocation42_spill] sm:$0xff]  ;;  %v14556_v52 = vld [vmem:[#allocation64_spill] sm:$0xff] }
 0x4bf   :  { %v1767_v3 = vadd.f32 %v1759_v26, %v1735_v33  ;;  %v1814_v11 = vadd.f32 %v1806_v13, %v1766_v54  ;;  %v1487_v17 = vadd.f32 %v14552_v44, %v1431_v28  ;;  %v1883_v19 = vsub.f32 %v8616_v6, %v1563_v4  ;;  %v14555_v13 = vld [vmem:[#allocation99_spill] sm:$0xff]  ;;  %v14557_v33 = vld [vmem:[#allocation54_spill] sm:$0xff]  ;;  %v14560_v28 = vld [vmem:[#allocation53_spill] sm:$0xff] }
 0x4c0   :  { %v1819_v5 = vadd.f32 %v1811_v61, %v1771_v51  ;;  %v1896_v53 = vsub.f32 %v7839_v39, %v1888_v20  ;;  %v1807_v39 = vmul.f32 %v8550_v62, %v6670_v14  ;;  %v1722_v27 = vadd.f32 %v1714_v38, %v1690_v36  ;;  %v14554_v51 = vld [vmem:[#allocation25_spill] sm:$0xff]  ;;  %v14558_v59 = vld [vmem:[#allocation70_spill] sm:$0xff] }
 0x4c1   :  { %v1804_v35 = vpop.permute.xlu1 %1803  ;;  %v1822_v57 = vmul.f32 %v14553_v32, %v6672_v43  ;;  %v1730_v60 = vmul.f32 %v14556_v52, %v6662_v50  ;;  %v1762_v62 = vmul.f32 %v8576_v2, %v6679_v9  ;;  %v1809_v6 = vmul.f32 %v1798_v16, %v6670_v14  ;;  %v14561_v36 = vld [vmem:[#allocation62_spill] sm:$0xff]  ;;  %v14565_v32 = vld [vmem:[#allocation45_spill] sm:$0xff] }
 0x4c2   :  { %v1835_v25 = vadd.f32 %v1827_v42, %v1819_v5  ;;  %v1912_v21 = vsub.f32 %v1896_v53, %v1904_v56  ;;  %v1761_v56 = vmul.f32 %v14555_v13, %v6679_v9  ;;  %v1815_v61 = vadd.f32 %v1807_v39, %v1767_v3  ;;  %v14563_v39 = vld [vmem:[#allocation79_spill] sm:$0xff]  ;;  %v14566_v13 = vld [vmem:[#allocation33_spill] sm:$0xff] }
 0x4c3   :  { %v1830_v58 = vadd.f32 %v1822_v57, %v1814_v11  ;;  %v1559_v22 = vadd.f32 %v14557_v33, %v1487_v17  ;;  %v1823_v42 = vmul.f32 %v14558_v59, %v6672_v43  ;;  %v1738_v50 = vadd.f32 %v1730_v60, %v1722_v27  ;;  %v14562_v17 = vld [vmem:[#allocation66_spill] sm:$0xff]  ;;  %v14570_v59 = vld [vmem:[#allocation21_spill] sm:$0xff] }
 0x4c4   :  { %v1867_v26 = vadd.f32 %v1859_v0, %v1835_v25  ;;  %v8703_v20 = vsub.f32 %v14554_v51, %v1912_v21  ;;  %v1902_v54 = vmul.f32 %v1878_v29, %v14533_v1  ;;  %v1907_v2 = vmul.f32 %v1883_v19, %v14533_v1 }
 0x4c5   :  { %v1840_v12 = vpop.permute.xlu0 %1839  ;;  %v1769_v16 = vadd.f32 %v1761_v56, %v8537_v34  ;;  %v1561_v23 = vadd.f32 %v14559_v18, %v1489_v55  ;;  %v1434_v3 = vadd.f32 %v14561_v36, %v14560_v28  ;;  %v1770_v0 = vadd.f32 %v1762_v62, %v1738_v50  ;;  %v14571_v50 = vld [vmem:[#allocation26_spill] sm:$0xff] }
 0x4c6   :  { %v1891_v4 = vmul.f32 %v1867_v26, %v14532_v63  ;;  %v1854_v38 = vmul.f32 %v1840_v12, %v14398_v31  ;;  %1931 = vrot.lane.b32.xlu1 %v8703_v20, %s6361_s2  ;;  %v1831_v25 = vadd.f32 %v1823_v42, %v1815_v61  ;;  %v1436_v34 = vadd.f32 %v14563_v39, %v14562_v17 }
 0x4c7   :  { %v1817_v21 = vadd.f32 %v1809_v6, %v1769_v16  ;;  %v1879_v27 = vsub.f32 %v8631_v10, %v1559_v22  ;;  %v1810_v55 = vmul.f32 %v8572_v37, %v6670_v14  ;;  %v1825_v57 = vmul.f32 %v14565_v32, %v6672_v43 }
 0x4c8   :  { %v1862_v5 = vadd.f32 %v1854_v38, %v1830_v58  ;;  %v1899_v53 = vsub.f32 %v7875_v40, %v1891_v4  ;;  %v14564_v40 = vld [vmem:[#allocation84_spill] sm:$0xff]  ;;  %v1881_v61 = vsub.f32 %v8637_v49, %v1561_v23  ;;  %v1764_v52 = vmul.f32 %v8523_v15, %v6679_v9  ;;  %v14567_v4 = vld [vmem:[#allocation83_spill] sm:$0xff] }
 0x4c9   :  { %v1842_v11 = vpop.permute.xlu1 %1841  ;;  %v1490_v19 = vadd.f32 %v14564_v40, %v1434_v3  ;;  %v1818_v10 = vadd.f32 %v1810_v55, %v1770_v0  ;;  %v1812_v60 = vmul.f32 %v1804_v35, %v6670_v14  ;;  %v1833_v12 = vadd.f32 %v1825_v57, %v1817_v21  ;;  %v14568_v38 = vld [vmem:[#allocation24_spill] sm:$0xff]  ;;  %v14569_v14 = vld [vmem:[#allocation85_spill] sm:$0xff]  ;;  %v14577_v57 = vld [vmem:[#allocation27_spill] sm:$0xff] }
 0x4ca   :  { %v1886_v46 = vmul.f32 %v1862_v5, %v14532_v63  ;;  %v1855_v29 = vmul.f32 %v1842_v11, %v14398_v31  ;;  %v1915_v44 = vsub.f32 %v1899_v53, %v1907_v2  ;;  %v1492_v58 = vadd.f32 %v14567_v4, %v1436_v34  ;;  %v14572_v23 = vld [vmem:[#allocation76_spill] sm:$0xff]  ;;  %v14583_v4 = vld [vmem:[#allocation23_spill] sm:$0xff] }
 0x4cb   :  { %v1903_v49 = vmul.f32 %v1879_v27, %v14533_v1  ;;  %v1562_v33 = vadd.f32 %v14568_v38, %v1490_v19  ;;  %v1772_v9 = vadd.f32 %v1764_v52, %v8554_v48  ;;  %v1826_v15 = vmul.f32 %v14569_v14, %v6672_v43  ;;  %v14574_v21 = vld [vmem:[#allocation32_spill] sm:$0xff]  ;;  %v14585_v38 = vld [vmem:[#allocation90_spill] sm:$0xff] }
 0x4cc   :  { %v1894_v26 = vsub.f32 %v7814_v41, %v1886_v46  ;;  %v1863_v51 = vadd.f32 %v1855_v29, %v1831_v25  ;;  %v8738_v56 = vsub.f32 %v14566_v13, %v1915_v44  ;;  %v1874_v2 = vmul.f32 4.0, %v14571_v50  ;;  %v14575_v29 = vld [vmem:[#allocation37_spill] sm:$0xff] }
 0x4cd   :  { %v1846_v62 = vpop.permute.xlu0 %1845  ;;  %v1834_v53 = vadd.f32 %v1826_v15, %v1818_v10  ;;  %v1564_v28 = vadd.f32 %v14572_v23, %v1492_v58  ;;  %v1905_v3 = vmul.f32 %v1881_v61, %v14533_v1  ;;  %v1876_v44 = vmul.f32 4.0, %v14575_v29  ;;  %v14578_v61 = vld [vmem:[#allocation29_spill] sm:$0xff] }
 0x4ce   :  { %v1887_v37 = vmul.f32 %v1863_v51, %v14532_v63  ;;  %v1857_v6 = vmul.f32 %v1846_v62, %v14398_v31  ;;  %1937 = vrot.lane.b32.xlu1 %v8738_v56, %s6361_s2  ;;  %v1910_v41 = vsub.f32 %v1894_v26, %v1902_v54  ;;  %v1820_v54 = vadd.f32 %v1812_v60, %v1772_v9  ;;  %v14579_v60 = vld [vmem:[#allocation93_spill] sm:$0xff] }
 0x4cf   :  { %v1882_v0 = vsub.f32 %v1874_v2, %v1562_v33  ;;  %6212 = vrcp.f32 %v14583_v4  ;;  %v73_v9 = vand.u32 2147483648, %v14583_v4  ;;  %vm67_vm3 = vweird.f32 %v14583_v4 }
 0x4d0   :  { %v1895_v35 = vsub.f32 %v14526_v24, %v1887_v37  ;;  %v1865_v22 = vadd.f32 %v1857_v6, %v1833_v12  ;;  %v8756_v42 = vsub.f32 %v14570_v59, %v1910_v41  ;;  %v14573_v24 = vld [vmem:[#allocation57_spill] sm:$0xff]  ;;  %v14580_v37 = vld [vmem:[#allocation34_spill] sm:$0xff]  ;;  %v14581_v6 = vld [vmem:[#allocation87_spill] sm:$0xff]  ;;  %v71_v15 = vand.u32 2147483647, %v14583_v4 }
 0x4d1   :  { %v1848_v16 = vpop.permute.xlu1 %1847  ;;  %v1828_v36 = vmul.f32 %v14573_v24, %v6672_v43  ;;  %v14576_v43 = vld [vmem:[#allocation88_spill] sm:$0xff]  ;;  %v1906_v19 = vmul.f32 %v1882_v0, %v14533_v1  ;;  %v14582_v41 = vld [vmem:[#allocation98_spill] sm:$0xff]  ;;  %v14586_v59 = vld [vmem:[#allocation97_spill] sm:$0xff]  ;;  %v2497_v24 = vrot.slane %v14579_v60, 1 }
 0x4d2   :  { %v1889_v5 = vmul.f32 %v1865_v22, %v14532_v63  ;;  %v1858_v18 = vmul.f32 %v1848_v16, %v14398_v31  ;;  %1927 = vrot.lane.b32.xlu2 %v8756_v42, %s6361_s2  ;;  %v1911_v48 = vsub.f32 %v1895_v35, %v1903_v49  ;;  %v14584_v49 = vld [vmem:[#allocation92_spill] sm:$0xff]  ;;  %v74_v22 = vor.u32 1.1754944e-38, %v73_v9 }
 0x4d3   :  { %v1836_v39 = vadd.f32 %v1828_v36, %v1820_v54  ;;  %vm72_vm8 = vcmp.eq.f32.partialorder %v71_v15, 8.507059e+37  ;;  %v2493_v54 = vrot.slane %v14581_v6, 1  ;;  %v2494_v16 = vrot.slane %v14576_v43, 1 }
 0x4d4   :  { %v1897_v11 = vsub.f32 %v14530_v8, %v1889_v5  ;;  %v1866_v25 = vadd.f32 %v1858_v18, %v1834_v53  ;;  %v8769_v46 = vsub.f32 %v14574_v21, %v1911_v48  ;;  %v1884_v8 = vsub.f32 %v1876_v44, %v1564_v28 }
 0x4d5   :  { %v1852_v17 = vpop.permute.xlu0 %1851  ;;  %v6213_v58 = vpop.eup %6212  ;;  %v8829_v48 = vsel %vm575_vm1, %v2493_v54, %v2494_v16  ;;  %v2496_v28 = vrot.slane %v14584_v49, 1  ;;  %v2499_v0 = vrot.slane %v14586_v59, 1  ;;  %v2495_v44 = vrot.slane %v14585_v38, 1 }
 0x4d6   :  { %v1890_v34 = vmul.f32 %v1866_v25, %v14532_v63  ;;  %v1860_v27 = vmul.f32 %v1852_v17, %v14398_v31  ;;  %1929 = vrot.lane.b32.xlu0 %v8769_v46, %s6361_s2  ;;  %2412 = vrot.lane.b32.xlu1 %v14576_v43, %s6360_s1  ;;  %v1913_v40 = vsub.f32 %v1897_v11, %v1905_v3  ;;  %vm68_vm6 = vweird.f32 %v6213_v58 }
 0x4d7   :  { %v1908_v10 = vmul.f32 %v1884_v8, %v14533_v1  ;;  %v63_v33 = vmul.f32 %v6213_v58, %v14583_v4  ;;  %vm69_vm7 = vmor %vm67_vm3, %vm68_vm6  ;;  %v8843_v36 = vsel %vm575_vm1, %v2496_v28, %v2497_v24  ;;  %v2500_v11 = vrot.slane %v14582_v41, 1 }
 0x4d8   :  { %v1898_v55 = vsub.f32 %v14571_v50, %v1890_v34  ;;  %v1868_v32 = vadd.f32 %v1860_v27, %v1836_v39  ;;  %v8781_v26 = vsub.f32 %v14577_v57, %v1913_v40  ;;  %v14587_v50 = vld [vmem:[#allocation96_spill] sm:$0xff]  ;;  %14588 = vst [vmem:[#allocation68_spill] sm:$0xff] %v8843_v36  ;;  %v8874_v39 = vsel %vm575_vm1, %v2495_v44, %v2496_v28 }
 0x4d9   :  { %v64_v14 = vsub.f32 1.0, %v63_v33  ;;  %v8835_v23 = vpop.permute.xlu1 %2339  ;;  %v8859_v21 = vsel %vm575_vm1, %v2499_v0, %v2500_v11  ;;  %14592 = vst [vmem:[#allocation75_spill] sm:$0xff] %v8874_v39  ;;  %v8878_v34 = vsel %vm575_vm1, %v2494_v16, %v2495_v44  ;;  %v2498_v27 = vrot.slane %v14587_v50, 1 }
 0x4da   :  { %v1892_v51 = vmul.f32 %v1868_v32, %v14532_v63  ;;  %1933 = vrot.lane.b32.xlu2 %v8781_v26, %s6361_s2  ;;  %v1914_v31 = vsub.f32 %v1898_v55, %v1906_v19  ;;  %14589 = vst [vmem:[#allocation77_spill] sm:$0xff] %v8859_v21 }
 0x4db   :  { %v65_v35 = vmul.f32 %v6213_v58, %v64_v14  ;;  %14593 = vst [vmem:[#allocation48_spill] sm:$0xff] %v8878_v34  ;;  %v8893_v8 = vsel %vm575_vm1, %v2498_v27, %v2499_v0  ;;  %v8897_v19 = vsel %vm575_vm1, %v2497_v24, %v2498_v27 }
 0x4dc   :  { %v1900_v13 = vsub.f32 %v14575_v29, %v1892_v51  ;;  %v8788_v52 = vsub.f32 %v14578_v61, %v1914_v31  ;;  %14594 = vst [vmem:[#allocation56_spill] sm:$0xff] %v8893_v8  ;;  %v8913_v51 = vsel %vm575_vm1, %v2500_v11, %v2493_v54  ;;  %v1951_v31 = vrot.slane %v8769_v46, 1  ;;  %v14600_v11 = vld [vmem:[#allocation95_spill] sm:$0xff] }
 0x4dd   :  { %v66_v2 = vadd.f32 %v6213_v58, %v65_v35  ;;  %14595 = vst [vmem:[#allocation36_spill] sm:$0xff] %v8897_v19 }
 0x4de   :  { %1935 = vrot.lane.b32.xlu0 %v8788_v52, %s6361_s2  ;;  %2418 = vrot.lane.b32.xlu1 %v14579_v60, %s6360_s1  ;;  %v1916_v62 = vsub.f32 %v1900_v13, %v1908_v10  ;;  %14598 = vst [vmem:[#allocation30_spill] sm:$0xff] %v8913_v51  ;;  %v1950_v13 = vrot.slane %v8756_v42, 1 }
 0x4df   :  { %v70_v5 = vsel %vm69_vm7, %v6213_v58, %v66_v2 }
 0x4e0   :  { %v8796_v12 = vsub.f32 %v14580_v37, %v1916_v62  ;;  %v75_v53 = vsel %vm72_vm8, %v74_v22, %v70_v5  ;;  %v1962_v10 = vsel %vm575_vm1, %v1950_v13, %v1951_v31  ;;  %v13927_v37 = vrot.slane %v8788_v52, 1 }
 0x4e1   :  { %v8825_v18 = vpop.permute.xlu2 %2335  ;;  %6181 = vpush %v75_v53  ;;  %v8853_v25 = vpop.permute.xlu1 %2345  ;;  %v8931_v62 = vsub.f32 %v1962_v10, %v8756_v42 }
 0x4e2   :  { %1939 = vrot.lane.b32.xlu2 %v8796_v12, %s6361_s2  ;;  %v1956_v5 = vrot.slane %v8796_v12, 1 }
 0x4e3   :  { %v1998_v33 = vmul.f32 %v8931_v62, %v8931_v62 }
 0x4e6   :  { %2410 = vrot.lane.b32.xlu0 %v14581_v6, %s6360_s1  ;;  %2424 = vrot.lane.b32.xlu1 %v14582_v41, %s6360_s1 }
 0x4e9   :  { %v8845_v3 = vpop.permute.xlu2 %2341 }
 0x4ea   :  { %2391 = vrot.lane.b32.xlu2 %v8499_v47, %s6361_s2 }
 0x4ee   :  { %2416 = vrot.lane.b32.xlu0 %v14584_v49, %s6360_s1  ;;  %2464 = vrot.lane.b32.xlu1 %v14585_v38, %s6361_s2 }
 0x4f1   :  { %v8865_v29 = vpop.permute.xlu2 %2347 }
 0x4f2   :  { %2414 = vrot.lane.b32.xlu2 %v14585_v38, %s6360_s1  ;;  %14590 = vst [vmem:[#allocation28_spill] sm:$0xff] %v8865_v29  ;;  %v1953_v38 = vrot.slane %v8781_v26, 1 }
 0x4f6   :  { %2422 = vrot.lane.b32.xlu0 %v14586_v59, %s6360_s1  ;;  %2470 = vrot.lane.b32.xlu1 %v14587_v50, %s6361_s2 }
 0x4f9   :  { %v8870_v17 = vpop.permute.xlu1 %2377  ;;  %v8887_v40 = vpop.permute.xlu2 %2379 }
 0x4fa   :  { %2420 = vrot.lane.b32.xlu2 %v14587_v50, %s6360_s1  ;;  %14591 = vst [vmem:[#allocation43_spill] sm:$0xff] %v8870_v17 }
 0x4fe   :  { %2462 = vrot.lane.b32.xlu0 %v14576_v43, %s6361_s2  ;;  %2509 = vrot.lane.b32.xlu1 %v8829_v48, %s6360_s1  ;;  %v8885_v43 = vpop.permute.xlu0 %2337 }
 0x501   :  { %v8899_v55 = vpop.permute.xlu1 %2383  ;;  %v8909_v57 = vpop.permute.xlu2 %2385 }
 0x502   :  { %2460 = vrot.lane.b32.xlu2 %v14581_v6, %s6361_s2  ;;  %14596 = vst [vmem:[#allocation60_spill] sm:$0xff] %v8899_v55 }
 0x503   :  { %14597 = vst [vmem:[#allocation69_spill] sm:$0xff] %v8909_v57  ;;  %v14613_v57 = vld [vmem:[#allocation104_spill] sm:$0xff] }
 0x506   :  { %2468 = vrot.lane.b32.xlu0 %v14579_v60, %s6361_s2  ;;  %2515 = vrot.lane.b32.xlu1 %v8843_v36, %s6360_s1  ;;  %v8905_v32 = vpop.permute.xlu0 %2343  ;;  %v1949_v60 = vrot.slane %v8668_v30, 1 }
 0x508   :  { %v1963_v58 = vsel %vm575_vm1, %v1949_v60, %v1950_v13 }
 0x509   :  { %v8921_v61 = vpop.permute.xlu1 %2389  ;;  %v8951_v14 = vsub.f32 %v1963_v58, %v8668_v30 }
 0x50a   :  { %2466 = vrot.lane.b32.xlu2 %v14584_v49, %s6361_s2  ;;  %14599 = vst [vmem:[#allocation44_spill] sm:$0xff] %v8921_v61  ;;  %v14605_v61 = vld [vmem:[#allocation103_spill] sm:$0xff] }
 0x50b   :  { %v1997_v54 = vmul.f32 %v8951_v14, %v8951_v14 }
 0x50e   :  { %2474 = vrot.lane.b32.xlu0 %v14582_v41, %s6361_s2  ;;  %2521 = vrot.lane.b32.xlu1 %v8859_v21, %s6360_s1  ;;  %v8934_v6 = vpop.permute.xlu0 %2349 }
 0x512   :  { %2472 = vrot.lane.b32.xlu2 %v14586_v59, %s6361_s2  ;;  %v1952_v59 = vrot.slane %v8703_v20, 1  ;;  %s9019_s13 = spop %6181 }
 0x513   :  { %s77_s14 = smul.f32 %s9019_s13, %s8994_s12 }
 0x514   :  { %v1960_v53 = vsel %vm575_vm1, %v1952_v59, %v1953_v38 }
 0x515   :  { %v8992_v10 = vsub.f32 %v1960_v53, %v8703_v20 }
 0x516   :  { %2513 = vrot.lane.b32.xlu0 %v8874_v39, %s6360_s1  ;;  %2561 = vrot.lane.b32.xlu1 %v8878_v34, %s6361_s2  ;;  %v8979_v0 = vpop.permute.xlu0 %2381 }
 0x51a   :  { %2511 = vrot.lane.b32.xlu2 %v8878_v34, %s6360_s1 }
 0x51e   :  { %2519 = vrot.lane.b32.xlu0 %v8893_v8, %s6360_s1  ;;  %2567 = vrot.lane.b32.xlu1 %v8897_v19, %s6361_s2 }
 0x522   :  { %2517 = vrot.lane.b32.xlu2 %v8897_v19, %s6360_s1 }
 0x526   :  { %2559 = vrot.lane.b32.xlu0 %v8829_v48, %s6361_s2  ;;  %2573 = vrot.lane.b32.xlu1 %v8913_v51, %s6361_s2 }
 0x52a   :  { %2523 = vrot.lane.b32.xlu2 %v8913_v51, %s6360_s1 }
 0x52c   :  { %v1928_v41 = vpop.permute.xlu2 %1927 }
 0x52d   :  { %v8939_v49 = vsub.f32 %v1928_v41, %v8756_v42  ;;  %v1959_v42 = vsel %vm575_vm1, %v1953_v38, %v13927_v37  ;;  %v1964_v41 = vsel %vm575_vm1, %v1956_v5, %v1949_v60  ;;  %v2000_v60 = vmul.f32 %v8992_v10, %v8992_v10 }
 0x52e   :  { %2565 = vrot.lane.b32.xlu0 %v8843_v36, %s6361_s2  ;;  %4259 = vrot.lane.b32.xlu1 %v8447_v7, %s6360_s1  ;;  %v8970_v16 = vsub.f32 %v1959_v42, %v8781_v26 }
 0x52f   :  { %v1990_v9 = vmul.f32 %v8939_v49, %v8939_v49 }
 0x530   :  { %v1926_v15 = vpop.permute.xlu1 %1925  ;;  %v2001_v13 = vmul.f32 %v8970_v16, %v8970_v16 }
 0x531   :  { %v2006_v35 = vadd.f32 %v1998_v33, %v1990_v9  ;;  %v8958_v22 = vsub.f32 %v1926_v15, %v8668_v30  ;;  %v13928_v33 = vrot.slane %v8738_v56, 1 }
 0x532   :  { %2563 = vrot.lane.b32.xlu2 %v8874_v39, %s6361_s2 }
 0x533   :  { %v8963_v50 = vmax.f32 %v2006_v35, 1e-24  ;;  %v1989_v2 = vmul.f32 %v8958_v22, %v8958_v22  ;;  %v9012_v35 = vsub.f32 %v1964_v41, %v8796_v12 }
 0x534   :  { %v1934_v30 = vpop.permute.xlu2 %1933 }
 0x535   :  { %6214 = vrsqrt.f32 %v8963_v50  ;;  %v2005_v28 = vadd.f32 %v1997_v54, %v1989_v2  ;;  %v8977_v24 = vsub.f32 %v1934_v30, %v8781_v26  ;;  %v1957_v54 = vsel %vm575_vm1, %v13928_v33, %v1956_v5 }
 0x536   :  { %2571 = vrot.lane.b32.xlu0 %v8859_v21, %s6361_s2  ;;  %4265 = vrot.lane.b32.xlu1 %v14600_v11, %s6360_s1  ;;  %v2004_v5 = vmul.f32 %v9012_v35, %v9012_v35  ;;  %vm2037_vm10 = vweird.f32 %v8963_v50 }
 0x537   :  { %v8985_v44 = vmax.f32 %v2005_v28, 1e-24  ;;  %v1993_v27 = vmul.f32 %v8977_v24, %v8977_v24 }
 0x538   :  { %v1932_v26 = vpop.permute.xlu1 %1931 }
 0x539   :  { %6216 = vrsqrt.f32 %v8985_v44  ;;  %v2009_v58 = vadd.f32 %v2001_v13, %v1993_v27  ;;  %v9000_v38 = vsub.f32 %v1932_v26, %v8703_v20  ;;  %v14601_v27 = vld [vmem:[#allocation102_spill] sm:$0xff]  ;;  %vm2027_vm13 = vweird.f32 %v8985_v44 }
 0x53a   :  { %2569 = vrot.lane.b32.xlu2 %v8893_v8, %s6361_s2 }
 0x53b   :  { %v6215_v9 = vpop.eup %6214  ;;  %v9005_v15 = vmax.f32 %v2009_v58, 1e-24  ;;  %v1992_v42 = vmul.f32 %v9000_v38, %v9000_v38  ;;  %v9042_v58 = vpop.permute.xlu0 %2387 }
 0x53c   :  { %v2032_v20 = vmul.f32 %v6215_v9, %v8963_v50  ;;  %v1940_v2 = vpop.permute.xlu2 %1939  ;;  %vm2038_vm9 = vweird.f32 %v6215_v9 }
 0x53d   :  { %6218 = vrsqrt.f32 %v9005_v15  ;;  %v2008_v30 = vadd.f32 %v2000_v60, %v1992_v42  ;;  %v9023_v53 = vsub.f32 %v1940_v2, %v8796_v12  ;;  %v9038_v12 = vsub.f32 %v1957_v54, %v8738_v56  ;;  %v14602_v54 = vld [vmem:[#allocation94_spill] sm:$0xff]  ;;  %vm2039_vm11 = vmor %vm2037_vm10, %vm2038_vm9 }
 0x53e   :  { %v2033_v28 = vmul.f32 %v6215_v9, %v2032_v20  ;;  %4257 = vrot.lane.b32.xlu0 %v14601_v27, %s6360_s1  ;;  %4271 = vrot.lane.b32.xlu1 %v8499_v47, %s6360_s1  ;;  %vm2067_vm2 = vweird.f32 %v9005_v15 }
 0x53f   :  { %v9029_v13 = vpop.eup %6216  ;;  %v9031_v26 = vmax.f32 %v2008_v30, 1e-24  ;;  %v1996_v41 = vmul.f32 %v9023_v53, %v9023_v53 }
 0x540   :  { %v2034_v42 = vmul.f32 0.5, %v2033_v28  ;;  %v2022_v60 = vmul.f32 %v9029_v13, %v8985_v44  ;;  %v1938_v20 = vpop.permute.xlu1 %1937  ;;  %v1961_v28 = vsel %vm575_vm1, %v1951_v31, %v1952_v59  ;;  %vm2028_vm12 = vweird.f32 %v9029_v13 }
 0x541   :  { %6220 = vrsqrt.f32 %v9031_v26  ;;  %v2012_v2 = vadd.f32 %v2004_v5, %v1996_v41  ;;  %v9048_v30 = vsub.f32 %v1938_v20, %v8738_v56  ;;  %v2003_v41 = vmul.f32 %v9038_v12, %v9038_v12  ;;  %vm9100_vm14 = vmor %vm2027_vm13, %vm2028_vm12 }
 0x542   :  { %v2035_v37 = vsub.f32 1.5, %v2034_v42  ;;  %v2023_v33 = vmul.f32 %v9029_v13, %v2022_v60  ;;  %4261 = vrot.lane.b32.xlu2 %v14602_v54, %s6360_s1  ;;  %v9065_v42 = vstv %s77_s14  ;;  %vm2057_vm8 = vweird.f32 %v9031_v26 }
 0x543   :  { %v9057_v1 = vpop.eup %6218  ;;  %v9059_v21 = vmax.f32 %v2012_v2, 1e-24  ;;  %v1995_v5 = vmul.f32 %v9048_v30, %v9048_v30  ;;  %14603 = vst [vmem:[#allocation86_spill] sm:$0xff] %v9065_v42 }
 0x544   :  { %v2024_v60 = vmul.f32 0.5, %v2023_v33  ;;  %v2062_v20 = vmul.f32 %v9057_v1, %v9005_v15  ;;  %v9070_v36 = vpop.permute.xlu2 %2391  ;;  %v2036_v31 = vmul.f32 %v6215_v9, %v2035_v37  ;;  %v9083_v37 = vsub.f32 %v1961_v28, %v8769_v46 }
 0x545   :  { %14604 = vst [vmem:[#allocation31_spill] sm:$0xff] %v9070_v36  ;;  %6222 = vrsqrt.f32 %v9059_v21  ;;  %v2011_v59 = vadd.f32 %v2003_v41, %v1995_v5  ;;  %vm2068_vm15 = vweird.f32 %v9057_v1  ;;  %vm2097_vm3 = vweird.f32 %v9059_v21 }
 0x546   :  { %v2025_v2 = vsub.f32 1.5, %v2024_v60  ;;  %v2063_v51 = vmul.f32 %v9057_v1, %v2062_v20  ;;  %4263 = vrot.lane.b32.xlu0 %v14605_v61, %s6360_s1  ;;  %4303 = vrot.lane.b32.xlu1 %v14602_v54, %s6361_s2  ;;  %v2040_v50 = vsel %vm2039_vm11, %v6215_v9, %v2036_v31  ;;  %v1999_v44 = vmul.f32 %v9083_v37, %v9083_v37  ;;  %vm9125_vm4 = vmor %vm2067_vm2, %vm2068_vm15 }
 0x547   :  { %v9078_v33 = vpop.eup %6220  ;;  %v9080_v4 = vmax.f32 %v2011_v59, 1e-24  ;;  %v2103_v63 = vmul.f32 %v9065_v42, %v2040_v50 }
 0x548   :  { %v2064_v5 = vmul.f32 0.5, %v2063_v51  ;;  %v2052_v41 = vmul.f32 %v9078_v33, %v9031_v26  ;;  %v1930_v60 = vpop.permute.xlu0 %1929  ;;  %v9089_v20 = vpop.permute.xlu1 %2412  ;;  %v2026_v9 = vmul.f32 %v9029_v13, %v2025_v2  ;;  %v14606_v51 = vld [vmem:[#allocation100_spill] sm:$0xff]  ;;  %vm2058_vm6 = vweird.f32 %v9078_v33 }
 0x549   :  { %6224 = vrsqrt.f32 %v9080_v4  ;;  %v9094_v31 = vsub.f32 %v1930_v60, %v8769_v46  ;;  %v2111_v50 = vsub.f32 1.0, %v2103_v63  ;;  %v14610_v63 = vrot.slane %v8788_v52, 1  ;;  %vm9183_vm9 = vmor %vm2057_vm8, %vm2058_vm6 }
 0x54a   :  { %v2065_v28 = vsub.f32 1.5, %v2064_v5  ;;  %v2053_v59 = vmul.f32 %v9078_v33, %v2052_v41  ;;  %4267 = vrot.lane.b32.xlu2 %v14606_v51, %s6360_s1  ;;  %v14609_v41 = vrot.slane %v8738_v56, 1  ;;  %v2030_v55 = vsel %vm9100_vm14, %v9029_v13, %v2026_v9 }
 0x54b   :  { %v6223_v19 = vpop.eup %6222  ;;  %v1991_v46 = vmul.f32 %v9094_v31, %v9094_v31  ;;  %v9118_v36 = vmax.f32 %v2111_v50, 0.0  ;;  %vm2087_vm11 = vweird.f32 %v9080_v4 }
 0x54c   :  { %v2092_v2 = vmul.f32 %v6223_v19, %v9059_v21  ;;  %v9110_v5 = vpop.permute.xlu2 %2414  ;;  %v1958_v60 = vsel %vm575_vm1, %v14610_v63, %v14609_v41  ;;  %v2066_v17 = vmul.f32 %v9057_v1, %v2065_v28  ;;  %v2054_v56 = vmul.f32 0.5, %v2053_v59 }
 0x54d   :  { %v2007_v34 = vadd.f32 %v1999_v44, %v1991_v46  ;;  %v2127_v8 = vmul.f32 %v9118_v36, %v8939_v49  ;;  %v9140_v9 = vsub.f32 %v1958_v60, %v8788_v52  ;;  %v2102_v59 = vmul.f32 %v9065_v42, %v2030_v55 }
 0x54e   :  { %v2093_v39 = vmul.f32 %v6223_v19, %v2092_v2  ;;  %4269 = vrot.lane.b32.xlu0 %v14613_v57, %s6360_s1  ;;  %4309 = vrot.lane.b32.xlu1 %v14606_v51, %s6361_s2  ;;  %v2070_v28 = vsel %vm9125_vm4, %v9057_v1, %v2066_v17  ;;  %vm2098_vm5 = vweird.f32 %v6223_v19  ;;  %v2055_v29 = vsub.f32 1.5, %v2054_v56 }
 0x54f   :  { %v9135_v13 = vpop.eup %6224  ;;  %v9137_v15 = vmax.f32 %v2007_v34, 1e-24  ;;  %v9151_v41 = vsub.f32 %v8939_v49, %v2127_v8  ;;  %v2002_v49 = vmul.f32 %v9140_v9, %v9140_v9  ;;  %v2110_v63 = vsub.f32 1.0, %v2102_v59  ;;  %vm2099_vm7 = vmor %vm2097_vm3, %vm2098_vm5 }
 0x550   :  { %v2094_v50 = vmul.f32 0.5, %v2093_v39  ;;  %v2082_v46 = vmul.f32 %v9135_v13, %v9080_v4  ;;  %v1936_v44 = vpop.permute.xlu0 %1935  ;;  %v9148_v2 = vpop.permute.xlu1 %2418  ;;  %v2106_v39 = vmul.f32 %v9065_v42, %v2070_v28  ;;  %vm2088_vm10 = vweird.f32 %v9135_v13 }
 0x551   :  { %14614 = vst [vmem:[#allocation41_spill] sm:$0xff] %v9151_v41  ;;  %6226 = vrsqrt.f32 %v9137_v15  ;;  %v9155_v34 = vsub.f32 %v1936_v44, %v8788_v52  ;;  %v9170_v60 = vsub.f32 %v2127_v8, %v9151_v41  ;;  %v2056_v8 = vmul.f32 %v9078_v33, %v2055_v29  ;;  %vm9218_vm12 = vmor %vm2087_vm11, %vm2088_vm10 }
 0x552   :  { %v2095_v1 = vsub.f32 1.5, %v2094_v50  ;;  %v2083_v17 = vmul.f32 %v9135_v13, %v2082_v46  ;;  %4299 = vrot.lane.b32.xlu2 %v14601_v27, %s6361_s2  ;;  %v2114_v56 = vsub.f32 1.0, %v2106_v39  ;;  %v2118_v26 = vmax.f32 %v2110_v63, 0.0 }
 0x553   :  { %v1994_v55 = vmul.f32 %v9155_v34, %v9155_v34  ;;  %14615 = vst [vmem:[#allocation80_spill] sm:$0xff] %v9170_v60  ;;  %v2060_v29 = vsel %vm9183_vm9, %v9078_v33, %v2056_v8  ;;  %vm2047_vm13 = vweird.f32 %v9137_v15 }
 0x554   :  { %v9167_v52 = vpop.permute.xlu2 %2420  ;;  %v2096_v50 = vmul.f32 %v6223_v19, %v2095_v1  ;;  %v2084_v28 = vmul.f32 0.5, %v2083_v17  ;;  %v9178_v59 = vmax.f32 %v2114_v56, 0.0  ;;  %v2126_v41 = vmul.f32 %v2118_v26, %v8958_v22 }
 0x555   :  { %v2010_v21 = vadd.f32 %v2002_v49, %v1994_v55 }
 0x556   :  { %4301 = vrot.lane.b32.xlu0 %v8447_v7, %s6361_s2  ;;  %2249 = vrot.lane.b32.xlu1 %v9170_v60, %s6360_s1  ;;  %v2100_v46 = vsel %vm2099_vm7, %v6223_v19, %v2096_v50  ;;  %v2130_v19 = vmul.f32 %v9178_v59, %v8977_v24  ;;  %v2085_v50 = vsub.f32 1.5, %v2084_v28  ;;  %v2105_v60 = vmul.f32 %v9065_v42, %v2060_v29 }
 0x557   :  { %v6227_v44 = vpop.eup %6226  ;;  %v9187_v17 = vmax.f32 %v2010_v21, 1e-24  ;;  %v2109_v39 = vmul.f32 %v9065_v42, %v2100_v46  ;;  %v9231_v29 = vsub.f32 %v8958_v22, %v2126_v41 }
 0x558   :  { %v2042_v55 = vmul.f32 %v6227_v44, %v9137_v15  ;;  %v9191_v49 = vpop.permute.xlu0 %2410  ;;  %v9193_v56 = vpop.permute.xlu1 %2424  ;;  %v9202_v63 = vsub.f32 %v8977_v24, %v2130_v19  ;;  %v2113_v24 = vsub.f32 1.0, %v2105_v60  ;;  %v2086_v8 = vmul.f32 %v9135_v13, %v2085_v50 }
 0x559   :  { %14618 = vst [vmem:[#allocation81_spill] sm:$0xff] %v9193_v56  ;;  %6228 = vrsqrt.f32 %v9187_v17  ;;  %v2117_v46 = vsub.f32 1.0, %v2109_v39  ;;  %vm2048_vm14 = vweird.f32 %v6227_v44  ;;  %v9254_v39 = vsub.f32 %v2126_v41, %v9231_v29 }
 0x55a   :  { %v2043_v21 = vmul.f32 %v6227_v44, %v2042_v55  ;;  %14619 = vst [vmem:[#allocation58_spill] sm:$0xff] %v9202_v63  ;;  %4305 = vrot.lane.b32.xlu2 %v14605_v61, %s6361_s2  ;;  %v9212_v33 = vsub.f32 %v2130_v19, %v9202_v63  ;;  %v2134_v19 = vmul.f32 %v2118_v26, %v8951_v14  ;;  %v2121_v50 = vmax.f32 %v2113_v24, 0.0  ;;  %vm2049_vm15 = vmor %vm2047_vm13, %vm2048_vm14 }
 0x55b   :  { %v9214_v28 = vmax.f32 %v2117_v46, 0.0  ;;  %14624 = vst [vmem:[#allocation35_spill] sm:$0xff] %v9231_v29  ;;  %v2135_v26 = vmul.f32 %v9118_v36, %v8931_v62  ;;  %vm2077_vm4 = vweird.f32 %v9187_v17 }
 0x55c   :  { %v2044_v56 = vmul.f32 0.5, %v2043_v21  ;;  %v9209_v1 = vpop.permute.xlu2 %2460  ;;  %14621 = vst [vmem:[#allocation74_spill] sm:$0xff] %v9212_v33  ;;  %v2129_v36 = vmul.f32 %v2121_v50, %v9000_v38 }
 0x55d   :  { %14620 = vst [vmem:[#allocation39_spill] sm:$0xff] %v9209_v1  ;;  %v2133_v4 = vmul.f32 %v9214_v28, %v9023_v53 }
 0x55e   :  { %v2045_v55 = vsub.f32 1.5, %v2044_v56  ;;  %4307 = vrot.lane.b32.xlu0 %v14600_v11, %s6361_s2  ;;  %2255 = vrot.lane.b32.xlu1 %v9212_v33, %s6360_s1  ;;  %v2090_v56 = vsel %vm9218_vm12, %v9135_v13, %v2086_v8  ;;  %14626 = vst [vmem:[#allocation19_spill] sm:$0xff] %v9254_v39 }
 0x55f   :  { %v6229_v60 = vpop.eup %6228  ;;  %v9242_v1 = vsub.f32 %v9023_v53, %v2133_v4  ;;  %v2108_v13 = vmul.f32 %v9065_v42, %v2090_v56 }
 0x560   :  { %v2046_v21 = vmul.f32 %v6227_v44, %v2045_v55  ;;  %v2072_v46 = vmul.f32 %v6229_v60, %v9187_v17  ;;  %v9237_v63 = vpop.permute.xlu0 %2416  ;;  %v9239_v33 = vpop.permute.xlu1 %2464  ;;  %vm2078_vm2 = vweird.f32 %v6229_v60 }
 0x561   :  { %14625 = vst [vmem:[#allocation65_spill] sm:$0xff] %v9242_v1  ;;  %v9257_v53 = vsub.f32 %v2133_v4, %v9242_v1  ;;  %v9287_v1 = vsub.f32 %v9000_v38, %v2129_v36  ;;  %vm2079_vm5 = vmor %vm2077_vm4, %vm2078_vm2 }
 0x562   :  { %v2050_v22 = vsel %vm2049_vm15, %v6227_v44, %v2046_v21  ;;  %v2073_v24 = vmul.f32 %v6229_v60, %v2072_v46  ;;  %4311 = vrot.lane.b32.xlu2 %v14613_v57, %s6361_s2  ;;  %v2116_v44 = vsub.f32 1.0, %v2108_v13  ;;  %v9263_v21 = vsub.f32 %v8951_v14, %v2134_v19 }
 0x563   :  { %v2104_v8 = vmul.f32 %v9065_v42, %v2050_v22  ;;  %14627 = vst [vmem:[#allocation91_spill] sm:$0xff] %v9257_v53  ;;  %v9266_v46 = vsub.f32 %v8931_v62, %v2135_v26  ;;  %v2137_v22 = vmul.f32 %v2121_v50, %v8992_v10  ;;  %v2138_v13 = vmul.f32 %v9178_v59, %v8970_v16 }
 0x564   :  { %v2074_v55 = vmul.f32 0.5, %v2073_v24  ;;  %v9260_v15 = vpop.permute.xlu2 %2466  ;;  %14629 = vst [vmem:[#allocation73_spill] sm:$0xff] %v9263_v21  ;;  %v9274_v4 = vsub.f32 %v2134_v19, %v9263_v21  ;;  %v2124_v62 = vmax.f32 %v2116_v44, 0.0 }
 0x565   :  { %14628 = vst [vmem:[#allocation71_spill] sm:$0xff] %v9260_v15  ;;  %v2112_v56 = vsub.f32 1.0, %v2104_v8  ;;  %v9277_v14 = vsub.f32 %v2135_v26, %v9266_v46  ;;  %v9293_v44 = vsub.f32 %v8992_v10, %v2137_v22  ;;  %v9309_v10 = vsub.f32 %v2129_v36, %v9287_v1 }
 0x566   :  { %14630 = vst [vmem:[#allocation67_spill] sm:$0xff] %v9266_v46  ;;  %v2075_v41 = vsub.f32 1.5, %v2074_v55  ;;  %2247 = vrot.lane.b32.xlu0 %v9254_v39, %s6360_s1  ;;  %2261 = vrot.lane.b32.xlu1 %v9257_v53, %s6360_s1  ;;  %v2271_v19 = vrot.slane %v9274_v4, 7  ;;  %v2132_v29 = vmul.f32 %v2124_v62, %v9048_v30  ;;  %v2140_v21 = vmul.f32 %v2124_v62, %v9038_v12 }
 0x567   :  { %14631 = vst [vmem:[#allocation72_spill] sm:$0xff] %v9274_v4  ;;  %v2120_v24 = vmax.f32 %v2112_v56, 0.0  ;;  %v2272_v56 = vrot.slane %v9277_v14, 7  ;;  %v9486_v39 = vstv %s6171_s17 }
 0x568   :  { %v2076_v50 = vmul.f32 %v6229_v60, %v2075_v41  ;;  %v9282_v8 = vpop.permute.xlu0 %2422  ;;  %v9284_v55 = vpop.permute.xlu1 %2470  ;;  %14632 = vst [vmem:[#allocation38_spill] sm:$0xff] %v9287_v1  ;;  %v9298_v41 = vsub.f32 %v8970_v16, %v2138_v13  ;;  %v9342_v62 = vsub.f32 %v9038_v12, %v2140_v21 }
 0x569   :  { %v2128_v26 = vmul.f32 %v2120_v24, %v9094_v31  ;;  %14633 = vst [vmem:[#allocation49_spill] sm:$0xff] %v9293_v44  ;;  %v2136_v17 = vmul.f32 %v2120_v24, %v9083_v37 }
 0x56a   :  { %v2080_v59 = vsel %vm2079_vm5, %v6229_v60, %v2076_v50  ;;  %14634 = vst [vmem:[#allocation82_spill] sm:$0xff] %v9298_v41  ;;  %v9313_v60 = vsel %vm351_vm0, %v2271_v19, %v2272_v56  ;;  %v9329_v50 = vsub.f32 %v2137_v22, %v9293_v44 }
 0x56b   :  { %v9301_v38 = vsub.f32 %v9094_v31, %v2128_v26  ;;  %v2107_v46 = vmul.f32 %v9065_v42, %v2080_v59  ;;  %14637 = vst [vmem:[#allocation25_spill] sm:$0xff] %v9309_v10  ;;  %v9316_v16 = vsub.f32 %v9083_v37, %v2136_v17  ;;  %v9332_v59 = vsub.f32 %v2138_v13, %v9298_v41 }
 0x56c   :  { %v9306_v53 = vpop.permute.xlu2 %2472  ;;  %14639 = vst [vmem:[#allocation64_spill] sm:$0xff] %v9329_v50 }
 0x56d   :  { %14635 = vst [vmem:[#allocation78_spill] sm:$0xff] %v9301_v38  ;;  %v2115_v31 = vsub.f32 1.0, %v2107_v46  ;;  %v9319_v24 = vsub.f32 %v2128_v26, %v9301_v38  ;;  %v9326_v36 = vsub.f32 %v2136_v17, %v9316_v16  ;;  %v9337_v46 = vsub.f32 %v9048_v30, %v2132_v29 }
 0x56e   :  { %14636 = vst [vmem:[#allocation42_spill] sm:$0xff] %v9306_v53  ;;  %2253 = vrot.lane.b32.xlu0 %v9309_v10, %s6360_s1  ;;  %v2141_v26 = vmul.f32 %v9214_v28, %v9012_v35  ;;  %v2275_v42 = vrot.slane %v9332_v59, 7 }
 0x56f   :  { %14638 = vst [vmem:[#allocation99_spill] sm:$0xff] %v9316_v16  ;;  %v2123_v37 = vmax.f32 %v2115_v31, 0.0  ;;  %2251 = vrot.lane.b32.xlu2 %v9319_v24, %s6360_s1  ;;  %v2273_v13 = vrot.slane %v9326_v36, 7  ;;  %v2274_v31 = vrot.slane %v9329_v50, 7  ;;  %v9365_v16 = vsub.f32 %v2140_v21, %v9342_v62 }
 0x570   :  { %14640 = vst [vmem:[#allocation54_spill] sm:$0xff] %v9337_v46  ;;  %v9344_v17 = vpop.permute.xlu0 %2462  ;;  %v9346_v22 = vpop.permute.xlu1 %2509  ;;  %v9362_v38 = vsub.f32 %v9012_v35, %v2141_v26  ;;  %v9371_v44 = vsub.f32 %v2132_v29, %v9337_v46 }
 0x571   :  { %14641 = vst [vmem:[#allocation70_spill] sm:$0xff] %v9342_v62  ;;  %v2131_v41 = vmul.f32 %v2123_v37, %v9155_v34  ;;  %v2139_v30 = vmul.f32 %v2123_v37, %v9140_v9  ;;  %v9355_v28 = vsel %vm351_vm0, %v2272_v56, %v2273_v13  ;;  %v9359_v12 = vsel %vm351_vm0, %v2274_v31, %v2275_v42 }
 0x572   :  { %14642 = vst [vmem:[#allocation63_spill] sm:$0xff] %v9362_v38  ;;  %v9383_v21 = vsub.f32 %v2141_v26, %v9362_v38  ;;  %v9391_v29 = vsel %vm351_vm0, %v2273_v13, %v2274_v31 }
 0x573   :  { %14643 = vst [vmem:[#allocation53_spill] sm:$0xff] %v9365_v16  ;;  %v9368_v1 = vsub.f32 %v9155_v34, %v2131_v41  ;;  %v9380_v35 = vsub.f32 %v9140_v9, %v2139_v30  ;;  %v2277_v34 = vrot.slane %v9365_v16, 7 }
 0x574   :  { %14645 = vst [vmem:[#allocation66_spill] sm:$0xff] %v9371_v44  ;;  %v9375_v37 = vpop.permute.xlu2 %2511  ;;  %v2278_v9 = vrot.slane %v9383_v21, 7 }
 0x575   :  { %14644 = vst [vmem:[#allocation62_spill] sm:$0xff] %v9368_v1  ;;  %v9387_v62 = vsub.f32 %v2131_v41, %v9368_v1  ;;  %v9396_v10 = vsub.f32 %v2139_v30, %v9380_v35 }
 0x576   :  { %14646 = vst [vmem:[#allocation79_spill] sm:$0xff] %v9380_v35  ;;  %2259 = vrot.lane.b32.xlu0 %v9371_v44, %s6360_s1  ;;  %v9410_v31 = vsel %vm351_vm0, %v2278_v9, %v2271_v19  ;;  %v9414_v30 = vsel %vm351_vm0, %v2277_v34, %v2278_v9 }
 0x577   :  { %14647 = vst [vmem:[#allocation84_spill] sm:$0xff] %v9383_v21  ;;  %2257 = vrot.lane.b32.xlu2 %v9387_v62, %s6360_s1  ;;  %v2276_v13 = vrot.slane %v9396_v10, 7 }
 0x578   :  { %14648 = vst [vmem:[#allocation45_spill] sm:$0xff] %v9391_v29  ;;  %v9403_v41 = vpop.permute.xlu0 %2468  ;;  %v9405_v56 = vpop.permute.xlu1 %2515 }
 0x579   :  { %14649 = vst [vmem:[#allocation33_spill] sm:$0xff] %v9396_v10  ;;  %v9420_v38 = vsel %vm351_vm0, %v2275_v42, %v2276_v13  ;;  %v9426_v35 = vsel %vm351_vm0, %v2276_v13, %v2277_v34 }
 0x57a   :  { %14650 = vst [vmem:[#allocation83_spill] sm:$0xff] %v9405_v56 }
 0x57b   :  { %14651 = vst [vmem:[#allocation24_spill] sm:$0xff] %v9410_v31  ;;  %v9470_v31 = vstv %s6169_s15 }
 0x57c   :  { %14652 = vst [vmem:[#allocation85_spill] sm:$0xff] %v9414_v30  ;;  %v9432_v46 = vpop.permute.xlu2 %2517 }
 0x57d   :  { %14653 = vst [vmem:[#allocation21_spill] sm:$0xff] %v9420_v38  ;;  %v6248_v38 = vld [vmem:[#allocation13 + $0x10] sm:$0xff] }
 0x57e   :  { %14654 = vst [vmem:[#allocation26_spill] sm:$0xff] %v9426_v35 }
 0x57f   :  { %14664 = vst [vmem:[#allocation87_spill] sm:$0xff] %v9470_v31 }
 0x580   :  { %v9434_v26 = vpop.permute.xlu0 %2474  ;;  %v9436_v44 = vpop.permute.xlu1 %2521 }
 0x581   :  { %14655 = vst [vmem:[#allocation76_spill] sm:$0xff] %v9436_v44 }
 0x584   :  { %v9438_v42 = vpop.permute.xlu2 %2523 }
 0x588   :  { %v9440_v50 = vpop.permute.xlu0 %2513  ;;  %v9442_v1 = vpop.permute.xlu1 %2561 }
 0x58c   :  { %v9444_v34 = vpop.permute.xlu2 %2563 }
 0x590   :  { %v9446_v13 = vpop.permute.xlu0 %2519  ;;  %v9448_v19 = vpop.permute.xlu1 %2567 }
 0x594   :  { %v9450_v45 = vpop.permute.xlu2 %2569 }
 0x598   :  { %v9452_v9 = vpop.permute.xlu0 %2559  ;;  %v9454_v16 = vpop.permute.xlu1 %2573 }
 0x599   :  { %14656 = vst [vmem:[#allocation57_spill] sm:$0xff] %v9454_v16  ;;  %v9494_v16 = vstv %s6164_s19 }
 0x59a   :  { %14668 = vst [vmem:[#allocation97_spill] sm:$0xff] %v9494_v16 }
 0x59c   :  { %v9456_v35 = vpop.permute.xlu2 %4261 }
 0x59d   :  { %14657 = vst [vmem:[#allocation32_spill] sm:$0xff] %v9456_v35  ;;  %v9472_v35 = vstv %s6170_s16 }
 0x59e   :  { %14665 = vst [vmem:[#allocation98_spill] sm:$0xff] %v9472_v35 }
 0x5a0   :  { %v9458_v29 = vpop.permute.xlu0 %2565  ;;  %v9460_v44 = vpop.permute.xlu1 %4259 }
 0x5a1   :  { %14658 = vst [vmem:[#allocation37_spill] sm:$0xff] %v9458_v29 }
 0x5a2   :  { %14659 = vst [vmem:[#allocation88_spill] sm:$0xff] %v9460_v44  ;;  %v2363_v44 = vmul.f32 %v9472_v35, %v14602_v54  ;;  %v2396_v54 = vmul.f32 %v9486_v39, %v8979_v0  ;;  %v2365_v0 = vmul.f32 %v9472_v35, %v14600_v11  ;;  %v9522_v11 = vstv %s6167_s20 }
 0x5a4   :  { %v9462_v53 = vpop.permute.xlu2 %4267 }
 0x5a5   :  { %14660 = vst [vmem:[#allocation27_spill] sm:$0xff] %v9462_v53  ;;  %v2354_v53 = vmul.f32 %v9470_v31, %v8835_v23  ;;  %v9492_v23 = vstv %s6166_s18 }
 0x5a7   :  { %v2371_v56 = vadd.f32 %v2363_v44, %v2354_v53  ;;  %v2352_v53 = vmul.f32 %v9470_v31, %v8825_v18  ;;  %v2429_v44 = vmul.f32 %v9492_v23, %v9110_v5  ;;  %v2356_v18 = vmul.f32 %v9470_v31, %v8905_v32 }
 0x5a8   :  { %v9464_v21 = vpop.permute.xlu0 %2571  ;;  %v9466_v30 = vpop.permute.xlu1 %4265  ;;  %v2368_v32 = vmul.f32 %v9472_v35, %v8499_v47 }
 0x5a9   :  { %14661 = vst [vmem:[#allocation29_spill] sm:$0xff] %v9464_v21  ;;  %v2404_v5 = vadd.f32 %v2396_v54, %v2371_v56 }
 0x5aa   :  { %14662 = vst [vmem:[#allocation93_spill] sm:$0xff] %v9466_v30  ;;  %v2362_v30 = vmul.f32 %v9472_v35, %v8447_v7 }
 0x5ab   :  { %v2437_v10 = vadd.f32 %v2429_v44, %v2404_v5  ;;  %v14674_v44 = vld [vmem:[#allocation69_spill] sm:$0xff] }
 0x5ac   :  { %v9468_v4 = vpop.permute.xlu2 %4299 }
 0x5ad   :  { %14663 = vst [vmem:[#allocation34_spill] sm:$0xff] %v9468_v4  ;;  %v2353_v4 = vmul.f32 %v9470_v31, %v8885_v43  ;;  %v2361_v43 = vmul.f32 %v9472_v35, %v14601_v27  ;;  %v2357_v27 = vmul.f32 %v9470_v31, %v8853_v25  ;;  %v2446_v25 = vmul.f32 %v6248_v38, %v9522_v11 }
 0x5ae   :  { %v2359_v38 = vmul.f32 %v9470_v31, %v8934_v6  ;;  %v14675_v6 = vld [vmem:[#allocation75_spill] sm:$0xff] }
 0x5b0   :  { %v9478_v29 = vpop.permute.xlu0 %4257  ;;  %v9480_v21 = vpop.permute.xlu1 %4271 }
 0x5b1   :  { %14666 = vst [vmem:[#allocation92_spill] sm:$0xff] %v9478_v29  ;;  %v2370_v29 = vadd.f32 %v2362_v30, %v2353_v4  ;;  %v2364_v4 = vmul.f32 %v9472_v35, %v14605_v61  ;;  %v2366_v30 = vmul.f32 %v9472_v35, %v14606_v51 }
 0x5b2   :  { %14667 = vst [vmem:[#allocation90_spill] sm:$0xff] %v9480_v21  ;;  %v2395_v21 = vmul.f32 %v9486_v39, %v8887_v40  ;;  %v2355_v40 = vmul.f32 %v9470_v31, %v8845_v3  ;;  %v9530_v3 = vmul.f32 %v9494_v16, %v8829_v48 }
 0x5b4   :  { %v9500_v7 = vpop.permute.xlu2 %4305  ;;  %14672 = vst [vmem:[#allocation107_spill] sm:$0xff] %v9530_v3  ;;  %v2403_v51 = vadd.f32 %v2395_v21, %v2370_v29  ;;  %v2372_v54 = vadd.f32 %v2364_v4, %v2355_v40  ;;  %v2373_v21 = vadd.f32 %v2365_v0, %v2356_v18  ;;  %v2374_v29 = vadd.f32 %v2366_v30, %v2357_v27 }
 0x5b5   :  { %14669 = vst [vmem:[#allocation96_spill] sm:$0xff] %v9500_v7  ;;  %v2428_v7 = vmul.f32 %v9492_v23, %v9089_v20  ;;  %v2369_v20 = vadd.f32 %v2361_v43, %v2352_v53  ;;  %v2399_v43 = vmul.f32 %v9486_v39, %v9042_v58  ;;  %v9555_v4 = vstv %s9498_s22 }
 0x5b6   :  { %v9559_v27 = vmul.f32 %v9472_v35, %v14613_v57  ;;  %v2432_v58 = vmul.f32 %v9492_v23, %v9167_v52  ;;  %v2454_v0 = vadd.f32 %v2446_v25, %v2437_v10  ;;  %v2545_v40 = vmul.f32 %v9494_v16, %v14675_v6  ;;  %v14678_v10 = vld [vmem:[#allocation43_spill] sm:$0xff] }
 0x5b7   :  { %v2436_v56 = vadd.f32 %v2428_v7, %v2403_v51  ;;  %v2398_v7 = vmul.f32 %v9486_v39, %v14674_v44  ;;  %v2431_v30 = vmul.f32 %v9492_v23, %v9148_v2  ;;  %v2527_v18 = vmul.f32 %v9555_v4, %v9375_v37  ;;  %v14677_v44 = vld [vmem:[#allocation28_spill] sm:$0xff] }
 0x5b8   :  { %v9524_v61 = vpop.permute.xlu0 %4263  ;;  %v9526_v15 = vpop.permute.xlu1 %4303  ;;  %v9575_v52 = vmul.f32 %v9470_v31, %v14677_v44  ;;  %v2407_v25 = vadd.f32 %v2399_v43, %v2374_v29  ;;  %v2376_v2 = vadd.f32 %v2368_v32, %v2359_v38  ;;  %v9587_v3 = vstv %s9535_s23 }
 0x5b9   :  { %14670 = vst [vmem:[#allocation105_spill] sm:$0xff] %v9524_v61  ;;  %v9538_v61 = vstv %s9488_s21  ;;  %v2427_v29 = vmul.f32 %v9492_v23, %v9191_v49  ;;  %v14686_v49 = vld [vmem:[#allocation81_spill] sm:$0xff] }
 0x5ba   :  { %14671 = vst [vmem:[#allocation106_spill] sm:$0xff] %v9526_v15  ;;  %v9540_v15 = vld [vmem:[#allocation13 + $0x8] sm:$0xff]  ;;  %v2479_v53 = vmul.f32 %v9538_v61, %v9239_v33  ;;  %v2478_v51 = vmul.f32 %v9538_v61, %v9344_v17  ;;  %v2528_v33 = vmul.f32 %v9555_v4, %v9440_v50  ;;  %v2394_v50 = vmul.f32 %v9486_v39, %v14678_v10 }
 0x5bb   :  { %14673 = vst [vmem:[#allocation108_spill] sm:$0xff] %v9540_v15  ;;  %v2445_v48 = vmul.f32 %v9540_v15, %v9522_v11  ;;  %v6250_v15 = vld [vmem:[#allocation13 + $0x28] sm:$0xff] }
 0x5bc   :  { %v9571_v5 = vpop.permute.xlu2 %4311  ;;  %v2487_v57 = vadd.f32 %v2479_v53, %v2454_v0  ;;  %v2449_v44 = vmul.f32 %v6250_v15, %v9522_v11  ;;  %14682 = vst [vmem:[#allocation43_spill] sm:$0xff] %v9587_v3  ;;  %v9591_v53 = vld [vmem:[#allocation13 + $0x20] sm:$0xff]  ;;  %v2402_v38 = vadd.f32 %v2394_v50, %v2369_v20  ;;  %v2482_v15 = vmul.f32 %v9538_v61, %v9284_v55 }
 0x5bd   :  { %v2453_v17 = vadd.f32 %v2445_v48, %v2436_v56  ;;  %14676 = vst [vmem:[#allocation69_spill] sm:$0xff] %v9571_v5  ;;  %v14681_v56 = vld [vmem:[#allocation48_spill] sm:$0xff]  ;;  %v2406_v48 = vadd.f32 %v2398_v7, %v2373_v21  ;;  %v2440_v5 = vadd.f32 %v2432_v58, %v2407_v25  ;;  %v2448_v32 = vmul.f32 %v9591_v53, %v9522_v11  ;;  %v14685_v58 = vld [vmem:[#allocation31_spill] sm:$0xff] }
 0x5be   :  { %v2544_v37 = vmul.f32 %v9494_v16, %v14681_v56  ;;  %v2536_v31 = vadd.f32 %v2528_v33, %v2487_v57  ;;  %14683 = vst [vmem:[#allocation48_spill] sm:$0xff] %v9591_v53  ;;  %v14684_v21 = vld [vmem:[#allocation60_spill] sm:$0xff]  ;;  %v2434_v0 = vmul.f32 %v9492_v23, %v14686_v49  ;;  %v2481_v20 = vmul.f32 %v9538_v61, %v9403_v41 }
 0x5bf   :  { %v2486_v47 = vadd.f32 %v2478_v51, %v2453_v17  ;;  %v2439_v10 = vadd.f32 %v2431_v30, %v2406_v48  ;;  %v2397_v7 = vmul.f32 %v9486_v39, %v14684_v21  ;;  %v9597_v51 = vld [vmem:[#allocation13] sm:$0xff]  ;;  %v2577_v33 = vmul.f32 %v9587_v3, %v9442_v1  ;;  %v14687_v21 = vld [vmem:[#allocation56_spill] sm:$0xff] }
 0x5c0   :  { %v9579_v6 = vpop.permute.xlu0 %4269  ;;  %v9581_v35 = vpop.permute.xlu1 %4309  ;;  %v2444_v57 = vmul.f32 %v9597_v51, %v9522_v11  ;;  %v2457_v30 = vadd.f32 %v2449_v44, %v2440_v5  ;;  %v2553_v17 = vadd.f32 %v2545_v40, %v2536_v31  ;;  %v2531_v55 = vmul.f32 %v9555_v4, %v9446_v13 }
 0x5c1   :  { %14679 = vst [vmem:[#allocation75_spill] sm:$0xff] %v9579_v6  ;;  %v2535_v43 = vadd.f32 %v2527_v18, %v2486_v47  ;;  %v2401_v47 = vmul.f32 %v9486_v39, %v14685_v58  ;;  %v2578_v18 = vmul.f32 %v9587_v3, %v9444_v34  ;;  %v2435_v50 = vadd.f32 %v2427_v29, %v2402_v38  ;;  %v14688_v58 = vld [vmem:[#allocation36_spill] sm:$0xff]  ;;  %v9624_v38 = vld [vmem:[#allocation13 + $0x38] sm:$0xff] }
 0x5c2   :  { %14680 = vst [vmem:[#allocation28_spill] sm:$0xff] %v9581_v35  ;;  %v2456_v25 = vadd.f32 %v2448_v32, %v2439_v10  ;;  %v2530_v56 = vmul.f32 %v9555_v4, %v9432_v46  ;;  %v2548_v41 = vmul.f32 %v9494_v16, %v14687_v21  ;;  %v2547_v1 = vmul.f32 %v9494_v16, %v14688_v58  ;;  %v14690_v29 = vld [vmem:[#allocation80_spill] sm:$0xff] }
 0x5c3   :  { %v2552_v48 = vadd.f32 %v2544_v37, %v2535_v43  ;;  %v2405_v5 = vadd.f32 %v2397_v7, %v2372_v54  ;;  %v2490_v31 = vadd.f32 %v2482_v15, %v2457_v30  ;;  %v2409_v44 = vadd.f32 %v2401_v47, %v2376_v2  ;;  %14691 = vst [vmem:[#allocation31_spill] sm:$0xff] %v9624_v38 }
 0x5c4   :  { %v2489_v49 = vadd.f32 %v2481_v20, %v2456_v25  ;;  %v2451_v46 = vmul.f32 %v9624_v38, %v9522_v11  ;;  %v2586_v37 = vadd.f32 %v2578_v18, %v2553_v17  ;;  %v2452_v7 = vadd.f32 %v2444_v57, %v2435_v50  ;;  %v14693_v20 = vld [vmem:[#allocation39_spill] sm:$0xff] }
 0x5c5   :  { %v2585_v13 = vadd.f32 %v2577_v33, %v2552_v48  ;;  %v2539_v43 = vadd.f32 %v2531_v55, %v2490_v31  ;;  %v2442_v54 = vadd.f32 %v2434_v0, %v2409_v44  ;;  %v14692_v2 = vsub.f32 %v9313_v60, %v9277_v14  ;;  %v14695_v0 = vld [vmem:[#allocation22_spill] sm:$0xff]  ;;  %v14696_v60 = vld [vmem:[#allocation23_spill] sm:$0xff] }
 0x5c6   :  { %v2538_v15 = vadd.f32 %v2530_v56, %v2489_v49  ;;  %v2477_v33 = vmul.f32 %v9538_v61, %v14693_v20  ;;  %v2430_v30 = vmul.f32 %v9492_v23, %v9237_v63  ;;  %v2526_v25 = vmul.f32 %v9555_v4, %v9346_v22  ;;  %v14705_v20 = vld [vmem:[#allocation21_spill] sm:$0xff] }
 0x5c7   :  { %v14694_v17 = vsub.f32 %v9355_v28, %v9326_v36  ;;  %v2484_v57 = vmul.f32 %v9538_v61, %v9434_v26  ;;  %v2593_v18 = vmul.f32 %v2585_v13, %v14695_v0  ;;  %v2580_v14 = vmul.f32 %v9587_v3, %v9448_v19  ;;  %v9655_v19 = vld [vmem:[#allocation13 + $0x18] sm:$0xff] }
 0x5c8   :  { %v9621_v40 = vpop.permute.xlu0 %4301  ;;  %v2250_v34 = vpop.permute.xlu1 %2249  ;;  %v2594_v50 = vmul.f32 %v2586_v37, %v14695_v0  ;;  %v2556_v63 = vadd.f32 %v2548_v41, %v2539_v43  ;;  %v2581_v22 = vmul.f32 %v9587_v3, %v9450_v45  ;;  %v2459_v36 = vadd.f32 %v2451_v46, %v2442_v54  ;;  %14698 = vst [vmem:[#allocation56_spill] sm:$0xff] %v9655_v19 }
 0x5c9   :  { %14689 = vst [vmem:[#allocation60_spill] sm:$0xff] %v9621_v40  ;;  %v2264_v10 = vsub.f32 %v2250_v34, %v14690_v29  ;;  %v2252_v32 = vpop.permute.xlu2 %2251  ;;  %v2533_v28 = vmul.f32 %v9555_v4, %v9438_v42  ;;  %v2555_v26 = vadd.f32 %v2547_v1, %v2538_v15  ;;  %v2485_v58 = vadd.f32 %v2477_v33, %v2452_v7  ;;  %v14701_v1 = vld [vmem:[#allocation74_spill] sm:$0xff] }
 0x5ca   :  { %v2265_v21 = vsub.f32 %v2252_v32, %v9319_v24  ;;  %v2438_v31 = vadd.f32 %v2430_v30, %v2405_v5  ;;  %v2447_v34 = vmul.f32 %v9655_v19, %v9522_v11  ;;  %v2375_v49 = vadd.f32 %v9559_v27, %v9575_v52  ;;  %v14702_v5 = vld [vmem:[#allocation44_spill] sm:$0xff] }
 0x5cb   :  { %v2296_v47 = vadd.f32 %v14692_v2, %v2264_v10  ;;  %v2492_v13 = vadd.f32 %v2484_v57, %v2459_v36  ;;  %v2588_v42 = vadd.f32 %v2580_v14, %v2555_v26  ;;  %v2400_v32 = vmul.f32 %v9486_v39, %v14702_v5  ;;  %v14709_v57 = vld [vmem:[#allocation57_spill] sm:$0xff]  ;;  %v14710_v14 = vld [vmem:[#allocation107_spill] sm:$0xff]  ;;  %v14717_v5 = vld [vmem:[#allocation68_spill] sm:$0xff] }
 0x5cc   :  { %v2297_v24 = vadd.f32 %v14694_v17, %v2265_v21  ;;  %v2534_v46 = vadd.f32 %v2526_v25, %v2485_v58  ;;  %v2589_v37 = vadd.f32 %v2581_v22, %v2556_v63  ;;  %v14703_v21 = vld [vmem:[#allocation30_spill] sm:$0xff]  ;;  %v14704_v54 = vsub.f32 %v9359_v12, %v9332_v59  ;;  %v14708_v25 = vld [vmem:[#allocation71_spill] sm:$0xff] }
 0x5cd   :  { %v2304_v55 = vmul.f32 %v2296_v47, %v14696_v60  ;;  %v2550_v27 = vmul.f32 %v9494_v16, %v14703_v21  ;;  %v2541_v52 = vadd.f32 %v2533_v28, %v2492_v13  ;;  %v2455_v15 = vadd.f32 %v2447_v34, %v2438_v31  ;;  %v9698_v28 = vld [vmem:[#allocation13 + $0x30] sm:$0xff] }
 0x5ce   :  { %v2305_v56 = vmul.f32 %v2297_v24, %v14696_v60  ;;  %v2433_v2 = vmul.f32 %v9492_v23, %v9282_v8  ;;  %v2576_v47 = vmul.f32 %v9587_v3, %v9452_v9  ;;  %v2480_v17 = vmul.f32 %v9538_v61, %v14708_v25  ;;  %14713 = vst [vmem:[#allocation74_spill] sm:$0xff] %v9698_v28 }
 0x5cf   :  { %v9653_v48 = vadd.f32 %v2593_v18, %v2304_v55  ;;  %v2596_v24 = vmul.f32 %v2588_v42, %v14695_v0  ;;  %v2583_v59 = vmul.f32 %v9587_v3, %v14709_v57  ;;  %v2408_v18 = vadd.f32 %v2400_v32, %v2375_v49  ;;  %v14715_v42 = vld [vmem:[#allocation19_spill] sm:$0xff]  ;;  %v14726_v57 = vld [vmem:[#allocation76_spill] sm:$0xff] }
 0x5d0   :  { %v9659_v41 = vadd.f32 %v2594_v50, %v2305_v56  ;;  %v9661_v44 = vpop.permute.xlu0 %4307  ;;  %v2256_v45 = vpop.permute.xlu1 %2255  ;;  %v2597_v8 = vmul.f32 %v2589_v37, %v14695_v0  ;;  %v2551_v55 = vadd.f32 %v14710_v14, %v2534_v46  ;;  %v14711_v50 = vld [vmem:[#allocation83_spill] sm:$0xff]  ;;  %v2558_v22 = vadd.f32 %v2550_v27, %v2541_v52  ;;  %v14718_v37 = vld [vmem:[#allocation24_spill] sm:$0xff]  ;;  %v14721_v52 = vld [vmem:[#allocation85_spill] sm:$0xff] }
 0x5d1   :  { %14697 = vst [vmem:[#allocation81_spill] sm:$0xff] %v9653_v48  ;;  %v2267_v29 = vsub.f32 %v2256_v45, %v14701_v1  ;;  %v2258_v10 = vpop.permute.xlu2 %2257  ;;  %2698 = vrot.lane.b32.xlu1 %v9653_v48, %s6360_s1  ;;  %v2529_v63 = vmul.f32 %v9555_v4, %v14711_v50  ;;  %v2441_v36 = vadd.f32 %v2433_v2, %v2408_v18  ;;  %v14729_v50 = vld [vmem:[#allocation25_spill] sm:$0xff] }
 0x5d2   :  { %14699 = vst [vmem:[#allocation36_spill] sm:$0xff] %v9659_v41  ;;  %v2268_v43 = vsub.f32 %v2258_v10, %v9387_v62  ;;  %2700 = vrot.lane.b32.xlu2 %v9659_v41, %s6360_s1  ;;  %v14706_v62 = vld [vmem:[#allocation33_spill] sm:$0xff]  ;;  %v2450_v26 = vmul.f32 %v9698_v28, %v9522_v11  ;;  %v2584_v58 = vadd.f32 %v2576_v47, %v2551_v55  ;;  %v14724_v47 = vld [vmem:[#allocation42_spill] sm:$0xff] }
 0x5d3   :  { %14700 = vst [vmem:[#allocation80_spill] sm:$0xff] %v9661_v44  ;;  %v2299_v7 = vadd.f32 %v14704_v54, %v2267_v29  ;;  %v14707_v33 = vsub.f32 %v14705_v20, %v14706_v62  ;;  %v2488_v49 = vadd.f32 %v2480_v17, %v2455_v15  ;;  %v2591_v13 = vadd.f32 %v2583_v59, %v2558_v22  ;;  %v14716_v29 = vld [vmem:[#allocation91_spill] sm:$0xff]  ;;  %v14722_v54 = vld [vmem:[#allocation84_spill] sm:$0xff]  ;;  %v14730_v22 = vld [vmem:[#allocation77_spill] sm:$0xff] }
 0x5d4   :  { %v2546_v32 = vmul.f32 %v9494_v16, %v14717_v5  ;;  %v2458_v2 = vadd.f32 %v2450_v26, %v2441_v36  ;;  %v2483_v20 = vmul.f32 %v9538_v61, %v14724_v47  ;;  %v2592_v62 = vmul.f32 %v2584_v58, %v14695_v0  ;;  %v14731_v58 = vld [vmem:[#allocation45_spill] sm:$0xff] }
 0x5d5   :  { %v2300_v30 = vadd.f32 %v14707_v33, %v2268_v43  ;;  %v2307_v12 = vmul.f32 %v2299_v7, %v14696_v60  ;;  %v2537_v46 = vadd.f32 %v2529_v63, %v2488_v49  ;;  %v14719_v43 = vld [vmem:[#allocation72_spill] sm:$0xff]  ;;  %v14723_v7 = vsub.f32 %v14721_v52, %v14722_v54 }
 0x5d6   :  { %v14720_v21 = vsub.f32 %v14718_v37, %v14719_v43  ;;  %v2599_v33 = vmul.f32 %v2591_v13, %v14695_v0  ;;  %v2532_v59 = vmul.f32 %v9555_v4, %v14726_v57  ;;  %v2491_v55 = vadd.f32 %v2483_v20, %v2458_v2  ;;  %v14736_v37 = vld [vmem:[#allocation66_spill] sm:$0xff] }
 0x5d7   :  { %v2308_v9 = vmul.f32 %v2300_v30, %v14696_v60  ;;  %v9696_v56 = vadd.f32 %v2596_v24, %v2307_v12  ;;  %v14725_v30 = vld [vmem:[#allocation37_spill] sm:$0xff]  ;;  %v2554_v12 = vadd.f32 %v2546_v32, %v2537_v46  ;;  %v2549_v36 = vmul.f32 %v9494_v16, %v14730_v22 }
 0x5d8   :  { %v2248_v34 = vpop.permute.xlu0 %2247  ;;  %v2262_v45 = vpop.permute.xlu1 %2261  ;;  %v2579_v25 = vmul.f32 %v9587_v3, %v14725_v30  ;;  %v2540_v26 = vadd.f32 %v2532_v59, %v2491_v55  ;;  %v2609_v47 = vrot.slane %v9653_v48, 7  ;;  %v2610_v20 = vrot.slane %v9659_v41, 7 }
 0x5d9   :  { %14712 = vst [vmem:[#allocation39_spill] sm:$0xff] %v9696_v56  ;;  %v9702_v31 = vadd.f32 %v2597_v8, %v2308_v9  ;;  %v2263_v1 = vsub.f32 %v2248_v34, %v14715_v42  ;;  %v2270_v10 = vsub.f32 %v2262_v45, %v14716_v29  ;;  %2704 = vrot.lane.b32.xlu1 %v9696_v56, %s6360_s1  ;;  %v14732_v34 = vld [vmem:[#allocation64_spill] sm:$0xff]  ;;  %v14734_v42 = vld [vmem:[#allocation29_spill] sm:$0xff] }
 0x5da   :  { %v2587_v9 = vadd.f32 %v2579_v25, %v2554_v12  ;;  %v14733_v45 = vsub.f32 %v14731_v58, %v14732_v34  ;;  %v9776_v25 = vsel %vm351_vm0, %v2609_v47, %v2610_v20 }
 0x5db   :  { %14714 = vst [vmem:[#allocation44_spill] sm:$0xff] %v9702_v31  ;;  %2706 = vrot.lane.b32.xlu2 %v9702_v31, %s6360_s1  ;;  %v2295_v27 = vadd.f32 %v14720_v21, %v2263_v1  ;;  %v2302_v15 = vadd.f32 %v14723_v7, %v2270_v10  ;;  %v2582_v1 = vmul.f32 %v9587_v3, %v14734_v42  ;;  %v14737_v21 = vld [vmem:[#allocation26_spill] sm:$0xff]  ;;  %v2613_v57 = vrot.slane %v9702_v31, 7 }
 0x5dc   :  { %v2595_v13 = vmul.f32 %v2587_v9, %v14695_v0  ;;  %v2557_v10 = vadd.f32 %v2549_v36, %v2540_v26  ;;  %v2793_v36 = vrot.slane %v9653_v48, 1 }
 0x5dd   :  { %v2303_v17 = vmul.f32 %v2295_v27, %v14696_v60  ;;  %v2310_v24 = vmul.f32 %v2302_v15, %v14696_v60  ;;  %v14738_v27 = vld [vmem:[#allocation53_spill] sm:$0xff] }
 0x5de   :  { %v2590_v46 = vadd.f32 %v2582_v1, %v2557_v10  ;;  %v14739_v52 = vsub.f32 %v14737_v21, %v14738_v27  ;;  %v2797_v10 = vrot.slane %v9702_v31, 1 }
 0x5df   :  { %v9728_v18 = vadd.f32 %v2592_v62, %v2303_v17  ;;  %v9730_v8 = vadd.f32 %v2599_v33, %v2310_v24  ;;  %v2612_v24 = vrot.slane %v9696_v56, 7 }
 0x5e0   :  { %v2254_v14 = vpop.permute.xlu0 %2253  ;;  %v2598_v7 = vmul.f32 %v2590_v46, %v14695_v0 }
 0x5e1   :  { %14727 = vst [vmem:[#allocation30_spill] sm:$0xff] %v9728_v18  ;;  %v2266_v63 = vsub.f32 %v2254_v14, %v14729_v50  ;;  %2696 = vrot.lane.b32.xlu0 %v9728_v18, %s6360_s1  ;;  %2710 = vrot.lane.b32.xlu1 %v9730_v8, %s6360_s1  ;;  %v2608_v62 = vrot.slane %v9728_v18, 7  ;;  %v2615_v33 = vrot.slane %v9730_v8, 7  ;;  %v9793_v12 = vsel %vm351_vm0, %v2612_v24, %v2613_v57 }
 0x5e2   :  { %14728 = vst [vmem:[#allocation21_spill] sm:$0xff] %v9730_v8  ;;  %v2792_v22 = vrot.slane %v9728_v18, 1 }
 0x5e3   :  { %2752 = vrot.lane.b32.xlu2 %v9728_v18, %s6361_s2  ;;  %v2298_v49 = vadd.f32 %v14733_v45, %v2266_v63  ;;  %v9784_v17 = vsel %vm351_vm0, %v2615_v33, %v2608_v62  ;;  %14742 = vst [vmem:[#allocation57_spill] sm:$0xff] %v9793_v12  ;;  %v9818_v50 = vsel %vm351_vm0, %v2608_v62, %v2609_v47  ;;  %v2794_v45 = vrot.slane %v9659_v41, 1  ;;  %v14759_v62 = vld [vmem:[#allocation108_spill] sm:$0xff] }
 0x5e4   :  { %14745 = vst [vmem:[#allocation19_spill] sm:$0xff] %v9818_v50  ;;  %v9840_v26 = vsel %vm575_vm1, %v2792_v22, %v2793_v36  ;;  %v2649_v19 = vmul.f32 %v9818_v50, %v9494_v16 }
 0x5e5   :  { %v2306_v29 = vmul.f32 %v2298_v49, %v14696_v60  ;;  %14747 = vst [vmem:[#allocation68_spill] sm:$0xff] %v9840_v26  ;;  %v2796_v49 = vrot.slane %v9696_v56, 1  ;;  %v9865_v42 = vsel %vm575_vm1, %v2793_v36, %v2794_v45 }
 0x5e6   :  { %14750 = vst [vmem:[#allocation85_spill] sm:$0xff] %v9865_v42 }
 0x5e7   :  { %v9748_v5 = vadd.f32 %v2595_v13, %v2306_v29 }
 0x5e8   :  { %v2260_v32 = vpop.permute.xlu0 %2259 }
 0x5e9   :  { %14735 = vst [vmem:[#allocation33_spill] sm:$0xff] %v9748_v5  ;;  %v2269_v43 = vsub.f32 %v2260_v32, %v14736_v37  ;;  %2702 = vrot.lane.b32.xlu0 %v9748_v5, %s6360_s1  ;;  %2756 = vrot.lane.b32.xlu1 %v9659_v41, %s6361_s2  ;;  %v2611_v59 = vrot.slane %v9748_v5, 7  ;;  %v2795_v34 = vrot.slane %v9748_v5, 1  ;;  %v2799_v32 = vrot.slane %v9730_v8, 1 }
 0x5ea   :  { %v9884_v37 = vsel %vm575_vm1, %v2796_v49, %v2797_v10 }
 0x5eb   :  { %2758 = vrot.lane.b32.xlu2 %v9748_v5, %s6361_s2  ;;  %v2301_v54 = vadd.f32 %v14739_v52, %v2269_v43  ;;  %v9801_v14 = vsel %vm351_vm0, %v2610_v20, %v2611_v59  ;;  %v9828_v63 = vsel %vm351_vm0, %v2611_v59, %v2612_v24  ;;  %v9857_v13 = vsel %vm575_vm1, %v2795_v34, %v2796_v49 }
 0x5ec   :  { %14743 = vst [vmem:[#allocation107_spill] sm:$0xff] %v9801_v14  ;;  %v9892_v21 = vsel %vm575_vm1, %v2794_v45, %v2795_v34  ;;  %v9900_v27 = vsel %vm575_vm1, %v2799_v32, %v2792_v22 }
 0x5ed   :  { %v2309_v15 = vmul.f32 %v2301_v54, %v14696_v60  ;;  %14746 = vst [vmem:[#allocation91_spill] sm:$0xff] %v9828_v63 }
 0x5ee   :  { %14749 = vst [vmem:[#allocation72_spill] sm:$0xff] %v9857_v13 }
 0x5ef   :  { %v9762_v2 = vadd.f32 %v2598_v7, %v2309_v15  ;;  %14752 = vst [vmem:[#allocation42_spill] sm:$0xff] %v9884_v37 }
 0x5f0   :  { %14753 = vst [vmem:[#allocation37_spill] sm:$0xff] %v9900_v27 }
 0x5f1   :  { %14740 = vst [vmem:[#allocation71_spill] sm:$0xff] %v9762_v2  ;;  %2708 = vrot.lane.b32.xlu0 %v9762_v2, %s6360_s1  ;;  %2762 = vrot.lane.b32.xlu1 %v9702_v31, %s6361_s2  ;;  %v2614_v55 = vrot.slane %v9762_v2, 7  ;;  %v2798_v29 = vrot.slane %v9762_v2, 1 }
 0x5f3   :  { %2764 = vrot.lane.b32.xlu2 %v9762_v2, %s6361_s2  ;;  %v9812_v9 = vsel %vm351_vm0, %v2613_v57, %v2614_v55  ;;  %v9844_v58 = vsel %vm351_vm0, %v2614_v55, %v2615_v33  ;;  %v9876_v46 = vsel %vm575_vm1, %v2798_v29, %v2799_v32  ;;  %v9908_v54 = vsel %vm575_vm1, %v2797_v10, %v2798_v29 }
 0x5f4   :  { %14744 = vst [vmem:[#allocation83_spill] sm:$0xff] %v9812_v9 }
 0x5f5   :  { %14748 = vst [vmem:[#allocation24_spill] sm:$0xff] %v9844_v58 }
 0x5f6   :  { %14751 = vst [vmem:[#allocation84_spill] sm:$0xff] %v9876_v46 }
 0x5f7   :  { %14754 = vst [vmem:[#allocation76_spill] sm:$0xff] %v9908_v54 }
 0x5f9   :  { %2754 = vrot.lane.b32.xlu0 %v9653_v48, %s6361_s2  ;;  %2628 = vrot.lane.b32.xlu1 %v9776_v25, %s6360_s1 }
 0x5fb   :  { %2624 = vrot.lane.b32.xlu2 %v9784_v17, %s6360_s1 }
 0x601   :  { %2760 = vrot.lane.b32.xlu0 %v9696_v56, %s6361_s2  ;;  %2634 = vrot.lane.b32.xlu1 %v9793_v12, %s6360_s1 }
 0x603   :  { %2630 = vrot.lane.b32.xlu2 %v9801_v14, %s6360_s1 }
 0x609   :  { %2766 = vrot.lane.b32.xlu0 %v9730_v8, %s6361_s2  ;;  %2664 = vrot.lane.b32.xlu1 %v9784_v17, %s6361_s2 }
 0x60b   :  { %2636 = vrot.lane.b32.xlu2 %v9812_v9, %s6360_s1 }
 0x611   :  { %2626 = vrot.lane.b32.xlu0 %v9818_v50, %s6360_s1  ;;  %2670 = vrot.lane.b32.xlu1 %v9801_v14, %s6361_s2 }
 0x613   :  { %2666 = vrot.lane.b32.xlu2 %v9818_v50, %s6361_s2 }
 0x619   :  { %2632 = vrot.lane.b32.xlu0 %v9828_v63, %s6360_s1  ;;  %2676 = vrot.lane.b32.xlu1 %v9812_v9, %s6361_s2 }
 0x61b   :  { %2672 = vrot.lane.b32.xlu2 %v9828_v63, %s6361_s2 }
 0x621   :  { %2808 = vrot.lane.b32.xlu1 %v9840_v26, %s6360_s1  ;;  %2638 = vrot.lane.b32.xlu0 %v9844_v58, %s6360_s1 }
 0x623   :  { %2678 = vrot.lane.b32.xlu2 %v9844_v58, %s6361_s2 }
 0x629   :  { %2814 = vrot.lane.b32.xlu1 %v9857_v13, %s6360_s1  ;;  %2668 = vrot.lane.b32.xlu0 %v9776_v25, %s6361_s2 }
 0x62b   :  { %2810 = vrot.lane.b32.xlu2 %v9865_v42, %s6360_s1 }
 0x62c   :  { %v9869_v1 = vpop.permute.xlu2 %2700 }
 0x631   :  { %2820 = vrot.lane.b32.xlu1 %v9876_v46, %s6360_s1  ;;  %2674 = vrot.lane.b32.xlu0 %v9793_v12, %s6361_s2 }
 0x633   :  { %2816 = vrot.lane.b32.xlu2 %v9884_v37, %s6360_s1 }
 0x635   :  { %v9888_v43 = vpop.permute.xlu2 %2706 }
 0x639   :  { %2866 = vrot.lane.b32.xlu1 %v9865_v42, %s6361_s2  ;;  %2812 = vrot.lane.b32.xlu0 %v9892_v21, %s6360_s1 }
 0x63b   :  { %2822 = vrot.lane.b32.xlu2 %v9900_v27, %s6360_s1 }
 0x63d   :  { %v9904_v52 = vpop.permute.xlu2 %2752 }
 0x641   :  { %2872 = vrot.lane.b32.xlu1 %v9884_v37, %s6361_s2  ;;  %2818 = vrot.lane.b32.xlu0 %v9908_v54, %s6360_s1 }
 0x643   :  { %2868 = vrot.lane.b32.xlu2 %v9892_v21, %s6361_s2  ;;  %v9916_v7 = vpop.permute.xlu1 %2698 }
 0x644   :  { %14755 = vst [vmem:[#allocation25_spill] sm:$0xff] %v9916_v7 }
 0x645   :  { %v9918_v15 = vpop.permute.xlu2 %2758 }
 0x646   :  { %14756 = vst [vmem:[#allocation77_spill] sm:$0xff] %v9918_v15 }
 0x649   :  { %2878 = vrot.lane.b32.xlu1 %v9900_v27, %s6361_s2  ;;  %2864 = vrot.lane.b32.xlu0 %v9840_v26, %s6361_s2  ;;  %v2713_v26 = vmul.f32 %v9916_v7, %v9492_v23 }
 0x64b   :  { %2874 = vrot.lane.b32.xlu2 %v9908_v54, %s6361_s2  ;;  %v9926_v47 = vpop.permute.xlu1 %2704 }
 0x64c   :  { %14757 = vst [vmem:[#allocation45_spill] sm:$0xff] %v9926_v47 }
 0x64d   :  { %v9928_v20 = vpop.permute.xlu2 %2764 }
 0x64e   :  { %14758 = vst [vmem:[#allocation64_spill] sm:$0xff] %v9928_v20 }
 0x651   :  { %4332 = vrot.lane.b32.xlu1 %v9597_v51, %s6360_s1  ;;  %2870 = vrot.lane.b32.xlu0 %v9857_v13, %s6361_s2  ;;  %v14762_v51 = vld [vmem:[#allocation101_spill] sm:$0xff] }
 0x653   :  { %4334 = vrot.lane.b32.xlu2 %v14759_v62, %s6360_s1  ;;  %v9936_v33 = vpop.permute.xlu0 %2696  ;;  %v9938_v24 = vpop.permute.xlu1 %2710 }
 0x654   :  { %14760 = vst [vmem:[#allocation29_spill] sm:$0xff] %v9938_v24 }
 0x655   :  { %v2625_v57 = vpop.permute.xlu2 %2624 }
 0x659   :  { %2876 = vrot.lane.b32.xlu0 %v9876_v46, %s6361_s2 }
 0x65b   :  { %v9942_v59 = vpop.permute.xlu0 %2702  ;;  %v9944_v55 = vpop.permute.xlu1 %2756 }
 0x65c   :  { %14761 = vst [vmem:[#allocation66_spill] sm:$0xff] %v9942_v59 }
 0x65d   :  { %v9946_v22 = vpop.permute.xlu2 %2630 }
 0x661   :  { %4313 = vrot.lane.b32.xlu0 %v14762_v51, %s6361_s2 }
 0x663   :  { %v9950_v36 = vpop.permute.xlu0 %2708  ;;  %v9952_v34 = vpop.permute.xlu1 %2762 }
 0x664   :  { %14763 = vst [vmem:[#allocation26_spill] sm:$0xff] %v9950_v36 }
 0x665   :  { %14764 = vst [vmem:[#allocation53_spill] sm:$0xff] %v9952_v34  ;;  %v9954_v45 = vpop.permute.xlu2 %2636 }
 0x66b   :  { %v9956_v49 = vpop.permute.xlu0 %2754  ;;  %v2629_v29 = vpop.permute.xlu1 %2628 }
 0x66c   :  { %14765 = vst [vmem:[#allocation108_spill] sm:$0xff] %v9956_v49  ;;  %v2642_v30 = vmul.f32 %v2629_v29, %v9555_v4 }
 0x66d   :  { %v2667_v10 = vpop.permute.xlu2 %2666 }
 0x66e   :  { %v2681_v2 = vmul.f32 %v2667_v10, %v9587_v3  ;;  %v2650_v10 = vmul.f32 %v9776_v25, %v9494_v16 }
 0x670   :  { %v2658_v7 = vadd.f32 %v2650_v10, %v2642_v30 }
 0x673   :  { %v9958_v32 = vpop.permute.xlu0 %2760  ;;  %v2635_v62 = vpop.permute.xlu1 %2634 }
 0x674   :  { %14766 = vst [vmem:[#allocation109_spill] sm:$0xff] %v9958_v32  ;;  %v2645_v30 = vmul.f32 %v2635_v62, %v9555_v4  ;;  %v2648_v62 = vmul.f32 %v9784_v17, %v9494_v16 }
 0x675   :  { %v2673_v35 = vpop.permute.xlu2 %2672 }
 0x67b   :  { %v9960_v60 = vpop.permute.xlu0 %2766  ;;  %v2665_v6 = vpop.permute.xlu1 %2664 }
 0x67c   :  { %14767 = vst [vmem:[#allocation110_spill] sm:$0xff] %v9960_v60 }
 0x67d   :  { %v2679_v44 = vpop.permute.xlu2 %2678 }
 0x683   :  { %v2627_v40 = vpop.permute.xlu0 %2626  ;;  %v9962_v51 = vpop.permute.xlu1 %2670 }
 0x684   :  { %v2641_v53 = vmul.f32 %v2627_v40, %v9555_v4  ;;  %v2652_v40 = vmul.f32 %v9828_v63, %v9494_v16 }
 0x685   :  { %v2811_v28 = vpop.permute.xlu2 %2810 }
 0x686   :  { %v2657_v46 = vadd.f32 %v2649_v19, %v2641_v53 }
 0x688   :  { %v2689_v15 = vadd.f32 %v2681_v2, %v2657_v46  ;;  %v2737_v46 = vmul.f32 %v9653_v48, %v9522_v11 }
 0x68a   :  { %v2721_v50 = vadd.f32 %v2713_v26, %v2689_v15  ;;  %v2716_v15 = vmul.f32 %v9926_v47, %v9492_v23 }
 0x68b   :  { %v2633_v0 = vpop.permute.xlu0 %2632  ;;  %v9964_v38 = vpop.permute.xlu1 %2676 }
 0x68c   :  { %14768 = vst [vmem:[#allocation111_spill] sm:$0xff] %v9964_v38  ;;  %v2644_v27 = vmul.f32 %v2633_v0, %v9555_v4  ;;  %v2684_v0 = vmul.f32 %v2673_v35, %v9587_v3  ;;  %v2745_v38 = vadd.f32 %v2737_v46, %v2721_v50  ;;  %v2655_v35 = vmul.f32 %v9844_v58, %v9494_v16 }
 0x68d   :  { %v9972_v36 = vpop.permute.xlu2 %2816  ;;  %v2640_v50 = vmul.f32 %v2625_v57, %v9555_v4  ;;  %v2740_v46 = vmul.f32 %v9696_v56, %v9522_v11  ;;  %v2680_v57 = vmul.f32 %v2665_v6, %v9587_v3  ;;  %v2741_v6 = vmul.f32 %v9702_v31, %v9522_v11 }
 0x68e   :  { %v2660_v53 = vadd.f32 %v2652_v40, %v2644_v27  ;;  %v2769_v40 = vmul.f32 %v9956_v49, %v9538_v61 }
 0x690   :  { %v2692_v63 = vadd.f32 %v2684_v0, %v2660_v53  ;;  %v2653_v0 = vmul.f32 %v9793_v12, %v9494_v16 }
 0x692   :  { %v2724_v53 = vadd.f32 %v2716_v15, %v2692_v63  ;;  %v14769_v63 = vld [vmem:[#allocation87_spill] sm:$0xff]  ;;  %v2661_v15 = vadd.f32 %v2653_v0, %v2645_v30  ;;  %v2772_v30 = vmul.f32 %v9958_v32, %v9538_v61  ;;  %v2643_v0 = vmul.f32 %v9946_v22, %v9555_v4 }
 0x693   :  { %v2639_v20 = vpop.permute.xlu0 %2638  ;;  %v9969_v13 = vpop.permute.xlu1 %2808  ;;  %v2828_v22 = vmul.f32 %v9972_v36, %v14769_v63 }
 0x694   :  { %v2647_v29 = vmul.f32 %v2639_v20, %v9555_v4  ;;  %v2777_v20 = vadd.f32 %v2769_v40, %v2745_v38  ;;  %v2687_v38 = vmul.f32 %v2679_v44, %v9587_v3  ;;  %v2738_v40 = vmul.f32 %v9659_v41, %v9522_v11 }
 0x695   :  { %v9989_v26 = vpop.permute.xlu2 %2822  ;;  %v2748_v49 = vadd.f32 %v2740_v46, %v2724_v53  ;;  %v2743_v53 = vmul.f32 %v9730_v8, %v9522_v11 }
 0x696   :  { %v2663_v10 = vadd.f32 %v2655_v35, %v2647_v29  ;;  %v2825_v29 = vmul.f32 %v2811_v28, %v14769_v63  ;;  %v2656_v35 = vadd.f32 %v2648_v62, %v2640_v50  ;;  %v2719_v28 = vmul.f32 %v9938_v24, %v9492_v23 }
 0x697   :  { %v2780_v46 = vadd.f32 %v2772_v30, %v2748_v49  ;;  %v2651_v24 = vmul.f32 %v9801_v14, %v9494_v16 }
 0x698   :  { %v2833_v12 = vadd.f32 %v2825_v29, %v2777_v20  ;;  %v2695_v56 = vadd.f32 %v2687_v38, %v2663_v10  ;;  %v2688_v50 = vadd.f32 %v2680_v57, %v2656_v35  ;;  %v2717_v20 = vmul.f32 %v9888_v43, %v9492_v23 }
 0x69a   :  { %v2727_v62 = vadd.f32 %v2719_v28, %v2695_v56  ;;  %v2836_v28 = vadd.f32 %v2828_v22, %v2780_v46 }
 0x69b   :  { %v2669_v19 = vpop.permute.xlu0 %2668  ;;  %v9980_v5 = vpop.permute.xlu1 %2814 }
 0x69c   :  { %v2682_v2 = vmul.f32 %v2669_v19, %v9587_v3  ;;  %v2714_v19 = vmul.f32 %v9869_v1, %v9492_v23  ;;  %v2751_v30 = vadd.f32 %v2743_v53, %v2727_v62  ;;  %v2715_v53 = vmul.f32 %v9942_v59, %v9492_v23 }
 0x69d   :  { %v2869_v10 = vpop.permute.xlu2 %2868 }
 0x69e   :  { %v2690_v27 = vadd.f32 %v2682_v2, %v2658_v7 }
 0x6a0   :  { %v2722_v58 = vadd.f32 %v2714_v19, %v2690_v27  ;;  %v14770_v27 = vld [vmem:[#allocation98_spill] sm:$0xff] }
 0x6a1   :  { %v2841_v19 = vmul.f32 %v9865_v42, %v14770_v27  ;;  %v2844_v44 = vmul.f32 %v9884_v37, %v14770_v27  ;;  %v2683_v42 = vmul.f32 %v9962_v51, %v9587_v3  ;;  %v2842_v56 = vmul.f32 %v9892_v21, %v14770_v27 }
 0x6a2   :  { %v2746_v48 = vadd.f32 %v2738_v40, %v2722_v58  ;;  %v2770_v58 = vmul.f32 %v9944_v55, %v9538_v61 }
 0x6a3   :  { %v2675_v7 = vpop.permute.xlu0 %2674  ;;  %v10001_v2 = vpop.permute.xlu1 %2820  ;;  %v2849_v57 = vadd.f32 %v2841_v19, %v2833_v12  ;;  %v2845_v19 = vmul.f32 %v9908_v54, %v14770_v27  ;;  %v2852_v62 = vadd.f32 %v2844_v44, %v2836_v28 }
 0x6a4   :  { %v2685_v47 = vmul.f32 %v2675_v7, %v9587_v3  ;;  %v2778_v40 = vadd.f32 %v2770_v58, %v2746_v48  ;;  %v2736_v48 = vmul.f32 %v9728_v18, %v9522_v11  ;;  %v2654_v58 = vmul.f32 %v9812_v9, %v9494_v16 }
 0x6a6   :  { %v2693_v7 = vadd.f32 %v2685_v47, %v2661_v15  ;;  %v2712_v47 = vmul.f32 %v9936_v33, %v9492_v23 }
 0x6a8   :  { %v2725_v15 = vadd.f32 %v2717_v20, %v2693_v7  ;;  %v2720_v32 = vadd.f32 %v2712_v47, %v2688_v50  ;;  %v2659_v7 = vadd.f32 %v2651_v24, %v2643_v0  ;;  %v2882_v50 = vmul.f32 %v2869_v10, %v9486_v39  ;;  %v14771_v20 = vld [vmem:[#allocation52_spill] sm:$0xff] }
 0x6a9   :  { %v2768_v24 = vmul.f32 %v9904_v52, %v9538_v61  ;;  %v2773_v10 = vmul.f32 %v9952_v34, %v9538_v61 }
 0x6aa   :  { %v2749_v36 = vadd.f32 %v2741_v6, %v2725_v15  ;;  %v2646_v6 = vmul.f32 %v9954_v45, %v9555_v4  ;;  %v14772_v15 = vld [vmem:[#allocation40_spill] sm:$0xff] }
 0x6ab   :  { %v2813_v38 = vpop.permute.xlu0 %2812  ;;  %v2867_v29 = vpop.permute.xlu1 %2866 }
 0x6ac   :  { %v2826_v35 = vmul.f32 %v2813_v38, %v14769_v63  ;;  %v2881_v37 = vmul.f32 %v2867_v29, %v9486_v39  ;;  %v2775_v38 = vmul.f32 %v9960_v60, %v9538_v61 }
 0x6ae   :  { %v2834_v12 = vadd.f32 %v2826_v35, %v2778_v40  ;;  %v2889_v49 = vadd.f32 %v2881_v37, %v2849_v57  ;;  %v2691_v37 = vadd.f32 %v2683_v42, %v2659_v7  ;;  %v2744_v57 = vadd.f32 %v2736_v48, %v2720_v32  ;;  %v2875_v7 = vpop.permute.xlu2 %2874 }
 0x6af   :  { %v2824_v42 = vmul.f32 %v9969_v13, %v14769_v63  ;;  %v2783_v32 = vadd.f32 %v2775_v38, %v2751_v30  ;;  %v2781_v35 = vadd.f32 %v2773_v10, %v2749_v36  ;;  %v2831_v13 = vmul.f32 %v9989_v26, %v14769_v63  ;;  %v14775_v26 = vld [vmem:[#allocation46_spill] sm:$0xff] }
 0x6b0   :  { %v2850_v51 = vadd.f32 %v2842_v56, %v2834_v12  ;;  %v10051_v47 = vmul.f32 %v2889_v49, %v14771_v20  ;;  %v2723_v48 = vadd.f32 %v2715_v53, %v2691_v37  ;;  %v14773_v12 = vld [vmem:[#allocation111_spill] sm:$0xff]  ;;  %v2776_v45 = vadd.f32 %v2768_v24, %v2744_v57  ;;  %v14774_v37 = vld [vmem:[#allocation33_spill] sm:$0xff] }
 0x6b1   :  { %v2686_v49 = vmul.f32 %v14773_v12, %v9587_v3  ;;  %v2839_v38 = vadd.f32 %v2831_v13, %v2783_v32  ;;  %v2739_v53 = vmul.f32 %v14774_v37, %v9522_v11  ;;  %v2885_v57 = vmul.f32 %v2875_v7, %v9486_v39 }
 0x6b2   :  { %v2890_v0 = vadd.f32 %v2882_v50, %v2850_v51  ;;  %3002 = vrot.lane.b32.xlu1 %v10051_v47, %s6360_s1  ;;  %v14026_v28 = vrot.slane %v10051_v47, 1  ;;  %v2662_v51 = vadd.f32 %v2654_v58, %v2646_v6  ;;  %v2832_v36 = vadd.f32 %v2824_v42, %v2776_v45  ;;  %v14778_v58 = vld [vmem:[#allocation68_spill] sm:$0xff] }
 0x6b3   :  { %v2819_v46 = vpop.permute.xlu0 %2818  ;;  %v2873_v29 = vpop.permute.xlu1 %2872  ;;  %v2840_v6 = vmul.f32 %v14778_v58, %v14770_v27  ;;  %v2747_v32 = vadd.f32 %v2739_v53, %v2723_v48  ;;  %v2827_v45 = vmul.f32 %v9980_v5, %v14769_v63  ;;  %v14782_v48 = vld [vmem:[#allocation61_spill] sm:$0xff] }
 0x6b4   :  { %v10070_v40 = vmul.f32 %v2890_v0, %v14772_v15  ;;  %v2829_v22 = vmul.f32 %v2819_v46, %v14769_v63  ;;  %v2884_v56 = vmul.f32 %v2873_v29, %v9486_v39  ;;  %v2694_v42 = vadd.f32 %v2686_v49, %v2662_v51  ;;  %v14809_v0 = vld [vmem:[#allocation56_spill] sm:$0xff] }
 0x6b5   :  { %v2848_v7 = vadd.f32 %v2840_v6, %v2832_v36  ;;  %v14784_v6 = vld [vmem:[#allocation71_spill] sm:$0xff] }
 0x6b6   :  { %v2837_v30 = vadd.f32 %v2829_v22, %v2781_v35  ;;  %v2892_v44 = vadd.f32 %v2884_v56, %v2852_v62  ;;  %3004 = vrot.lane.b32.xlu2 %v10070_v40, %s6360_s1  ;;  %v14025_v50 = vrot.slane %v10070_v40, 1  ;;  %v14779_v62 = vld [vmem:[#allocation37_spill] sm:$0xff]  ;;  %v14781_v56 = vld [vmem:[#allocation26_spill] sm:$0xff] }
 0x6b7   :  { %v2847_v29 = vmul.f32 %v14779_v62, %v14770_v27  ;;  %v14780_v35 = vld [vmem:[#allocation77_spill] sm:$0xff]  ;;  %v2718_v12 = vmul.f32 %v14781_v56, %v9492_v23 }
 0x6b8   :  { %v2853_v24 = vadd.f32 %v2845_v19, %v2837_v30  ;;  %v10086_v10 = vmul.f32 %v2892_v44, %v14775_v26  ;;  %v10094_v46 = vsel %vm575_vm1, %v14026_v28, %v14025_v50  ;;  %v2771_v22 = vmul.f32 %v14780_v35, %v9538_v61  ;;  %v14785_v26 = vld [vmem:[#allocation59_spill] sm:$0xff]  ;;  %v14810_v35 = vld [vmem:[#allocation48_spill] sm:$0xff] }
 0x6b9   :  { %14777 = vst [vmem:[#allocation87_spill] sm:$0xff] %v10094_v46  ;;  %v2855_v51 = vadd.f32 %v2847_v29, %v2839_v38  ;;  %v14786_v38 = vld [vmem:[#allocation51_spill] sm:$0xff] }
 0x6ba   :  { %v2893_v19 = vadd.f32 %v2885_v57, %v2853_v24  ;;  %3008 = vrot.lane.b32.xlu1 %v10086_v10, %s6360_s1  ;;  %v2726_v57 = vadd.f32 %v2718_v12, %v2694_v42  ;;  %v2779_v24 = vadd.f32 %v2771_v22, %v2747_v32  ;;  %v14028_v5 = vrot.slane %v10086_v10, 1  ;;  %v14788_v32 = vld [vmem:[#allocation72_spill] sm:$0xff] }
 0x6bb   :  { %v2865_v13 = vpop.permute.xlu0 %2864  ;;  %v2879_v49 = vpop.permute.xlu1 %2878  ;;  %v2843_v22 = vmul.f32 %v14788_v32, %v14770_v27 }
 0x6bc   :  { %v10109_v30 = vmul.f32 %v2893_v19, %v14782_v48  ;;  %v2880_v44 = vmul.f32 %v2865_v13, %v9486_v39  ;;  %v2887_v53 = vmul.f32 %v2879_v49, %v9486_v39  ;;  %v2742_v19 = vmul.f32 %v14784_v6, %v9522_v11 }
 0x6bd   :  { %v2835_v48 = vadd.f32 %v2827_v45, %v2779_v24  ;;  %v14790_v24 = vld [vmem:[#allocation50_spill] sm:$0xff]  ;;  %v14799_v6 = vrot.slane %v10070_v40, 1 }
 0x6be   :  { %14783 = vst [vmem:[#allocation98_spill] sm:$0xff] %v10109_v30  ;;  %v2888_v50 = vadd.f32 %v2880_v44, %v2848_v7  ;;  %v2895_v28 = vadd.f32 %v2887_v53, %v2855_v51  ;;  %3010 = vrot.lane.b32.xlu2 %v10109_v30, %s6360_s1  ;;  %v14027_v36 = vrot.slane %v10109_v30, 1  ;;  %v2750_v12 = vadd.f32 %v2742_v19, %v2726_v57 }
 0x6bf   :  { %v2830_v7 = vmul.f32 %v10001_v2, %v14769_v63  ;;  %v2851_v49 = vadd.f32 %v2843_v22, %v2835_v48 }
 0x6c0   :  { %v10120_v13 = vmul.f32 %v2888_v50, %v14785_v26  ;;  %v10123_v29 = vmul.f32 %v2895_v28, %v14786_v38  ;;  %v10131_v42 = vsel %vm575_vm1, %v14028_v5, %v14027_v36  ;;  %v14789_v50 = vld [vmem:[#allocation64_spill] sm:$0xff]  ;;  %v10251_v26 = vpop.permute.xlu2 %4334 }
 0x6c1   :  { %14787 = vst [vmem:[#allocation111_spill] sm:$0xff] %v10131_v42  ;;  %v2774_v45 = vmul.f32 %v14789_v50, %v9538_v61  ;;  %v14791_v36 = vld [vmem:[#allocation84_spill] sm:$0xff] }
 0x6c2   :  { %3000 = vrot.lane.b32.xlu0 %v10120_v13, %s6360_s1  ;;  %3014 = vrot.lane.b32.xlu1 %v10123_v29, %s6360_s1  ;;  %v2846_v5 = vmul.f32 %v14791_v36, %v14770_v27  ;;  %14795 = vst [vmem:[#allocation113_spill] sm:$0xff] %v10251_v26 }
 0x6c3   :  { %v2871_v28 = vpop.permute.xlu0 %2870  ;;  %v2782_v51 = vadd.f32 %v2774_v45, %v2750_v12  ;;  %v10291_v50 = vpop.permute.xlu1 %4332 }
 0x6c4   :  { %v2883_v44 = vmul.f32 %v2871_v28, %v9486_v39  ;;  %v14792_v28 = vld [vmem:[#allocation55_spill] sm:$0xff]  ;;  %14801 = vst [vmem:[#allocation117_spill] sm:$0xff] %v10291_v50 }
 0x6c5   :  { %v2838_v57 = vadd.f32 %v2830_v7, %v2782_v51  ;;  %v2914_v7 = vrot.slane %v10070_v40, 7  ;;  %v2919_v51 = vrot.slane %v10123_v29, 7 }
 0x6c6   :  { %v2891_v53 = vadd.f32 %v2883_v44, %v2851_v49  ;;  %3048 = vrot.lane.b32.xlu2 %v10120_v13, %s6361_s2  ;;  %v2912_v44 = vrot.slane %v10120_v13, 7 }
 0x6c7   :  { %v2854_v48 = vadd.f32 %v2846_v5, %v2838_v57  ;;  %v2913_v5 = vrot.slane %v10051_v47, 7  ;;  %v2917_v57 = vrot.slane %v10109_v30, 7 }
 0x6c8   :  { %v10147_v19 = vmul.f32 %v2891_v53, %v14790_v24  ;;  %v10181_v53 = vsel %vm351_vm0, %v2919_v51, %v2912_v44 }
 0x6c9   :  { %v10171_v49 = vsel %vm351_vm0, %v2913_v5, %v2914_v7 }
 0x6ca   :  { %3006 = vrot.lane.b32.xlu0 %v10147_v19, %s6360_s1  ;;  %3052 = vrot.lane.b32.xlu1 %v10070_v40, %s6361_s2 }
 0x6cb   :  { %v2877_v2 = vpop.permute.xlu0 %2876 }
 0x6cc   :  { %v2886_v22 = vmul.f32 %v2877_v2, %v9486_v39  ;;  %v2916_v2 = vrot.slane %v10086_v10, 7 }
 0x6ce   :  { %v2894_v12 = vadd.f32 %v2886_v22, %v2854_v48  ;;  %3054 = vrot.lane.b32.xlu2 %v10147_v19, %s6361_s2  ;;  %v10189_v48 = vsel %vm351_vm0, %v2916_v2, %v2917_v57  ;;  %v2915_v22 = vrot.slane %v10147_v19, 7 }
 0x6d0   :  { %v10159_v45 = vmul.f32 %v2894_v12, %v14792_v28  ;;  %v10198_v12 = vsel %vm351_vm0, %v2914_v7, %v2915_v22  ;;  %v10215_v7 = vsel %vm351_vm0, %v2912_v44, %v2913_v5  ;;  %v3080_v5 = vrot.slane %v10120_v13, 1 }
 0x6d1   :  { %v14793_v44 = vrot.slane %v10051_v47, 1 }
 0x6d2   :  { %3012 = vrot.lane.b32.xlu0 %v10159_v45, %s6360_s1  ;;  %3058 = vrot.lane.b32.xlu1 %v10109_v30, %s6361_s2  ;;  %v2918_v28 = vrot.slane %v10159_v45, 7 }
 0x6d3   :  { %v10238_v38 = vsel %vm575_vm1, %v3080_v5, %v14793_v44  ;;  %v14796_v44 = vrot.slane %v10086_v10, 1 }
 0x6d4   :  { %v10209_v24 = vsel %vm351_vm0, %v2917_v57, %v2918_v28  ;;  %v10225_v57 = vsel %vm351_vm0, %v2915_v22, %v2916_v2  ;;  %14794 = vst [vmem:[#allocation112_spill] sm:$0xff] %v10238_v38  ;;  %v10242_v2 = vsel %vm351_vm0, %v2918_v28, %v2919_v51  ;;  %v3083_v22 = vrot.slane %v10147_v19, 1 }
 0x6d5   :  { %v3086_v28 = vrot.slane %v10159_v45, 1  ;;  %v3087_v51 = vrot.slane %v10123_v29, 1 }
 0x6d6   :  { %3060 = vrot.lane.b32.xlu2 %v10159_v45, %s6361_s2  ;;  %v10257_v15 = vsel %vm575_vm1, %v3083_v22, %v14796_v44  ;;  %v10285_v36 = vsel %vm575_vm1, %v14799_v6, %v3083_v22  ;;  %v14804_v6 = vrot.slane %v10109_v30, 1 }
 0x6d7   :  { %14797 = vst [vmem:[#allocation114_spill] sm:$0xff] %v10257_v15  ;;  %v10271_v20 = vsel %vm575_vm1, %v3086_v28, %v3087_v51  ;;  %v10295_v37 = vsel %vm575_vm1, %v3087_v51, %v3080_v5 }
 0x6d8   :  { %14798 = vst [vmem:[#allocation115_spill] sm:$0xff] %v10271_v20  ;;  %v10305_v22 = vsel %vm575_vm1, %v14804_v6, %v3086_v28  ;;  %v10319_v28 = vpop.permute.xlu0 %4313 }
 0x6d9   :  { %14800 = vst [vmem:[#allocation116_spill] sm:$0xff] %v10285_v36 }
 0x6da   :  { %3050 = vrot.lane.b32.xlu0 %v10051_v47, %s6361_s2  ;;  %2932 = vrot.lane.b32.xlu1 %v10171_v49, %s6360_s1  ;;  %14802 = vst [vmem:[#allocation118_spill] sm:$0xff] %v10295_v37 }
 0x6db   :  { %14805 = vst [vmem:[#allocation120_spill] sm:$0xff] %v10305_v22 }
 0x6dc   :  { %14807 = vst [vmem:[#allocation122_spill] sm:$0xff] %v10319_v28 }
 0x6de   :  { %2928 = vrot.lane.b32.xlu2 %v10181_v53, %s6360_s1 }
 0x6e2   :  { %3056 = vrot.lane.b32.xlu0 %v10086_v10, %s6361_s2  ;;  %2938 = vrot.lane.b32.xlu1 %v10189_v48, %s6360_s1 }
 0x6e6   :  { %2934 = vrot.lane.b32.xlu2 %v10198_v12, %s6360_s1 }
 0x6ea   :  { %3062 = vrot.lane.b32.xlu0 %v10123_v29, %s6361_s2  ;;  %2968 = vrot.lane.b32.xlu1 %v10181_v53, %s6361_s2 }
 0x6ee   :  { %2940 = vrot.lane.b32.xlu2 %v10209_v24, %s6360_s1 }
 0x6f2   :  { %2930 = vrot.lane.b32.xlu0 %v10215_v7, %s6360_s1  ;;  %2974 = vrot.lane.b32.xlu1 %v10198_v12, %s6361_s2 }
 0x6f6   :  { %2970 = vrot.lane.b32.xlu2 %v10215_v7, %s6361_s2 }
 0x6fa   :  { %2936 = vrot.lane.b32.xlu0 %v10225_v57, %s6360_s1  ;;  %2980 = vrot.lane.b32.xlu1 %v10209_v24, %s6361_s2 }
 0x6fe   :  { %2976 = vrot.lane.b32.xlu2 %v10225_v57, %s6361_s2 }
 0x702   :  { %3096 = vrot.lane.b32.xlu1 %v10238_v38, %s6360_s1  ;;  %2942 = vrot.lane.b32.xlu0 %v10242_v2, %s6360_s1 }
 0x706   :  { %2982 = vrot.lane.b32.xlu2 %v10242_v2, %s6361_s2 }
 0x70a   :  { %3102 = vrot.lane.b32.xlu1 %v10257_v15, %s6360_s1  ;;  %2972 = vrot.lane.b32.xlu0 %v10171_v49, %s6361_s2 }
 0x70e   :  { %3098 = vrot.lane.b32.xlu2 %v10094_v46, %s6360_s1 }
 0x710   :  { %v10267_v26 = vpop.permute.xlu2 %3004 }
 0x712   :  { %3108 = vrot.lane.b32.xlu1 %v10271_v20, %s6360_s1  ;;  %2978 = vrot.lane.b32.xlu0 %v10189_v48, %s6361_s2 }
 0x716   :  { %3104 = vrot.lane.b32.xlu2 %v10131_v42, %s6360_s1 }
 0x718   :  { %v10279_v44 = vpop.permute.xlu2 %3010 }
 0x71a   :  { %3146 = vrot.lane.b32.xlu1 %v10094_v46, %s6361_s2  ;;  %3100 = vrot.lane.b32.xlu0 %v10285_v36, %s6360_s1 }
 0x71e   :  { %3110 = vrot.lane.b32.xlu2 %v10295_v37, %s6360_s1 }
 0x720   :  { %v10299_v56 = vpop.permute.xlu2 %3048 }
 0x721   :  { %14803 = vst [vmem:[#allocation119_spill] sm:$0xff] %v10299_v56 }
 0x722   :  { %3152 = vrot.lane.b32.xlu1 %v10131_v42, %s6361_s2  ;;  %3106 = vrot.lane.b32.xlu0 %v10305_v22, %s6360_s1 }
 0x724   :  { %v3003_v50 = vpop.permute.xlu1 %3002 }
 0x726   :  { %3148 = vrot.lane.b32.xlu2 %v10285_v36, %s6361_s2 }
 0x728   :  { %v10313_v5 = vpop.permute.xlu2 %3054 }
 0x729   :  { %14806 = vst [vmem:[#allocation121_spill] sm:$0xff] %v10313_v5  ;;  %v14811_v5 = vld [vmem:[#allocation74_spill] sm:$0xff] }
 0x72a   :  { %3158 = vrot.lane.b32.xlu1 %v10295_v37, %s6361_s2  ;;  %3144 = vrot.lane.b32.xlu0 %v10238_v38, %s6361_s2  ;;  %v10343_v38 = vld [vmem:[#allocation13 + $0x10] sm:$0xff] }
 0x72b   :  { %14814 = vst [vmem:[#allocation48_spill] sm:$0xff] %v10343_v38 }
 0x72c   :  { %v10321_v51 = vpop.permute.xlu1 %3008 }
 0x72e   :  { %3154 = vrot.lane.b32.xlu2 %v10305_v22, %s6361_s2 }
 0x730   :  { %v10325_v6 = vpop.permute.xlu2 %3060 }
 0x731   :  { %14808 = vst [vmem:[#allocation123_spill] sm:$0xff] %v10325_v6 }
 0x732   :  { %4338 = vrot.lane.b32.xlu1 %v14809_v0, %s6360_s1  ;;  %3150 = vrot.lane.b32.xlu0 %v10257_v15, %s6361_s2  ;;  %v14813_v0 = vld [vmem:[#allocation31_spill] sm:$0xff] }
 0x734   :  { %v3001_v9 = vpop.permute.xlu0 %3000  ;;  %v10331_v32 = vpop.permute.xlu1 %3014 }
 0x735   :  { %v3016_v36 = vmul.f32 %v3001_v9, %v9492_v23 }
 0x736   :  { %4340 = vrot.lane.b32.xlu2 %v14810_v35, %s6360_s1 }
 0x738   :  { %v2929_v28 = vpop.permute.xlu2 %2928 }
 0x739   :  { %v2944_v56 = vmul.f32 %v2929_v28, %v14769_v63  ;;  %v2955_v28 = vmul.f32 %v10198_v12, %v14770_v27 }
 0x73a   :  { %4344 = vrot.lane.b32.xlu1 %v14811_v5, %s6360_s1  ;;  %3156 = vrot.lane.b32.xlu0 %v10271_v20, %s6361_s2  ;;  %v6257_v5 = vld [vmem:[#allocation13 + $0x28] sm:$0xff] }
 0x73c   :  { %v3007_v6 = vpop.permute.xlu0 %3006  ;;  %v10339_v37 = vpop.permute.xlu1 %3052 }
 0x73d   :  { %14812 = vst [vmem:[#allocation56_spill] sm:$0xff] %v10339_v37  ;;  %v3032_v37 = vmul.f32 %v10120_v13, %v9522_v11 }
 0x73e   :  { %4346 = vrot.lane.b32.xlu2 %v14813_v0, %s6360_s1 }
 0x740   :  { %v2935_v15 = vpop.permute.xlu2 %2934 }
 0x741   :  { %v2947_v3 = vmul.f32 %v2935_v15, %v14769_v63 }
 0x742   :  { %4336 = vrot.lane.b32.xlu0 %v10343_v38, %s6360_s1  ;;  %v2952_v38 = vmul.f32 %v10181_v53, %v14770_v27 }
 0x744   :  { %v3013_v35 = vpop.permute.xlu0 %3012  ;;  %v10347_v62 = vpop.permute.xlu1 %3058  ;;  %v2960_v58 = vadd.f32 %v2952_v38, %v2944_v56  ;;  %v2963_v56 = vadd.f32 %v2955_v28, %v2947_v3 }
 0x745   :  { %14815 = vst [vmem:[#allocation74_spill] sm:$0xff] %v10347_v62 }
 0x748   :  { %v2941_v59 = vpop.permute.xlu2 %2940 }
 0x749   :  { %v2950_v3 = vmul.f32 %v2941_v59, %v14769_v63 }
 0x74a   :  { %4342 = vrot.lane.b32.xlu0 %v6257_v5, %s6360_s1 }
 0x74c   :  { %v10350_v20 = vpop.permute.xlu0 %3050  ;;  %v10352_v14 = vpop.permute.xlu1 %2932 }
 0x750   :  { %v2971_v22 = vpop.permute.xlu2 %2970 }
 0x754   :  { %v10354_v60 = vpop.permute.xlu0 %3056  ;;  %v10356_v0 = vpop.permute.xlu1 %2938 }
 0x758   :  { %v2977_v42 = vpop.permute.xlu2 %2976 }
 0x75c   :  { %v10361_v62 = vpop.permute.xlu0 %3062  ;;  %v2969_v54 = vpop.permute.xlu1 %2968 }
 0x75d   :  { %14816 = vst [vmem:[#allocation31_spill] sm:$0xff] %v10361_v62  ;;  %v2984_v5 = vmul.f32 %v2969_v54, %v9486_v39  ;;  %v2953_v54 = vmul.f32 %v10215_v7, %v14770_v27 }
 0x75f   :  { %v2992_v30 = vadd.f32 %v2984_v5, %v2960_v58  ;;  %v3019_v58 = vmul.f32 %v3007_v6, %v9492_v23 }
 0x760   :  { %v2983_v46 = vpop.permute.xlu2 %2982 }
 0x761   :  { %v3024_v34 = vadd.f32 %v3016_v36, %v2992_v30  ;;  %v2985_v30 = vmul.f32 %v2971_v22, %v9486_v39  ;;  %v2956_v22 = vmul.f32 %v10225_v57, %v14770_v27 }
 0x763   :  { %v10370_v53 = vadd.f32 %v3032_v37, %v3024_v34  ;;  %v3035_v34 = vmul.f32 %v10147_v19, %v9522_v11  ;;  %v3017_v37 = vmul.f32 %v3003_v50, %v9492_v23 }
 0x764   :  { %v2931_v62 = vpop.permute.xlu0 %2930  ;;  %v2975_v16 = vpop.permute.xlu1 %2974 }
 0x765   :  { %v2945_v9 = vmul.f32 %v2931_v62, %v14769_v63  ;;  %v2987_v15 = vmul.f32 %v2975_v16, %v9486_v39  ;;  %v2958_v62 = vmul.f32 %v10209_v24, %v14770_v27  ;;  %v3033_v16 = vmul.f32 %v10051_v47, %v9522_v11 }
 0x766   :  { %v3022_v24 = vmul.f32 %v3013_v35, %v9492_v23 }
 0x767   :  { %v2961_v36 = vadd.f32 %v2953_v54, %v2945_v9  ;;  %v2995_v13 = vadd.f32 %v2987_v15, %v2963_v56  ;;  %v2966_v28 = vadd.f32 %v2958_v62, %v2950_v3  ;;  %v2988_v9 = vmul.f32 %v2977_v42, %v9486_v39 }
 0x768   :  { %v3099_v50 = vpop.permute.xlu2 %3098 }
 0x769   :  { %v2993_v38 = vadd.f32 %v2985_v30, %v2961_v36  ;;  %v3027_v12 = vadd.f32 %v3019_v58, %v2995_v13  ;;  %v3020_v58 = vmul.f32 %v10321_v51, %v9492_v23  ;;  %v3038_v36 = vmul.f32 %v10159_v45, %v9522_v11 }
 0x76a   :  { %v2959_v51 = vmul.f32 %v10242_v2, %v14770_v27 }
 0x76b   :  { %v3025_v7 = vadd.f32 %v3017_v37, %v2993_v38  ;;  %v10386_v6 = vadd.f32 %v3035_v34, %v3027_v12  ;;  %v3036_v34 = vmul.f32 %v10086_v10, %v9522_v11  ;;  %v2991_v12 = vmul.f32 %v2983_v46, %v9486_v39 }
 0x76c   :  { %v2937_v5 = vpop.permute.xlu0 %2936  ;;  %v2981_v19 = vpop.permute.xlu1 %2980  ;;  %v2954_v46 = vmul.f32 %v10171_v49, %v14770_v27  ;;  %v3065_v49 = vmul.f32 %v10350_v20, %v9538_v61  ;;  %v14820_v20 = vld [vmem:[#allocation108_spill] sm:$0xff] }
 0x76d   :  { %v3041_v56 = vadd.f32 %v3033_v16, %v3025_v7  ;;  %v2948_v59 = vmul.f32 %v2937_v5, %v14769_v63  ;;  %v2990_v54 = vmul.f32 %v2981_v19, %v9486_v39  ;;  %v3023_v7 = vmul.f32 %v10331_v32, %v9492_v23 }
 0x76e   :  { %v2946_v16 = vmul.f32 %v10352_v14, %v14769_v63  ;;  %v3039_v5 = vmul.f32 %v10123_v29, %v9522_v11  ;;  %v2730_v14 = vadd.f32 %v9869_v1, %v9776_v25  ;;  %v2949_v29 = vmul.f32 %v10356_v0, %v14769_v63 }
 0x76f   :  { %v2964_v15 = vadd.f32 %v2956_v22, %v2948_v59  ;;  %v2998_v47 = vadd.f32 %v2990_v54, %v2966_v28  ;;  %v3073_v25 = vadd.f32 %v3065_v49, %v3041_v56  ;;  %v3034_v56 = vmul.f32 %v10070_v40, %v9522_v11 }
 0x770   :  { %v10408_v62 = vpop.permute.xlu2 %3104  ;;  %v2962_v54 = vadd.f32 %v2954_v46, %v2946_v16 }
 0x771   :  { %v2996_v30 = vadd.f32 %v2988_v9, %v2964_v15  ;;  %v3030_v57 = vadd.f32 %v3022_v24, %v2998_v47  ;;  %v3018_v9 = vmul.f32 %v10267_v26, %v9492_v23  ;;  %v14817_v15 = vld [vmem:[#allocation19_spill] sm:$0xff]  ;;  %v14818_v47 = vld [vmem:[#allocation25_spill] sm:$0xff]  ;;  %v3178_v26 = vmul.f32 4.0, %v9659_v41 }
 0x773   :  { %v3028_v13 = vadd.f32 %v3020_v58, %v2996_v30  ;;  %v10400_v37 = vadd.f32 %v3038_v36, %v3030_v57  ;;  %v2729_v58 = vadd.f32 %v14818_v47, %v14817_v15  ;;  %v2786_v30 = vadd.f32 %v9944_v55, %v2730_v14  ;;  %v14827_v15 = vld [vmem:[#allocation97_spill] sm:$0xff]  ;;  %v14828_v47 = vld [vmem:[#allocation87_spill] sm:$0xff] }
 0x774   :  { %v2943_v3 = vpop.permute.xlu0 %2942  ;;  %v10402_v35 = vpop.permute.xlu1 %3096  ;;  %v2957_v57 = vmul.f32 %v10189_v48, %v14770_v27  ;;  %v2728_v55 = vadd.f32 %v9936_v33, %v9784_v17  ;;  %v3113_v48 = vmul.f32 %v3099_v50, %v9555_v4  ;;  %v10462_v33 = vmul.f32 4.0, %v9730_v8 }
 0x775   :  { %v3044_v42 = vadd.f32 %v3036_v34, %v3028_v13  ;;  %v2951_v38 = vmul.f32 %v2943_v3, %v14769_v63  ;;  %v14819_v34 = vld [vmem:[#allocation81_spill] sm:$0xff]  ;;  %v3068_v14 = vmul.f32 %v10354_v60, %v9538_v61 }
 0x776   :  { %v3177_v3 = vmul.f32 4.0, %v14819_v34  ;;  %v3121_v46 = vadd.f32 %v3113_v48, %v3073_v25  ;;  %v14830_v25 = vld [vmem:[#allocation53_spill] sm:$0xff] }
 0x777   :  { %v2967_v45 = vadd.f32 %v2959_v51, %v2951_v38  ;;  %v2785_v38 = vadd.f32 %v14820_v20, %v2729_v58  ;;  %v2965_v51 = vadd.f32 %v2957_v57, %v2949_v29  ;;  %v2784_v29 = vadd.f32 %v9904_v52, %v2728_v55  ;;  %v14831_v55 = vld [vmem:[#allocation43_spill] sm:$0xff] }
 0x778   :  { %v10423_v32 = vpop.permute.xlu2 %3110  ;;  %v3129_v58 = vmul.f32 %v14828_v47, %v14827_v15 }
 0x779   :  { %v2999_v10 = vadd.f32 %v2991_v12, %v2967_v45  ;;  %v10447_v12 = vmul.f32 4.0, %v9702_v31  ;;  %v10453_v45 = vmul.f32 4.0, %v9728_v18 }
 0x77a   :  { %v3137_v52 = vadd.f32 %v3129_v58, %v3121_v46  ;;  %v14837_v46 = vld [vmem:[#allocation68_spill] sm:$0xff] }
 0x77b   :  { %v3031_v22 = vadd.f32 %v3023_v7, %v2999_v10  ;;  %v2858_v7 = vadd.f32 %v9892_v21, %v2786_v30  ;;  %v14821_v10 = vld [vmem:[#allocation39_spill] sm:$0xff]  ;;  %v3021_v21 = vmul.f32 %v10279_v44, %v9492_v23  ;;  %v14829_v30 = vld [vmem:[#allocation56_spill] sm:$0xff] }
 0x77c   :  { %v2973_v19 = vpop.permute.xlu0 %2972  ;;  %v10416_v28 = vpop.permute.xlu1 %3102  ;;  %v10457_v16 = vmul.f32 4.0, %v14821_v10  ;;  %v3066_v57 = vmul.f32 %v14829_v30, %v9538_v61 }
 0x77d   :  { %v10420_v2 = vadd.f32 %v3039_v5, %v3031_v22  ;;  %v2986_v59 = vmul.f32 %v2973_v19, %v9486_v39  ;;  %v14822_v5 = vld [vmem:[#allocation91_spill] sm:$0xff]  ;;  %v14823_v19 = vld [vmem:[#allocation45_spill] sm:$0xff] }
 0x77e   :  { %v2732_v17 = vadd.f32 %v14823_v19, %v14822_v5  ;;  %v14833_v5 = vld [vmem:[#allocation29_spill] sm:$0xff] }
 0x77f   :  { %v2994_v24 = vadd.f32 %v2986_v59, %v2962_v54  ;;  %v14824_v59 = vld [vmem:[#allocation57_spill] sm:$0xff] }
 0x780   :  { %v2733_v40 = vadd.f32 %v9888_v43, %v14824_v59  ;;  %v14825_v54 = vld [vmem:[#allocation85_spill] sm:$0xff]  ;;  %v3186_v43 = vsub.f32 %v3178_v26, %v2858_v7  ;;  %v3116_v59 = vmul.f32 %v10408_v62, %v9555_v4  ;;  %v14834_v26 = vld [vmem:[#allocation98_spill] sm:$0xff] }
 0x781   :  { %v3026_v1 = vadd.f32 %v3018_v9, %v2994_v24  ;;  %v2857_v24 = vadd.f32 %v14825_v54, %v2785_v38  ;;  %v14826_v9 = vld [vmem:[#allocation109_spill] sm:$0xff]  ;;  %v3037_v7 = vmul.f32 %v14834_v26, %v9522_v11 }
 0x782   :  { %v2788_v49 = vadd.f32 %v14826_v9, %v2732_v17  ;;  %v14838_v9 = vld [vmem:[#allocation47_spill] sm:$0xff] }
 0x783   :  { %v3042_v50 = vadd.f32 %v3034_v56, %v3026_v1  ;;  %v2789_v1 = vadd.f32 %v14830_v25, %v2733_v40  ;;  %v14832_v56 = vld [vmem:[#allocation24_spill] sm:$0xff]  ;;  %v3185_v17 = vsub.f32 %v3177_v3, %v2857_v24  ;;  %v3210_v47 = vmul.f32 %v3186_v43, %v14838_v9  ;;  %v14840_v25 = vld [vmem:[#allocation22_spill] sm:$0xff] }
 0x784   :  { %v2979_v36 = vpop.permute.xlu0 %2978  ;;  %v10438_v13 = vpop.permute.xlu1 %3108  ;;  %v2735_v19 = vadd.f32 %v14833_v5, %v14832_v56  ;;  %v14836_v40 = vld [vmem:[#allocation116_spill] sm:$0xff]  ;;  %v3112_v56 = vmul.f32 %v10402_v35, %v9555_v4 }
 0x785   :  { %v2989_v0 = vmul.f32 %v2979_v36, %v9486_v39  ;;  %v3149_v36 = vpop.permute.xlu2 %3148  ;;  %v14839_v24 = vld [vmem:[#allocation76_spill] sm:$0xff] }
 0x786   :  { %v2861_v30 = vadd.f32 %v14839_v24, %v2789_v1  ;;  %v3162_v62 = vmul.f32 %v3149_v36, %v14831_v55  ;;  %v14844_v1 = vld [vmem:[#allocation119_spill] sm:$0xff] }
 0x787   :  { %v2997_v22 = vadd.f32 %v2989_v0, %v2965_v51  ;;  %v3076_v0 = vadd.f32 %v3068_v14, %v3044_v42  ;;  %v3074_v51 = vadd.f32 %v3066_v57, %v3042_v50  ;;  %v14835_v42 = vld [vmem:[#allocation42_spill] sm:$0xff]  ;;  %v3130_v50 = vmul.f32 %v14836_v40, %v14827_v15 }
 0x788   :  { %v10490_v14 = vadd.f32 %v14837_v46, %v2784_v29 }
 0x789   :  { %v3029_v20 = vadd.f32 %v3021_v21, %v2997_v22  ;;  %v2860_v22 = vadd.f32 %v14835_v42, %v2788_v49  ;;  %v3124_v58 = vadd.f32 %v3116_v59, %v3076_v0  ;;  %v3209_v49 = vmul.f32 %v3185_v17, %v14838_v9 }
 0x78b   :  { %v3045_v3 = vadd.f32 %v3037_v7, %v3029_v20  ;;  %v3188_v0 = vsub.f32 %v10457_v16, %v2860_v22  ;;  %v3064_v20 = vmul.f32 %v14844_v1, %v9538_v61  ;;  %v14849_v1 = vld [vmem:[#allocation37_spill] sm:$0xff] }
 0x78c   :  { %v3101_v44 = vpop.permute.xlu0 %3100  ;;  %v3147_v38 = vpop.permute.xlu1 %3146 }
 0x78d   :  { %v3114_v60 = vmul.f32 %v3101_v44, %v9555_v4  ;;  %v3161_v48 = vmul.f32 %v3147_v38, %v14831_v55  ;;  %v14841_v38 = vld [vmem:[#allocation111_spill] sm:$0xff]  ;;  %v3072_v35 = vadd.f32 %v3064_v20, %v10370_v53 }
 0x78f   :  { %v3122_v54 = vadd.f32 %v3114_v60, %v3074_v51  ;;  %v3169_v21 = vadd.f32 %v3161_v48, %v3137_v52  ;;  %v3132_v51 = vmul.f32 %v14841_v38, %v14827_v15  ;;  %v14842_v60 = vld [vmem:[#allocation74_spill] sm:$0xff]  ;;  %v14843_v52 = vld [vmem:[#allocation31_spill] sm:$0xff] }
 0x790   :  { %v3069_v29 = vmul.f32 %v14842_v60, %v9538_v61  ;;  %v3071_v43 = vmul.f32 %v14843_v52, %v9538_v61 }
 0x791   :  { %v3138_v57 = vadd.f32 %v3130_v50, %v3122_v54  ;;  %v3193_v44 = vmul.f32 %v3169_v21, %v14840_v25  ;;  %v3140_v26 = vadd.f32 %v3132_v51, %v3124_v58  ;;  %v14845_v50 = vld [vmem:[#allocation110_spill] sm:$0xff]  ;;  %v14846_v21 = vld [vmem:[#allocation120_spill] sm:$0xff]  ;;  %v3120_v51 = vadd.f32 %v3112_v56, %v3072_v35 }
 0x792   :  { %v3079_v5 = vadd.f32 %v3071_v43, %v10420_v2  ;;  %v3077_v59 = vadd.f32 %v3069_v29, %v3045_v3  ;;  %v2791_v54 = vadd.f32 %v14845_v50, %v2735_v19  ;;  %v3133_v46 = vmul.f32 %v14846_v21, %v14827_v15  ;;  %v3155_v3 = vpop.permute.xlu2 %3154  ;;  %v14847_v19 = vld [vmem:[#allocation107_spill] sm:$0xff] }
 0x793   :  { %v3170_v36 = vadd.f32 %v3162_v62, %v3138_v57  ;;  %v3201_v48 = vsub.f32 %v14819_v34, %v3193_v44  ;;  %v3119_v2 = vmul.f32 %v10423_v32, %v9555_v4  ;;  %v3184_v44 = vsub.f32 %v10453_v45, %v10490_v14  ;;  %v14850_v45 = vld [vmem:[#allocation112_spill] sm:$0xff] }
 0x794   :  { %v3107_v17 = vpop.permute.xlu0 %3106  ;;  %v3153_v7 = vpop.permute.xlu1 %3152  ;;  %v3165_v53 = vmul.f32 %v3155_v3, %v14831_v55  ;;  %v3189_v43 = vsub.f32 %v10447_v12, %v2861_v30  ;;  %v2863_v20 = vadd.f32 %v14849_v1, %v2791_v54  ;;  %v3128_v14 = vmul.f32 %v14850_v45, %v14827_v15  ;;  %v14853_v54 = vld [vmem:[#allocation77_spill] sm:$0xff] }
 0x795   :  { %v3194_v42 = vmul.f32 %v3170_v36, %v14840_v25  ;;  %v3217_v40 = vsub.f32 %v3201_v48, %v3209_v49  ;;  %v3117_v16 = vmul.f32 %v3107_v17, %v9555_v4  ;;  %v3164_v22 = vmul.f32 %v3153_v7, %v14831_v55  ;;  %v14848_v49 = vld [vmem:[#allocation66_spill] sm:$0xff] }
 0x796   :  { %v2731_v38 = vadd.f32 %v14848_v49, %v14847_v19  ;;  %v3127_v60 = vadd.f32 %v3119_v2, %v3079_v5  ;;  %v14851_v36 = vld [vmem:[#allocation118_spill] sm:$0xff]  ;;  %v3212_v56 = vmul.f32 %v3188_v0, %v14838_v9  ;;  %v3115_v12 = vmul.f32 %v10416_v28, %v9555_v4 }
 0x797   :  { %v3202_v58 = vsub.f32 %v9659_v41, %v3194_v42  ;;  %v10521_v24 = vsub.f32 %v14819_v34, %v3217_v40  ;;  %v3125_v62 = vadd.f32 %v3117_v16, %v3077_v59  ;;  %v3172_v57 = vadd.f32 %v3164_v22, %v3140_v26  ;;  %v14852_v59 = vld [vmem:[#allocation121_spill] sm:$0xff] }
 0x798   :  { %v3135_v48 = vmul.f32 %v14851_v36, %v14827_v15  ;;  %v3067_v26 = vmul.f32 %v14852_v59, %v9538_v61  ;;  %v3136_v7 = vadd.f32 %v3128_v14, %v3120_v51  ;;  %v2787_v21 = vadd.f32 %v14853_v54, %v2731_v38  ;;  %v14855_v38 = vld [vmem:[#allocation72_spill] sm:$0xff]  ;;  %v14859_v14 = vld [vmem:[#allocation33_spill] sm:$0xff] }
 0x799   :  { %v3218_v29 = vsub.f32 %v3202_v58, %v3210_v47  ;;  %v3141_v32 = vadd.f32 %v3133_v46, %v3125_v62  ;;  %v3196_v52 = vmul.f32 %v3172_v57, %v14840_v25  ;;  %3322 = vrot.lane.b32.xlu1 %v10521_v24, %s6360_s1  ;;  %v3213_v46 = vmul.f32 %v3189_v43, %v14838_v9 }
 0x79a   :  { %v3143_v42 = vadd.f32 %v3135_v48, %v3127_v60  ;;  %v3191_v28 = vsub.f32 %v10462_v33, %v2863_v20  ;;  %v3075_v35 = vadd.f32 %v3067_v26, %v10386_v6  ;;  %v3208_v33 = vmul.f32 %v3184_v44, %v14838_v9  ;;  %v14856_v60 = vld [vmem:[#allocation83_spill] sm:$0xff] }
 0x79b   :  { %v10539_v47 = vsub.f32 %v9659_v41, %v3218_v29  ;;  %v3173_v5 = vadd.f32 %v3165_v53, %v3141_v32  ;;  %v3204_v17 = vsub.f32 %v14821_v10, %v3196_v52  ;;  %v2859_v6 = vadd.f32 %v14855_v38, %v2787_v21  ;;  %v14857_v53 = vld [vmem:[#allocation26_spill] sm:$0xff]  ;;  %v14860_v44 = vld [vmem:[#allocation123_spill] sm:$0xff]  ;;  %v14863_v21 = vld [vmem:[#allocation84_spill] sm:$0xff] }
 0x79c   :  { %v3145_v30 = vpop.permute.xlu0 %3144  ;;  %v3159_v40 = vpop.permute.xlu1 %3158  ;;  %v3123_v57 = vadd.f32 %v3115_v12, %v3075_v35  ;;  %v2734_v29 = vadd.f32 %v14857_v53, %v14856_v60  ;;  %v14858_v32 = vld [vmem:[#allocation114_spill] sm:$0xff]  ;;  %v3215_v43 = vmul.f32 %v3191_v28, %v14838_v9  ;;  %v3179_v36 = vmul.f32 4.0, %v14859_v14 }
 0x79d   :  { %v3197_v16 = vmul.f32 %v3173_v5, %v14840_v25  ;;  %v3220_v22 = vsub.f32 %v3204_v17, %v3212_v56  ;;  %v3160_v0 = vmul.f32 %v3145_v30, %v14831_v55  ;;  %v3167_v50 = vmul.f32 %v3159_v40, %v14831_v55  ;;  %3324 = vrot.lane.b32.xlu2 %v10539_v47, %s6360_s1 }
 0x79e   :  { %v3131_v52 = vmul.f32 %v14858_v32, %v14827_v15  ;;  %v3070_v48 = vmul.f32 %v14860_v44, %v9538_v61  ;;  %v3118_v17 = vmul.f32 %v10438_v13, %v9555_v4  ;;  %v3187_v30 = vsub.f32 %v3179_v36, %v2859_v6 }
 0x79f   :  { %v3205_v2 = vsub.f32 %v9702_v31, %v3197_v16  ;;  %v10557_v3 = vsub.f32 %v14821_v10, %v3220_v22  ;;  %v3168_v58 = vadd.f32 %v3160_v0, %v3136_v7  ;;  %v3175_v62 = vadd.f32 %v3167_v50, %v3143_v42  ;;  %v14861_v7 = vld [vmem:[#allocation64_spill] sm:$0xff] }
 0x7a0   :  { %v3139_v5 = vadd.f32 %v3131_v52, %v3123_v57  ;;  %v2790_v42 = vadd.f32 %v14861_v7, %v2734_v29  ;;  %v3078_v40 = vadd.f32 %v3070_v48, %v10400_v37  ;;  %v3211_v54 = vmul.f32 %v3187_v30, %v14838_v9 }
 0x7a1   :  { %14854 = vst [vmem:[#allocation19_spill] sm:$0xff] %v10557_v3  ;;  %v3221_v19 = vsub.f32 %v3205_v2, %v3213_v46  ;;  %v3192_v49 = vmul.f32 %v3168_v58, %v14840_v25  ;;  %v3199_v51 = vmul.f32 %v3175_v62, %v14840_v25  ;;  %3328 = vrot.lane.b32.xlu1 %v10557_v3, %s6360_s1  ;;  %v14864_v46 = vld [vmem:[#allocation115_spill] sm:$0xff]  ;;  %v3234_v52 = vrot.slane %v10539_v47, 7 }
 0x7a2   :  { %v3126_v13 = vadd.f32 %v3118_v17, %v3078_v40  ;;  %v2862_v37 = vadd.f32 %v14863_v21, %v2790_v42  ;;  %v3134_v28 = vmul.f32 %v14864_v46, %v14827_v15  ;;  %v14865_v58 = vld [vmem:[#allocation71_spill] sm:$0xff] }
 0x7a3   :  { %v10571_v1 = vsub.f32 %v9702_v31, %v3221_v19  ;;  %v3200_v20 = vsub.f32 %v9728_v18, %v3192_v49  ;;  %v3207_v45 = vsub.f32 %v9730_v8, %v3199_v51  ;;  %v3182_v62 = vmul.f32 4.0, %v14865_v58 }
 0x7a4   :  { %v3151_v56 = vpop.permute.xlu0 %3150  ;;  %v3142_v19 = vadd.f32 %v3134_v28, %v3126_v13  ;;  %v3417_v13 = vrot.slane %v10521_v24, 1 }
 0x7a5   :  { %v3216_v59 = vsub.f32 %v3200_v20, %v3208_v33  ;;  %v3223_v26 = vsub.f32 %v3207_v45, %v3215_v43  ;;  %v3163_v12 = vmul.f32 %v3151_v56, %v14831_v55  ;;  %3330 = vrot.lane.b32.xlu2 %v10571_v1, %s6360_s1  ;;  %v3190_v51 = vsub.f32 %v3182_v62, %v2862_v37 }
 0x7a6   :  { %v3233_v43 = vrot.slane %v10521_v24, 7  ;;  %v3237_v56 = vrot.slane %v10571_v1, 7  ;;  %v3420_v37 = vrot.slane %v10557_v3, 1 }
 0x7a7   :  { %v10586_v16 = vsub.f32 %v9728_v18, %v3216_v59  ;;  %v10589_v22 = vsub.f32 %v9730_v8, %v3223_v26  ;;  %v3171_v0 = vadd.f32 %v3163_v12, %v3139_v5  ;;  %v3214_v60 = vmul.f32 %v3190_v51, %v14838_v9 }
 0x7a8   :  { %v10630_v45 = vsel %vm351_vm0, %v3233_v43, %v3234_v52  ;;  %v3236_v5 = vrot.slane %v10557_v3, 7  ;;  %v3421_v51 = vrot.slane %v10571_v1, 1 }
 0x7a9   :  { %14862 = vst [vmem:[#allocation25_spill] sm:$0xff] %v10589_v22  ;;  %v3195_v50 = vmul.f32 %v3171_v0, %v14840_v25  ;;  %3320 = vrot.lane.b32.xlu0 %v10586_v16, %s6360_s1  ;;  %3334 = vrot.lane.b32.xlu1 %v10589_v22, %s6360_s1  ;;  %v3232_v36 = vrot.slane %v10586_v16, 7  ;;  %v3239_v44 = vrot.slane %v10589_v22, 7  ;;  %v3416_v40 = vrot.slane %v10586_v16, 1  ;;  %v10691_v0 = vpop.permute.xlu2 %4340 }
 0x7aa   :  { %v10648_v17 = vsel %vm351_vm0, %v3236_v5, %v3237_v56  ;;  %14874 = vst [vmem:[#allocation56_spill] sm:$0xff] %v10691_v0 }
 0x7ab   :  { %v3203_v35 = vsub.f32 %v14859_v14, %v3195_v50  ;;  %v10640_v48 = vsel %vm351_vm0, %v3239_v44, %v3232_v36  ;;  %14869 = vst [vmem:[#allocation45_spill] sm:$0xff] %v10648_v17  ;;  %v10674_v7 = vsel %vm351_vm0, %v3232_v36, %v3233_v43  ;;  %v10698_v50 = vsel %vm575_vm1, %v3416_v40, %v3417_v13 }
 0x7ac   :  { %v3157_v2 = vpop.permute.xlu0 %3156  ;;  %14872 = vst [vmem:[#allocation109_spill] sm:$0xff] %v10674_v7 }
 0x7ad   :  { %v3219_v57 = vsub.f32 %v3203_v35, %v3211_v54  ;;  %v3166_v49 = vmul.f32 %v3157_v2, %v14831_v55  ;;  %3376 = vrot.lane.b32.xlu2 %v10586_v16, %s6361_s2  ;;  %14875 = vst [vmem:[#allocation53_spill] sm:$0xff] %v10698_v50  ;;  %v3418_v35 = vrot.slane %v10539_v47, 1 }
 0x7af   :  { %v10606_v33 = vsub.f32 %v14859_v14, %v3219_v57  ;;  %v3174_v38 = vadd.f32 %v3166_v49, %v3142_v19  ;;  %v10725_v2 = vsel %vm575_vm1, %v3417_v13, %v3418_v35  ;;  %v3423_v57 = vrot.slane %v10589_v22, 1  ;;  %v10798_v13 = vld [vmem:[#allocation13 + $0x8] sm:$0xff] }
 0x7b0   :  { %14879 = vst [vmem:[#allocation42_spill] sm:$0xff] %v10725_v2 }
 0x7b1   :  { %14866 = vst [vmem:[#allocation108_spill] sm:$0xff] %v10606_v33  ;;  %v3198_v6 = vmul.f32 %v3174_v38, %v14840_v25  ;;  %3326 = vrot.lane.b32.xlu0 %v10606_v33, %s6360_s1  ;;  %3380 = vrot.lane.b32.xlu1 %v10539_v47, %s6361_s2  ;;  %v3235_v59 = vrot.slane %v10606_v33, 7  ;;  %v3419_v21 = vrot.slane %v10606_v33, 1  ;;  %v10712_v46 = vpop.permute.xlu2 %4346  ;;  %v10738_v38 = vpop.permute.xlu1 %4338 }
 0x7b2   :  { %14877 = vst [vmem:[#allocation29_spill] sm:$0xff] %v10712_v46 }
 0x7b3   :  { %v3206_v53 = vsub.f32 %v14865_v58, %v3198_v6  ;;  %v10657_v26 = vsel %vm351_vm0, %v3234_v52, %v3235_v59  ;;  %v10684_v42 = vsel %vm351_vm0, %v3235_v59, %v3236_v5  ;;  %v10716_v28 = vsel %vm575_vm1, %v3419_v21, %v3420_v37  ;;  %14881 = vst [vmem:[#allocation68_spill] sm:$0xff] %v10738_v38 }
 0x7b4   :  { %14870 = vst [vmem:[#allocation57_spill] sm:$0xff] %v10657_v26  ;;  %v10746_v6 = vsel %vm575_vm1, %v3420_v37, %v3421_v51  ;;  %v10764_v52 = vsel %vm575_vm1, %v3423_v57, %v3416_v40 }
 0x7b5   :  { %v3222_v29 = vsub.f32 %v3206_v53, %v3214_v60  ;;  %3382 = vrot.lane.b32.xlu2 %v10606_v33, %s6361_s2  ;;  %14873 = vst [vmem:[#allocation87_spill] sm:$0xff] %v10684_v42  ;;  %v10754_v53 = vsel %vm575_vm1, %v3418_v35, %v3419_v21  ;;  %v14897_v35 = vld [vmem:[#allocation48_spill] sm:$0xff] }
 0x7b6   :  { %14878 = vst [vmem:[#allocation98_spill] sm:$0xff] %v10716_v28 }
 0x7b7   :  { %v10618_v32 = vsub.f32 %v14865_v58, %v3222_v29  ;;  %14882 = vst [vmem:[#allocation76_spill] sm:$0xff] %v10746_v6 }
 0x7b8   :  { %14884 = vst [vmem:[#allocation74_spill] sm:$0xff] %v10754_v53 }
 0x7b9   :  { %14867 = vst [vmem:[#allocation91_spill] sm:$0xff] %v10618_v32  ;;  %3332 = vrot.lane.b32.xlu0 %v10618_v32, %s6360_s1  ;;  %3386 = vrot.lane.b32.xlu1 %v10571_v1, %s6361_s2  ;;  %v3238_v12 = vrot.slane %v10618_v32, 7  ;;  %v3422_v62 = vrot.slane %v10618_v32, 1  ;;  %v10760_v29 = vpop.permute.xlu1 %4344 }
 0x7ba   :  { %14885 = vst [vmem:[#allocation31_spill] sm:$0xff] %v10760_v29  ;;  %v10818_v29 = vld [vmem:[#allocation13] sm:$0xff] }
 0x7bb   :  { %v10668_v30 = vsel %vm351_vm0, %v3237_v56, %v3238_v12  ;;  %v10702_v54 = vsel %vm351_vm0, %v3238_v12, %v3239_v44  ;;  %v10735_v49 = vsel %vm575_vm1, %v3422_v62, %v3423_v57  ;;  %14886 = vst [vmem:[#allocation119_spill] sm:$0xff] %v10764_v52  ;;  %v10772_v36 = vsel %vm575_vm1, %v3421_v51, %v3422_v62  ;;  %v10774_v44 = vpop.permute.xlu0 %4336 }
 0x7bc   :  { %14871 = vst [vmem:[#allocation85_spill] sm:$0xff] %v10668_v30 }
 0x7bd   :  { %3388 = vrot.lane.b32.xlu2 %v10618_v32, %s6361_s2  ;;  %14876 = vst [vmem:[#allocation24_spill] sm:$0xff] %v10702_v54 }
 0x7be   :  { %14880 = vst [vmem:[#allocation116_spill] sm:$0xff] %v10735_v49 }
 0x7bf   :  { %14888 = vst [vmem:[#allocation120_spill] sm:$0xff] %v10772_v36 }
 0x7c0   :  { %14889 = vst [vmem:[#allocation107_spill] sm:$0xff] %v10774_v44 }
 0x7c1   :  { %3378 = vrot.lane.b32.xlu0 %v10521_v24, %s6361_s2  ;;  %3252 = vrot.lane.b32.xlu1 %v10630_v45, %s6360_s1  ;;  %14895 = vst [vmem:[#allocation77_spill] sm:$0xff] %v10798_v13 }
 0x7c2   :  { %14899 = vst [vmem:[#allocation26_spill] sm:$0xff] %v10818_v29 }
 0x7c3   :  { %v10790_v59 = vpop.permute.xlu0 %4342 }
 0x7c4   :  { %14892 = vst [vmem:[#allocation112_spill] sm:$0xff] %v10790_v59 }
 0x7c5   :  { %3248 = vrot.lane.b32.xlu2 %v10640_v48, %s6360_s1 }
 0x7c9   :  { %3384 = vrot.lane.b32.xlu0 %v10557_v3, %s6361_s2  ;;  %3258 = vrot.lane.b32.xlu1 %v10648_v17, %s6360_s1 }
 0x7cd   :  { %3254 = vrot.lane.b32.xlu2 %v10657_v26, %s6360_s1 }
 0x7d1   :  { %3390 = vrot.lane.b32.xlu0 %v10589_v22, %s6361_s2  ;;  %3288 = vrot.lane.b32.xlu1 %v10640_v48, %s6361_s2 }
 0x7d5   :  { %3260 = vrot.lane.b32.xlu2 %v10668_v30, %s6360_s1 }
 0x7d9   :  { %3250 = vrot.lane.b32.xlu0 %v10674_v7, %s6360_s1  ;;  %3294 = vrot.lane.b32.xlu1 %v10657_v26, %s6361_s2 }
 0x7dd   :  { %3290 = vrot.lane.b32.xlu2 %v10674_v7, %s6361_s2 }
 0x7e1   :  { %3256 = vrot.lane.b32.xlu0 %v10684_v42, %s6360_s1  ;;  %3300 = vrot.lane.b32.xlu1 %v10668_v30, %s6361_s2 }
 0x7e5   :  { %3296 = vrot.lane.b32.xlu2 %v10684_v42, %s6361_s2 }
 0x7e9   :  { %3432 = vrot.lane.b32.xlu1 %v10698_v50, %s6360_s1  ;;  %3262 = vrot.lane.b32.xlu0 %v10702_v54, %s6360_s1 }
 0x7ed   :  { %3302 = vrot.lane.b32.xlu2 %v10702_v54, %s6361_s2 }
 0x7f1   :  { %3438 = vrot.lane.b32.xlu1 %v10716_v28, %s6360_s1  ;;  %3292 = vrot.lane.b32.xlu0 %v10630_v45, %s6361_s2 }
 0x7f5   :  { %3434 = vrot.lane.b32.xlu2 %v10725_v2, %s6360_s1 }
 0x7f7   :  { %v10731_v19 = vpop.permute.xlu2 %3324 }
 0x7f9   :  { %3444 = vrot.lane.b32.xlu1 %v10735_v49, %s6360_s1  ;;  %3298 = vrot.lane.b32.xlu0 %v10648_v17, %s6361_s2 }
 0x7fd   :  { %3440 = vrot.lane.b32.xlu2 %v10746_v6, %s6360_s1 }
 0x7ff   :  { %v10750_v60 = vpop.permute.xlu2 %3330 }
 0x800   :  { %14883 = vst [vmem:[#allocation111_spill] sm:$0xff] %v10750_v60 }
 0x801   :  { %3490 = vrot.lane.b32.xlu1 %v10725_v2, %s6361_s2  ;;  %3436 = vrot.lane.b32.xlu0 %v10754_v53, %s6360_s1 }
 0x805   :  { %3446 = vrot.lane.b32.xlu2 %v10764_v52, %s6360_s1 }
 0x807   :  { %v10768_v43 = vpop.permute.xlu2 %3376 }
 0x808   :  { %14887 = vst [vmem:[#allocation110_spill] sm:$0xff] %v10768_v43 }
 0x809   :  { %3496 = vrot.lane.b32.xlu1 %v10746_v6, %s6361_s2  ;;  %3442 = vrot.lane.b32.xlu0 %v10772_v36, %s6360_s1 }
 0x80b   :  { %v10780_v56 = vpop.permute.xlu1 %3322 }
 0x80c   :  { %14890 = vst [vmem:[#allocation66_spill] sm:$0xff] %v10780_v56  ;;  %v3337_v33 = vmul.f32 %v10780_v56, %v9492_v23 }
 0x80d   :  { %3492 = vrot.lane.b32.xlu2 %v10754_v53, %s6361_s2 }
 0x80f   :  { %v10784_v5 = vpop.permute.xlu2 %3382 }
 0x810   :  { %14891 = vst [vmem:[#allocation37_spill] sm:$0xff] %v10784_v5 }
 0x811   :  { %3502 = vrot.lane.b32.xlu1 %v10764_v52, %s6361_s2  ;;  %3488 = vrot.lane.b32.xlu0 %v10698_v50, %s6361_s2 }
 0x813   :  { %v10792_v12 = vpop.permute.xlu1 %3328 }
 0x814   :  { %14893 = vst [vmem:[#allocation118_spill] sm:$0xff] %v10792_v12 }
 0x815   :  { %3498 = vrot.lane.b32.xlu2 %v10772_v36, %s6361_s2 }
 0x817   :  { %v10796_v40 = vpop.permute.xlu2 %3388 }
 0x818   :  { %14894 = vst [vmem:[#allocation121_spill] sm:$0xff] %v10796_v40  ;;  %v3273_v40 = vmul.f32 %v10674_v7, %v14827_v15 }
 0x819   :  { %4384 = vrot.lane.b32.xlu1 %v10798_v13, %s6361_s2  ;;  %3494 = vrot.lane.b32.xlu0 %v10716_v28, %s6361_s2 }
 0x81b   :  { %v10804_v21 = vpop.permute.xlu0 %3320  ;;  %v10806_v37 = vpop.permute.xlu1 %3334 }
 0x81c   :  { %14896 = vst [vmem:[#allocation72_spill] sm:$0xff] %v10806_v37 }
 0x81d   :  { %4386 = vrot.lane.b32.xlu2 %v14897_v35, %s6361_s2 }
 0x81f   :  { %v3249_v62 = vpop.permute.xlu2 %3248 }
 0x821   :  { %3500 = vrot.lane.b32.xlu0 %v10735_v49, %s6361_s2 }
 0x823   :  { %v10812_v57 = vpop.permute.xlu0 %3326  ;;  %v10814_v51 = vpop.permute.xlu1 %3380 }
 0x824   :  { %14898 = vst [vmem:[#allocation83_spill] sm:$0xff] %v10812_v57 }
 0x827   :  { %v10816_v59 = vpop.permute.xlu2 %3254 }
 0x829   :  { %4382 = vrot.lane.b32.xlu0 %v10818_v29, %s6361_s2 }
 0x82b   :  { %v10822_v44 = vpop.permute.xlu0 %3332  ;;  %v10824_v46 = vpop.permute.xlu1 %3386 }
 0x82c   :  { %14900 = vst [vmem:[#allocation114_spill] sm:$0xff] %v10822_v44 }
 0x82d   :  { %14901 = vst [vmem:[#allocation123_spill] sm:$0xff] %v10824_v46 }
 0x82f   :  { %v10826_v35 = vpop.permute.xlu2 %3260 }
 0x830   :  { %14902 = vst [vmem:[#allocation64_spill] sm:$0xff] %v10826_v35 }
 0x833   :  { %v10828_v38 = vpop.permute.xlu0 %3378  ;;  %v3253_v0 = vpop.permute.xlu1 %3252 }
 0x837   :  { %v3291_v58 = vpop.permute.xlu2 %3290 }
 0x838   :  { %v3305_v5 = vmul.f32 %v3291_v58, %v14831_v55  ;;  %v3274_v58 = vmul.f32 %v10630_v45, %v14827_v15 }
 0x83b   :  { %v10830_v14 = vpop.permute.xlu0 %3384  ;;  %v3259_v8 = vpop.permute.xlu1 %3258 }
 0x83c   :  { %14903 = vst [vmem:[#allocation84_spill] sm:$0xff] %v10830_v14 }
 0x83f   :  { %v3297_v18 = vpop.permute.xlu2 %3296 }
 0x843   :  { %v10832_v31 = vpop.permute.xlu0 %3390  ;;  %v3289_v10 = vpop.permute.xlu1 %3288 }
 0x844   :  { %14904 = vst [vmem:[#allocation115_spill] sm:$0xff] %v10832_v31 }
 0x847   :  { %v3303_v41 = vpop.permute.xlu2 %3302 }
 0x84b   :  { %v3251_v34 = vpop.permute.xlu0 %3250  ;;  %v10834_v9 = vpop.permute.xlu1 %3294 }
 0x84c   :  { %v3265_v49 = vmul.f32 %v3251_v34, %v9555_v4  ;;  %v3276_v34 = vmul.f32 %v10684_v42, %v14827_v15 }
 0x84e   :  { %v3281_v28 = vadd.f32 %v3273_v40, %v3265_v49 }
 0x84f   :  { %v3435_v29 = vpop.permute.xlu2 %3434 }
 0x850   :  { %v3313_v50 = vadd.f32 %v3305_v5, %v3281_v28  ;;  %v3361_v5 = vmul.f32 %v10521_v24, %v9522_v11 }
 0x852   :  { %v3345_v7 = vadd.f32 %v3337_v33, %v3313_v50  ;;  %v3340_v50 = vmul.f32 %v10792_v12, %v9492_v23 }
 0x853   :  { %v3257_v25 = vpop.permute.xlu0 %3256  ;;  %v10836_v13 = vpop.permute.xlu1 %3300 }
 0x854   :  { %14905 = vst [vmem:[#allocation48_spill] sm:$0xff] %v10836_v13  ;;  %v3268_v20 = vmul.f32 %v3257_v25, %v9555_v4  ;;  %v3266_v13 = vmul.f32 %v3253_v0, %v9555_v4  ;;  %v3308_v25 = vmul.f32 %v3297_v18, %v14831_v55  ;;  %v3279_v18 = vmul.f32 %v10702_v54, %v14827_v15 }
 0x856   :  { %v3284_v49 = vadd.f32 %v3276_v34, %v3268_v20  ;;  %v3282_v56 = vadd.f32 %v3274_v58, %v3266_v13  ;;  %v3393_v34 = vmul.f32 %v10828_v38, %v9538_v61  ;;  %v3264_v13 = vmul.f32 %v3249_v62, %v9555_v4 }
 0x857   :  { %v10844_v52 = vpop.permute.xlu2 %3440  ;;  %v3304_v62 = vmul.f32 %v3289_v10, %v14831_v55  ;;  %v3365_v10 = vmul.f32 %v10571_v1, %v9522_v11 }
 0x858   :  { %v3316_v42 = vadd.f32 %v3308_v25, %v3284_v49  ;;  %v3277_v25 = vmul.f32 %v10648_v17, %v14827_v15 }
 0x85a   :  { %v3348_v49 = vadd.f32 %v3340_v50, %v3316_v42  ;;  %v3311_v42 = vmul.f32 %v3303_v41, %v14831_v55  ;;  %v3362_v50 = vmul.f32 %v10539_v47, %v9522_v11  ;;  %v3468_v41 = vmul.f32 %v10746_v6, %v14770_v27 }
 0x85b   :  { %v3263_v32 = vpop.permute.xlu0 %3262  ;;  %v10841_v44 = vpop.permute.xlu1 %3432 }
 0x85c   :  { %14906 = vst [vmem:[#allocation124_spill] sm:$0xff] %v10841_v44  ;;  %v3369_v44 = vadd.f32 %v3361_v5, %v3345_v7  ;;  %v3271_v0 = vmul.f32 %v3263_v32, %v9555_v4  ;;  %v3269_v7 = vmul.f32 %v3259_v8, %v9555_v4  ;;  %v3364_v5 = vmul.f32 %v10557_v3, %v9522_v11 }
 0x85d   :  { %v3272_v8 = vmul.f32 %v10640_v48, %v14827_v15 }
 0x85e   :  { %v3401_v32 = vadd.f32 %v3393_v34, %v3369_v44  ;;  %v3287_v58 = vadd.f32 %v3279_v18, %v3271_v0  ;;  %v3449_v44 = vmul.f32 %v3435_v29, %v14769_v63  ;;  %v3285_v0 = vadd.f32 %v3277_v25, %v3269_v7 }
 0x85f   :  { %v10861_v33 = vpop.permute.xlu2 %3446  ;;  %v3280_v34 = vadd.f32 %v3272_v8, %v3264_v13  ;;  %v3372_v17 = vadd.f32 %v3364_v5, %v3348_v49  ;;  %v3343_v29 = vmul.f32 %v10806_v37, %v9492_v23  ;;  %v3396_v7 = vmul.f32 %v10830_v14, %v9538_v61 }
 0x860   :  { %v3457_v18 = vadd.f32 %v3449_v44, %v3401_v32  ;;  %v3319_v3 = vadd.f32 %v3311_v42, %v3287_v58  ;;  %v3341_v32 = vmul.f32 %v10750_v60, %v9492_v23  ;;  %v3367_v49 = vmul.f32 %v10589_v22, %v9522_v11 }
 0x861   :  { %v3312_v13 = vadd.f32 %v3304_v62, %v3280_v34  ;;  %v3267_v25 = vmul.f32 %v10816_v59, %v9555_v4  ;;  %v3404_v5 = vadd.f32 %v3396_v7, %v3372_v17  ;;  %v3275_v37 = vmul.f32 %v10657_v26, %v14827_v15 }
 0x862   :  { %v3351_v8 = vadd.f32 %v3343_v29, %v3319_v3  ;;  %v3452_v17 = vmul.f32 %v10844_v52, %v14769_v63  ;;  %v3466_v3 = vmul.f32 %v10754_v53, %v14770_v27  ;;  %v3360_v59 = vmul.f32 %v10586_v16, %v9522_v11 }
 0x863   :  { %v3293_v40 = vpop.permute.xlu0 %3292  ;;  %v10852_v35 = vpop.permute.xlu1 %3438 }
 0x864   :  { %v3306_v28 = vmul.f32 %v3293_v40, %v14831_v55  ;;  %v3338_v40 = vmul.f32 %v10731_v19, %v9492_v23  ;;  %v3460_v29 = vadd.f32 %v3452_v17, %v3404_v5  ;;  %v3375_v7 = vadd.f32 %v3367_v49, %v3351_v8  ;;  %v14909_v8 = vld [vmem:[#allocation124_spill] sm:$0xff] }
 0x865   :  { %v3339_v49 = vmul.f32 %v10812_v57, %v9492_v23  ;;  %v14949_v57 = vld [vmem:[#allocation77_spill] sm:$0xff] }
 0x866   :  { %v3314_v20 = vadd.f32 %v3306_v28, %v3282_v56  ;;  %v4416_v26 = vrot.slane %v14949_v57, 1 }
 0x867   :  { %v3493_v58 = vpop.permute.xlu2 %3492 }
 0x868   :  { %v3346_v54 = vadd.f32 %v3338_v40, %v3314_v20  ;;  %v3465_v20 = vmul.f32 %v10725_v2, %v14770_v27  ;;  %v3307_v2 = vmul.f32 %v10834_v9, %v14831_v55 }
 0x86a   :  { %v3473_v62 = vadd.f32 %v3465_v20, %v3457_v18 }
 0x86b   :  { %v3299_v56 = vpop.permute.xlu0 %3298  ;;  %v10873_v28 = vpop.permute.xlu1 %3444 }
 0x86c   :  { %v3309_v12 = vmul.f32 %v3299_v56, %v14831_v55  ;;  %v3370_v56 = vadd.f32 %v3362_v50, %v3346_v54  ;;  %v3394_v54 = vmul.f32 %v10814_v51, %v9538_v61 }
 0x86e   :  { %v3317_v40 = vadd.f32 %v3309_v12, %v3285_v0  ;;  %v3336_v12 = vmul.f32 %v10804_v21, %v9492_v23  ;;  %v3402_v50 = vadd.f32 %v3394_v54, %v3370_v56  ;;  %v3283_v56 = vadd.f32 %v3275_v37, %v3267_v25 }
 0x86f   :  { %v3278_v54 = vmul.f32 %v10668_v30, %v14827_v15  ;;  %v3392_v37 = vmul.f32 %v10768_v43, %v9538_v61 }
 0x870   :  { %v3349_v0 = vadd.f32 %v3341_v32, %v3317_v40  ;;  %v3344_v14 = vadd.f32 %v3336_v12, %v3312_v13  ;;  %v3469_v40 = vmul.f32 %v10772_v36, %v14770_v27  ;;  %v3506_v13 = vmul.f32 %v3493_v58, %v9486_v39  ;;  %v14907_v32 = vld [vmem:[#allocation52_spill] sm:$0xff] }
 0x871   :  { %v3397_v58 = vmul.f32 %v10824_v46, %v9538_v61 }
 0x872   :  { %v3373_v52 = vadd.f32 %v3365_v10, %v3349_v0  ;;  %v14908_v10 = vld [vmem:[#allocation64_spill] sm:$0xff]  ;;  %v3476_v0 = vadd.f32 %v3468_v41, %v3460_v29 }
 0x873   :  { %v3437_v42 = vpop.permute.xlu0 %3436  ;;  %v3491_v44 = vpop.permute.xlu1 %3490  ;;  %v3270_v5 = vmul.f32 %v14908_v10, %v9555_v4  ;;  %v3455_v10 = vmul.f32 %v10861_v33, %v14769_v63  ;;  %v14913_v33 = vld [vmem:[#allocation46_spill] sm:$0xff] }
 0x874   :  { %v3450_v34 = vmul.f32 %v3437_v42, %v14769_v63  ;;  %v3505_v6 = vmul.f32 %v3491_v44, %v9486_v39  ;;  %v3399_v42 = vmul.f32 %v10832_v31, %v9538_v61 }
 0x876   :  { %v3458_v18 = vadd.f32 %v3450_v34, %v3402_v50  ;;  %v3513_v20 = vadd.f32 %v3505_v6, %v3473_v62  ;;  %v3315_v6 = vadd.f32 %v3307_v2, %v3283_v56  ;;  %v3368_v62 = vadd.f32 %v3360_v59, %v3344_v14  ;;  %v14910_v34 = vld [vmem:[#allocation40_spill] sm:$0xff] }
 0x877   :  { %v3448_v2 = vmul.f32 %v14909_v8, %v14769_v63  ;;  %v3407_v14 = vadd.f32 %v3399_v42, %v3375_v7  ;;  %v14911_v56 = vld [vmem:[#allocation48_spill] sm:$0xff]  ;;  %v3499_v7 = vpop.permute.xlu2 %3498 }
 0x878   :  { %v3474_v9 = vadd.f32 %v3466_v3, %v3458_v18  ;;  %v10923_v12 = vmul.f32 %v3513_v20, %v14907_v32  ;;  %v3405_v3 = vadd.f32 %v3397_v58, %v3373_v52  ;;  %v3347_v20 = vadd.f32 %v3339_v49, %v3315_v6  ;;  %v14912_v49 = vld [vmem:[#allocation108_spill] sm:$0xff]  ;;  %v14923_v32 = vld [vmem:[#allocation59_spill] sm:$0xff] }
 0x879   :  { %v3286_v58 = vadd.f32 %v3278_v54, %v3270_v5  ;;  %v3463_v6 = vadd.f32 %v3455_v10, %v3407_v14  ;;  %v3363_v8 = vmul.f32 %v14912_v49, %v9522_v11  ;;  %v14916_v54 = vld [vmem:[#allocation53_spill] sm:$0xff] }
 0x87a   :  { %v3514_v25 = vadd.f32 %v3506_v13, %v3474_v9  ;;  %3618 = vrot.lane.b32.xlu1 %v10923_v12, %s6360_s1  ;;  %v3310_v13 = vmul.f32 %v14911_v56, %v14831_v55  ;;  %v3400_v9 = vadd.f32 %v3392_v37, %v3368_v62  ;;  %v14091_v29 = vrot.slane %v10923_v12, 1 }
 0x87b   :  { %v3443_v44 = vpop.permute.xlu0 %3442  ;;  %v3497_v50 = vpop.permute.xlu1 %3496  ;;  %v3509_v62 = vmul.f32 %v3499_v7, %v9486_v39  ;;  %v3464_v5 = vmul.f32 %v14916_v54, %v14770_v27  ;;  %v3371_v14 = vadd.f32 %v3363_v8, %v3347_v20  ;;  %v3451_v7 = vmul.f32 %v10852_v35, %v14769_v63  ;;  %v14920_v20 = vld [vmem:[#allocation61_spill] sm:$0xff] }
 0x87c   :  { %v10942_v17 = vmul.f32 %v3514_v25, %v14910_v34  ;;  %v3453_v59 = vmul.f32 %v3443_v44, %v14769_v63  ;;  %v3508_v18 = vmul.f32 %v3497_v50, %v9486_v39  ;;  %v3456_v25 = vadd.f32 %v3448_v2, %v3400_v9  ;;  %v14919_v9 = vld [vmem:[#allocation114_spill] sm:$0xff] }
 0x87d   :  { %v3318_v2 = vadd.f32 %v3310_v13, %v3286_v58  ;;  %v3342_v10 = vmul.f32 %v14919_v9, %v9492_v23 }
 0x87e   :  { %v3461_v42 = vadd.f32 %v3453_v59, %v3405_v3  ;;  %v3516_v41 = vadd.f32 %v3508_v18, %v3476_v0  ;;  %3620 = vrot.lane.b32.xlu2 %v10942_v17, %s6360_s1  ;;  %v14090_v52 = vrot.slane %v10942_v17, 1  ;;  %v14917_v3 = vld [vmem:[#allocation119_spill] sm:$0xff]  ;;  %v14918_v18 = vld [vmem:[#allocation37_spill] sm:$0xff] }
 0x87f   :  { %v3471_v59 = vmul.f32 %v14917_v3, %v14770_v27  ;;  %v3395_v56 = vmul.f32 %v14918_v18, %v9538_v61  ;;  %v6260_v18 = vld [vmem:[#allocation13 + $0x20] sm:$0xff] }
 0x880   :  { %v3477_v37 = vadd.f32 %v3469_v40, %v3461_v42  ;;  %v10958_v44 = vmul.f32 %v3516_v41, %v14913_v33  ;;  %v10966_v50 = vsel %vm575_vm1, %v14091_v29, %v14090_v52  ;;  %v3472_v41 = vadd.f32 %v3464_v5, %v3456_v25  ;;  %v14922_v5 = vld [vmem:[#allocation91_spill] sm:$0xff] }
 0x881   :  { %14915 = vst [vmem:[#allocation64_spill] sm:$0xff] %v10966_v50  ;;  %v3350_v52 = vadd.f32 %v3342_v10, %v3318_v2  ;;  %v3403_v29 = vadd.f32 %v3395_v56, %v3371_v14  ;;  %v14926_v14 = vld [vmem:[#allocation98_spill] sm:$0xff] }
 0x882   :  { %v3517_v40 = vadd.f32 %v3509_v62, %v3477_v37  ;;  %3624 = vrot.lane.b32.xlu1 %v10958_v44, %s6360_s1  ;;  %v3479_v62 = vadd.f32 %v3471_v59, %v3463_v6  ;;  %v14093_v35 = vrot.slane %v10958_v44, 1  ;;  %v14924_v6 = vld [vmem:[#allocation51_spill] sm:$0xff]  ;;  %v3467_v56 = vmul.f32 %v14926_v14, %v14770_v27 }
 0x883   :  { %v3489_v42 = vpop.permute.xlu0 %3488  ;;  %v3503_v13 = vpop.permute.xlu1 %3502 }
 0x884   :  { %v10981_v58 = vmul.f32 %v3517_v40, %v14920_v20  ;;  %v3504_v8 = vmul.f32 %v3489_v42, %v9486_v39  ;;  %v3511_v37 = vmul.f32 %v3503_v13, %v9486_v39  ;;  %v3366_v40 = vmul.f32 %v14922_v5, %v9522_v11 }
 0x885   :  { %v3459_v20 = vadd.f32 %v3451_v7, %v3403_v29  ;;  %v14927_v29 = vld [vmem:[#allocation121_spill] sm:$0xff]  ;;  %v3454_v7 = vmul.f32 %v10873_v28, %v14769_v63 }
 0x886   :  { %14921 = vst [vmem:[#allocation124_spill] sm:$0xff] %v10981_v58  ;;  %v3512_v34 = vadd.f32 %v3504_v8, %v3472_v41  ;;  %v3519_v33 = vadd.f32 %v3511_v37, %v3479_v62  ;;  %3626 = vrot.lane.b32.xlu2 %v10981_v58, %s6360_s1  ;;  %v14092_v25 = vrot.slane %v10981_v58, 1  ;;  %v3374_v10 = vadd.f32 %v3366_v40, %v3350_v52  ;;  %v14928_v37 = vld [vmem:[#allocation50_spill] sm:$0xff] }
 0x887   :  { %v3475_v41 = vadd.f32 %v3467_v56, %v3459_v20 }
 0x888   :  { %v10992_v42 = vmul.f32 %v3512_v34, %v14923_v32  ;;  %v10995_v59 = vmul.f32 %v3519_v33, %v14924_v6  ;;  %v11003_v2 = vsel %vm575_vm1, %v14093_v35, %v14092_v25  ;;  %v3398_v33 = vmul.f32 %v14927_v29, %v9538_v61  ;;  %v14929_v25 = vld [vmem:[#allocation116_spill] sm:$0xff]  ;;  %v11123_v32 = vpop.permute.xlu2 %4386 }
 0x889   :  { %14925 = vst [vmem:[#allocation48_spill] sm:$0xff] %v11003_v2  ;;  %v3470_v35 = vmul.f32 %v14929_v25, %v14770_v27  ;;  %v14938_v29 = vrot.slane %v10942_v17, 1 }
 0x88a   :  { %3616 = vrot.lane.b32.xlu0 %v10992_v42, %s6360_s1  ;;  %3630 = vrot.lane.b32.xlu1 %v10995_v59, %s6360_s1  ;;  %v3406_v8 = vadd.f32 %v3398_v33, %v3374_v10  ;;  %14933 = vst [vmem:[#allocation126_spill] sm:$0xff] %v11123_v32 }
 0x88b   :  { %v3495_v34 = vpop.permute.xlu0 %3494  ;;  %v11163_v9 = vpop.permute.xlu1 %4384 }
 0x88c   :  { %v3507_v13 = vmul.f32 %v3495_v34, %v9486_v39  ;;  %v3462_v52 = vadd.f32 %v3454_v7, %v3406_v8  ;;  %v14930_v34 = vld [vmem:[#allocation55_spill] sm:$0xff]  ;;  %v3530_v7 = vrot.slane %v10942_v17, 7  ;;  %v3535_v8 = vrot.slane %v10995_v59, 7  ;;  %14940 = vst [vmem:[#allocation131_spill] sm:$0xff] %v11163_v9 }
 0x88e   :  { %v3515_v62 = vadd.f32 %v3507_v13, %v3475_v41  ;;  %3664 = vrot.lane.b32.xlu2 %v10992_v42, %s6361_s2  ;;  %v3478_v20 = vadd.f32 %v3470_v35, %v3462_v52  ;;  %v3529_v35 = vrot.slane %v10923_v12, 7  ;;  %v3528_v13 = vrot.slane %v10992_v42, 7 }
 0x88f   :  { %v3533_v52 = vrot.slane %v10981_v58, 7 }
 0x890   :  { %v11019_v40 = vmul.f32 %v3515_v62, %v14928_v37  ;;  %v11043_v41 = vsel %vm351_vm0, %v3529_v35, %v3530_v7  ;;  %v11053_v62 = vsel %vm351_vm0, %v3535_v8, %v3528_v13 }
 0x892   :  { %3622 = vrot.lane.b32.xlu0 %v11019_v40, %s6360_s1  ;;  %3668 = vrot.lane.b32.xlu1 %v10942_v17, %s6361_s2 }
 0x893   :  { %v3501_v28 = vpop.permute.xlu0 %3500 }
 0x894   :  { %v3510_v56 = vmul.f32 %v3501_v28, %v9486_v39  ;;  %v3532_v28 = vrot.slane %v10958_v44, 7 }
 0x896   :  { %v3518_v10 = vadd.f32 %v3510_v56, %v3478_v20  ;;  %3670 = vrot.lane.b32.xlu2 %v11019_v40, %s6361_s2  ;;  %v11061_v20 = vsel %vm351_vm0, %v3532_v28, %v3533_v52  ;;  %v3531_v56 = vrot.slane %v11019_v40, 7 }
 0x898   :  { %v11031_v33 = vmul.f32 %v3518_v10, %v14930_v34  ;;  %v11070_v10 = vsel %vm351_vm0, %v3530_v7, %v3531_v56  ;;  %v11087_v7 = vsel %vm351_vm0, %v3528_v13, %v3529_v35  ;;  %v3696_v35 = vrot.slane %v10992_v42, 1 }
 0x899   :  { %v14931_v13 = vrot.slane %v10923_v12, 1 }
 0x89a   :  { %3628 = vrot.lane.b32.xlu0 %v11031_v33, %s6360_s1  ;;  %3674 = vrot.lane.b32.xlu1 %v10981_v58, %s6361_s2  ;;  %v3534_v6 = vrot.slane %v11031_v33, 7 }
 0x89b   :  { %v11110_v37 = vsel %vm575_vm1, %v3696_v35, %v14931_v13  ;;  %v14934_v13 = vrot.slane %v10958_v44, 1 }
 0x89c   :  { %v11081_v34 = vsel %vm351_vm0, %v3533_v52, %v3534_v6  ;;  %v11097_v52 = vsel %vm351_vm0, %v3531_v56, %v3532_v28  ;;  %14932 = vst [vmem:[#allocation125_spill] sm:$0xff] %v11110_v37  ;;  %v11114_v28 = vsel %vm351_vm0, %v3534_v6, %v3535_v8  ;;  %v3699_v56 = vrot.slane %v11019_v40, 1 }
 0x89d   :  { %v3702_v6 = vrot.slane %v11031_v33, 1  ;;  %v3703_v8 = vrot.slane %v10995_v59, 1 }
 0x89e   :  { %3676 = vrot.lane.b32.xlu2 %v11031_v33, %s6361_s2  ;;  %v11129_v5 = vsel %vm575_vm1, %v3699_v56, %v14934_v13  ;;  %v11157_v49 = vsel %vm575_vm1, %v14938_v29, %v3699_v56  ;;  %v14943_v29 = vrot.slane %v10981_v58, 1  ;;  %v6265_v58 = vld [vmem:[#allocation13 + $0x30] sm:$0xff] }
 0x89f   :  { %14935 = vst [vmem:[#allocation127_spill] sm:$0xff] %v11129_v5  ;;  %v11143_v25 = vsel %vm575_vm1, %v3702_v6, %v3703_v8  ;;  %v11167_v30 = vsel %vm575_vm1, %v3703_v8, %v3696_v35  ;;  %v4421_v55 = vrot.slane %v6265_v58, 1 }
 0x8a0   :  { %14936 = vst [vmem:[#allocation128_spill] sm:$0xff] %v11143_v25  ;;  %v11177_v56 = vsel %vm575_vm1, %v14943_v29, %v3702_v6  ;;  %v11193_v6 = vpop.permute.xlu0 %4382 }
 0x8a1   :  { %14939 = vst [vmem:[#allocation130_spill] sm:$0xff] %v11157_v49 }
 0x8a2   :  { %3666 = vrot.lane.b32.xlu0 %v10923_v12, %s6361_s2  ;;  %3548 = vrot.lane.b32.xlu1 %v11043_v41, %s6360_s1  ;;  %14941 = vst [vmem:[#allocation132_spill] sm:$0xff] %v11167_v30 }
 0x8a3   :  { %14944 = vst [vmem:[#allocation134_spill] sm:$0xff] %v11177_v56 }
 0x8a4   :  { %14946 = vst [vmem:[#allocation136_spill] sm:$0xff] %v11193_v6  ;;  %v14948_v6 = vld [vmem:[#allocation26_spill] sm:$0xff] }
 0x8a6   :  { %3544 = vrot.lane.b32.xlu2 %v11053_v62, %s6360_s1 }
 0x8aa   :  { %3672 = vrot.lane.b32.xlu0 %v10958_v44, %s6361_s2  ;;  %3554 = vrot.lane.b32.xlu1 %v11061_v20, %s6360_s1 }
 0x8ae   :  { %3550 = vrot.lane.b32.xlu2 %v11070_v10, %s6360_s1 }
 0x8b2   :  { %3678 = vrot.lane.b32.xlu0 %v10995_v59, %s6361_s2  ;;  %3584 = vrot.lane.b32.xlu1 %v11053_v62, %s6361_s2 }
 0x8b6   :  { %3556 = vrot.lane.b32.xlu2 %v11081_v34, %s6360_s1 }
 0x8ba   :  { %3546 = vrot.lane.b32.xlu0 %v11087_v7, %s6360_s1  ;;  %3590 = vrot.lane.b32.xlu1 %v11070_v10, %s6361_s2 }
 0x8be   :  { %3586 = vrot.lane.b32.xlu2 %v11087_v7, %s6361_s2 }
 0x8c2   :  { %3552 = vrot.lane.b32.xlu0 %v11097_v52, %s6360_s1  ;;  %3596 = vrot.lane.b32.xlu1 %v11081_v34, %s6361_s2 }
 0x8c6   :  { %3592 = vrot.lane.b32.xlu2 %v11097_v52, %s6361_s2 }
 0x8ca   :  { %3712 = vrot.lane.b32.xlu1 %v11110_v37, %s6360_s1  ;;  %3558 = vrot.lane.b32.xlu0 %v11114_v28, %s6360_s1 }
 0x8ce   :  { %3598 = vrot.lane.b32.xlu2 %v11114_v28, %s6361_s2 }
 0x8d2   :  { %3718 = vrot.lane.b32.xlu1 %v11129_v5, %s6360_s1  ;;  %3588 = vrot.lane.b32.xlu0 %v11043_v41, %s6361_s2 }
 0x8d6   :  { %3714 = vrot.lane.b32.xlu2 %v10966_v50, %s6360_s1 }
 0x8d8   :  { %v11139_v32 = vpop.permute.xlu2 %3620 }
 0x8da   :  { %3724 = vrot.lane.b32.xlu1 %v11143_v25, %s6360_s1  ;;  %3594 = vrot.lane.b32.xlu0 %v11061_v20, %s6361_s2 }
 0x8de   :  { %3720 = vrot.lane.b32.xlu2 %v11003_v2, %s6360_s1 }
 0x8e0   :  { %v11151_v13 = vpop.permute.xlu2 %3626 }
 0x8e1   :  { %14937 = vst [vmem:[#allocation129_spill] sm:$0xff] %v11151_v13 }
 0x8e2   :  { %3762 = vrot.lane.b32.xlu1 %v10966_v50, %s6361_s2  ;;  %3716 = vrot.lane.b32.xlu0 %v11157_v49, %s6360_s1 }
 0x8e6   :  { %3726 = vrot.lane.b32.xlu2 %v11167_v30, %s6360_s1 }
 0x8e8   :  { %v11171_v14 = vpop.permute.xlu2 %3664 }
 0x8e9   :  { %14942 = vst [vmem:[#allocation133_spill] sm:$0xff] %v11171_v14 }
 0x8ea   :  { %3768 = vrot.lane.b32.xlu1 %v11003_v2, %s6361_s2  ;;  %3722 = vrot.lane.b32.xlu0 %v11177_v56, %s6360_s1  ;;  %v6264_v2 = vld [vmem:[#allocation13 + $0x18] sm:$0xff] }
 0x8eb   :  { %v4418_v36 = vrot.slane %v6264_v2, 1 }
 0x8ec   :  { %v11183_v9 = vpop.permute.xlu1 %3618 }
 0x8ee   :  { %3764 = vrot.lane.b32.xlu2 %v11157_v49, %s6361_s2 }
 0x8f0   :  { %v11187_v35 = vpop.permute.xlu2 %3670 }
 0x8f1   :  { %14945 = vst [vmem:[#allocation135_spill] sm:$0xff] %v11187_v35 }
 0x8f2   :  { %3774 = vrot.lane.b32.xlu1 %v11167_v30, %s6361_s2  ;;  %3760 = vrot.lane.b32.xlu0 %v11110_v37, %s6361_s2  ;;  %v6261_v30 = vld [vmem:[#allocation13 + $0x28] sm:$0xff]  ;;  %v4415_v37 = vrot.slane %v14948_v6, 1 }
 0x8f4   :  { %v11195_v8 = vpop.permute.xlu1 %3624 }
 0x8f6   :  { %3770 = vrot.lane.b32.xlu2 %v11177_v56, %s6361_s2  ;;  %v6262_v56 = vld [vmem:[#allocation13 + $0x38] sm:$0xff] }
 0x8f8   :  { %v11199_v29 = vpop.permute.xlu2 %3676 }
 0x8f9   :  { %14947 = vst [vmem:[#allocation137_spill] sm:$0xff] %v11199_v29  ;;  %v11214_v29 = vsel %vm575_vm1, %v4415_v37, %v4416_v26 }
 0x8fa   :  { %4390 = vrot.lane.b32.xlu1 %v6260_v18, %s6361_s2  ;;  %3766 = vrot.lane.b32.xlu0 %v11129_v5, %s6361_s2  ;;  %14950 = vst [vmem:[#allocation26_spill] sm:$0xff] %v11214_v29  ;;  %v6263_v5 = vld [vmem:[#allocation13 + $0x10] sm:$0xff] }
 0x8fb   :  { %v4417_v14 = vrot.slane %v6263_v5, 1  ;;  %v4420_v5 = vrot.slane %v6261_v30, 1 }
 0x8fc   :  { %v3617_v35 = vpop.permute.xlu0 %3616  ;;  %v11204_v3 = vpop.permute.xlu1 %3630 }
 0x8fd   :  { %v11222_v57 = vsel %vm575_vm1, %v4417_v14, %v4418_v36  ;;  %v11256_v15 = vsel %vm575_vm1, %v4416_v26, %v4417_v14 }
 0x8fe   :  { %4392 = vrot.lane.b32.xlu2 %v6261_v30, %s6361_s2  ;;  %14956 = vst [vmem:[#allocation142_spill] sm:$0xff] %v11256_v15 }
 0x900   :  { %v3545_v31 = vpop.permute.xlu2 %3544 }
 0x901   :  { %v3560_v26 = vmul.f32 %v3545_v31, %v14769_v63  ;;  %v3632_v31 = vmul.f32 %v3617_v35, %v9492_v23 }
 0x902   :  { %4396 = vrot.lane.b32.xlu1 %v6262_v56, %s6361_s2  ;;  %3772 = vrot.lane.b32.xlu0 %v11143_v25, %s6361_s2  ;;  %v4419_v25 = vrot.slane %v6260_v18, 1  ;;  %v11239_v18 = vsel %vm575_vm1, %v4420_v5, %v4421_v55 }
 0x903   :  { %14954 = vst [vmem:[#allocation140_spill] sm:$0xff] %v11239_v18 }
 0x904   :  { %v3623_v54 = vpop.permute.xlu0 %3622  ;;  %v11216_v49 = vpop.permute.xlu1 %3668 }
 0x905   :  { %14951 = vst [vmem:[#allocation77_spill] sm:$0xff] %v11216_v49  ;;  %v11233_v49 = vsel %vm575_vm1, %v4418_v36, %v4419_v25 }
 0x906   :  { %4431 = vrot.lane.b32.xlu2 %v11214_v29, %s6360_s1  ;;  %14953 = vst [vmem:[#allocation139_spill] sm:$0xff] %v11233_v49 }
 0x908   :  { %v3551_v6 = vpop.permute.xlu2 %3550 }
 0x90a   :  { %4435 = vrot.lane.b32.xlu1 %v11222_v57, %s6360_s1  ;;  %4388 = vrot.lane.b32.xlu0 %v6264_v2, %s6361_s2  ;;  %v4422_v2 = vrot.slane %v6262_v56, 1 }
 0x90c   :  { %v11227_v46 = vpop.permute.xlu0 %3628  ;;  %v11229_v53 = vpop.permute.xlu1 %3674  ;;  %v11250_v36 = vsel %vm575_vm1, %v4421_v55, %v4422_v2  ;;  %v11270_v55 = vsel %vm575_vm1, %v4419_v25, %v4420_v5  ;;  %v11287_v5 = vsel %vm575_vm1, %v4422_v2, %v4415_v37 }
 0x90d   :  { %14952 = vst [vmem:[#allocation138_spill] sm:$0xff] %v11229_v53 }
 0x90e   :  { %4437 = vrot.lane.b32.xlu2 %v11233_v49, %s6360_s1  ;;  %14955 = vst [vmem:[#allocation141_spill] sm:$0xff] %v11250_v36 }
 0x910   :  { %v3557_v50 = vpop.permute.xlu2 %3556 }
 0x912   :  { %4441 = vrot.lane.b32.xlu1 %v11239_v18, %s6360_s1  ;;  %4394 = vrot.lane.b32.xlu0 %v6265_v58, %s6361_s2 }
 0x914   :  { %v11244_v30 = vpop.permute.xlu0 %3666  ;;  %v11246_v53 = vpop.permute.xlu1 %3548 }
 0x916   :  { %4443 = vrot.lane.b32.xlu2 %v11250_v36, %s6360_s1 }
 0x918   :  { %v3587_v56 = vpop.permute.xlu2 %3586 }
 0x91a   :  { %4481 = vrot.lane.b32.xlu1 %v11214_v29, %s6361_s2  ;;  %4433 = vrot.lane.b32.xlu0 %v11256_v15, %s6360_s1  ;;  %v3568_v29 = vmul.f32 %v11053_v62, %v14770_v27  ;;  %v3648_v62 = vmul.f32 %v10992_v42, %v9522_v11 }
 0x91c   :  { %v11262_v58 = vpop.permute.xlu0 %3672  ;;  %v11264_v43 = vpop.permute.xlu1 %3554 }
 0x91d   :  { %14957 = vst [vmem:[#allocation143_spill] sm:$0xff] %v11262_v58 }
 0x91e   :  { %4483 = vrot.lane.b32.xlu2 %v11256_v15, %s6361_s2  ;;  %v3576_v15 = vadd.f32 %v3568_v29, %v3560_v26  ;;  %v3635_v26 = vmul.f32 %v3623_v54, %v9492_v23  ;;  %v3574_v54 = vmul.f32 %v11081_v34, %v14770_v27  ;;  %v3638_v34 = vmul.f32 %v11227_v46, %v9492_v23 }
 0x920   :  { %v3593_v14 = vpop.permute.xlu2 %3592 }
 0x922   :  { %4487 = vrot.lane.b32.xlu1 %v11233_v49, %s6361_s2  ;;  %4439 = vrot.lane.b32.xlu0 %v11270_v55, %s6360_s1  ;;  %v3563_v49 = vmul.f32 %v3551_v6, %v14769_v63  ;;  %v3569_v6 = vmul.f32 %v11087_v7, %v14770_v27  ;;  %v3566_v7 = vmul.f32 %v3557_v50, %v14769_v63 }
 0x924   :  { %v11279_v58 = vpop.permute.xlu0 %3678  ;;  %v3585_v13 = vpop.permute.xlu1 %3584  ;;  %v3582_v50 = vadd.f32 %v3574_v54, %v3566_v7 }
 0x925   :  { %v3600_v60 = vmul.f32 %v3585_v13, %v9486_v39  ;;  %v3571_v13 = vmul.f32 %v11070_v10, %v14770_v27  ;;  %v3601_v10 = vmul.f32 %v3587_v56, %v9486_v39  ;;  %v3649_v56 = vmul.f32 %v10923_v12, %v9522_v11 }
 0x926   :  { %4489 = vrot.lane.b32.xlu2 %v11270_v55, %s6361_s2 }
 0x927   :  { %v3608_v25 = vadd.f32 %v3600_v60, %v3576_v15  ;;  %v3579_v29 = vadd.f32 %v3571_v13, %v3563_v49  ;;  %v3633_v49 = vmul.f32 %v11183_v9, %v9492_v23 }
 0x928   :  { %v3599_v15 = vpop.permute.xlu2 %3598 }
 0x929   :  { %v3640_v22 = vadd.f32 %v3632_v31, %v3608_v25  ;;  %v3651_v25 = vmul.f32 %v11019_v40, %v9522_v11  ;;  %v3572_v40 = vmul.f32 %v11097_v52, %v14770_v27 }
 0x92a   :  { %4493 = vrot.lane.b32.xlu1 %v11250_v36, %s6361_s2  ;;  %4445 = vrot.lane.b32.xlu0 %v11287_v5, %s6360_s1 }
 0x92b   :  { %v11298_v60 = vadd.f32 %v3648_v62, %v3640_v22 }
 0x92c   :  { %v3547_v37 = vpop.permute.xlu0 %3546  ;;  %v3591_v35 = vpop.permute.xlu1 %3590 }
 0x92d   :  { %v3561_v42 = vmul.f32 %v3547_v37, %v14769_v63  ;;  %v3603_v2 = vmul.f32 %v3591_v35, %v9486_v39 }
 0x92e   :  { %4495 = vrot.lane.b32.xlu2 %v11287_v5, %s6361_s2 }
 0x92f   :  { %v3577_v31 = vadd.f32 %v3569_v6, %v3561_v42  ;;  %v3611_v22 = vadd.f32 %v3603_v2, %v3579_v29 }
 0x930   :  { %v3715_v6 = vpop.permute.xlu2 %3714 }
 0x931   :  { %v3609_v62 = vadd.f32 %v3601_v10, %v3577_v31  ;;  %v3643_v13 = vadd.f32 %v3635_v26, %v3611_v22  ;;  %v3604_v10 = vmul.f32 %v3593_v14, %v9486_v39  ;;  %v3636_v22 = vmul.f32 %v11195_v8, %v9492_v23 }
 0x932   :  { %4485 = vrot.lane.b32.xlu0 %v11222_v57, %s6361_s2 }
 0x933   :  { %v3641_v37 = vadd.f32 %v3633_v49, %v3609_v62  ;;  %v11319_v35 = vadd.f32 %v3651_v25, %v3643_v13  ;;  %v3654_v49 = vmul.f32 %v11031_v33, %v9522_v11  ;;  %v3652_v62 = vmul.f32 %v10958_v44, %v9522_v11 }
 0x934   :  { %v3553_v9 = vpop.permute.xlu0 %3552  ;;  %v3597_v29 = vpop.permute.xlu1 %3596  ;;  %v3607_v33 = vmul.f32 %v3599_v15, %v9486_v39 }
 0x935   :  { %v3657_v42 = vadd.f32 %v3649_v56, %v3641_v37  ;;  %v3564_v2 = vmul.f32 %v3553_v9, %v14769_v63  ;;  %v3606_v26 = vmul.f32 %v3597_v29, %v9486_v39  ;;  %v3575_v37 = vmul.f32 %v11114_v28, %v14770_v27 }
 0x936   :  { %v3639_v9 = vmul.f32 %v11204_v3, %v9492_v23  ;;  %v3562_v29 = vmul.f32 %v11246_v53, %v14769_v63  ;;  %v3570_v28 = vmul.f32 %v11043_v41, %v14770_v27  ;;  %v3565_v53 = vmul.f32 %v11264_v43, %v14769_v63 }
 0x937   :  { %v3580_v12 = vadd.f32 %v3572_v40, %v3564_v2  ;;  %v3614_v31 = vadd.f32 %v3606_v26, %v3582_v50  ;;  %v3655_v2 = vmul.f32 %v10995_v59, %v9522_v11  ;;  %v3634_v59 = vmul.f32 %v11139_v32, %v9492_v23 }
 0x938   :  { %v11344_v56 = vpop.permute.xlu2 %3720  ;;  %v3354_v43 = vadd.f32 %v10731_v19, %v10630_v45  ;;  %v11378_v32 = vmul.f32 4.0, %v10539_v47  ;;  %v11394_v19 = vmul.f32 4.0, %v10571_v1 }
 0x939   :  { %v3612_v52 = vadd.f32 %v3604_v10, %v3580_v12  ;;  %v3646_v25 = vadd.f32 %v3638_v34, %v3614_v31  ;;  %v3578_v12 = vadd.f32 %v3570_v28, %v3562_v29  ;;  %v14962_v29 = vld [vmem:[#allocation118_spill] sm:$0xff]  ;;  %v14965_v28 = vld [vmem:[#allocation111_spill] sm:$0xff] }
 0x93a   :  { %4491 = vrot.lane.b32.xlu0 %v11239_v18, %s6361_s2  ;;  %v3410_v45 = vadd.f32 %v10814_v51, %v3354_v43 }
 0x93b   :  { %v3644_v7 = vadd.f32 %v3636_v22, %v3612_v52  ;;  %v11336_v46 = vadd.f32 %v3654_v49, %v3646_v25  ;;  %v3681_v22 = vmul.f32 %v11244_v30, %v9538_v61  ;;  %v14958_v52 = vld [vmem:[#allocation109_spill] sm:$0xff]  ;;  %v14959_v25 = vld [vmem:[#allocation66_spill] sm:$0xff]  ;;  %v3573_v49 = vmul.f32 %v11061_v20, %v14770_v27  ;;  %v14960_v20 = vld [vmem:[#allocation19_spill] sm:$0xff] }
 0x93c   :  { %v3559_v14 = vpop.permute.xlu0 %3558  ;;  %v11338_v13 = vpop.permute.xlu1 %3712  ;;  %v3353_v41 = vadd.f32 %v14959_v25, %v14958_v52  ;;  %v3352_v27 = vadd.f32 %v10804_v21, %v10640_v48  ;;  %v14963_v21 = vld [vmem:[#allocation25_spill] sm:$0xff]  ;;  %v14970_v25 = vld [vmem:[#allocation84_spill] sm:$0xff] }
 0x93d   :  { %v3660_v54 = vadd.f32 %v3652_v62, %v3644_v7  ;;  %v3567_v8 = vmul.f32 %v3559_v14, %v14769_v63  ;;  %v3793_v14 = vmul.f32 4.0, %v10521_v24 }
 0x93e   :  { %v3409_v30 = vadd.f32 %v10828_v38, %v3353_v41 }
 0x93f   :  { %v3583_v40 = vadd.f32 %v3575_v37, %v3567_v8  ;;  %v3689_v8 = vadd.f32 %v3681_v22, %v3657_v42  ;;  %v3729_v42 = vmul.f32 %v3715_v6, %v9555_v4  ;;  %v14969_v22 = vld [vmem:[#allocation110_spill] sm:$0xff] }
 0x940   :  { %v11359_v3 = vpop.permute.xlu2 %3726  ;;  %v3408_v52 = vadd.f32 %v14969_v22, %v3352_v27  ;;  %v14978_v22 = vld [vmem:[#allocation72_spill] sm:$0xff] }
 0x941   :  { %v3615_v44 = vadd.f32 %v3607_v33, %v3583_v40  ;;  %v3581_v33 = vadd.f32 %v3573_v49, %v3565_v53  ;;  %v11384_v40 = vmul.f32 4.0, %v14960_v20  ;;  %v14968_v53 = vld [vmem:[#allocation143_spill] sm:$0xff]  ;;  %v14971_v49 = vld [vmem:[#allocation97_spill] sm:$0xff] }
 0x943   :  { %v3647_v50 = vadd.f32 %v3639_v9, %v3615_v44  ;;  %v11390_v9 = vmul.f32 4.0, %v10586_v16  ;;  %v14961_v44 = vld [vmem:[#allocation87_spill] sm:$0xff] }
 0x944   :  { %v3589_v26 = vpop.permute.xlu0 %3588  ;;  %v11352_v34 = vpop.permute.xlu1 %3718  ;;  %v3356_v48 = vadd.f32 %v14962_v29, %v14961_v44 }
 0x945   :  { %v11356_v15 = vadd.f32 %v3655_v2, %v3647_v50  ;;  %v3602_v10 = vmul.f32 %v3589_v26, %v9486_v39  ;;  %v11399_v50 = vmul.f32 4.0, %v14963_v21  ;;  %v3737_v2 = vadd.f32 %v3729_v42, %v3689_v8  ;;  %v14964_v26 = vld [vmem:[#allocation45_spill] sm:$0xff] }
 0x946   :  { %v3412_v41 = vadd.f32 %v14970_v25, %v3356_v48  ;;  %v14973_v8 = vld [vmem:[#allocation77_spill] sm:$0xff]  ;;  %v14976_v48 = vld [vmem:[#allocation43_spill] sm:$0xff] }
 0x947   :  { %v3610_v31 = vadd.f32 %v3602_v10, %v3578_v12  ;;  %v14966_v10 = vld [vmem:[#allocation42_spill] sm:$0xff] }
 0x948   :  { %v3481_v12 = vadd.f32 %v14966_v10, %v3409_v30  ;;  %v3765_v43 = vpop.permute.xlu2 %3764  ;;  %v14975_v30 = vld [vmem:[#allocation123_spill] sm:$0xff] }
 0x949   :  { %v3642_v37 = vadd.f32 %v3634_v59, %v3610_v31  ;;  %v14967_v31 = vld [vmem:[#allocation129_spill] sm:$0xff]  ;;  %v3684_v59 = vmul.f32 %v14968_v53, %v9538_v61  ;;  %v14977_v53 = vld [vmem:[#allocation24_spill] sm:$0xff] }
 0x94a   :  { %v3637_v51 = vmul.f32 %v14967_v31, %v9492_v23  ;;  %v3359_v25 = vadd.f32 %v14978_v22, %v14977_v53 }
 0x94b   :  { %v3692_v44 = vadd.f32 %v3684_v59, %v3660_v54  ;;  %v14980_v54 = vld [vmem:[#allocation76_spill] sm:$0xff] }
 0x94c   :  { %v3595_v7 = vpop.permute.xlu0 %3594  ;;  %v11371_v62 = vpop.permute.xlu1 %3724 }
 0x94d   :  { %v3605_v63 = vmul.f32 %v3595_v7, %v9486_v39  ;;  %v3650_v39 = vmul.f32 %v10942_v17, %v9522_v11  ;;  %v3357_v17 = vadd.f32 %v14965_v28, %v14964_v26  ;;  %v14972_v7 = vld [vmem:[#allocation64_spill] sm:$0xff] }
 0x94f   :  { %v3613_v38 = vadd.f32 %v3605_v63, %v3581_v33  ;;  %v3658_v6 = vadd.f32 %v3650_v39, %v3642_v37  ;;  %v3745_v63 = vmul.f32 %v14972_v7, %v14971_v49  ;;  %v3682_v37 = vmul.f32 %v14973_v8, %v9538_v61  ;;  %v14974_v33 = vld [vmem:[#allocation74_spill] sm:$0xff] }
 0x950   :  { %v3482_v42 = vadd.f32 %v14974_v33, %v3410_v45  ;;  %v3413_v39 = vadd.f32 %v14975_v30, %v3357_v17  ;;  %v3801_v7 = vsub.f32 %v3793_v14, %v3481_v12  ;;  %v3732_v8 = vmul.f32 %v11344_v56, %v9555_v4  ;;  %v14979_v45 = vld [vmem:[#allocation124_spill] sm:$0xff] }
 0x951   :  { %v3645_v23 = vadd.f32 %v3637_v51, %v3613_v38  ;;  %v3690_v28 = vadd.f32 %v3682_v37, %v3658_v6  ;;  %v3753_v10 = vadd.f32 %v3745_v63, %v3737_v2  ;;  %v3653_v17 = vmul.f32 %v14979_v45, %v9522_v11  ;;  %v14981_v51 = vld [vmem:[#allocation130_spill] sm:$0xff]  ;;  %v14982_v2 = vld [vmem:[#allocation53_spill] sm:$0xff]  ;;  %v14983_v12 = vld [vmem:[#allocation120_spill] sm:$0xff] }
 0x952   :  { %v3484_v38 = vadd.f32 %v14980_v54, %v3412_v41  ;;  %v3746_v6 = vmul.f32 %v14981_v51, %v14971_v49  ;;  %v11428_v63 = vadd.f32 %v14982_v2, %v3408_v52  ;;  %v3802_v33 = vsub.f32 %v11378_v32, %v3482_v42  ;;  %v14984_v11 = vld [vmem:[#allocation22_spill] sm:$0xff]  ;;  %v14985_v41 = vld [vmem:[#allocation47_spill] sm:$0xff]  ;;  %v14986_v45 = vld [vmem:[#allocation48_spill] sm:$0xff]  ;;  %v3771_v2 = vpop.permute.xlu2 %3770 }
 0x953   :  { %v3740_v30 = vadd.f32 %v3732_v8, %v3692_v44  ;;  %v3661_v14 = vadd.f32 %v3653_v17, %v3645_v23  ;;  %v3778_v56 = vmul.f32 %v3765_v43, %v14976_v48  ;;  %v3825_v22 = vmul.f32 %v3801_v7, %v14985_v41 }
 0x954   :  { %v3717_v29 = vpop.permute.xlu0 %3716  ;;  %v3763_v26 = vpop.permute.xlu1 %3762  ;;  %v3687_v32 = vmul.f32 %v11279_v58, %v9538_v61  ;;  %v3804_v42 = vsub.f32 %v11384_v40, %v3484_v38 }
 0x955   :  { %v3730_v27 = vmul.f32 %v3717_v29, %v9555_v4  ;;  %v3777_v31 = vmul.f32 %v3763_v26, %v14976_v48  ;;  %v3485_v29 = vadd.f32 %v14983_v12, %v3413_v39  ;;  %v14988_v39 = vld [vmem:[#allocation133_spill] sm:$0xff] }
 0x956   :  { %v3680_v44 = vmul.f32 %v14988_v39, %v9538_v61  ;;  %v14991_v12 = vld [vmem:[#allocation81_spill] sm:$0xff]  ;;  %v3828_v39 = vmul.f32 %v3804_v42, %v14985_v41 }
 0x957   :  { %v3738_v59 = vadd.f32 %v3730_v27, %v3690_v28  ;;  %v3785_v37 = vadd.f32 %v3777_v31, %v3753_v10  ;;  %v3748_v28 = vmul.f32 %v14986_v45, %v14971_v49  ;;  %v14987_v27 = vld [vmem:[#allocation138_spill] sm:$0xff]  ;;  %v3728_v10 = vmul.f32 %v11338_v13, %v9555_v4 }
 0x958   :  { %v3685_v52 = vmul.f32 %v14987_v27, %v9538_v61  ;;  %v3695_v31 = vadd.f32 %v3687_v32, %v11356_v15  ;;  %v3688_v13 = vadd.f32 %v3680_v44, %v11298_v60  ;;  %v3735_v15 = vmul.f32 %v11359_v3, %v9555_v4 }
 0x959   :  { %v3754_v26 = vadd.f32 %v3746_v6, %v3738_v59  ;;  %v3809_v53 = vmul.f32 %v3785_v37, %v14984_v11  ;;  %v3756_v17 = vadd.f32 %v3748_v28, %v3740_v30  ;;  %v14989_v6 = vld [vmem:[#allocation115_spill] sm:$0xff]  ;;  %v3805_v60 = vsub.f32 %v11394_v19, %v3485_v29 }
 0x95a   :  { %v3693_v8 = vadd.f32 %v3685_v52, %v3661_v14  ;;  %v3415_v59 = vadd.f32 %v14989_v6, %v3359_v25  ;;  %v3826_v25 = vmul.f32 %v3802_v33, %v14985_v41  ;;  %v3736_v28 = vadd.f32 %v3728_v10, %v3688_v13  ;;  %v14996_v10 = vld [vmem:[#allocation119_spill] sm:$0xff]  ;;  %v14999_v13 = vld [vmem:[#allocation37_spill] sm:$0xff] }
 0x95b   :  { %v3786_v43 = vadd.f32 %v3778_v56, %v3754_v26  ;;  %v3817_v23 = vsub.f32 %v10521_v24, %v3809_v53  ;;  %v14990_v24 = vld [vmem:[#allocation134_spill] sm:$0xff]  ;;  %v14992_v53 = vld [vmem:[#allocation57_spill] sm:$0xff]  ;;  %v3743_v27 = vadd.f32 %v3735_v15, %v3695_v31  ;;  %v3781_v52 = vmul.f32 %v3771_v2, %v14976_v48  ;;  %v14997_v19 = vld [vmem:[#allocation135_spill] sm:$0xff] }
 0x95c   :  { %v3723_v7 = vpop.permute.xlu0 %3722  ;;  %v3769_v54 = vpop.permute.xlu1 %3768  ;;  %v3749_v37 = vmul.f32 %v14990_v24, %v14971_v49  ;;  %v3487_v31 = vadd.f32 %v14996_v10, %v3415_v59  ;;  %v3683_v29 = vmul.f32 %v14997_v19, %v9538_v61  ;;  %v15007_v10 = vld [vmem:[#allocation137_spill] sm:$0xff] }
 0x95d   :  { %v3810_v51 = vmul.f32 %v3786_v43, %v14984_v11  ;;  %v3733_v58 = vmul.f32 %v3723_v7, %v9555_v4  ;;  %v3780_v40 = vmul.f32 %v3769_v54, %v14976_v48  ;;  %v3833_v38 = vsub.f32 %v3817_v23, %v3825_v22  ;;  %v14993_v22 = vld [vmem:[#allocation83_spill] sm:$0xff]  ;;  %v14995_v43 = vld [vmem:[#allocation132_spill] sm:$0xff] }
 0x95e   :  { %v3355_v45 = vadd.f32 %v14993_v22, %v14992_v53  ;;  %v3751_v33 = vmul.f32 %v14995_v43, %v14971_v49  ;;  %v3691_v2 = vadd.f32 %v3683_v29, %v11319_v35  ;;  %v3807_v22 = vsub.f32 %v11399_v50, %v3487_v31  ;;  %v15006_v43 = vld [vmem:[#allocation108_spill] sm:$0xff] }
 0x95f   :  { %v3741_v30 = vadd.f32 %v3733_v58, %v3693_v8  ;;  %v3788_v14 = vadd.f32 %v3780_v40, %v3756_v17  ;;  %v11458_v56 = vsub.f32 %v14991_v12, %v3833_v38  ;;  %v3818_v26 = vsub.f32 %v10539_v47, %v3810_v51  ;;  %v14994_v47 = vld [vmem:[#allocation125_spill] sm:$0xff]  ;;  %v14998_v40 = vld [vmem:[#allocation36_spill] sm:$0xff]  ;;  %v15000_v12 = vld [vmem:[#allocation39_spill] sm:$0xff] }
 0x960   :  { %v3744_v44 = vmul.f32 %v14994_v47, %v14971_v49  ;;  %v3731_v17 = vmul.f32 %v11352_v34, %v9555_v4  ;;  %v3759_v51 = vadd.f32 %v3751_v33, %v3743_v27  ;;  %v3411_v15 = vadd.f32 %v14999_v13, %v3355_v45  ;;  %v15001_v45 = vld [vmem:[#allocation98_spill] sm:$0xff]  ;;  %v15002_v27 = vld [vmem:[#allocation85_spill] sm:$0xff]  ;;  %v15005_v47 = vld [vmem:[#allocation44_spill] sm:$0xff] }
 0x961   :  { %v3757_v3 = vadd.f32 %v3749_v37, %v3741_v30  ;;  %v3812_v32 = vmul.f32 %v3788_v14, %v14984_v11  ;;  %3850 = vrot.lane.b32.xlu0 %v11458_v56, %s6361_s2  ;;  %v3834_v23 = vsub.f32 %v3818_v26, %v3826_v25  ;;  %v3829_v34 = vmul.f32 %v3805_v60, %v14985_v41  ;;  %v15003_v60 = vld [vmem:[#allocation114_spill] sm:$0xff] }
 0x962   :  { %v3752_v42 = vadd.f32 %v3744_v44, %v3736_v28  ;;  %v3739_v25 = vadd.f32 %v3731_v17, %v3691_v2  ;;  %v3483_v28 = vadd.f32 %v15001_v45, %v3411_v15  ;;  %v3795_v33 = vmul.f32 4.0, %v15006_v43  ;;  %v15013_v2 = vld [vmem:[#allocation91_spill] sm:$0xff] }
 0x963   :  { %v3789_v7 = vadd.f32 %v3781_v52, %v3757_v3  ;;  %v3820_v8 = vsub.f32 %v14960_v20, %v3812_v32  ;;  %v11481_v38 = vsub.f32 %v14998_v40, %v3834_v23  ;;  %v3800_v20 = vsub.f32 %v11390_v9, %v11428_v63  ;;  %v15009_v40 = vld [vmem:[#allocation30_spill] sm:$0xff] }
 0x964   :  { %v3761_v54 = vpop.permute.xlu0 %3760  ;;  %v3775_v58 = vpop.permute.xlu1 %3774  ;;  %v3358_v52 = vadd.f32 %v15003_v60, %v15002_v27  ;;  %v3831_v23 = vmul.f32 %v3807_v22, %v14985_v41  ;;  %v3686_v31 = vmul.f32 %v15007_v10, %v9538_v61  ;;  %v3734_v29 = vmul.f32 %v11371_v62, %v9555_v4  ;;  %v15015_v27 = vld [vmem:[#allocation71_spill] sm:$0xff] }
 0x965   :  { %v3813_v6 = vmul.f32 %v3789_v7, %v14984_v11  ;;  %v3776_v59 = vmul.f32 %v3761_v54, %v14976_v48  ;;  %v3783_v24 = vmul.f32 %v3775_v58, %v14976_v48  ;;  %v3836_v37 = vsub.f32 %v3820_v8, %v3828_v39  ;;  %3852 = vrot.lane.b32.xlu1 %v11481_v38, %s6361_s2  ;;  %v15008_v54 = vld [vmem:[#allocation121_spill] sm:$0xff] }
 0x966   :  { %v3824_v3 = vmul.f32 %v3800_v20, %v14985_v41  ;;  %v3803_v17 = vsub.f32 %v3795_v33, %v3483_v28 }
 0x967   :  { %v3784_v30 = vadd.f32 %v3776_v59, %v3752_v42  ;;  %v3791_v14 = vadd.f32 %v3783_v24, %v3759_v51  ;;  %v11494_v26 = vsub.f32 %v15000_v12, %v3836_v37  ;;  %v3821_v53 = vsub.f32 %v10571_v1, %v3813_v6  ;;  %v15004_v1 = vld [vmem:[#allocation127_spill] sm:$0xff]  ;;  %v15010_v6 = vld [vmem:[#allocation21_spill] sm:$0xff]  ;;  %v15011_v24 = vld [vmem:[#allocation116_spill] sm:$0xff] }
 0x968   :  { %v3747_v32 = vmul.f32 %v15004_v1, %v14971_v49  ;;  %v3414_v42 = vadd.f32 %v15008_v54, %v3358_v52  ;;  %v3694_v51 = vadd.f32 %v3686_v31, %v11336_v46  ;;  %v15012_v46 = vld [vmem:[#allocation128_spill] sm:$0xff]  ;;  %v3827_v15 = vmul.f32 %v3803_v17, %v14985_v41 }
 0x969   :  { %v3808_v9 = vmul.f32 %v3784_v30, %v14984_v11  ;;  %v3815_v63 = vmul.f32 %v3791_v14, %v14984_v11  ;;  %3856 = vrot.lane.b32.xlu0 %v11494_v26, %s6361_s2  ;;  %v3837_v35 = vsub.f32 %v3821_v53, %v3829_v34  ;;  %v3750_v20 = vmul.f32 %v15012_v46, %v14971_v49  ;;  %v15022_v46 = vld [vmem:[#allocation73_spill] sm:$0xff] }
 0x96a   :  { %v3755_v7 = vadd.f32 %v3747_v32, %v3739_v25  ;;  %v3742_v4 = vadd.f32 %v3734_v29, %v3694_v51  ;;  %v3486_v37 = vadd.f32 %v15011_v24, %v3414_v42  ;;  %v3798_v30 = vmul.f32 4.0, %v15013_v2 }
 0x96b   :  { %v3816_v50 = vsub.f32 %v10586_v16, %v3808_v9  ;;  %v3823_v39 = vsub.f32 %v14963_v21, %v3815_v63  ;;  %v11511_v44 = vsub.f32 %v15005_v47, %v3837_v35  ;;  %v15014_v9 = vld [vmem:[#allocation33_spill] sm:$0xff]  ;;  %v3873_v17 = vrot.slane %v11458_v56, 1 }
 0x96c   :  { %v3767_v19 = vpop.permute.xlu0 %3766  ;;  %v3758_v14 = vadd.f32 %v3750_v20, %v3742_v4  ;;  %v3806_v22 = vsub.f32 %v3798_v30, %v3486_v37  ;;  %v3874_v51 = vrot.slane %v11481_v38, 1 }
 0x96d   :  { %v3779_v8 = vmul.f32 %v3767_v19, %v14976_v48  ;;  %v3832_v16 = vsub.f32 %v3816_v50, %v3824_v3  ;;  %3858 = vrot.lane.b32.xlu1 %v11511_v44, %s6361_s2  ;;  %v3839_v21 = vsub.f32 %v3823_v39, %v3831_v23  ;;  %v11559_v3 = vpop.permute.xlu1 %4390 }
 0x96e   :  { %v3830_v45 = vmul.f32 %v3806_v22, %v14985_v41 }
 0x96f   :  { %v3787_v58 = vadd.f32 %v3779_v8, %v3755_v7  ;;  %v11525_v61 = vsub.f32 %v15009_v40, %v3832_v16  ;;  %v11528_v59 = vsub.f32 %v15010_v6, %v3839_v21  ;;  %v3876_v6 = vrot.slane %v11494_v26, 1 }
 0x971   :  { %v3811_v62 = vmul.f32 %v3787_v58, %v14984_v11  ;;  %3848 = vrot.lane.b32.xlu2 %v11525_v61, %s6361_s2  ;;  %3862 = vrot.lane.b32.xlu0 %v11528_v59, %s6361_s2  ;;  %v3872_v8 = vrot.slane %v11525_v61, 1 }
 0x973   :  { %v3819_v13 = vsub.f32 %v15006_v43, %v3811_v62  ;;  %v3886_v54 = vsel %vm575_vm1, %v3872_v8, %v3873_v17 }
 0x974   :  { %v3773_v34 = vpop.permute.xlu0 %3772  ;;  %v3888_v58 = vsub.f32 %v3886_v54, %v11525_v61 }
 0x975   :  { %v3782_v12 = vmul.f32 %v3773_v34, %v14976_v48  ;;  %v3835_v53 = vsub.f32 %v3819_v13, %v3827_v15  ;;  %v11555_v48 = vpop.permute.xlu2 %4392  ;;  %v11567_v39 = vpop.permute.xlu1 %4396  ;;  %v3885_v13 = vsel %vm575_vm1, %v3873_v17, %v3874_v51  ;;  %v15023_v15 = vld [vmem:[#allocation35_spill] sm:$0xff] }
 0x976   :  { %15016 = vst [vmem:[#allocation109_spill] sm:$0xff] %v11555_v48  ;;  %v11607_v20 = vadd.f32 %v3888_v58, %v15022_v46  ;;  %v15026_v17 = vld [vmem:[#allocation67_spill] sm:$0xff]  ;;  %v15027_v46 = vld [vmem:[#allocation38_spill] sm:$0xff] }
 0x977   :  { %v3790_v25 = vadd.f32 %v3782_v12, %v3758_v14  ;;  %v11543_v63 = vsub.f32 %v15014_v9, %v3835_v53  ;;  %v3889_v14 = vsub.f32 %v3885_v13, %v11458_v56 }
 0x978   :  { %v3920_v22 = vmul.f32 %v11607_v20, %v11607_v20 }
 0x979   :  { %v3814_v35 = vmul.f32 %v3790_v25, %v14984_v11  ;;  %3854 = vrot.lane.b32.xlu2 %v11543_v63, %s6361_s2  ;;  %v3875_v40 = vrot.slane %v11543_v63, 1  ;;  %v3879_v25 = vrot.slane %v11528_v59, 1  ;;  %v11631_v54 = vadd.f32 %v3889_v14, %v15026_v17 }
 0x97b   :  { %v3822_v49 = vsub.f32 %v15013_v2, %v3814_v35  ;;  %v3883_v24 = vsel %vm575_vm1, %v3875_v40, %v3876_v6  ;;  %v3877_v2 = vrot.slane %v11511_v44, 1  ;;  %v3884_v35 = vsel %vm575_vm1, %v3874_v51, %v3875_v40 }
 0x97c   :  { %v11557_v52 = vpop.permute.xlu0 %4388  ;;  %v3891_v30 = vsub.f32 %v3883_v24, %v11543_v63  ;;  %v3890_v40 = vsub.f32 %v3884_v35, %v11481_v38  ;;  %v15029_v35 = vld [vmem:[#allocation99_spill] sm:$0xff] }
 0x97d   :  { %v3838_v28 = vsub.f32 %v3822_v49, %v3830_v45  ;;  %v11561_v1 = vpop.permute.xlu2 %4431  ;;  %v11573_v33 = vpop.permute.xlu1 %4435  ;;  %v15025_v45 = vld [vmem:[#allocation49_spill] sm:$0xff]  ;;  %v3882_v58 = vsel %vm575_vm1, %v3876_v6, %v3877_v2 }
 0x97e   :  { %v3892_v14 = vsub.f32 %v3882_v58, %v11494_v26  ;;  %v3887_v58 = vsel %vm575_vm1, %v3879_v25, %v3872_v8 }
 0x97f   :  { %v11551_v60 = vsub.f32 %v15015_v27, %v3838_v28  ;;  %v11628_v28 = vadd.f32 %v3891_v30, %v15025_v45 }
 0x981   :  { %3860 = vrot.lane.b32.xlu2 %v11551_v60, %s6361_s2  ;;  %v3878_v12 = vrot.slane %v11551_v60, 1 }
 0x984   :  { %v11563_v32 = vpop.permute.xlu0 %4394 }
 0x985   :  { %v11565_v50 = vpop.permute.xlu2 %4437  ;;  %v11579_v31 = vpop.permute.xlu1 %4441 }
 0x986   :  { %15018 = vst [vmem:[#allocation19_spill] sm:$0xff] %v11579_v31 }
 0x98c   :  { %v11569_v47 = vpop.permute.xlu0 %4433 }
 0x98d   :  { %v11571_v43 = vpop.permute.xlu2 %4443  ;;  %v11585_v7 = vpop.permute.xlu1 %4481 }
 0x98e   :  { %15017 = vst [vmem:[#allocation66_spill] sm:$0xff] %v11571_v43 }
 0x994   :  { %v11575_v23 = vpop.permute.xlu0 %4439 }
 0x995   :  { %v11577_v10 = vpop.permute.xlu2 %4483  ;;  %v11595_v42 = vpop.permute.xlu1 %4487 }
 0x99c   :  { %v11581_v19 = vpop.permute.xlu0 %4445 }
 0x99d   :  { %v11583_v29 = vpop.permute.xlu2 %4489  ;;  %v11618_v53 = vpop.permute.xlu1 %4493 }
 0x99e   :  { %15024 = vst [vmem:[#allocation45_spill] sm:$0xff] %v11618_v53 }
 0x9a4   :  { %v11588_v16 = vpop.permute.xlu0 %4485 }
 0x9a5   :  { %15019 = vst [vmem:[#allocation87_spill] sm:$0xff] %v11588_v16  ;;  %v11591_v21 = vpop.permute.xlu2 %4495 }
 0x9a6   :  { %15020 = vst [vmem:[#allocation118_spill] sm:$0xff] %v11591_v21 }
 0x9ac   :  { %v11601_v4 = vpop.permute.xlu0 %4491 }
 0x9ad   :  { %15021 = vst [vmem:[#allocation25_spill] sm:$0xff] %v11601_v4  ;;  %v15032_v4 = vld [vmem:[#allocation82_spill] sm:$0xff] }
 0x9ae   :  { %v11672_v18 = vadd.f32 %v3892_v14, %v15032_v4  ;;  %v3881_v4 = vsel %vm575_vm1, %v3877_v2, %v3878_v12  ;;  %v3895_v14 = vsub.f32 %v3887_v58, %v11528_v59 }
 0x9cb   :  { %v3849_v62 = vpop.permute.xlu2 %3848 }
 0x9cc   :  { %v3864_v37 = vsub.f32 %v3849_v62, %v11525_v61  ;;  %v3880_v62 = vsel %vm575_vm1, %v3878_v12, %v3879_v25  ;;  %v3924_v12 = vmul.f32 %v11672_v18, %v11672_v18 }
 0x9cd   :  { %v3894_v6 = vsub.f32 %v3880_v62, %v11551_v60  ;;  %v15030_v62 = vld [vmem:[#allocation78_spill] sm:$0xff] }
 0x9ce   :  { %v11612_v34 = vadd.f32 %v3864_v37, %v15023_v15  ;;  %v15028_v15 = vld [vmem:[#allocation41_spill] sm:$0xff] }
 0x9d0   :  { %v3912_v61 = vmul.f32 %v11612_v34, %v11612_v34 }
 0x9d2   :  { %v3928_v9 = vadd.f32 %v3920_v22, %v3912_v61  ;;  %v3921_v22 = vmul.f32 %v11631_v54, %v11631_v54 }
 0x9d3   :  { %v3855_v49 = vpop.permute.xlu2 %3854  ;;  %v3851_v27 = vpop.permute.xlu0 %3850 }
 0x9d4   :  { %v11637_v24 = vmax.f32 %v3928_v9, 1e-24  ;;  %v3867_v37 = vsub.f32 %v3855_v49, %v11543_v63  ;;  %v3865_v51 = vsub.f32 %v3851_v27, %v11458_v56  ;;  %v3923_v56 = vmul.f32 %v11628_v28, %v11628_v28 }
 0x9d5   :  { %v11660_v49 = vadd.f32 %v3890_v40, %v15029_v35 }
 0x9d6   :  { %6230 = vrsqrt.f32 %v11637_v24  ;;  %v11644_v13 = vadd.f32 %v3867_v37, %v15027_v46  ;;  %v11647_v30 = vadd.f32 %v3865_v51, %v15028_v15  ;;  %v15031_v46 = vld [vmem:[#allocation70_spill] sm:$0xff]  ;;  %vm3950_vm6 = vweird.f32 %v11637_v24 }
 0x9d7   :  { %v3853_v9 = vpop.permute.xlu1 %3852  ;;  %v11669_v15 = vadd.f32 %v3894_v6, %v15031_v46 }
 0x9d8   :  { %v3915_v61 = vmul.f32 %v11644_v13, %v11644_v13  ;;  %v3913_v63 = vmul.f32 %v11647_v30, %v11647_v30  ;;  %v3866_v45 = vsub.f32 %v3853_v9, %v11481_v38 }
 0x9d9   :  { %v3926_v2 = vmul.f32 %v11669_v15, %v11669_v15 }
 0x9da   :  { %v3931_v27 = vadd.f32 %v3923_v56, %v3915_v61  ;;  %v3929_v17 = vadd.f32 %v3921_v22, %v3913_v63  ;;  %v11666_v37 = vadd.f32 %v3866_v45, %v15030_v62  ;;  %v3922_v56 = vmul.f32 %v11660_v49, %v11660_v49  ;;  %v15033_v63 = vld [vmem:[#allocation54_spill] sm:$0xff] }
 0x9db   :  { %v3861_v51 = vpop.permute.xlu2 %3860  ;;  %v3857_v41 = vpop.permute.xlu0 %3856 }
 0x9dc   :  { %v6231_v40 = vpop.eup %6230  ;;  %v11674_v35 = vmax.f32 %v3931_v27, 1e-24  ;;  %v11676_v38 = vmax.f32 %v3929_v17, 1e-24  ;;  %v3870_v61 = vsub.f32 %v3861_v51, %v11551_v60  ;;  %v3868_v8 = vsub.f32 %v3857_v41, %v11494_v26  ;;  %v15034_v26 = vld [vmem:[#allocation58_spill] sm:$0xff] }
 0x9dd   :  { %v3945_v25 = vmul.f32 %v6231_v40, %v11637_v24  ;;  %v3914_v6 = vmul.f32 %v11666_v37, %v11666_v37  ;;  %v3893_v27 = vsub.f32 %v3881_v4, %v11511_v44  ;;  %vm3951_vm3 = vweird.f32 %v6231_v40 }
 0x9de   :  { %6232 = vrsqrt.f32 %v11674_v35  ;;  %v11690_v22 = vadd.f32 %v3870_v61, %v15033_v63  ;;  %v11694_v9 = vadd.f32 %v3868_v8, %v15034_v26  ;;  %v15035_v63 = vld [vmem:[#allocation79_spill] sm:$0xff]  ;;  %vm3952_vm7 = vmor %vm3950_vm6, %vm3951_vm3  ;;  %vm3980_vm8 = vweird.f32 %v11674_v35 }
 0x9df   :  { %v3946_v60 = vmul.f32 %v6231_v40, %v3945_v25  ;;  %6234 = vrsqrt.f32 %v11676_v38  ;;  %v3930_v41 = vadd.f32 %v3922_v56, %v3914_v6  ;;  %v3859_v17 = vpop.permute.xlu1 %3858  ;;  %v11712_v4 = vadd.f32 %v3893_v27, %v15035_v63  ;;  %v15037_v26 = vld [vmem:[#allocation63_spill] sm:$0xff] }
 0x9e0   :  { %v3918_v45 = vmul.f32 %v11690_v22, %v11690_v22  ;;  %v3916_v51 = vmul.f32 %v11694_v9, %v11694_v9  ;;  %v3869_v46 = vsub.f32 %v3859_v17, %v11511_v44  ;;  %v11718_v31 = vadd.f32 %v3895_v14, %v15037_v26  ;;  %v15038_v14 = vld [vmem:[#allocation86_spill] sm:$0xff] }
 0x9e1   :  { %v3947_v58 = vmul.f32 0.5, %v3946_v60  ;;  %v11703_v62 = vmax.f32 %v3930_v41, 1e-24  ;;  %v15036_v60 = vld [vmem:[#allocation62_spill] sm:$0xff]  ;;  %v3925_v63 = vmul.f32 %v11712_v4, %v11712_v4  ;;  %vm3960_vm9 = vweird.f32 %v11676_v38 }
 0x9e2   :  { %v3934_v61 = vadd.f32 %v3926_v2, %v3918_v45  ;;  %v3932_v25 = vadd.f32 %v3924_v12, %v3916_v51  ;;  %v11715_v41 = vadd.f32 %v3869_v46, %v15036_v60 }
 0x9e3   :  { %v3948_v8 = vsub.f32 1.5, %v3947_v58  ;;  %6236 = vrsqrt.f32 %v11703_v62  ;;  %v3863_v27 = vpop.permute.xlu0 %3862  ;;  %vm3970_vm11 = vweird.f32 %v11703_v62 }
 0x9e4   :  { %v6233_v56 = vpop.eup %6232  ;;  %v11709_v6 = vmax.f32 %v3934_v61, 1e-24  ;;  %v11722_v2 = vmax.f32 %v3932_v25, 1e-24  ;;  %v3917_v24 = vmul.f32 %v11715_v41, %v11715_v41  ;;  %v3927_v61 = vmul.f32 %v11718_v31, %v11718_v31 }
 0x9e5   :  { %v6235_v48 = vpop.eup %6234  ;;  %v3949_v44 = vmul.f32 %v6231_v40, %v3948_v8  ;;  %v3975_v45 = vmul.f32 %v6233_v56, %v11674_v35  ;;  %vm3981_vm10 = vweird.f32 %v6233_v56 }
 0x9e6   :  { %v3955_v12 = vmul.f32 %v6235_v48, %v11676_v38  ;;  %6238 = vrsqrt.f32 %v11709_v6  ;;  %vm3961_vm12 = vweird.f32 %v6235_v48  ;;  %vm4010_vm13 = vweird.f32 %v11709_v6  ;;  %vm3982_vm14 = vmor %vm3980_vm8, %vm3981_vm10 }
 0x9e7   :  { %v3953_v17 = vsel %vm3952_vm7, %v6231_v40, %v3949_v44  ;;  %v3976_v58 = vmul.f32 %v6233_v56, %v3975_v45  ;;  %6240 = vrsqrt.f32 %v11722_v2  ;;  %v3871_v40 = vsub.f32 %v3863_v27, %v11528_v59  ;;  %v15039_v27 = vld [vmem:[#allocation65_spill] sm:$0xff]  ;;  %vm3962_vm15 = vmor %vm3960_vm9, %vm3961_vm12 }
 0x9e8   :  { %v4024_v51 = vmul.f32 %v3953_v17, %v15038_v14  ;;  %v3956_v46 = vmul.f32 %v6235_v48, %v3955_v12  ;;  %v3933_v12 = vadd.f32 %v3925_v63, %v3917_v24  ;;  %vm3990_vm4 = vweird.f32 %v11722_v2 }
 0x9e9   :  { %v6237_v8 = vpop.eup %6236  ;;  %v3977_v25 = vmul.f32 0.5, %v3976_v58 }
 0x9ea   :  { %v4032_v60 = vsub.f32 1.0, %v4024_v51  ;;  %v3957_v26 = vmul.f32 0.5, %v3956_v46  ;;  %v3965_v44 = vmul.f32 %v6237_v8, %v11703_v62  ;;  %v11744_v51 = vadd.f32 %v3871_v40, %v15039_v27 }
 0x9eb   :  { %v3978_v45 = vsub.f32 1.5, %v3977_v25  ;;  %v11749_v63 = vmax.f32 %v3933_v12, 1e-24  ;;  %vm3971_vm2 = vweird.f32 %v6237_v8 }
 0x9ec   :  { %v6239_v17 = vpop.eup %6238  ;;  %v4040_v58 = vmax.f32 %v4032_v60, 0.0  ;;  %v3958_v53 = vsub.f32 1.5, %v3957_v26  ;;  %v3966_v36 = vmul.f32 %v6237_v8, %v3965_v44  ;;  %vm3972_vm3 = vmor %vm3970_vm11, %vm3971_vm2 }
 0x9ed   :  { %v11739_v16 = vpop.eup %6240  ;;  %v3979_v21 = vmul.f32 %v6233_v56, %v3978_v45  ;;  %v4005_v59 = vmul.f32 %v6239_v17, %v11709_v6  ;;  %vm4011_vm5 = vweird.f32 %v6239_v17  ;;  %6242 = vrsqrt.f32 %v11749_v63 }
 0x9ee   :  { %v4048_v46 = vmul.f32 %v4040_v58, %v11612_v34  ;;  %v3959_v24 = vmul.f32 %v6235_v48, %v3958_v53  ;;  %v3967_v25 = vmul.f32 0.5, %v3966_v36  ;;  %v3985_v44 = vmul.f32 %v11739_v16, %v11722_v2  ;;  %vm4012_vm7 = vmor %vm4010_vm13, %vm4011_vm5 }
 0x9ef   :  { %v3983_v60 = vsel %vm3982_vm14, %v6233_v56, %v3979_v21  ;;  %v4006_v26 = vmul.f32 %v6239_v17, %v4005_v59  ;;  %v4056_v56 = vmul.f32 %v4040_v58, %v11607_v20  ;;  %v3919_v59 = vmul.f32 %v11744_v51, %v11744_v51 }
 0x9f0   :  { %v4080_v40 = vsub.f32 %v11612_v34, %v4048_v46  ;;  %v4027_v35 = vmul.f32 %v3983_v60, %v15038_v14  ;;  %v3963_v45 = vsel %vm3962_vm15, %v6235_v48, %v3959_v24  ;;  %v3968_v53 = vsub.f32 1.5, %v3967_v25 }
 0x9f1   :  { %v4025_v36 = vmul.f32 %v3963_v45, %v15038_v14  ;;  %v4007_v21 = vmul.f32 0.5, %v4006_v26  ;;  %v3986_v38 = vmul.f32 %v11739_v16, %v3985_v44  ;;  %vm3991_vm6 = vweird.f32 %v11739_v16 }
 0x9f2   :  { %v4035_v12 = vsub.f32 1.0, %v4027_v35  ;;  %v3969_v34 = vmul.f32 %v6237_v8, %v3968_v53  ;;  %v3935_v24 = vadd.f32 %v3927_v61, %v3919_v59  ;;  %v11768_v25 = vsub.f32 %v4048_v46, %v4080_v40  ;;  %vm3992_vm8 = vmor %vm3990_vm4, %vm3991_vm6 }
 0x9f3   :  { %v4033_v27 = vsub.f32 1.0, %v4025_v36  ;;  %v4008_v43 = vsub.f32 1.5, %v4007_v21  ;;  %v3987_v60 = vmul.f32 0.5, %v3986_v38  ;;  %v4096_v61 = vsub.f32 %v11607_v20, %v4056_v56  ;;  %v6243_v40 = vpop.eup %6242 }
 0x9f4   :  { %v4043_v48 = vmax.f32 %v4035_v12, 0.0  ;;  %v3973_v26 = vsel %vm3972_vm3, %v6237_v8, %v3969_v34  ;;  %v11776_v62 = vmax.f32 %v3935_v24, 1e-24  ;;  %4169 = vrot.lane.b32.xlu1 %v11768_v25, %s6360_s1  ;;  %vm4001_vm9 = vweird.f32 %v6243_v40 }
 0x9f5   :  { %v4041_v58 = vmax.f32 %v4033_v27, 0.0  ;;  %v4009_v44 = vmul.f32 %v6239_v17, %v4008_v43  ;;  %v3988_v35 = vsub.f32 1.5, %v3987_v60  ;;  %v4026_v53 = vmul.f32 %v3973_v26, %v15038_v14 }
 0x9f6   :  { %v4051_v45 = vmul.f32 %v4043_v48, %v11644_v13  ;;  %v4059_v36 = vmul.f32 %v4043_v48, %v11628_v28  ;;  %v3995_v27 = vmul.f32 %v6243_v40, %v11749_v63  ;;  %6244 = vrsqrt.f32 %v11776_v62 }
 0x9f7   :  { %v4049_v43 = vmul.f32 %v4041_v58, %v11647_v30  ;;  %v4013_v8 = vsel %vm4012_vm7, %v6239_v17, %v4009_v44  ;;  %v3989_v46 = vmul.f32 %v11739_v16, %v3988_v35  ;;  %v4034_v38 = vsub.f32 1.0, %v4026_v53 }
 0x9f8   :  { %v4083_v21 = vsub.f32 %v11644_v13, %v4051_v45  ;;  %v4030_v12 = vmul.f32 %v4013_v8, %v15038_v14  ;;  %v4057_v6 = vmul.f32 %v4041_v58, %v11631_v54  ;;  %v4099_v20 = vsub.f32 %v11628_v28, %v4059_v36 }
 0x9f9   :  { %v4081_v59 = vsub.f32 %v11647_v30, %v4049_v43  ;;  %v3993_v17 = vsel %vm3992_vm8, %v11739_v16, %v3989_v46  ;;  %v4042_v34 = vmax.f32 %v4034_v38, 0.0  ;;  %v3996_v48 = vmul.f32 %v6243_v40, %v3995_v27 }
 0x9fa   :  { %v4038_v13 = vsub.f32 1.0, %v4030_v12  ;;  %v4028_v60 = vmul.f32 %v3993_v17, %v15038_v14  ;;  %v11798_v2 = vsub.f32 %v4051_v45, %v4083_v21  ;;  %v4097_v44 = vsub.f32 %v11631_v54, %v4057_v6 }
 0x9fb   :  { %v11796_v24 = vsub.f32 %v4049_v43, %v4081_v59  ;;  %v4050_v58 = vmul.f32 %v4042_v34, %v11666_v37  ;;  %v4058_v28 = vmul.f32 %v4042_v34, %v11660_v49  ;;  %v3997_v16 = vmul.f32 0.5, %v3996_v48 }
 0x9fc   :  { %v4046_v30 = vmax.f32 %v4038_v13, 0.0  ;;  %v4036_v26 = vsub.f32 1.0, %v4028_v60  ;;  %v11805_v35 = vsub.f32 %v4056_v56, %v4096_v61  ;;  %4175 = vrot.lane.b32.xlu1 %v11798_v2, %s6360_s1  ;;  %v11812_v8 = vsub.f32 %v4059_v36, %v4099_v20  ;;  %v6245_v12 = vpop.eup %6244 }
 0x9fd   :  { %4171 = vrot.lane.b32.xlu2 %v11796_v24, %s6360_s1  ;;  %v4082_v53 = vsub.f32 %v11666_v37, %v4050_v58  ;;  %v4098_v43 = vsub.f32 %v11660_v49, %v4058_v28  ;;  %v3998_v21 = vsub.f32 1.5, %v3997_v16  ;;  %v11814_v38 = vsub.f32 %v4057_v6, %v4097_v44 }
 0x9fe   :  { %v4054_v45 = vmul.f32 %v4046_v30, %v11690_v22  ;;  %v4044_v46 = vmax.f32 %v4036_v26, 0.0  ;;  %vm4000_vm10 = vweird.f32 %v11749_v63  ;;  %v4015_v36 = vmul.f32 %v6245_v12, %v11776_v62 }
 0x9ff   :  { %v11818_v37 = vsub.f32 %v4050_v58, %v4082_v53  ;;  %v11820_v49 = vsub.f32 %v4058_v28, %v4098_v43  ;;  %v3999_v61 = vmul.f32 %v6243_v40, %v3998_v21  ;;  %v4193_v20 = vrot.slane %v11805_v35, 7  ;;  %vm4002_vm11 = vmor %vm4000_vm10, %vm4001_vm9  ;;  %v15054_v53 = vld [vmem:[#allocation95_spill] sm:$0xff] }
 0xa00   :  { %v4086_v54 = vsub.f32 %v11690_v22, %v4054_v45  ;;  %v4052_v56 = vmul.f32 %v4044_v46, %v11694_v9  ;;  %v4194_v22 = vrot.slane %v11814_v38, 7  ;;  %v4060_v63 = vmul.f32 %v4044_v46, %v11672_v18 }
 0xa01   :  { %15040 = vst [vmem:[#allocation111_spill] sm:$0xff] %v11818_v37  ;;  %4173 = vrot.lane.b32.xlu0 %v11818_v37, %s6360_s1  ;;  %v4196_v59 = vrot.slane %v11812_v8, 7  ;;  %v4003_v27 = vsel %vm4002_vm11, %v6243_v40, %v3999_v61  ;;  %v4016_v34 = vmul.f32 %v6245_v12, %v4015_v36  ;;  %v4195_v13 = vrot.slane %v11820_v49, 7 }
 0xa02   :  { %15041 = vst [vmem:[#allocation42_spill] sm:$0xff] %v11820_v49  ;;  %v11827_v6 = vsub.f32 %v4054_v45, %v4086_v54  ;;  %v4084_v17 = vsub.f32 %v11694_v9, %v4052_v56  ;;  %v4062_v60 = vmul.f32 %v4046_v30, %v11669_v15  ;;  %v4029_v48 = vmul.f32 %v4003_v27, %v15038_v14  ;;  %v6266_v45 = vld [vmem:[#allocation13 + $0x8] sm:$0xff]  ;;  %v15068_v49 = vld [vmem:[#allocation101_spill] sm:$0xff] }
 0xa03   :  { %v11840_v58 = vsel %vm351_vm0, %v4193_v20, %v4194_v22  ;;  %v4100_v28 = vsub.f32 %v11672_v18, %v4060_v63  ;;  %v4017_v26 = vmul.f32 0.5, %v4016_v34  ;;  %v11849_v40 = vsel %vm351_vm0, %v4195_v13, %v4196_v59  ;;  %v15058_v9 = vld [vmem:[#allocation56_spill] sm:$0xff] }
 0xa04   :  { %15042 = vst [vmem:[#allocation129_spill] sm:$0xff] %v11827_v6  ;;  %v11843_v16 = vsub.f32 %v4052_v56, %v4084_v17  ;;  %v4037_v30 = vsub.f32 1.0, %v4029_v48  ;;  %4181 = vrot.lane.b32.xlu1 %v11827_v6, %s6360_s1  ;;  %v11859_v18 = vsel %vm351_vm0, %v4194_v22, %v4195_v13  ;;  %vm4021_vm12 = vweird.f32 %v6245_v12  ;;  %v15055_v17 = vld [vmem:[#allocation93_spill] sm:$0xff]  ;;  %v15067_v6 = vld [vmem:[#allocation32_spill] sm:$0xff] }
 0xa05   :  { %v11853_v44 = vsub.f32 %v4060_v63, %v4100_v28  ;;  %15043 = vst [vmem:[#allocation143_spill] sm:$0xff] %v11859_v18  ;;  %v4018_v43 = vsub.f32 1.5, %v4017_v26  ;;  %v4102_v46 = vsub.f32 %v11669_v15, %v4062_v60  ;;  %vm4020_vm13 = vweird.f32 %v11776_v62 }
 0xa06   :  { %4177 = vrot.lane.b32.xlu2 %v11843_v16, %s6360_s1  ;;  %v4045_v21 = vmax.f32 %v4037_v30, 0.0  ;;  %vm4022_vm14 = vmor %vm4020_vm13, %vm4021_vm12 }
 0xa07   :  { %v4197_v54 = vrot.slane %v11853_v44, 7  ;;  %v4019_v56 = vmul.f32 %v6245_v12, %v4018_v43  ;;  %v11879_v62 = vsub.f32 %v4062_v60, %v4102_v46  ;;  %v11942_v43 = vstv %s6176_s29 }
 0xa08   :  { %v4053_v61 = vmul.f32 %v4045_v21, %v11715_v41  ;;  %v4061_v36 = vmul.f32 %v4045_v21, %v11712_v4 }
 0xa09   :  { %v11872_v22 = vsel %vm351_vm0, %v4196_v59, %v4197_v54  ;;  %v4023_v63 = vsel %vm4022_vm14, %v6245_v12, %v4019_v56  ;;  %15044 = vst [vmem:[#allocation110_spill] sm:$0xff] %v11879_v62  ;;  %v4199_v12 = vrot.slane %v11879_v62, 7  ;;  %v15060_v62 = vld [vmem:[#allocation102_spill] sm:$0xff] }
 0xa0a   :  { %v4085_v15 = vsub.f32 %v11715_v41, %v4053_v61  ;;  %v4101_v27 = vsub.f32 %v11712_v4, %v4061_v36  ;;  %v4031_v34 = vmul.f32 %v4023_v63, %v15038_v14 }
 0xa0c   :  { %v4039_v13 = vsub.f32 1.0, %v4031_v34  ;;  %v11881_v48 = vsub.f32 %v4053_v61, %v4085_v15  ;;  %v11883_v28 = vsub.f32 %v4061_v36, %v4101_v27  ;;  %v11926_v15 = vstv %s6178_s24  ;;  %v15050_v34 = vld [vmem:[#allocation89_spill] sm:$0xff] }
 0xa0d   :  { %v11928_v27 = vstv %s6179_s26 }
 0xa0e   :  { %15045 = vst [vmem:[#allocation84_spill] sm:$0xff] %v11881_v48  ;;  %v4047_v26 = vmax.f32 %v4039_v13, 0.0  ;;  %4179 = vrot.lane.b32.xlu0 %v11881_v48, %s6360_s1  ;;  %v4198_v59 = vrot.slane %v11883_v28, 7  ;;  %v4284_v13 = vmul.f32 %v11928_v27, %v15050_v34  ;;  %v4287_v63 = vmul.f32 %v11928_v27, %v15054_v53 }
 0xa0f   :  { %15046 = vst [vmem:[#allocation97_spill] sm:$0xff] %v11883_v28  ;;  %v11961_v28 = vstv %s6173_s5 }
 0xa10   :  { %v4055_v41 = vmul.f32 %v4047_v26, %v11744_v51  ;;  %v4063_v4 = vmul.f32 %v4047_v26, %v11718_v31  ;;  %v11893_v14 = vsel %vm351_vm0, %v4198_v59, %v4199_v12  ;;  %v11897_v60 = vsel %vm351_vm0, %v4197_v54, %v4198_v59 }
 0xa11   :  { %15047 = vst [vmem:[#allocation64_spill] sm:$0xff] %v11893_v14  ;;  %v11936_v59 = vstv %s6175_s28  ;;  %v4283_v14 = vmul.f32 %v11928_v27, %v15060_v62 }
 0xa12   :  { %15048 = vst [vmem:[#allocation77_spill] sm:$0xff] %v11897_v60  ;;  %v4087_v46 = vsub.f32 %v11744_v51, %v4055_v41  ;;  %v4103_v21 = vsub.f32 %v11718_v31, %v4063_v4  ;;  %v11945_v31 = vstv %s6177_s30  ;;  %v4353_v53 = vmul.f32 %v11936_v59, %v15058_v9  ;;  %v15059_v60 = vld [vmem:[#allocation142_spill] sm:$0xff] }
 0xa13   :  { %v4403_v9 = vmul.f32 %v11945_v31, %v11559_v3 }
 0xa14   :  { %v11905_v56 = vsub.f32 %v4055_v41, %v4087_v46  ;;  %v11907_v61 = vsub.f32 %v4063_v4, %v4103_v21  ;;  %v15052_v41 = vld [vmem:[#allocation60_spill] sm:$0xff]  ;;  %v15053_v21 = vld [vmem:[#allocation113_spill] sm:$0xff] }
 0xa16   :  { %15049 = vst [vmem:[#allocation74_spill] sm:$0xff] %v11907_v61  ;;  %4183 = vrot.lane.b32.xlu2 %v11905_v56, %s6360_s1  ;;  %v4200_v54 = vrot.slane %v11907_v61, 7 }
 0xa18   :  { %v11914_v36 = vsel %vm351_vm0, %v4199_v12, %v4200_v54  ;;  %v11920_v51 = vsel %vm351_vm0, %v4200_v54, %v4193_v20  ;;  %v15051_v20 = vld [vmem:[#allocation88_spill] sm:$0xff]  ;;  %v11934_v12 = vstv %s6180_s27  ;;  %v4350_v54 = vmul.f32 %v11936_v59, %v15053_v21 }
 0xa19   :  { %v4275_v26 = vmul.f32 %v11926_v15, %v15051_v20  ;;  %v4317_v4 = vmul.f32 %v11934_v12, %v15052_v41  ;;  %v4367_v20 = vmul.f32 %v6266_v45, %v11942_v43  ;;  %v4278_v41 = vmul.f32 %v11926_v15, %v15055_v17 }
 0xa1a   :  { %v11953_v21 = vstv %s6172_s4 }
 0xa1b   :  { %v4292_v46 = vadd.f32 %v4284_v13, %v4275_v26  ;;  %v15056_v13 = vld [vmem:[#allocation131_spill] sm:$0xff]  ;;  %v4449_v45 = vmul.f32 %v11953_v21, %v11569_v47 }
 0xa1c   :  { %v4400_v26 = vmul.f32 %v11945_v31, %v15056_v13  ;;  %v4466_v13 = vmul.f32 %v11961_v28, %v15059_v60  ;;  %v6267_v47 = vld [vmem:[#allocation13 + $0x20] sm:$0xff] }
 0xa1d   :  { %v4325_v30 = vadd.f32 %v4317_v4, %v4292_v46  ;;  %v15057_v4 = vld [vmem:[#allocation80_spill] sm:$0xff] }
 0xa1f   :  { %v4358_v34 = vadd.f32 %v4350_v54, %v4325_v30  ;;  %v4320_v30 = vmul.f32 %v11934_v12, %v15057_v4  ;;  %v4295_v54 = vadd.f32 %v4287_v63, %v4278_v41  ;;  %v15061_v4 = vld [vmem:[#allocation92_spill] sm:$0xff]  ;;  %v4370_v63 = vmul.f32 %v6267_v47, %v11942_v43  ;;  %v15065_v47 = vld [vmem:[#allocation117_spill] sm:$0xff] }
 0xa20   :  { %v11970_v41 = vstv %s6174_s6  ;;  %v4349_v3 = vmul.f32 %v11936_v59, %v15065_v47  ;;  %v4469_v47 = vmul.f32 %v11961_v28, %v11270_v55 }
 0xa21   :  { %v4375_v46 = vadd.f32 %v4367_v20, %v4358_v34  ;;  %v4328_v17 = vadd.f32 %v4320_v30, %v4295_v54  ;;  %v4274_v34 = vmul.f32 %v11926_v15, %v15061_v4  ;;  %v4499_v60 = vmul.f32 %v11970_v41, %v11577_v10  ;;  %v15062_v30 = vld [vmem:[#allocation34_spill] sm:$0xff]  ;;  %v15064_v54 = vld [vmem:[#allocation105_spill] sm:$0xff] }
 0xa22   :  { %v4316_v62 = vmul.f32 %v11934_v12, %v15062_v30  ;;  %v4452_v4 = vmul.f32 %v11953_v21, %v11575_v23 }
 0xa23   :  { %v4408_v0 = vadd.f32 %v4400_v26, %v4375_v46  ;;  %v4361_v20 = vadd.f32 %v4353_v53, %v4328_v17  ;;  %v15063_v46 = vld [vmem:[#allocation103_spill] sm:$0xff]  ;;  %v4277_v53 = vmul.f32 %v11926_v15, %v15064_v54  ;;  %v15069_v54 = vld [vmem:[#allocation96_spill] sm:$0xff] }
 0xa24   :  { %v4319_v23 = vmul.f32 %v11934_v12, %v15069_v54  ;;  %v15077_v54 = vld [vmem:[#allocation122_spill] sm:$0xff] }
 0xa25   :  { %v4457_v48 = vadd.f32 %v4449_v45, %v4408_v0  ;;  %v4291_v0 = vadd.f32 %v4283_v14, %v4274_v34  ;;  %v4286_v45 = vmul.f32 %v11928_v27, %v15063_v46  ;;  %v4378_v17 = vadd.f32 %v4370_v63, %v4361_v20 }
 0xa26   :  { %v4276_v46 = vmul.f32 %v11926_v15, %v15067_v6  ;;  %v4290_v20 = vmul.f32 %v11928_v27, %v15068_v49  ;;  %v15072_v6 = vld [vmem:[#allocation104_spill] sm:$0xff] }
 0xa27   :  { %v4474_v26 = vadd.f32 %v4466_v13, %v4457_v48  ;;  %v15066_v13 = vld [vmem:[#allocation94_spill] sm:$0xff]  ;;  %v4411_v14 = vadd.f32 %v4403_v9, %v4378_v17  ;;  %v4324_v63 = vadd.f32 %v4316_v62, %v4291_v0  ;;  %v4294_v18 = vadd.f32 %v4286_v45, %v4277_v53  ;;  %v6268_v0 = vld [vmem:[#allocation13] sm:$0xff]  ;;  %v15074_v53 = vld [vmem:[#allocation68_spill] sm:$0xff] }
 0xa28   :  { %v4285_v10 = vmul.f32 %v11928_v27, %v15066_v13  ;;  %v15070_v9 = vsub.f32 %v11840_v58, %v11814_v38  ;;  %v4289_v17 = vmul.f32 %v11928_v27, %v15072_v6  ;;  %v4366_v62 = vmul.f32 %v6268_v0, %v11942_v43  ;;  %v15075_v38 = vld [vmem:[#allocation23_spill] sm:$0xff] }
 0xa29   :  { %v4507_v34 = vadd.f32 %v4499_v60, %v4474_v26  ;;  %v4460_v37 = vadd.f32 %v4452_v4, %v4411_v14  ;;  %v4357_v49 = vadd.f32 %v4349_v3, %v4324_v63  ;;  %v4352_v55 = vmul.f32 %v11936_v59, %v15074_v53  ;;  %v15076_v14 = vld [vmem:[#allocation106_spill] sm:$0xff]  ;;  %v15078_v63 = vld [vmem:[#allocation136_spill] sm:$0xff]  ;;  %v15080_v53 = vld [vmem:[#allocation29_spill] sm:$0xff] }
 0xa2a   :  { %v4293_v13 = vadd.f32 %v4285_v10, %v4276_v46  ;;  %v4323_v3 = vmul.f32 %v11934_v12, %v15077_v54  ;;  %v4502_v0 = vmul.f32 %v11970_v41, %v11583_v29  ;;  %v4356_v10 = vmul.f32 %v11936_v59, %v15080_v53  ;;  %v15081_v54 = vld [vmem:[#allocation69_spill] sm:$0xff]  ;;  %v15084_v53 = vld [vmem:[#allocation31_spill] sm:$0xff] }
 0xa2b   :  { %v4515_v4 = vmul.f32 %v4507_v34, %v14984_v11  ;;  %v4477_v6 = vadd.f32 %v4469_v47, %v4460_v37  ;;  %v4374_v46 = vadd.f32 %v4366_v62, %v4357_v49  ;;  %v4322_v61 = vmul.f32 %v11934_v12, %v15081_v54 }
 0xa57   :  { %v4172_v48 = vpop.permute.xlu2 %4171 }
 0xa58   :  { %v4186_v30 = vsub.f32 %v4172_v48, %v11796_v24  ;;  %v15071_v24 = vld [vmem:[#allocation90_spill] sm:$0xff]  ;;  %v15073_v48 = vld [vmem:[#allocation75_spill] sm:$0xff] }
 0xa59   :  { %v4281_v60 = vmul.f32 %v11926_v15, %v15071_v24  ;;  %v4280_v45 = vmul.f32 %v11926_v15, %v15073_v48  ;;  %v4327_v24 = vadd.f32 %v4319_v23, %v4294_v18  ;;  %v6269_v18 = vld [vmem:[#allocation13 + $0x18] sm:$0xff] }
 0xa5a   :  { %v4218_v26 = vadd.f32 %v15070_v9, %v4186_v30  ;;  %v4318_v30 = vmul.f32 %v11934_v12, %v15076_v14  ;;  %v4399_v9 = vmul.f32 %v11945_v31, %v15078_v63  ;;  %v4369_v37 = vmul.f32 %v6269_v18, %v11942_v43 }
 0xa5b   :  { %v4298_v34 = vadd.f32 %v4290_v20, %v4281_v60  ;;  %v4297_v14 = vadd.f32 %v4289_v17, %v4280_v45  ;;  %v4360_v63 = vadd.f32 %v4352_v55, %v4327_v24  ;;  %v15082_v20 = vld [vmem:[#allocation107_spill] sm:$0xff]  ;;  %v4510_v17 = vadd.f32 %v4502_v0, %v4477_v6  ;;  %v15083_v55 = vld [vmem:[#allocation26_spill] sm:$0xff]  ;;  %v6271_v6 = vld [vmem:[#allocation13 + $0x10] sm:$0xff] }
 0xa5c   :  { %v4226_v58 = vmul.f32 %v4218_v26, %v15075_v38  ;;  %v4448_v26 = vmul.f32 %v11953_v21, %v11561_v1  ;;  %v4351_v23 = vmul.f32 %v11936_v59, %v15082_v20  ;;  %v4407_v47 = vadd.f32 %v4399_v9, %v4374_v46  ;;  %v6270_v24 = vld [vmem:[#allocation13 + $0x38] sm:$0xff]  ;;  %v6272_v20 = vld [vmem:[#allocation13 + $0x30] sm:$0xff] }
 0xa5d   :  { %v4331_v29 = vadd.f32 %v4323_v3, %v4298_v34  ;;  %v4326_v49 = vadd.f32 %v4318_v30, %v4293_v13  ;;  %v4402_v1 = vmul.f32 %v11945_v31, %v11557_v52  ;;  %v4373_v3 = vmul.f32 %v6270_v24, %v11942_v43 }
 0xa5e   :  { %v12019_v48 = vadd.f32 %v4515_v4, %v4226_v58  ;;  %v4465_v4 = vmul.f32 %v11961_v28, %v15083_v55  ;;  %v4456_v58 = vadd.f32 %v4448_v26, %v4407_v47  ;;  %v4330_v34 = vadd.f32 %v4322_v61, %v4297_v14  ;;  %v15090_v55 = vld [vmem:[#allocation139_spill] sm:$0xff] }
 0xa5f   :  { %v4364_v45 = vadd.f32 %v4356_v10, %v4331_v29  ;;  %v4355_v9 = vmul.f32 %v11936_v59, %v15084_v53  ;;  %v4377_v46 = vadd.f32 %v4369_v37, %v4360_v63  ;;  %v15085_v13 = vsub.f32 %v11872_v22, %v11853_v44  ;;  %v15086_v44 = vld [vmem:[#allocation100_spill] sm:$0xff] }
 0xa60   :  { %15079 = vst [vmem:[#allocation123_spill] sm:$0xff] %v12019_v48  ;;  %4620 = vrot.lane.b32.xlu2 %v12019_v48, %s6360_s1  ;;  %v4178_v60 = vpop.permute.xlu2 %4177  ;;  %v4359_v30 = vadd.f32 %v4351_v23, %v4326_v49  ;;  %v4406_v0 = vmul.f32 %v11945_v31, %v11567_v39  ;;  %v4498_v10 = vmul.f32 %v11970_v41, %v11585_v7  ;;  %v15087_v39 = vld [vmem:[#allocation27_spill] sm:$0xff] }
 0xa61   :  { %v4189_v62 = vsub.f32 %v4178_v60, %v11843_v16  ;;  %v4368_v16 = vmul.f32 %v6271_v6, %v11942_v43  ;;  %v4410_v26 = vadd.f32 %v4402_v1, %v4377_v46  ;;  %v4451_v61 = vmul.f32 %v11953_v21, %v11565_v50  ;;  %v15089_v60 = vld [vmem:[#allocation126_spill] sm:$0xff] }
 0xa62   :  { %v4518_v14 = vmul.f32 %v4510_v17, %v14984_v11  ;;  %v4288_v22 = vmul.f32 %v11928_v27, %v15086_v44  ;;  %v4381_v63 = vadd.f32 %v4373_v3, %v4364_v45  ;;  %v4473_v18 = vadd.f32 %v4465_v4, %v4456_v58 }
 0xa63   :  { %v4221_v52 = vadd.f32 %v15085_v13, %v4189_v62  ;;  %v4455_v37 = vmul.f32 %v11953_v21, %v11581_v19  ;;  %v4279_v29 = vmul.f32 %v11926_v15, %v15087_v39  ;;  %v4363_v7 = vadd.f32 %v4355_v9, %v4330_v34 }
 0xa64   :  { %v4372_v23 = vmul.f32 %v6272_v20, %v11942_v43  ;;  %v4401_v49 = vmul.f32 %v11945_v31, %v15089_v60  ;;  %v4414_v1 = vadd.f32 %v4406_v0, %v4381_v63  ;;  %v4506_v17 = vadd.f32 %v4498_v10, %v4473_v18  ;;  %v15093_v0 = vld [vmem:[#allocation66_spill] sm:$0xff]  ;;  %v15097_v18 = vld [vmem:[#allocation87_spill] sm:$0xff] }
 0xa65   :  { %v4229_v54 = vmul.f32 %v4221_v52, %v15075_v38  ;;  %v4376_v45 = vadd.f32 %v4368_v16, %v4359_v30  ;;  %v4468_v19 = vmul.f32 %v11961_v28, %v15090_v55  ;;  %v4459_v4 = vadd.f32 %v4451_v61, %v4410_v26  ;;  %v15094_v61 = vld [vmem:[#allocation118_spill] sm:$0xff] }
 0xa66   :  { %v4170_v47 = vpop.permute.xlu1 %4169  ;;  %v4405_v58 = vmul.f32 %v11945_v31, %v11563_v32  ;;  %v4472_v24 = vmul.f32 %v11961_v28, %v11287_v5  ;;  %v4450_v3 = vmul.f32 %v11953_v21, %v11573_v33  ;;  %v4463_v34 = vadd.f32 %v4455_v37, %v4414_v1  ;;  %v15092_v32 = vld [vmem:[#allocation28_spill] sm:$0xff] }
 0xa67   :  { %v12059_v50 = vadd.f32 %v4518_v14, %v4229_v54  ;;  %v4185_v62 = vsub.f32 %v4170_v47, %v11768_v25  ;;  %v15091_v25 = vsub.f32 %v11920_v51, %v11805_v35  ;;  %v4296_v9 = vadd.f32 %v4288_v22, %v4279_v29  ;;  %v15096_v54 = vld [vmem:[#allocation112_spill] sm:$0xff]  ;;  %v15098_v29 = vld [vmem:[#allocation141_spill] sm:$0xff] }
 0xa68   :  { %v4380_v46 = vadd.f32 %v4372_v23, %v4363_v7  ;;  %v4501_v13 = vmul.f32 %v11970_v41, %v11595_v42  ;;  %v4321_v52 = vmul.f32 %v11934_v12, %v15092_v32  ;;  %v4409_v30 = vadd.f32 %v4401_v49, %v4376_v45  ;;  %v6273_v45 = vld [vmem:[#allocation13 + $0x28] sm:$0xff] }
 0xa69   :  { %15088 = vst [vmem:[#allocation43_spill] sm:$0xff] %v12059_v50  ;;  %4626 = vrot.lane.b32.xlu2 %v12059_v50, %s6360_s1  ;;  %v4217_v53 = vadd.f32 %v15091_v25, %v4185_v62  ;;  %v4514_v6 = vmul.f32 %v4506_v17, %v14984_v11  ;;  %v4467_v33 = vmul.f32 %v11961_v28, %v11222_v57 }
 0xa6a   :  { %v4413_v16 = vadd.f32 %v4405_v58, %v4380_v46  ;;  %v4454_v35 = vmul.f32 %v11953_v21, %v15093_v0  ;;  %v4476_v51 = vadd.f32 %v4468_v19, %v4459_v4  ;;  %v4458_v10 = vadd.f32 %v4450_v3, %v4409_v30  ;;  %v15100_v19 = vld [vmem:[#allocation45_spill] sm:$0xff]  ;;  %v15101_v3 = vld [vmem:[#allocation74_spill] sm:$0xff]  ;;  %v15106_v30 = vld [vmem:[#allocation143_spill] sm:$0xff] }
 0xa6b   :  { %v4225_v5 = vmul.f32 %v4217_v53, %v15075_v38  ;;  %v4480_v26 = vadd.f32 %v4472_v24, %v4463_v34  ;;  %v4505_v42 = vmul.f32 %v11970_v41, %v15094_v61  ;;  %v4354_v44 = vmul.f32 %v11936_v59, %v15096_v54  ;;  %v15103_v53 = vld [vmem:[#allocation111_spill] sm:$0xff] }
 0xa6c   :  { %v4509_v22 = vadd.f32 %v4501_v13, %v4476_v51  ;;  %v4500_v57 = vmul.f32 %v11970_v41, %v15097_v18  ;;  %v4329_v39 = vadd.f32 %v4321_v52, %v4296_v9  ;;  %v4471_v7 = vmul.f32 %v11961_v28, %v15098_v29  ;;  %v15114_v18 = vld [vmem:[#allocation110_spill] sm:$0xff] }
 0xa6d   :  { %v12089_v14 = vadd.f32 %v4514_v6, %v4225_v5  ;;  %v4462_v20 = vadd.f32 %v4454_v35, %v4413_v16  ;;  %v4513_v47 = vadd.f32 %v4505_v42, %v4480_v26  ;;  %v4475_v60 = vadd.f32 %v4467_v33, %v4458_v10  ;;  %v15107_v6 = vld [vmem:[#allocation42_spill] sm:$0xff]  ;;  %v15109_v16 = vld [vmem:[#allocation19_spill] sm:$0xff]  ;;  %v15111_v42 = vld [vmem:[#allocation129_spill] sm:$0xff] }
 0xa6e   :  { %v4176_v63 = vpop.permute.xlu1 %4175  ;;  %v15099_v1 = vsub.f32 %v11849_v40, %v11812_v8  ;;  %v4362_v62 = vadd.f32 %v4354_v44, %v4329_v39  ;;  %v4517_v55 = vmul.f32 %v4509_v22, %v14984_v11  ;;  %v4504_v4 = vmul.f32 %v11970_v41, %v15100_v19  ;;  %v15104_v40 = vld [vmem:[#allocation109_spill] sm:$0xff]  ;;  %v15116_v39 = vld [vmem:[#allocation140_spill] sm:$0xff] }
 0xa6f   :  { %15095 = vst [vmem:[#allocation24_spill] sm:$0xff] %v12089_v14  ;;  %v4188_v37 = vsub.f32 %v4176_v63, %v11798_v2  ;;  %4618 = vrot.lane.b32.xlu1 %v12089_v14, %s6360_s1  ;;  %v4371_v2 = vmul.f32 %v6273_v45, %v11942_v43  ;;  %v4508_v24 = vadd.f32 %v4500_v57, %v4475_v60  ;;  %v15113_v63 = vld [vmem:[#allocation64_spill] sm:$0xff]  ;;  %v15121_v19 = vld [vmem:[#allocation97_spill] sm:$0xff] }
 0xa70   :  { %v4184_v23 = vpop.permute.xlu2 %4183  ;;  %v15102_v34 = vsub.f32 %v11914_v36, %v15101_v3  ;;  %v4404_v9 = vmul.f32 %v11945_v31, %v15104_v40  ;;  %v4479_v46 = vadd.f32 %v4471_v7, %v4462_v20  ;;  %v4521_v13 = vmul.f32 %v4513_v47, %v14984_v11  ;;  %v15117_v47 = vld [vmem:[#allocation25_spill] sm:$0xff]  ;;  %v15119_v45 = vld [vmem:[#allocation84_spill] sm:$0xff] }
 0xa71   :  { %v4192_v49 = vsub.f32 %v4184_v23, %v11905_v56  ;;  %v4220_v17 = vadd.f32 %v15099_v1, %v4188_v37  ;;  %v15108_v5 = vsub.f32 %v15106_v30, %v15107_v6  ;;  %v4379_v36 = vadd.f32 %v4371_v2, %v4362_v62 }
 0xa72   :  { %v4453_v0 = vmul.f32 %v11953_v21, %v15109_v16  ;;  %v4512_v35 = vadd.f32 %v4504_v4, %v4479_v46  ;;  %v4516_v10 = vmul.f32 %v4508_v24, %v14984_v11  ;;  %v15115_v57 = vsub.f32 %v15113_v63, %v15114_v18 }
 0xa73   :  { %v4174_v58 = vpop.permute.xlu0 %4173  ;;  %v4224_v25 = vadd.f32 %v15102_v34, %v4192_v49  ;;  %v4228_v56 = vmul.f32 %v4220_v17, %v15075_v38  ;;  %v4412_v44 = vadd.f32 %v4404_v9, %v4379_v36  ;;  %v4470_v29 = vmul.f32 %v11961_v28, %v15116_v39 }
 0xa74   :  { %v4187_v8 = vsub.f32 %v4174_v58, %v15103_v53  ;;  %v4520_v20 = vmul.f32 %v4512_v35, %v14984_v11  ;;  %v4503_v60 = vmul.f32 %v11970_v41, %v15117_v47  ;;  %v4534_v40 = vrot.slane %v12059_v50, 7 }
 0xa75   :  { %v4232_v32 = vmul.f32 %v4224_v25, %v15075_v38  ;;  %v12117_v52 = vadd.f32 %v4517_v55, %v4228_v56  ;;  %v4461_v7 = vadd.f32 %v4453_v0, %v4412_v44  ;;  %v15120_v55 = vld [vmem:[#allocation77_spill] sm:$0xff]  ;;  %v4531_v56 = vrot.slane %v12019_v48, 7 }
 0xa76   :  { %v4219_v33 = vadd.f32 %v15108_v5, %v4187_v8  ;;  %v4182_v51 = vpop.permute.xlu1 %4181  ;;  %v15122_v4 = vsub.f32 %v15120_v55, %v15121_v19  ;;  %v4530_v46 = vrot.slane %v12089_v14, 7  ;;  %v4714_v35 = vrot.slane %v12089_v14, 1 }
 0xa77   :  { %15105 = vst [vmem:[#allocation72_spill] sm:$0xff] %v12117_v52  ;;  %v12125_v26 = vadd.f32 %v4521_v13, %v4232_v32  ;;  %v4191_v54 = vsub.f32 %v4182_v51, %v15111_v42  ;;  %4624 = vrot.lane.b32.xlu1 %v12117_v52, %s6360_s1  ;;  %v4478_v1 = vadd.f32 %v4470_v29, %v4461_v7  ;;  %v4533_v6 = vrot.slane %v12117_v52, 7 }
 0xa78   :  { %v4227_v61 = vmul.f32 %v4219_v33, %v15075_v38  ;;  %v12194_v32 = vsel %vm351_vm0, %v4530_v46, %v4531_v56  ;;  %v4715_v51 = vrot.slane %v12019_v48, 1  ;;  %v4718_v42 = vrot.slane %v12059_v50, 1 }
 0xa79   :  { %15110 = vst [vmem:[#allocation124_spill] sm:$0xff] %v12125_v26  ;;  %4632 = vrot.lane.b32.xlu2 %v12125_v26, %s6360_s1  ;;  %v4223_v37 = vadd.f32 %v15115_v57, %v4191_v54  ;;  %v4511_v62 = vadd.f32 %v4503_v60, %v4478_v1  ;;  %v4537_v13 = vrot.slane %v12125_v26, 7  ;;  %v12209_v5 = vsel %vm351_vm0, %v4533_v6, %v4534_v40 }
 0xa7a   :  { %v12133_v22 = vadd.f32 %v4516_v10, %v4227_v61  ;;  %15127 = vst [vmem:[#allocation138_spill] sm:$0xff] %v12194_v32  ;;  %v12242_v10 = vsel %vm575_vm1, %v4714_v35, %v4715_v51  ;;  %v4717_v61 = vrot.slane %v12117_v52, 1  ;;  %v4721_v18 = vrot.slane %v12125_v26, 1 }
 0xa7b   :  { %v4231_v23 = vmul.f32 %v4223_v37, %v15075_v38  ;;  %v4519_v24 = vmul.f32 %v4511_v62, %v14984_v11  ;;  %v12200_v30 = vsel %vm351_vm0, %v4537_v13, %v4530_v46  ;;  %15129 = vst [vmem:[#allocation115_spill] sm:$0xff] %v12209_v5 }
 0xa7c   :  { %15112 = vst [vmem:[#allocation76_spill] sm:$0xff] %v12133_v22  ;;  %4622 = vrot.lane.b32.xlu0 %v12133_v22, %s6360_s1  ;;  %v4532_v25 = vrot.slane %v12133_v22, 7  ;;  %v12254_v54 = vsel %vm575_vm1, %v4717_v61, %v4718_v42  ;;  %v4716_v44 = vrot.slane %v12133_v22, 1  ;;  %v12312_v1 = vsel %vm575_vm1, %v4721_v18, %v4714_v35 }
 0xa7d   :  { %v12146_v49 = vadd.f32 %v4520_v20, %v4231_v23  ;;  %15128 = vst [vmem:[#allocation133_spill] sm:$0xff] %v12200_v30 }
 0xa7e   :  { %v12215_v33 = vsel %vm351_vm0, %v4532_v25, %v4533_v6  ;;  %v12265_v57 = vsel %vm575_vm1, %v4716_v44, %v4717_v61  ;;  %v12288_v20 = vsel %vm575_vm1, %v4715_v51, %v4716_v44  ;;  %15141 = vst [vmem:[#allocation98_spill] sm:$0xff] %v12312_v1 }
 0xa7f   :  { %15118 = vst [vmem:[#allocation130_spill] sm:$0xff] %v12146_v49  ;;  %4630 = vrot.lane.b32.xlu1 %v12146_v49, %s6360_s1  ;;  %v4536_v36 = vrot.slane %v12146_v49, 7  ;;  %v4720_v63 = vrot.slane %v12146_v49, 1 }
 0xa80   :  { %v4180_v17 = vpop.permute.xlu0 %4179  ;;  %15130 = vst [vmem:[#allocation134_spill] sm:$0xff] %v12215_v33 }
 0xa81   :  { %v4190_v2 = vsub.f32 %v4180_v17, %v15119_v45  ;;  %4678 = vrot.lane.b32.xlu2 %v12133_v22, %s6361_s2  ;;  %v12224_v16 = vsel %vm351_vm0, %v4536_v36, %v4537_v13  ;;  %15133 = vst [vmem:[#allocation83_spill] sm:$0xff] %v12265_v57  ;;  %v12271_v37 = vsel %vm575_vm1, %v4720_v63, %v4721_v18 }
 0xa82   :  { %15131 = vst [vmem:[#allocation81_spill] sm:$0xff] %v12224_v16  ;;  %v4573_v22 = vmul.f32 %v12215_v33, %v11961_v28 }
 0xa83   :  { %v4222_v58 = vadd.f32 %v15122_v4, %v4190_v2  ;;  %15134 = vst [vmem:[#allocation125_spill] sm:$0xff] %v12271_v37 }
 0xa84   :  { %15137 = vst [vmem:[#allocation135_spill] sm:$0xff] %v12288_v20 }
 0xa85   :  { %v4230_v3 = vmul.f32 %v4222_v58, %v15075_v38  ;;  %v12172_v38 = vsel %vm351_vm0, %v4531_v56, %v4532_v25 }
 0xa86   :  { %15125 = vst [vmem:[#allocation120_spill] sm:$0xff] %v12172_v38 }
 0xa87   :  { %v12158_v34 = vadd.f32 %v4519_v24, %v4230_v3  ;;  %4676 = vrot.lane.b32.xlu1 %v12019_v48, %s6361_s2 }
 0xa89   :  { %15123 = vst [vmem:[#allocation53_spill] sm:$0xff] %v12158_v34  ;;  %4684 = vrot.lane.b32.xlu2 %v12158_v34, %s6361_s2  ;;  %4628 = vrot.lane.b32.xlu0 %v12158_v34, %s6360_s1  ;;  %v4535_v8 = vrot.slane %v12158_v34, 7  ;;  %v4719_v29 = vrot.slane %v12158_v34, 1 }
 0xa8b   :  { %v12184_v9 = vsel %vm351_vm0, %v4534_v40, %v4535_v8  ;;  %v12230_v0 = vsel %vm351_vm0, %v4535_v8, %v4536_v36  ;;  %v12282_v7 = vsel %vm575_vm1, %v4719_v29, %v4720_v63  ;;  %v12300_v47 = vsel %vm575_vm1, %v4718_v42, %v4719_v29 }
 0xa8c   :  { %15126 = vst [vmem:[#allocation48_spill] sm:$0xff] %v12184_v9 }
 0xa8d   :  { %15132 = vst [vmem:[#allocation57_spill] sm:$0xff] %v12230_v0 }
 0xa8e   :  { %15136 = vst [vmem:[#allocation119_spill] sm:$0xff] %v12282_v7 }
 0xa8f   :  { %4682 = vrot.lane.b32.xlu1 %v12059_v50, %s6361_s2  ;;  %15139 = vst [vmem:[#allocation37_spill] sm:$0xff] %v12300_v47 }
 0xa91   :  { %4550 = vrot.lane.b32.xlu2 %v12172_v38, %s6360_s1  ;;  %4674 = vrot.lane.b32.xlu0 %v12089_v14, %s6361_s2 }
 0xa97   :  { %4688 = vrot.lane.b32.xlu1 %v12125_v26, %s6361_s2 }
 0xa99   :  { %4556 = vrot.lane.b32.xlu2 %v12184_v9, %s6360_s1  ;;  %4680 = vrot.lane.b32.xlu0 %v12117_v52, %s6361_s2 }
 0xa9f   :  { %4548 = vrot.lane.b32.xlu1 %v12194_v32, %s6360_s1 }
 0xaa1   :  { %4586 = vrot.lane.b32.xlu2 %v12200_v30, %s6361_s2  ;;  %4686 = vrot.lane.b32.xlu0 %v12146_v49, %s6361_s2 }
 0xaa7   :  { %4554 = vrot.lane.b32.xlu1 %v12209_v5, %s6360_s1 }
 0xaa9   :  { %4592 = vrot.lane.b32.xlu2 %v12215_v33, %s6361_s2  ;;  %4546 = vrot.lane.b32.xlu0 %v12200_v30, %s6360_s1 }
 0xaaf   :  { %4560 = vrot.lane.b32.xlu1 %v12224_v16, %s6360_s1 }
 0xab1   :  { %4552 = vrot.lane.b32.xlu0 %v12215_v33, %s6360_s1  ;;  %4598 = vrot.lane.b32.xlu2 %v12230_v0, %s6361_s2 }
 0xab7   :  { %4590 = vrot.lane.b32.xlu1 %v12172_v38, %s6361_s2 }
 0xab9   :  { %4730 = vrot.lane.b32.xlu2 %v12242_v10, %s6360_s1  ;;  %4558 = vrot.lane.b32.xlu0 %v12230_v0, %s6360_s1 }
 0xaba   :  { %v12273_v39 = vpop.permute.xlu2 %4620 }
 0xabb   :  { %15135 = vst [vmem:[#allocation132_spill] sm:$0xff] %v12273_v39 }
 0xabf   :  { %4596 = vrot.lane.b32.xlu1 %v12184_v9, %s6361_s2 }
 0xac1   :  { %4736 = vrot.lane.b32.xlu2 %v12254_v54, %s6360_s1  ;;  %4588 = vrot.lane.b32.xlu0 %v12194_v32, %s6361_s2 }
 0xac3   :  { %v12294_v23 = vpop.permute.xlu2 %4626 }
 0xac4   :  { %15138 = vst [vmem:[#allocation36_spill] sm:$0xff] %v12294_v23 }
 0xac7   :  { %4734 = vrot.lane.b32.xlu1 %v12265_v57, %s6360_s1 }
 0xac9   :  { %4742 = vrot.lane.b32.xlu2 %v12271_v37, %s6360_s1  ;;  %4594 = vrot.lane.b32.xlu0 %v12209_v5, %s6361_s2 }
 0xacf   :  { %4740 = vrot.lane.b32.xlu1 %v12282_v7, %s6360_s1 }
 0xad1   :  { %4788 = vrot.lane.b32.xlu2 %v12288_v20, %s6361_s2  ;;  %4600 = vrot.lane.b32.xlu0 %v12224_v16, %s6361_s2 }
 0xad3   :  { %v12306_v60 = vpop.permute.xlu2 %4632 }
 0xad4   :  { %15140 = vst [vmem:[#allocation39_spill] sm:$0xff] %v12306_v60 }
 0xad7   :  { %4786 = vrot.lane.b32.xlu1 %v12242_v10, %s6361_s2 }
 0xad9   :  { %4794 = vrot.lane.b32.xlu2 %v12300_v47, %s6361_s2  ;;  %4732 = vrot.lane.b32.xlu0 %v12288_v20, %s6360_s1 }
 0xadb   :  { %v12320_v62 = vpop.permute.xlu2 %4678 }
 0xadc   :  { %15143 = vst [vmem:[#allocation114_spill] sm:$0xff] %v12320_v62 }
 0xadf   :  { %4792 = vrot.lane.b32.xlu1 %v12254_v54, %s6361_s2 }
 0xae1   :  { %4800 = vrot.lane.b32.xlu2 %v12312_v1, %s6361_s2  ;;  %4738 = vrot.lane.b32.xlu0 %v12300_v47, %s6360_s1  ;;  %v12318_v17 = vpop.permute.xlu1 %4618 }
 0xae2   :  { %15142 = vst [vmem:[#allocation85_spill] sm:$0xff] %v12318_v17  ;;  %v4634_v53 = vmul.f32 %v12318_v17, %v11936_v59 }
 0xae3   :  { %v12328_v2 = vpop.permute.xlu2 %4684 }
 0xae4   :  { %15144 = vst [vmem:[#allocation127_spill] sm:$0xff] %v12328_v2 }
 0xae7   :  { %4798 = vrot.lane.b32.xlu1 %v12271_v37, %s6361_s2 }
 0xae9   :  { %4744 = vrot.lane.b32.xlu0 %v12312_v1, %s6360_s1  ;;  %v12326_v45 = vpop.permute.xlu1 %4624 }
 0xaeb   :  { %v12336_v4 = vpop.permute.xlu2 %4550 }
 0xaee   :  { %v12332_v55 = vpop.permute.xlu0 %4622 }
 0xaef   :  { %15145 = vst [vmem:[#allocation44_spill] sm:$0xff] %v12332_v55 }
 0xaf1   :  { %4790 = vrot.lane.b32.xlu0 %v12265_v57, %s6361_s2  ;;  %v12334_v19 = vpop.permute.xlu1 %4630 }
 0xaf3   :  { %v12346_v25 = vpop.permute.xlu2 %4556 }
 0xaf9   :  { %4796 = vrot.lane.b32.xlu0 %v12282_v7, %s6361_s2  ;;  %v12340_v58 = vpop.permute.xlu1 %4676  ;;  %v4570_v7 = vmul.f32 %v12200_v30, %v11961_v28 }
 0xafa   :  { %15146 = vst [vmem:[#allocation108_spill] sm:$0xff] %v12340_v58 }
 0xafb   :  { %v12342_v24 = vpop.permute.xlu0 %4628  ;;  %v4587_v46 = vpop.permute.xlu2 %4586 }
 0xafc   :  { %15147 = vst [vmem:[#allocation137_spill] sm:$0xff] %v12342_v24  ;;  %v4602_v1 = vmul.f32 %v4587_v46, %v11970_v41 }
 0xb01   :  { %v12344_v3 = vpop.permute.xlu1 %4682 }
 0xb02   :  { %15148 = vst [vmem:[#allocation121_spill] sm:$0xff] %v12344_v3 }
 0xb03   :  { %v12348_v56 = vpop.permute.xlu0 %4674  ;;  %v4593_v36 = vpop.permute.xlu2 %4592 }
 0xb09   :  { %v12350_v8 = vpop.permute.xlu1 %4688 }
 0xb0a   :  { %15149 = vst [vmem:[#allocation30_spill] sm:$0xff] %v12350_v8 }
 0xb0b   :  { %v12352_v40 = vpop.permute.xlu0 %4680  ;;  %v4599_v61 = vpop.permute.xlu2 %4598 }
 0xb11   :  { %v4549_v13 = vpop.permute.xlu1 %4548 }
 0xb12   :  { %v4563_v30 = vmul.f32 %v4549_v13, %v11953_v21 }
 0xb13   :  { %v12354_v6 = vpop.permute.xlu0 %4686  ;;  %v4731_v18 = vpop.permute.xlu2 %4730 }
 0xb14   :  { %15150 = vst [vmem:[#allocation21_spill] sm:$0xff] %v12354_v6 }
 0xb19   :  { %v4555_v35 = vpop.permute.xlu1 %4554 }
 0xb1a   :  { %v4566_v13 = vmul.f32 %v4555_v35, %v11953_v21  ;;  %v4661_v35 = vmul.f32 %v12117_v52, %v11942_v43 }
 0xb1b   :  { %v4547_v51 = vpop.permute.xlu0 %4546  ;;  %v4737_v24 = vpop.permute.xlu2 %4736 }
 0xb1c   :  { %v4562_v11 = vmul.f32 %v4547_v51, %v11953_v21 }
 0xb1e   :  { %v4578_v57 = vadd.f32 %v4570_v7, %v4562_v11  ;;  %v4605_v7 = vmul.f32 %v4593_v36, %v11970_v41 }
 0xb20   :  { %v4610_v62 = vadd.f32 %v4602_v1, %v4578_v57  ;;  %v4571_v57 = vmul.f32 %v12194_v32, %v11961_v28  ;;  %v4658_v1 = vmul.f32 %v12089_v14, %v11942_v43 }
 0xb21   :  { %v4561_v42 = vpop.permute.xlu1 %4560 }
 0xb22   :  { %v4642_v37 = vadd.f32 %v4634_v53, %v4610_v62  ;;  %v4690_v53 = vmul.f32 %v12348_v56, %v11945_v31  ;;  %v4576_v62 = vmul.f32 %v12230_v0, %v11961_v28 }
 0xb23   :  { %v4553_v44 = vpop.permute.xlu0 %4552  ;;  %v12379_v9 = vpop.permute.xlu2 %4742 }
 0xb24   :  { %v4565_v8 = vmul.f32 %v4553_v44, %v11953_v21  ;;  %v4579_v44 = vadd.f32 %v4571_v57, %v4563_v30  ;;  %v4666_v17 = vadd.f32 %v4658_v1, %v4642_v37  ;;  %v4635_v30 = vmul.f32 %v12273_v39, %v11936_v59 }
 0xb25   :  { %v4608_v1 = vmul.f32 %v4599_v61, %v11970_v41  ;;  %v4762_v61 = vmul.f32 %v12242_v10, %v11928_v27 }
 0xb26   :  { %v4698_v36 = vadd.f32 %v4690_v53, %v4666_v17 }
 0xb29   :  { %v12356_v63 = vpop.permute.xlu1 %4590 }
 0xb2b   :  { %v4559_v29 = vpop.permute.xlu0 %4558 }
 0xb31   :  { %v12361_v2 = vpop.permute.xlu1 %4596 }
 0xb32   :  { %15151 = vst [vmem:[#allocation116_spill] sm:$0xff] %v12361_v2  ;;  %v4581_v2 = vadd.f32 %v4573_v22, %v4565_v8  ;;  %v4637_v22 = vmul.f32 %v12326_v45, %v11936_v59 }
 0xb33   :  { %v4589_v34 = vpop.permute.xlu0 %4588 }
 0xb34   :  { %v4603_v46 = vmul.f32 %v4589_v34, %v11970_v41  ;;  %v4613_v33 = vadd.f32 %v4605_v7, %v4581_v2 }
 0xb36   :  { %v4611_v8 = vadd.f32 %v4603_v46, %v4579_v44  ;;  %v4645_v37 = vadd.f32 %v4637_v22, %v4613_v33  ;;  %v4746_v46 = vmul.f32 %v4731_v18, %v11926_v15  ;;  %v4659_v33 = vmul.f32 %v12019_v48, %v11942_v43 }
 0xb37   :  { %v4640_v18 = vmul.f32 %v12334_v19, %v11936_v59  ;;  %v4693_v22 = vmul.f32 %v12352_v40, %v11945_v31 }
 0xb38   :  { %v4643_v44 = vadd.f32 %v4635_v30, %v4611_v8  ;;  %v4669_v32 = vadd.f32 %v4661_v35, %v4645_v37  ;;  %v4754_v17 = vadd.f32 %v4746_v46, %v4698_v36  ;;  %v4691_v8 = vmul.f32 %v12340_v58, %v11945_v31 }
 0xb39   :  { %v12369_v51 = vpop.permute.xlu1 %4734  ;;  %v4664_v30 = vmul.f32 %v12146_v49, %v11942_v43  ;;  %v4577_v46 = vmul.f32 %v12224_v16, %v11961_v28 }
 0xb3a   :  { %15152 = vst [vmem:[#allocation128_spill] sm:$0xff] %v12369_v51  ;;  %v4568_v51 = vmul.f32 %v4559_v29, %v11953_v21  ;;  %v4574_v29 = vmul.f32 %v12209_v5, %v11961_v28  ;;  %v4667_v53 = vadd.f32 %v4659_v33, %v4643_v44  ;;  %v4770_v36 = vadd.f32 %v4762_v61, %v4754_v17 }
 0xb3b   :  { %v4595_v11 = vpop.permute.xlu0 %4594  ;;  %v4749_v33 = vmul.f32 %v4737_v24, %v11926_v15  ;;  %v4763_v17 = vmul.f32 %v12288_v20, %v11928_v27  ;;  %v4604_v61 = vmul.f32 %v12356_v63, %v11970_v41  ;;  %v4636_v63 = vmul.f32 %v12332_v55, %v11936_v59 }
 0xb3c   :  { %v4584_v2 = vadd.f32 %v4576_v62, %v4568_v51  ;;  %v4606_v7 = vmul.f32 %v4595_v11, %v11970_v41  ;;  %v4582_v0 = vadd.f32 %v4574_v29, %v4566_v13  ;;  %v4662_v11 = vmul.f32 %v12059_v50, %v11942_v43  ;;  %v4789_v13 = vpop.permute.xlu2 %4788 }
 0xb3d   :  { %v4638_v62 = vmul.f32 %v12294_v23, %v11936_v59  ;;  %v4699_v50 = vadd.f32 %v4691_v8, %v4667_v53  ;;  %v4765_v53 = vmul.f32 %v12254_v54, %v11928_v27 }
 0xb3e   :  { %v4616_v39 = vadd.f32 %v4608_v1, %v4584_v2  ;;  %v4614_v51 = vadd.f32 %v4606_v7, %v4582_v0  ;;  %v4569_v0 = vmul.f32 %v4561_v42, %v11953_v21  ;;  %v4701_v7 = vadd.f32 %v4693_v22, %v4669_v32 }
 0xb3f   :  { %v4564_v1 = vmul.f32 %v12336_v4, %v11953_v21  ;;  %v4572_v32 = vmul.f32 %v12172_v38, %v11961_v28 }
 0xb40   :  { %v4648_v2 = vadd.f32 %v4640_v18, %v4616_v39  ;;  %v4646_v35 = vadd.f32 %v4638_v62, %v4614_v51  ;;  %v4585_v4 = vadd.f32 %v4577_v46, %v4569_v0  ;;  %v4757_v24 = vadd.f32 %v4749_v33, %v4701_v7 }
 0xb41   :  { %v12388_v34 = vpop.permute.xlu1 %4740  ;;  %v4580_v62 = vadd.f32 %v4572_v32, %v4564_v1  ;;  %v4803_v0 = vmul.f32 %v4789_v13, %v11934_v12  ;;  %v15154_v32 = vld [vmem:[#allocation52_spill] sm:$0xff] }
 0xb42   :  { %v4672_v51 = vadd.f32 %v4664_v30, %v4648_v2  ;;  %v4773_v13 = vadd.f32 %v4765_v53, %v4757_v24 }
 0xb43   :  { %v4601_v57 = vpop.permute.xlu0 %4600  ;;  %v4612_v30 = vadd.f32 %v4604_v61, %v4580_v62 }
 0xb44   :  { %v4609_v44 = vmul.f32 %v4601_v57, %v11970_v41  ;;  %v15153_v57 = vld [vmem:[#allocation59_spill] sm:$0xff] }
 0xb45   :  { %v4644_v62 = vadd.f32 %v4636_v63, %v4612_v30 }
 0xb46   :  { %v4617_v8 = vadd.f32 %v4609_v44, %v4585_v4  ;;  %v4752_v44 = vmul.f32 %v12379_v9, %v11926_v15  ;;  %v15156_v9 = vld [vmem:[#allocation116_spill] sm:$0xff] }
 0xb49   :  { %v4787_v37 = vpop.permute.xlu1 %4786 }
 0xb4a   :  { %v4802_v29 = vmul.f32 %v4787_v37, %v11934_v12  ;;  %v4670_v37 = vadd.f32 %v4662_v11, %v4646_v35  ;;  %v4694_v11 = vmul.f32 %v12344_v3, %v11945_v31  ;;  %v4567_v35 = vmul.f32 %v12346_v25, %v11953_v21  ;;  %v15155_v25 = vld [vmem:[#allocation48_spill] sm:$0xff] }
 0xb4b   :  { %v4733_v42 = vpop.permute.xlu0 %4732  ;;  %v4575_v53 = vmul.f32 %v15155_v25, %v11961_v28 }
 0xb4c   :  { %v4747_v49 = vmul.f32 %v4733_v42, %v11926_v15  ;;  %v4810_v39 = vadd.f32 %v4802_v29, %v4770_v36  ;;  %v4696_v36 = vmul.f32 %v12354_v6, %v11945_v31  ;;  %v4795_v42 = vpop.permute.xlu2 %4794 }
 0xb4d   :  { %v4583_v30 = vadd.f32 %v4575_v53, %v4567_v35  ;;  %v15162_v53 = vld [vmem:[#allocation114_spill] sm:$0xff] }
 0xb4e   :  { %v4755_v18 = vadd.f32 %v4747_v49, %v4699_v50  ;;  %v12431_v22 = vmul.f32 %v4810_v39, %v15153_v57  ;;  %v4665_v50 = vmul.f32 %v12125_v26, %v11942_v43  ;;  %v4641_v49 = vmul.f32 %v12306_v60, %v11936_v59 }
 0xb4f   :  { %v4704_v46 = vadd.f32 %v4696_v36, %v4672_v51  ;;  %v4766_v51 = vmul.f32 %v12300_v47, %v11928_v27 }
 0xb50   :  { %v4771_v29 = vadd.f32 %v4763_v17, %v4755_v18  ;;  %4922 = vrot.lane.b32.xlu1 %v12431_v22, %s6360_s1  ;;  %v4649_v33 = vadd.f32 %v4641_v49, %v4617_v8  ;;  %v4702_v17 = vadd.f32 %v4694_v11, %v4670_v37  ;;  %v14164_v24 = vrot.slane %v12431_v22, 1  ;;  %v15157_v37 = vld [vmem:[#allocation50_spill] sm:$0xff]  ;;  %v15158_v11 = vld [vmem:[#allocation125_spill] sm:$0xff] }
 0xb51   :  { %v4793_v2 = vpop.permute.xlu1 %4792  ;;  %v4607_v8 = vmul.f32 %v15156_v9, %v11970_v41  ;;  %v4692_v9 = vmul.f32 %v15162_v53, %v11945_v31 }
 0xb52   :  { %v4811_v7 = vadd.f32 %v4803_v0, %v4771_v29  ;;  %v4805_v1 = vmul.f32 %v4793_v2, %v11934_v12  ;;  %v4760_v29 = vadd.f32 %v4752_v44, %v4704_v46  ;;  %v4768_v2 = vmul.f32 %v15158_v11, %v11928_v27 }
 0xb53   :  { %v4739_v39 = vpop.permute.xlu0 %4738  ;;  %v4673_v63 = vadd.f32 %v4665_v50, %v4649_v33  ;;  %v4615_v35 = vadd.f32 %v4607_v8, %v4583_v30 }
 0xb54   :  { %v12454_v4 = vmul.f32 %v4811_v7, %v15154_v32  ;;  %v4750_v61 = vmul.f32 %v4739_v39, %v11926_v15  ;;  %v4813_v18 = vadd.f32 %v4805_v1, %v4773_v13  ;;  %v15159_v7 = vld [vmem:[#allocation76_spill] sm:$0xff]  ;;  %v4806_v1 = vmul.f32 %v4795_v42, %v11934_v12  ;;  %v4801_v30 = vpop.permute.xlu2 %4800 }
 0xb55   :  { %v4660_v13 = vmul.f32 %v15159_v7, %v11942_v43  ;;  %v4776_v42 = vadd.f32 %v4768_v2, %v4760_v29  ;;  %v15165_v7 = vld [vmem:[#allocation46_spill] sm:$0xff] }
 0xb56   :  { %v4758_v36 = vadd.f32 %v4750_v61, %v4702_v17  ;;  %4924 = vrot.lane.b32.xlu2 %v12454_v4, %s6360_s1  ;;  %v12467_v0 = vmul.f32 %v4813_v18, %v15157_v37  ;;  %v14163_v49 = vrot.slane %v12454_v4, 1  ;;  %v15161_v17 = vld [vmem:[#allocation30_spill] sm:$0xff]  ;;  %v15164_v37 = vld [vmem:[#allocation128_spill] sm:$0xff] }
 0xb57   :  { %v4697_v61 = vmul.f32 %v15161_v17, %v11945_v31  ;;  %v4668_v18 = vadd.f32 %v4660_v13, %v4644_v62  ;;  %v15166_v2 = vld [vmem:[#allocation98_spill] sm:$0xff] }
 0xb58   :  { %v4774_v39 = vadd.f32 %v4766_v51, %v4758_v36  ;;  %4928 = vrot.lane.b32.xlu1 %v12467_v0, %s6360_s1  ;;  %v12483_v44 = vsel %vm575_vm1, %v14164_v24, %v14163_v49  ;;  %v15163_v36 = vld [vmem:[#allocation137_spill] sm:$0xff]  ;;  %v4748_v49 = vmul.f32 %v15164_v37, %v11926_v15  ;;  %v4769_v13 = vmul.f32 %v15166_v2, %v11928_v27  ;;  %v15167_v37 = vld [vmem:[#allocation55_spill] sm:$0xff] }
 0xb59   :  { %v4799_v50 = vpop.permute.xlu1 %4798  ;;  %v4639_v32 = vmul.f32 %v15163_v36, %v11936_v59  ;;  %v4705_v57 = vadd.f32 %v4697_v61, %v4673_v63 }
 0xb5a   :  { %v4814_v33 = vadd.f32 %v4806_v1, %v4774_v39  ;;  %v4808_v51 = vmul.f32 %v4799_v50, %v11934_v12  ;;  %v4700_v1 = vadd.f32 %v4692_v9, %v4668_v18  ;;  %v15170_v18 = vld [vmem:[#allocation83_spill] sm:$0xff] }
 0xb5b   :  { %v4745_v24 = vpop.permute.xlu0 %4744  ;;  %v4647_v39 = vadd.f32 %v4639_v32, %v4615_v35 }
 0xb5c   :  { %v12495_v25 = vmul.f32 %v4814_v33, %v15165_v7  ;;  %v4753_v62 = vmul.f32 %v4745_v24, %v11926_v15  ;;  %v4816_v8 = vadd.f32 %v4808_v51, %v4776_v42  ;;  %v4756_v33 = vadd.f32 %v4748_v49, %v4700_v1  ;;  %v15168_v42 = vld [vmem:[#allocation53_spill] sm:$0xff] }
 0xb5d   :  { %v4809_v24 = vmul.f32 %v4801_v30, %v11934_v12  ;;  %v4663_v51 = vmul.f32 %v15168_v42, %v11942_v43  ;;  %v4764_v49 = vmul.f32 %v15170_v18, %v11928_v27  ;;  %v4751_v1 = vmul.f32 %v12388_v34, %v11926_v15 }
 0xb5e   :  { %v4761_v50 = vadd.f32 %v4753_v62, %v4705_v57  ;;  %4930 = vrot.lane.b32.xlu2 %v12495_v25, %s6360_s1  ;;  %v12504_v63 = vmul.f32 %v4816_v8, %v15167_v37  ;;  %v14165_v61 = vrot.slane %v12495_v25, 1  ;;  %v15169_v57 = vrot.slane %v12467_v0, 1  ;;  %v15171_v62 = vld [vmem:[#allocation127_spill] sm:$0xff] }
 0xb5f   :  { %v4671_v35 = vadd.f32 %v4663_v51, %v4647_v39  ;;  %v4695_v8 = vmul.f32 %v15171_v62, %v11945_v31  ;;  %v4772_v30 = vadd.f32 %v4764_v49, %v4756_v33  ;;  %v15176_v51 = vrot.slane %v12431_v22, 1  ;;  %v15178_v49 = vld [vmem:[#allocation119_spill] sm:$0xff] }
 0xb60   :  { %v4777_v29 = vadd.f32 %v4769_v13, %v4761_v50  ;;  %4934 = vrot.lane.b32.xlu1 %v12504_v63, %s6360_s1  ;;  %v12518_v32 = vsel %vm575_vm1, %v15169_v57, %v14165_v61  ;;  %v15172_v50 = vld [vmem:[#allocation51_spill] sm:$0xff]  ;;  %v5008_v57 = vrot.slane %v12504_v63, 1  ;;  %v15185_v2 = vrot.slane %v12495_v25, 1 }
 0xb61   :  { %v4703_v61 = vadd.f32 %v4695_v8, %v4671_v35  ;;  %v4767_v35 = vmul.f32 %v15178_v49, %v11928_v27 }
 0xb62   :  { %v4817_v9 = vadd.f32 %v4809_v24, %v4777_v29  ;;  %v15174_v24 = vld [vmem:[#allocation40_spill] sm:$0xff] }
 0xb63   :  { %v4791_v13 = vpop.permute.xlu0 %4790  ;;  %v4759_v39 = vadd.f32 %v4751_v1, %v4703_v61 }
 0xb64   :  { %v12527_v7 = vmul.f32 %v4817_v9, %v15172_v50  ;;  %v4804_v37 = vmul.f32 %v4791_v13, %v11934_v12  ;;  %v15179_v13 = vld [vmem:[#allocation61_spill] sm:$0xff] }
 0xb66   :  { %15173 = vst [vmem:[#allocation91_spill] sm:$0xff] %v12527_v7  ;;  %v4812_v42 = vadd.f32 %v4804_v37, %v4772_v30  ;;  %4936 = vrot.lane.b32.xlu2 %v12527_v7, %s6360_s1  ;;  %v5009_v29 = vrot.slane %v12527_v7, 1 }
 0xb68   :  { %v12535_v33 = vmul.f32 %v4812_v42, %v15174_v24  ;;  %4972 = vrot.lane.b32.xlu1 %v12454_v4, %s6361_s2  ;;  %v12541_v34 = vsel %vm575_vm1, %v5008_v57, %v5009_v29  ;;  %v12547_v37 = vsel %vm575_vm1, %v5009_v29, %v15176_v51  ;;  %v4775_v42 = vadd.f32 %v4767_v35, %v4759_v39 }
 0xb69   :  { %15175 = vst [vmem:[#allocation33_spill] sm:$0xff] %v12541_v34  ;;  %v4835_v29 = vrot.slane %v12454_v4, 7  ;;  %v4834_v39 = vrot.slane %v12431_v22, 7  ;;  %v4840_v24 = vrot.slane %v12504_v63, 7 }
 0xb6a   :  { %15177 = vst [vmem:[#allocation71_spill] sm:$0xff] %v12547_v37  ;;  %4926 = vrot.lane.b32.xlu0 %v12535_v33, %s6360_s1  ;;  %v4836_v1 = vrot.slane %v12535_v33, 7 }
 0xb6b   :  { %v4797_v61 = vpop.permute.xlu0 %4796  ;;  %v12577_v35 = vsel %vm351_vm0, %v4834_v39, %v4835_v29 }
 0xb6c   :  { %v4807_v9 = vmul.f32 %v4797_v61, %v11934_v12  ;;  %v4847_v51 = vsel %vm351_vm0, %v4835_v29, %v4836_v1 }
 0xb6d   :  { %v4876_v46 = vmul.f32 %v4847_v51, %v11928_v27 }
 0xb6e   :  { %v4815_v8 = vadd.f32 %v4807_v9, %v4775_v42  ;;  %4974 = vrot.lane.b32.xlu2 %v12535_v33, %s6361_s2  ;;  %v4838_v42 = vrot.slane %v12495_v25, 7  ;;  %v4837_v9 = vrot.slane %v12467_v0, 7 }
 0xb70   :  { %v12557_v30 = vmul.f32 %v4815_v8, %v15179_v13  ;;  %4978 = vrot.lane.b32.xlu1 %v12495_v25, %s6361_s2  ;;  %v12591_v29 = vsel %vm351_vm0, %v4837_v9, %v4838_v42  ;;  %v4841_v13 = vrot.slane %v12527_v7, 7  ;;  %v12615_v49 = vsel %vm351_vm0, %v4836_v1, %v4837_v9 }
 0xb71   :  { %v5004_v1 = vrot.slane %v12535_v33, 1 }
 0xb72   :  { %4932 = vrot.lane.b32.xlu0 %v12557_v30, %s6360_s1  ;;  %v4839_v61 = vrot.slane %v12557_v30, 7  ;;  %v12601_v50 = vsel %vm351_vm0, %v4841_v13, %v4834_v39  ;;  %v15180_v39 = vrot.slane %v12467_v0, 1 }
 0xb74   :  { %v4844_v8 = vsel %vm351_vm0, %v4838_v42, %v4839_v61  ;;  %v12607_v42 = vsel %vm351_vm0, %v4840_v24, %v4841_v13  ;;  %v12624_v13 = vsel %vm351_vm0, %v4839_v61, %v4840_v24  ;;  %v12638_v9 = vsel %vm575_vm1, %v5004_v1, %v15180_v39 }
 0xb75   :  { %15181 = vst [vmem:[#allocation73_spill] sm:$0xff] %v12638_v9  ;;  %v5007_v24 = vrot.slane %v12557_v30, 1 }
 0xb76   :  { %4980 = vrot.lane.b32.xlu2 %v12557_v30, %s6361_s2 }
 0xb77   :  { %v12649_v61 = vsel %vm575_vm1, %v5007_v24, %v5008_v57  ;;  %v15183_v57 = vrot.slane %v12454_v4, 1  ;;  %v12683_v53 = vsel %vm575_vm1, %v15185_v2, %v5007_v24 }
 0xb78   :  { %4984 = vrot.lane.b32.xlu1 %v12527_v7, %s6361_s2  ;;  %15182 = vst [vmem:[#allocation35_spill] sm:$0xff] %v12649_v61  ;;  %v4877_v7 = vmul.f32 %v12615_v49, %v11928_v27 }
 0xb79   :  { %v12669_v36 = vsel %vm575_vm1, %v15183_v57, %v5004_v1  ;;  %15186 = vst [vmem:[#allocation67_spill] sm:$0xff] %v12683_v53 }
 0xb7a   :  { %4970 = vrot.lane.b32.xlu0 %v12431_v22, %s6361_s2  ;;  %15184 = vst [vmem:[#allocation49_spill] sm:$0xff] %v12669_v36 }
 0xb7e   :  { %4854 = vrot.lane.b32.xlu2 %v4847_v51, %s6360_s1 }
 0xb80   :  { %4852 = vrot.lane.b32.xlu1 %v12577_v35, %s6360_s1 }
 0xb82   :  { %4976 = vrot.lane.b32.xlu0 %v12467_v0, %s6361_s2 }
 0xb86   :  { %4860 = vrot.lane.b32.xlu2 %v4844_v8, %s6360_s1 }
 0xb88   :  { %4858 = vrot.lane.b32.xlu1 %v12591_v29, %s6360_s1 }
 0xb8a   :  { %4982 = vrot.lane.b32.xlu0 %v12504_v63, %s6361_s2 }
 0xb8e   :  { %4890 = vrot.lane.b32.xlu2 %v12601_v50, %s6361_s2 }
 0xb90   :  { %4864 = vrot.lane.b32.xlu1 %v12607_v42, %s6360_s1 }
 0xb92   :  { %4850 = vrot.lane.b32.xlu0 %v12601_v50, %s6360_s1 }
 0xb96   :  { %4896 = vrot.lane.b32.xlu2 %v12615_v49, %s6361_s2 }
 0xb98   :  { %4894 = vrot.lane.b32.xlu1 %v4847_v51, %s6361_s2 }
 0xb9a   :  { %4856 = vrot.lane.b32.xlu0 %v12615_v49, %s6360_s1 }
 0xb9e   :  { %4902 = vrot.lane.b32.xlu2 %v12624_v13, %s6361_s2 }
 0xba0   :  { %4900 = vrot.lane.b32.xlu1 %v4844_v8, %s6361_s2 }
 0xba2   :  { %4862 = vrot.lane.b32.xlu0 %v12624_v13, %s6360_s1 }
 0xba6   :  { %5018 = vrot.lane.b32.xlu2 %v12483_v44, %s6360_s1 }
 0xba8   :  { %5022 = vrot.lane.b32.xlu1 %v12638_v9, %s6360_s1 }
 0xbaa   :  { %4892 = vrot.lane.b32.xlu0 %v12577_v35, %s6361_s2 }
 0xbae   :  { %5024 = vrot.lane.b32.xlu2 %v12518_v32, %s6360_s1 }
 0xbb0   :  { %v12651_v62 = vpop.permute.xlu2 %4924  ;;  %5028 = vrot.lane.b32.xlu1 %v12649_v61, %s6360_s1 }
 0xbb2   :  { %4898 = vrot.lane.b32.xlu0 %v12591_v29, %s6361_s2 }
 0xbb6   :  { %5030 = vrot.lane.b32.xlu2 %v12541_v34, %s6360_s1 }
 0xbb8   :  { %v12659_v39 = vpop.permute.xlu2 %4930  ;;  %5066 = vrot.lane.b32.xlu1 %v12483_v44, %s6361_s2 }
 0xbba   :  { %4904 = vrot.lane.b32.xlu0 %v12607_v42, %s6361_s2 }
 0xbbe   :  { %5068 = vrot.lane.b32.xlu2 %v12669_v36, %s6361_s2 }
 0xbc0   :  { %v12673_v18 = vpop.permute.xlu2 %4936  ;;  %5072 = vrot.lane.b32.xlu1 %v12518_v32, %s6361_s2 }
 0xbc2   :  { %5020 = vrot.lane.b32.xlu0 %v12669_v36, %s6360_s1  ;;  %v4923_v26 = vpop.permute.xlu1 %4922 }
 0xbc3   :  { %v4938_v5 = vmul.f32 %v4923_v26, %v11936_v59 }
 0xbc6   :  { %5074 = vrot.lane.b32.xlu2 %v12683_v53, %s6361_s2 }
 0xbc8   :  { %v12687_v1 = vpop.permute.xlu2 %4974  ;;  %5078 = vrot.lane.b32.xlu1 %v12541_v34, %s6361_s2 }
 0xbc9   :  { %15187 = vst [vmem:[#allocation38_spill] sm:$0xff] %v12687_v1 }
 0xbca   :  { %5026 = vrot.lane.b32.xlu0 %v12683_v53, %s6360_s1  ;;  %v4929_v57 = vpop.permute.xlu1 %4928  ;;  %v4879_v53 = vmul.f32 %v4844_v8, %v11928_v27 }
 0xbce   :  { %5080 = vrot.lane.b32.xlu2 %v12547_v37, %s6361_s2 }
 0xbd0   :  { %v12695_v17 = vpop.permute.xlu2 %4980 }
 0xbd1   :  { %15188 = vst [vmem:[#allocation41_spill] sm:$0xff] %v12695_v17 }
 0xbd2   :  { %5032 = vrot.lane.b32.xlu0 %v12547_v37, %s6360_s1  ;;  %v12699_v2 = vpop.permute.xlu1 %4934 }
 0xbd8   :  { %v4855_v24 = vpop.permute.xlu2 %4854 }
 0xbd9   :  { %v4868_v1 = vmul.f32 %v4855_v24, %v11926_v15 }
 0xbda   :  { %5070 = vrot.lane.b32.xlu0 %v12638_v9, %s6361_s2  ;;  %v12705_v55 = vpop.permute.xlu1 %4972 }
 0xbdb   :  { %15189 = vst [vmem:[#allocation99_spill] sm:$0xff] %v12705_v55  ;;  %v4884_v38 = vadd.f32 %v4876_v46, %v4868_v1 }
 0xbdc   :  { %v4927_v60 = vpop.permute.xlu0 %4926 }
 0xbe0   :  { %v4861_v16 = vpop.permute.xlu2 %4860 }
 0xbe1   :  { %v4871_v17 = vmul.f32 %v4861_v16, %v11926_v15 }
 0xbe2   :  { %5076 = vrot.lane.b32.xlu0 %v12649_v61, %s6361_s2  ;;  %v12711_v37 = vpop.permute.xlu1 %4978  ;;  %v4874_v61 = vmul.f32 %v12601_v50, %v11928_v27 }
 0xbe3   :  { %v4887_v51 = vadd.f32 %v4879_v53, %v4871_v17 }
 0xbe4   :  { %v4933_v47 = vpop.permute.xlu0 %4932 }
 0xbe8   :  { %v4891_v46 = vpop.permute.xlu2 %4890 }
 0xbe9   :  { %v4906_v53 = vmul.f32 %v4891_v46, %v11934_v12 }
 0xbea   :  { %v12713_v24 = vpop.permute.xlu1 %4984 }
 0xbeb   :  { %15190 = vst [vmem:[#allocation78_spill] sm:$0xff] %v12713_v24  ;;  %v4954_v24 = vmul.f32 %v12431_v22, %v11942_v43  ;;  %v4956_v22 = vmul.f32 %v12535_v33, %v11942_v43 }
 0xbec   :  { %v4971_v3 = vpop.permute.xlu0 %4970 }
 0xbf0   :  { %v4897_v16 = vpop.permute.xlu2 %4896 }
 0xbf1   :  { %v4909_v26 = vmul.f32 %v4897_v16, %v11934_v12  ;;  %v4943_v16 = vmul.f32 %v4933_v47, %v11936_v59  ;;  %v4960_v47 = vmul.f32 %v12504_v63, %v11942_v43 }
 0xbf2   :  { %v4853_v9 = vpop.permute.xlu1 %4852 }
 0xbf4   :  { %v12715_v34 = vpop.permute.xlu0 %4976 }
 0xbf8   :  { %v4903_v20 = vpop.permute.xlu2 %4902 }
 0xbfa   :  { %v4859_v1 = vpop.permute.xlu1 %4858 }
 0xbfc   :  { %v12717_v11 = vpop.permute.xlu0 %4982 }
 0xbfd   :  { %15191 = vst [vmem:[#allocation70_spill] sm:$0xff] %v12717_v11 }
 0xc02   :  { %v12719_v48 = vpop.permute.xlu1 %4864 }
 0xc04   :  { %v4851_v8 = vpop.permute.xlu0 %4850 }
 0xc05   :  { %v4866_v17 = vmul.f32 %v4851_v8, %v11926_v15  ;;  %v4940_v8 = vmul.f32 %v4927_v60, %v11936_v59  ;;  %v4957_v60 = vmul.f32 %v12467_v0, %v11942_v43  ;;  %v4959_v0 = vmul.f32 %v12557_v30, %v11942_v43 }
 0xc06   :  { %v4870_v30 = vmul.f32 %v4859_v1, %v11926_v15 }
 0xc07   :  { %v4882_v23 = vadd.f32 %v4874_v61, %v4866_v17 }
 0xc09   :  { %v4914_v36 = vadd.f32 %v4906_v53, %v4882_v23 }
 0xc0a   :  { %v4895_v6 = vpop.permute.xlu1 %4894 }
 0xc0b   :  { %v4946_v55 = vadd.f32 %v4938_v5, %v4914_v36  ;;  %v4908_v58 = vmul.f32 %v4895_v6, %v11934_v12  ;;  %v4941_v5 = vmul.f32 %v4929_v57, %v11936_v59 }
 0xc0c   :  { %v4857_v50 = vpop.permute.xlu0 %4856 }
 0xc0d   :  { %v4962_v11 = vadd.f32 %v4954_v24, %v4946_v55  ;;  %v4869_v61 = vmul.f32 %v4857_v50, %v11926_v15  ;;  %v4916_v46 = vadd.f32 %v4908_v58, %v4884_v38  ;;  %v5019_v38 = vpop.permute.xlu2 %5018  ;;  %v4912_v50 = vmul.f32 %v4903_v20, %v11934_v12 }
 0xc0e   :  { %v5034_v1 = vmul.f32 %v5019_v38, %v11953_v21  ;;  %v5050_v38 = vmul.f32 %v12483_v44, %v11961_v28  ;;  %v4990_v44 = vmul.f32 %v12711_v37, %v11945_v31 }
 0xc0f   :  { %v4885_v23 = vadd.f32 %v4877_v7, %v4869_v61  ;;  %v4948_v17 = vadd.f32 %v4940_v8, %v4916_v46  ;;  %v4880_v7 = vmul.f32 %v12624_v13, %v11928_v27  ;;  %v4944_v46 = vmul.f32 %v12699_v2, %v11936_v59 }
 0xc11   :  { %v4917_v6 = vadd.f32 %v4909_v26, %v4885_v23  ;;  %v12737_v36 = vadd.f32 %v4956_v22, %v4948_v17 }
 0xc12   :  { %v4901_v49 = vpop.permute.xlu1 %4900 }
 0xc13   :  { %v4949_v55 = vadd.f32 %v4941_v5, %v4917_v6  ;;  %v4911_v24 = vmul.f32 %v4901_v49, %v11934_v12  ;;  %v4986_v5 = vmul.f32 %v4971_v3, %v11945_v31  ;;  %v15192_v6 = vld [vmem:[#allocation133_spill] sm:$0xff] }
 0xc14   :  { %v4863_v58 = vpop.permute.xlu0 %4862  ;;  %v15193_v49 = vld [vmem:[#allocation85_spill] sm:$0xff] }
 0xc15   :  { %v4965_v33 = vadd.f32 %v4957_v60, %v4949_v55  ;;  %v4872_v57 = vmul.f32 %v4863_v58, %v11926_v15  ;;  %v4919_v53 = vadd.f32 %v4911_v24, %v4887_v51  ;;  %v5025_v20 = vpop.permute.xlu2 %5024  ;;  %v4650_v2 = vadd.f32 %v15193_v49, %v15192_v6 }
 0xc16   :  { %v4867_v60 = vmul.f32 %v4853_v9, %v11926_v15  ;;  %v4878_v24 = vmul.f32 %v12591_v29, %v11928_v27  ;;  %v4994_v63 = vadd.f32 %v4986_v5, %v4962_v11 }
 0xc17   :  { %v4888_v8 = vadd.f32 %v4880_v7, %v4872_v57  ;;  %v4951_v61 = vadd.f32 %v4943_v16, %v4919_v53  ;;  %v4706_v58 = vadd.f32 %v12348_v56, %v4650_v2  ;;  %v4875_v7 = vmul.f32 %v12577_v35, %v11928_v27 }
 0xc18   :  { %v4886_v57 = vadd.f32 %v4878_v24, %v4870_v30  ;;  %v5042_v29 = vadd.f32 %v5034_v1, %v4994_v63  ;;  %v5098_v56 = vmul.f32 4.0, %v12089_v14  ;;  %v4989_v35 = vmul.f32 %v12715_v34, %v11945_v31 }
 0xc19   :  { %v4920_v26 = vadd.f32 %v4912_v50, %v4888_v8  ;;  %v12751_v23 = vadd.f32 %v4959_v0, %v4951_v61  ;;  %v4883_v9 = vadd.f32 %v4875_v7, %v4867_v60  ;;  %v4942_v50 = vmul.f32 %v12659_v39, %v11936_v59 }
 0xc1a   :  { %v12753_v13 = vpop.permute.xlu1 %5022  ;;  %v4778_v11 = vadd.f32 %v12242_v10, %v4706_v58  ;;  %v4958_v39 = vmul.f32 %v12495_v25, %v11942_v43  ;;  %v4881_v34 = vmul.f32 %v12607_v42, %v11928_v27  ;;  %v4997_v5 = vadd.f32 %v4989_v35, %v4965_v33  ;;  %v15195_v33 = vld [vmem:[#allocation138_spill] sm:$0xff]  ;;  %v15196_v58 = vld [vmem:[#allocation132_spill] sm:$0xff] }
 0xc1b   :  { %v4952_v17 = vadd.f32 %v4944_v46, %v4920_v26  ;;  %v4873_v46 = vmul.f32 %v12719_v48, %v11926_v15  ;;  %v5058_v30 = vadd.f32 %v5050_v38, %v5042_v29  ;;  %v4651_v37 = vadd.f32 %v15196_v58, %v15195_v33  ;;  %v15201_v38 = vld [vmem:[#allocation91_spill] sm:$0xff] }
 0xc1c   :  { %v4893_v51 = vpop.permute.xlu0 %4892  ;;  %v5106_v49 = vsub.f32 %v5098_v56, %v4778_v11  ;;  %v5101_v7 = vmul.f32 4.0, %v12117_v52  ;;  %v4945_v1 = vmul.f32 %v12673_v18, %v11936_v59  ;;  %v5053_v11 = vmul.f32 %v12518_v32, %v11961_v28  ;;  %v15206_v33 = vld [vmem:[#allocation135_spill] sm:$0xff] }
 0xc1d   :  { %v12757_v22 = vadd.f32 %v4960_v47, %v4952_v17  ;;  %v4907_v3 = vmul.f32 %v4893_v51, %v11934_v12  ;;  %v5031_v61 = vpop.permute.xlu2 %5030  ;;  %v15194_v47 = vld [vmem:[#allocation134_spill] sm:$0xff]  ;;  %v4939_v17 = vmul.f32 %v12651_v62, %v11936_v59  ;;  %v4889_v62 = vadd.f32 %v4881_v34, %v4873_v46  ;;  %v15202_v46 = vld [vmem:[#allocation108_spill] sm:$0xff] }
 0xc1e   :  { %v4653_v10 = vadd.f32 %v12326_v45, %v15194_v47  ;;  %v5037_v45 = vmul.f32 %v5025_v20, %v11953_v21  ;;  %v4961_v18 = vmul.f32 %v15201_v38, %v11942_v43  ;;  %v15213_v38 = vld [vmem:[#allocation121_spill] sm:$0xff] }
 0xc1f   :  { %v4915_v0 = vadd.f32 %v4907_v3, %v4883_v9  ;;  %v4955_v3 = vmul.f32 %v12454_v4, %v11942_v43  ;;  %v15200_v4 = vld [vmem:[#allocation70_spill] sm:$0xff] }
 0xc20   :  { %v4709_v25 = vadd.f32 %v12352_v40, %v4653_v10  ;;  %v15197_v40 = vld [vmem:[#allocation57_spill] sm:$0xff]  ;;  %v4992_v35 = vmul.f32 %v15200_v4, %v11945_v31 }
 0xc21   :  { %v4947_v2 = vadd.f32 %v4939_v17, %v4915_v0  ;;  %v4656_v20 = vadd.f32 %v12334_v19, %v15197_v40  ;;  %v15209_v40 = vld [vmem:[#allocation36_spill] sm:$0xff] }
 0xc22   :  { %v12764_v55 = vpop.permute.xlu1 %5028  ;;  %v4781_v29 = vadd.f32 %v12254_v54, %v4709_v25  ;;  %v15204_v54 = vld [vmem:[#allocation78_spill] sm:$0xff]  ;;  %v5040_v25 = vmul.f32 %v5031_v61, %v11953_v21 }
 0xc23   :  { %v4963_v56 = vadd.f32 %v4955_v3, %v4947_v2  ;;  %v4993_v10 = vmul.f32 %v15204_v54, %v11945_v31 }
 0xc24   :  { %v4899_v16 = vpop.permute.xlu0 %4898 }
 0xc25   :  { %v4910_v53 = vmul.f32 %v4899_v16, %v11934_v12  ;;  %v5045_v16 = vadd.f32 %v5037_v45, %v4997_v5  ;;  %v5069_v17 = vpop.permute.xlu2 %5068 }
 0xc26   :  { %v5083_v4 = vmul.f32 %v5069_v17, %v11970_v41 }
 0xc27   :  { %v4918_v8 = vadd.f32 %v4910_v53, %v4886_v57  ;;  %v15198_v53 = vld [vmem:[#allocation22_spill] sm:$0xff]  ;;  %v5061_v32 = vadd.f32 %v5053_v11, %v5045_v16  ;;  %v15208_v16 = vld [vmem:[#allocation115_spill] sm:$0xff]  ;;  %v15212_v11 = vld [vmem:[#allocation33_spill] sm:$0xff] }
 0xc29   :  { %v4950_v26 = vadd.f32 %v4942_v50, %v4918_v8  ;;  %v15199_v50 = vld [vmem:[#allocation47_spill] sm:$0xff] }
 0xc2a   :  { %v5067_v51 = vpop.permute.xlu1 %5066  ;;  %v5130_v8 = vmul.f32 %v5106_v49, %v15199_v50 }
 0xc2b   :  { %v5082_v48 = vmul.f32 %v5067_v51, %v11970_v41  ;;  %v4966_v6 = vadd.f32 %v4958_v39, %v4950_v26  ;;  %v4707_v26 = vadd.f32 %v15202_v46, %v4651_v37  ;;  %v15203_v39 = vld [vmem:[#allocation99_spill] sm:$0xff]  ;;  %v15214_v46 = vld [vmem:[#allocation130_spill] sm:$0xff] }
 0xc2c   :  { %v4905_v60 = vpop.permute.xlu0 %4904  ;;  %v4987_v47 = vmul.f32 %v15203_v39, %v11945_v31 }
 0xc2d   :  { %v4913_v24 = vmul.f32 %v4905_v60, %v11934_v12  ;;  %v5090_v42 = vadd.f32 %v5082_v48, %v5058_v30  ;;  %v12798_v63 = vadd.f32 %v4990_v44, %v4966_v6  ;;  %v5000_v44 = vadd.f32 %v4992_v35, %v12757_v22  ;;  %v15205_v6 = vld [vmem:[#allocation21_spill] sm:$0xff] }
 0xc2e   :  { %v5109_v48 = vsub.f32 %v5101_v7, %v4781_v29  ;;  %v4712_v49 = vadd.f32 %v15205_v6, %v4656_v20  ;;  %v4995_v2 = vadd.f32 %v4987_v47, %v4963_v56  ;;  %v4779_v58 = vadd.f32 %v15206_v33, %v4707_v26  ;;  %v15207_v22 = vld [vmem:[#allocation49_spill] sm:$0xff] }
 0xc2f   :  { %v4921_v57 = vadd.f32 %v4913_v24, %v4889_v62  ;;  %v5114_v9 = vmul.f32 %v5090_v42, %v15198_v53  ;;  %v5051_v37 = vmul.f32 %v15207_v22, %v11961_v28  ;;  %v5048_v61 = vadd.f32 %v5040_v25, %v5000_v44  ;;  %v15218_v22 = vld [vmem:[#allocation39_spill] sm:$0xff] }
 0xc30   :  { %v4654_v20 = vadd.f32 %v15209_v40, %v15208_v16  ;;  %v5056_v56 = vmul.f32 %v15212_v11, %v11961_v28  ;;  %v5104_v26 = vmul.f32 4.0, %v15214_v46  ;;  %v15222_v11 = vld [vmem:[#allocation30_spill] sm:$0xff] }
 0xc31   :  { %v4953_v0 = vadd.f32 %v4945_v1, %v4921_v57  ;;  %v5122_v19 = vsub.f32 %v12089_v14, %v5114_v9  ;;  %v15210_v1 = vld [vmem:[#allocation123_spill] sm:$0xff]  ;;  %v5133_v9 = vmul.f32 %v5109_v48, %v15199_v50 }
 0xc32   :  { %v5073_v34 = vpop.permute.xlu1 %5072  ;;  %v5099_v57 = vmul.f32 4.0, %v15210_v1 }
 0xc33   :  { %v5138_v51 = vsub.f32 %v5122_v19, %v5130_v8  ;;  %v5085_v5 = vmul.f32 %v5073_v34, %v11970_v41  ;;  %v4969_v30 = vadd.f32 %v4961_v18, %v4953_v0  ;;  %v15211_v8 = vld [vmem:[#allocation125_spill] sm:$0xff]  ;;  %v4710_v18 = vadd.f32 %v15213_v38, %v4654_v20 }
 0xc34   :  { %v5021_v45 = vpop.permute.xlu0 %5020  ;;  %v4784_v29 = vadd.f32 %v15211_v8, %v4712_v49  ;;  %v5107_v19 = vsub.f32 %v5099_v57, %v4779_v58  ;;  %v15215_v49 = vld [vmem:[#allocation37_spill] sm:$0xff] }
 0xc35   :  { %v12829_v60 = vsub.f32 %v12089_v14, %v5138_v51  ;;  %v5035_v62 = vmul.f32 %v5021_v45, %v11953_v21  ;;  %v5093_v24 = vadd.f32 %v5085_v5, %v5061_v32  ;;  %v12832_v42 = vadd.f32 %v4993_v10, %v4969_v30  ;;  %v5075_v51 = vpop.permute.xlu2 %5074  ;;  %v15216_v45 = vld [vmem:[#allocation67_spill] sm:$0xff]  ;;  %v15217_v58 = vld [vmem:[#allocation81_spill] sm:$0xff] }
 0xc36   :  { %v5064_v10 = vadd.f32 %v5056_v56, %v5048_v61  ;;  %v5112_v34 = vsub.f32 %v5104_v26, %v4784_v29  ;;  %v5131_v6 = vmul.f32 %v5107_v19, %v15199_v50  ;;  %v4782_v25 = vadd.f32 %v15215_v49, %v4710_v18  ;;  %v15224_v19 = vld [vmem:[#allocation38_spill] sm:$0xff] }
 0xc37   :  { %v5043_v7 = vadd.f32 %v5035_v62, %v4995_v2  ;;  %v5117_v3 = vmul.f32 %v5093_v24, %v15198_v53  ;;  %5242 = vrot.lane.b32.xlu1 %v12829_v60, %s6360_s1  ;;  %v5054_v2 = vmul.f32 %v15216_v45, %v11961_v28  ;;  %v5086_v16 = vmul.f32 %v5075_v51, %v11970_v41  ;;  %v15226_v51 = vld [vmem:[#allocation98_spill] sm:$0xff] }
 0xc38   :  { %v5136_v61 = vmul.f32 %v5112_v34, %v15199_v50  ;;  %v4988_v38 = vmul.f32 %v15224_v19, %v11945_v31  ;;  %v5036_v26 = vmul.f32 %v12753_v13, %v11953_v21 }
 0xc39   :  { %v5059_v35 = vadd.f32 %v5051_v37, %v5043_v7  ;;  %v5125_v0 = vsub.f32 %v12117_v52, %v5117_v3  ;;  %v4657_v37 = vadd.f32 %v15218_v22, %v15217_v58  ;;  %v15219_v7 = vld [vmem:[#allocation43_spill] sm:$0xff] }
 0xc3a   :  { %v5079_v39 = vpop.permute.xlu1 %5078  ;;  %v5102_v3 = vmul.f32 4.0, %v15219_v7  ;;  %v15229_v58 = vld [vmem:[#allocation83_spill] sm:$0xff] }
 0xc3b   :  { %v5091_v47 = vadd.f32 %v5083_v4, %v5059_v35  ;;  %v5141_v54 = vsub.f32 %v5125_v0, %v5133_v9  ;;  %v5088_v32 = vmul.f32 %v5079_v39, %v11970_v41  ;;  %v15220_v9 = vld [vmem:[#allocation120_spill] sm:$0xff]  ;;  %v4713_v56 = vadd.f32 %v15222_v11, %v4657_v37 }
 0xc3c   :  { %v5027_v5 = vpop.permute.xlu0 %5026  ;;  %v5110_v29 = vsub.f32 %v5102_v3, %v4782_v25  ;;  %v15228_v25 = vld [vmem:[#allocation124_spill] sm:$0xff]  ;;  %v15231_v3 = vld [vmem:[#allocation137_spill] sm:$0xff]  ;;  %v5039_v11 = vmul.f32 %v12764_v55, %v11953_v21 }
 0xc3d   :  { %v5115_v44 = vmul.f32 %v5091_v47, %v15198_v53  ;;  %v12854_v17 = vsub.f32 %v12117_v52, %v5141_v54  ;;  %v5038_v30 = vmul.f32 %v5027_v5, %v11953_v21  ;;  %v5096_v48 = vadd.f32 %v5088_v32, %v5064_v10  ;;  %v15225_v10 = vld [vmem:[#allocation114_spill] sm:$0xff]  ;;  %v15230_v37 = vld [vmem:[#allocation48_spill] sm:$0xff] }
 0xc3e   :  { %v5134_v34 = vmul.f32 %v5110_v29, %v15199_v50  ;;  %v4785_v5 = vadd.f32 %v15226_v51, %v4713_v56  ;;  %v5105_v45 = vmul.f32 4.0, %v15228_v25 }
 0xc3f   :  { %v5123_v62 = vsub.f32 %v15210_v1, %v5115_v44  ;;  %v5046_v24 = vadd.f32 %v5038_v30, %v12798_v63  ;;  %v5120_v33 = vmul.f32 %v5096_v48, %v15198_v53  ;;  %5248 = vrot.lane.b32.xlu1 %v12854_v17, %s6360_s1  ;;  %v15221_v63 = vld [vmem:[#allocation44_spill] sm:$0xff]  ;;  %v5081_v44 = vpop.permute.xlu2 %5080  ;;  %v15227_v30 = vld [vmem:[#allocation71_spill] sm:$0xff]  ;;  %v4996_v48 = vadd.f32 %v4988_v38, %v12737_v36 }
 0xc40   :  { %v4652_v8 = vadd.f32 %v15221_v63, %v15220_v9  ;;  %v5057_v13 = vmul.f32 %v15227_v30, %v11961_v28  ;;  %v5113_v36 = vsub.f32 %v5105_v45, %v4785_v5  ;;  %v15235_v63 = vld [vmem:[#allocation41_spill] sm:$0xff]  ;;  %v15236_v38 = vld [vmem:[#allocation127_spill] sm:$0xff] }
 0xc41   :  { %v5139_v40 = vsub.f32 %v5123_v62, %v5131_v6  ;;  %v5062_v20 = vadd.f32 %v5054_v2, %v5046_v24  ;;  %v5128_v57 = vsub.f32 %v15214_v46, %v5120_v33  ;;  %v5044_v2 = vadd.f32 %v5036_v26, %v4996_v48  ;;  %v15237_v5 = vld [vmem:[#allocation119_spill] sm:$0xff] }
 0xc42   :  { %v4708_v32 = vadd.f32 %v15225_v10, %v4652_v8  ;;  %v5089_v62 = vmul.f32 %v5081_v44, %v11970_v41  ;;  %v4991_v8 = vmul.f32 %v15235_v63, %v11945_v31  ;;  %v5137_v26 = vmul.f32 %v5113_v36, %v15199_v50  ;;  %v15238_v30 = vld [vmem:[#allocation35_spill] sm:$0xff] }
 0xc43   :  { %v12876_v4 = vsub.f32 %v15210_v1, %v5139_v40  ;;  %v5094_v35 = vadd.f32 %v5086_v16, %v5062_v20  ;;  %v5144_v0 = vsub.f32 %v5128_v57, %v5136_v61  ;;  %v4655_v61 = vadd.f32 %v15231_v3, %v15230_v37  ;;  %v15232_v16 = vld [vmem:[#allocation73_spill] sm:$0xff]  ;;  %v15234_v57 = vld [vmem:[#allocation76_spill] sm:$0xff] }
 0xc44   :  { %v5033_v18 = vpop.permute.xlu0 %5032  ;;  %v4780_v22 = vadd.f32 %v15229_v58, %v4708_v32  ;;  %v5052_v40 = vmul.f32 %v15232_v16, %v11961_v28  ;;  %v5100_v9 = vmul.f32 4.0, %v15234_v57 }
 0xc45   :  { %15223 = vst [vmem:[#allocation82_spill] sm:$0xff] %v12876_v4  ;;  %v5118_v39 = vmul.f32 %v5094_v35, %v15198_v53  ;;  %v12884_v47 = vsub.f32 %v15214_v46, %v5144_v0  ;;  %v5041_v54 = vmul.f32 %v5033_v18, %v11953_v21  ;;  %5244 = vrot.lane.b32.xlu2 %v12876_v4, %s6360_s1 }
 0xc46   :  { %v5060_v35 = vadd.f32 %v5052_v40, %v5044_v2  ;;  %v5108_v19 = vsub.f32 %v5100_v9, %v4780_v22  ;;  %v4711_v18 = vadd.f32 %v15236_v38, %v4655_v61  ;;  %v5155_v40 = vrot.slane %v12876_v4, 7 }
 0xc47   :  { %v5126_v6 = vsub.f32 %v15219_v7, %v5118_v39  ;;  %v5049_v49 = vadd.f32 %v5041_v54, %v12832_v42  ;;  %5254 = vrot.lane.b32.xlu1 %v12884_v47, %s6360_s1  ;;  %v4999_v39 = vadd.f32 %v4991_v8, %v12751_v23 }
 0xc48   :  { %v5132_v51 = vmul.f32 %v5108_v19, %v15199_v50  ;;  %v4783_v44 = vadd.f32 %v15237_v5, %v4711_v18  ;;  %v5160_v18 = vrot.slane %v12884_v47, 7  ;;  %v5338_v5 = vrot.slane %v12829_v60, 1 }
 0xc49   :  { %v5142_v24 = vsub.f32 %v5126_v6, %v5134_v34  ;;  %v5065_v33 = vadd.f32 %v5057_v13, %v5049_v49  ;;  %v5047_v55 = vadd.f32 %v5039_v11, %v4999_v39  ;;  %v5055_v13 = vmul.f32 %v15238_v30, %v11961_v28  ;;  %v15240_v49 = vld [vmem:[#allocation53_spill] sm:$0xff] }
 0xc4a   :  { %v5103_v45 = vmul.f32 4.0, %v15240_v49 }
 0xc4b   :  { %v12907_v42 = vsub.f32 %v15219_v7, %v5142_v24  ;;  %v5097_v20 = vadd.f32 %v5089_v62, %v5065_v33  ;;  %v5063_v62 = vadd.f32 %v5055_v13, %v5047_v55  ;;  %v5344_v13 = vrot.slane %v12884_v47, 1 }
 0xc4c   :  { %v5071_v29 = vpop.permute.xlu0 %5070  ;;  %v5111_v33 = vsub.f32 %v5103_v45, %v4783_v44 }
 0xc4d   :  { %15233 = vst [vmem:[#allocation54_spill] sm:$0xff] %v12907_v42  ;;  %v5121_v56 = vmul.f32 %v5097_v20, %v15198_v53  ;;  %v5084_v0 = vmul.f32 %v5071_v29, %v11970_v41  ;;  %5250 = vrot.lane.b32.xlu2 %v12907_v42, %s6360_s1  ;;  %v5154_v20 = vrot.slane %v12829_v60, 7  ;;  %v5158_v29 = vrot.slane %v12907_v42, 7 }
 0xc4e   :  { %v5135_v3 = vmul.f32 %v5111_v33, %v15199_v50 }
 0xc4f   :  { %v5129_v54 = vsub.f32 %v15228_v25, %v5121_v56  ;;  %v5092_v10 = vadd.f32 %v5084_v0, %v5060_v35  ;;  %5300 = vrot.lane.b32.xlu1 %v12876_v4, %s6361_s2  ;;  %v12962_v63 = vsel %vm351_vm0, %v5154_v20, %v5155_v40  ;;  %v5157_v56 = vrot.slane %v12854_v17, 7 }
 0xc51   :  { %v5145_v32 = vsub.f32 %v5129_v54, %v5137_v26  ;;  %v5116_v34 = vmul.f32 %v5092_v10, %v15198_v53  ;;  %v12979_v35 = vsel %vm351_vm0, %v5157_v56, %v5158_v29 }
 0xc53   :  { %v12930_v48 = vsub.f32 %v15228_v25, %v5145_v32  ;;  %v5124_v23 = vsub.f32 %v15234_v57, %v5116_v34  ;;  %v5341_v32 = vrot.slane %v12854_v17, 1 }
 0xc54   :  { %v5077_v6 = vpop.permute.xlu0 %5076 }
 0xc55   :  { %15239 = vst [vmem:[#allocation58_spill] sm:$0xff] %v12930_v48  ;;  %v5140_v2 = vsub.f32 %v5124_v23, %v5132_v51  ;;  %v5087_v24 = vmul.f32 %v5077_v6, %v11970_v41  ;;  %5256 = vrot.lane.b32.xlu2 %v12930_v48, %s6360_s1  ;;  %v5161_v19 = vrot.slane %v12930_v48, 7  ;;  %v5339_v51 = vrot.slane %v12876_v4, 1 }
 0xc56   :  { %v5342_v6 = vrot.slane %v12907_v42, 1 }
 0xc57   :  { %v12938_v58 = vsub.f32 %v15234_v57, %v5140_v2  ;;  %v5095_v22 = vadd.f32 %v5087_v24, %v5063_v62  ;;  %5306 = vrot.lane.b32.xlu1 %v12907_v42, %s6361_s2  ;;  %v12996_v26 = vsel %vm351_vm0, %v5160_v18, %v5161_v19  ;;  %v13004_v39 = vsel %vm351_vm0, %v5161_v19, %v5154_v20 }
 0xc58   :  { %v13043_v30 = vsel %vm575_vm1, %v5338_v5, %v5339_v51  ;;  %v13059_v45 = vsel %vm575_vm1, %v5341_v32, %v5342_v6  ;;  %v5345_v62 = vrot.slane %v12930_v48, 1 }
 0xc59   :  { %15241 = vst [vmem:[#allocation79_spill] sm:$0xff] %v12938_v58  ;;  %v5119_v37 = vmul.f32 %v5095_v22, %v15198_v53  ;;  %5246 = vrot.lane.b32.xlu0 %v12938_v58, %s6360_s1  ;;  %v5156_v8 = vrot.slane %v12938_v58, 7  ;;  %v5340_v10 = vrot.slane %v12938_v58, 1 }
 0xc5a   :  { %v13072_v24 = vsel %vm575_vm1, %v5344_v13, %v5345_v62  ;;  %v13110_v20 = vsel %vm575_vm1, %v5345_v62, %v5338_v5 }
 0xc5b   :  { %v5127_v61 = vsub.f32 %v15240_v49, %v5119_v37  ;;  %v12972_v11 = vsel %vm351_vm0, %v5155_v40, %v5156_v8  ;;  %v13014_v54 = vsel %vm351_vm0, %v5156_v8, %v5157_v56  ;;  %v13032_v34 = vsel %vm575_vm1, %v5340_v10, %v5341_v32  ;;  %15248 = vst [vmem:[#allocation88_spill] sm:$0xff] %v13110_v20 }
 0xc5c   :  { %15244 = vst [vmem:[#allocation63_spill] sm:$0xff] %v13032_v34  ;;  %v13086_v37 = vsel %vm575_vm1, %v5339_v51, %v5340_v10  ;;  %v5196_v53 = vmul.f32 %v12972_v11, %v11961_v28 }
 0xc5d   :  { %v5143_v36 = vsub.f32 %v5127_v61, %v5135_v3  ;;  %5302 = vrot.lane.b32.xlu2 %v12938_v58, %s6361_s2  ;;  %15246 = vst [vmem:[#allocation65_spill] sm:$0xff] %v13086_v37 }
 0xc5f   :  { %v12950_v16 = vsub.f32 %v15240_v49, %v5143_v36  ;;  %5312 = vrot.lane.b32.xlu1 %v12930_v48, %s6361_s2 }
 0xc61   :  { %15242 = vst [vmem:[#allocation62_spill] sm:$0xff] %v12950_v16  ;;  %5252 = vrot.lane.b32.xlu0 %v12950_v16, %s6360_s1  ;;  %v5159_v0 = vrot.slane %v12950_v16, 7  ;;  %v5343_v44 = vrot.slane %v12950_v16, 1 }
 0xc63   :  { %v12989_v38 = vsel %vm351_vm0, %v5158_v29, %v5159_v0  ;;  %v13025_v55 = vsel %vm351_vm0, %v5159_v0, %v5160_v18  ;;  %v13050_v23 = vsel %vm575_vm1, %v5343_v44, %v5344_v13  ;;  %v13100_v36 = vsel %vm575_vm1, %v5342_v6, %v5343_v44 }
 0xc64   :  { %15245 = vst [vmem:[#allocation86_spill] sm:$0xff] %v13050_v23 }
 0xc65   :  { %5308 = vrot.lane.b32.xlu2 %v12950_v16, %s6361_s2  ;;  %15247 = vst [vmem:[#allocation89_spill] sm:$0xff] %v13100_v36 }
 0xc67   :  { %5172 = vrot.lane.b32.xlu1 %v12962_v63, %s6360_s1 }
 0xc69   :  { %5298 = vrot.lane.b32.xlu0 %v12829_v60, %s6361_s2 }
 0xc6d   :  { %5174 = vrot.lane.b32.xlu2 %v12972_v11, %s6360_s1 }
 0xc6f   :  { %5178 = vrot.lane.b32.xlu1 %v12979_v35, %s6360_s1 }
 0xc71   :  { %5304 = vrot.lane.b32.xlu0 %v12854_v17, %s6361_s2 }
 0xc75   :  { %5180 = vrot.lane.b32.xlu2 %v12989_v38, %s6360_s1 }
 0xc77   :  { %5184 = vrot.lane.b32.xlu1 %v12996_v26, %s6360_s1 }
 0xc79   :  { %5310 = vrot.lane.b32.xlu0 %v12884_v47, %s6361_s2 }
 0xc7d   :  { %5210 = vrot.lane.b32.xlu2 %v13004_v39, %s6361_s2 }
 0xc7f   :  { %5214 = vrot.lane.b32.xlu1 %v12972_v11, %s6361_s2 }
 0xc81   :  { %5170 = vrot.lane.b32.xlu0 %v13004_v39, %s6360_s1 }
 0xc85   :  { %5216 = vrot.lane.b32.xlu2 %v13014_v54, %s6361_s2 }
 0xc87   :  { %5220 = vrot.lane.b32.xlu1 %v12989_v38, %s6361_s2 }
 0xc89   :  { %5176 = vrot.lane.b32.xlu0 %v13014_v54, %s6360_s1 }
 0xc8d   :  { %5222 = vrot.lane.b32.xlu2 %v13025_v55, %s6361_s2 }
 0xc8f   :  { %5358 = vrot.lane.b32.xlu1 %v13032_v34, %s6360_s1 }
 0xc91   :  { %5182 = vrot.lane.b32.xlu0 %v13025_v55, %s6360_s1 }
 0xc95   :  { %5354 = vrot.lane.b32.xlu2 %v13043_v30, %s6360_s1 }
 0xc97   :  { %5364 = vrot.lane.b32.xlu1 %v13050_v23, %s6360_s1 }
 0xc99   :  { %5212 = vrot.lane.b32.xlu0 %v12962_v63, %s6361_s2 }
 0xc9d   :  { %5360 = vrot.lane.b32.xlu2 %v13059_v45, %s6360_s1 }
 0xc9f   :  { %v13063_v2 = vpop.permute.xlu2 %5244  ;;  %5410 = vrot.lane.b32.xlu1 %v13043_v30, %s6361_s2 }
 0xca0   :  { %v5275_v29 = vadd.f32 %v13063_v2, %v12962_v63 }
 0xca1   :  { %5218 = vrot.lane.b32.xlu0 %v12979_v35, %s6361_s2 }
 0xca5   :  { %5366 = vrot.lane.b32.xlu2 %v13072_v24, %s6360_s1 }
 0xca7   :  { %5416 = vrot.lane.b32.xlu1 %v13059_v45, %s6361_s2  ;;  %v13078_v33 = vpop.permute.xlu2 %5250 }
 0xca8   :  { %v5278_v18 = vadd.f32 %v13078_v33, %v12979_v35 }
 0xca9   :  { %5224 = vrot.lane.b32.xlu0 %v12996_v26, %s6361_s2  ;;  %v13082_v22 = vpop.permute.xlu1 %5242 }
 0xcad   :  { %5412 = vrot.lane.b32.xlu2 %v13086_v37, %s6361_s2 }
 0xcaf   :  { %5422 = vrot.lane.b32.xlu1 %v13072_v24, %s6361_s2  ;;  %v13096_v61 = vpop.permute.xlu2 %5256 }
 0xcb0   :  { %v5281_v13 = vadd.f32 %v13096_v61, %v12996_v26 }
 0xcb1   :  { %5356 = vrot.lane.b32.xlu0 %v13086_v37, %s6360_s1  ;;  %v13094_v3 = vpop.permute.xlu1 %5248 }
 0xcb2   :  { %v5277_v1 = vadd.f32 %v13094_v3, %v13014_v54 }
 0xcb5   :  { %5418 = vrot.lane.b32.xlu2 %v13100_v36, %s6361_s2 }
 0xcb7   :  { %v5303_v8 = vpop.permute.xlu2 %5302 }
 0xcb9   :  { %5362 = vrot.lane.b32.xlu0 %v13100_v36, %s6360_s1  ;;  %v13106_v40 = vpop.permute.xlu1 %5254 }
 0xcbd   :  { %5424 = vrot.lane.b32.xlu2 %v13110_v20, %s6361_s2 }
 0xcbf   :  { %v5309_v19 = vpop.permute.xlu2 %5308 }
 0xcc1   :  { %5368 = vrot.lane.b32.xlu0 %v13110_v20, %s6360_s1  ;;  %v13118_v56 = vpop.permute.xlu1 %5300 }
 0xcc2   :  { %v13121_v0 = vadd.f32 %v13118_v56, %v5275_v29 }
 0xcc4   :  { %15249 = vst [vmem:[#allocation60_spill] sm:$0xff] %v13121_v0 }
 0xcc7   :  { %v5175_v6 = vpop.permute.xlu2 %5174 }
 0xcc8   :  { %v5188_v14 = vmul.f32 %v5175_v6, %v11953_v21  ;;  %v5284_v6 = vmul.f32 %v12938_v58, %v11942_v43 }
 0xcc9   :  { %5414 = vrot.lane.b32.xlu0 %v13032_v34, %s6361_s2  ;;  %v13127_v10 = vpop.permute.xlu1 %5306 }
 0xcca   :  { %v13130_v32 = vadd.f32 %v13127_v10, %v5278_v18 }
 0xccb   :  { %v5247_v51 = vpop.permute.xlu0 %5246 }
 0xccc   :  { %15250 = vst [vmem:[#allocation113_spill] sm:$0xff] %v13130_v32  ;;  %v5276_v5 = vadd.f32 %v5247_v51, %v12972_v11  ;;  %v5280_v32 = vadd.f32 %v13106_v40, %v13025_v55  ;;  %v5260_v34 = vmul.f32 %v5247_v51, %v11936_v59  ;;  %v5316_v11 = vmul.f32 %v5303_v8, %v11945_v31 }
 0xcce   :  { %v13133_v44 = vadd.f32 %v5303_v8, %v5276_v5  ;;  %v5274_v5 = vadd.f32 %v13082_v22, %v13004_v39 }
 0xccf   :  { %v5181_v57 = vpop.permute.xlu2 %5180 }
 0xcd0   :  { %15251 = vst [vmem:[#allocation95_spill] sm:$0xff] %v13133_v44  ;;  %v5191_v36 = vmul.f32 %v5181_v57, %v11953_v21 }
 0xcd1   :  { %5420 = vrot.lane.b32.xlu0 %v13050_v23, %s6361_s2  ;;  %v13139_v62 = vpop.permute.xlu1 %5312 }
 0xcd2   :  { %15252 = vst [vmem:[#allocation93_spill] sm:$0xff] %v13139_v62  ;;  %v13142_v29 = vadd.f32 %v13139_v62, %v5281_v13 }
 0xcd3   :  { %v5253_v46 = vpop.permute.xlu0 %5252 }
 0xcd4   :  { %15253 = vst [vmem:[#allocation131_spill] sm:$0xff] %v13142_v29  ;;  %v5279_v18 = vadd.f32 %v5253_v46, %v12989_v38  ;;  %v5263_v58 = vmul.f32 %v5253_v46, %v11936_v59 }
 0xcd6   :  { %v13145_v52 = vadd.f32 %v5309_v19, %v5279_v18 }
 0xcd7   :  { %v5211_v18 = vpop.permute.xlu2 %5210 }
 0xcd8   :  { %15254 = vst [vmem:[#allocation80_spill] sm:$0xff] %v13145_v52 }
 0xcd9   :  { %v5173_v49 = vpop.permute.xlu1 %5172 }
 0xcdb   :  { %v5299_v25 = vpop.permute.xlu0 %5298 }
 0xcdc   :  { %v13149_v7 = vadd.f32 %v5299_v25, %v5274_v5 }
 0xcde   :  { %15255 = vst [vmem:[#allocation56_spill] sm:$0xff] %v13149_v7 }
 0xcdf   :  { %v5217_v50 = vpop.permute.xlu2 %5216 }
 0xce1   :  { %v13151_v44 = vpop.permute.xlu1 %5178 }
 0xce3   :  { %v13155_v13 = vpop.permute.xlu0 %5304 }
 0xce4   :  { %v13158_v29 = vadd.f32 %v13155_v13, %v5277_v1  ;;  %v5204_v1 = vadd.f32 %v5196_v53, %v5188_v14  ;;  %v5199_v14 = vmul.f32 %v12989_v38, %v11961_v28  ;;  %v5287_v38 = vmul.f32 %v12950_v16, %v11942_v43 }
 0xce6   :  { %15256 = vst [vmem:[#allocation142_spill] sm:$0xff] %v13158_v29 }
 0xce9   :  { %v13160_v52 = vpop.permute.xlu1 %5184 }
 0xceb   :  { %v13164_v0 = vpop.permute.xlu0 %5310 }
 0xcec   :  { %v13167_v5 = vadd.f32 %v13164_v0, %v5280_v32 }
 0xcee   :  { %15257 = vst [vmem:[#allocation102_spill] sm:$0xff] %v13167_v5  ;;  %v5194_v5 = vmul.f32 %v13004_v39, %v11961_v28 }
 0xcf1   :  { %v5215_v7 = vpop.permute.xlu1 %5214 }
 0xcf2   :  { %v5228_v29 = vmul.f32 %v5215_v7, %v11970_v41  ;;  %v5223_v7 = vpop.permute.xlu2 %5222 }
 0xcf3   :  { %v5171_v23 = vpop.permute.xlu0 %5170 }
 0xcf4   :  { %v5236_v20 = vadd.f32 %v5228_v29, %v5204_v1  ;;  %v5186_v9 = vmul.f32 %v5171_v23, %v11953_v21  ;;  %v5207_v1 = vadd.f32 %v5199_v14, %v5191_v36  ;;  %v5319_v36 = vmul.f32 %v5309_v19, %v11945_v31 }
 0xcf6   :  { %v5268_v32 = vadd.f32 %v5260_v34, %v5236_v20  ;;  %v5202_v51 = vadd.f32 %v5194_v5, %v5186_v9  ;;  %v5226_v34 = vmul.f32 %v5211_v18, %v11970_v41  ;;  %v5258_v9 = vmul.f32 %v13082_v22, %v11936_v59 }
 0xcf7   :  { %v5197_v5 = vmul.f32 %v13014_v54, %v11961_v28  ;;  %v5314_v54 = vmul.f32 %v5299_v25, %v11945_v31 }
 0xcf8   :  { %v5292_v53 = vadd.f32 %v5284_v6, %v5268_v32  ;;  %v5234_v37 = vadd.f32 %v5226_v34, %v5202_v51  ;;  %v5229_v51 = vmul.f32 %v5217_v50, %v11970_v41  ;;  %v5195_v50 = vmul.f32 %v12962_v63, %v11961_v28 }
 0xcf9   :  { %v5221_v29 = vpop.permute.xlu1 %5220 }
 0xcfa   :  { %v5231_v23 = vmul.f32 %v5221_v29, %v11970_v41  ;;  %v13184_v57 = vadd.f32 %v5316_v11, %v5292_v53  ;;  %v5266_v32 = vadd.f32 %v5258_v9, %v5234_v37  ;;  %v5355_v14 = vpop.permute.xlu2 %5354  ;;  %v5261_v37 = vmul.f32 %v13094_v3, %v11936_v59 }
 0xcfb   :  { %v5177_v20 = vpop.permute.xlu0 %5176  ;;  %v5232_v9 = vmul.f32 %v5223_v7, %v11970_v41  ;;  %v5264_v7 = vmul.f32 %v13106_v40, %v11936_v59 }
 0xcfc   :  { %v5239_v39 = vadd.f32 %v5231_v23, %v5207_v1  ;;  %v5189_v8 = vmul.f32 %v5177_v20, %v11953_v21  ;;  %v5200_v1 = vmul.f32 %v13025_v55, %v11961_v28 }
 0xcfe   :  { %v5271_v62 = vadd.f32 %v5263_v58, %v5239_v39  ;;  %v5205_v46 = vadd.f32 %v5197_v5, %v5189_v8  ;;  %v5282_v58 = vmul.f32 %v12829_v60, %v11942_v43  ;;  %v5370_v8 = vmul.f32 %v5355_v14, %v11926_v15 }
 0xcff   :  { %v5259_v5 = vmul.f32 %v13063_v2, %v11936_v59  ;;  %v5386_v14 = vmul.f32 %v13043_v30, %v11928_v27  ;;  %v5315_v2 = vmul.f32 %v13118_v56, %v11945_v31 }
 0xd00   :  { %v5295_v18 = vadd.f32 %v5287_v38, %v5271_v62  ;;  %v5290_v22 = vadd.f32 %v5282_v58, %v5266_v32  ;;  %v5237_v29 = vadd.f32 %v5229_v51, %v5205_v46  ;;  %v5187_v62 = vmul.f32 %v5173_v49, %v11953_v21 }
 0xd01   :  { %v13196_v6 = vpop.permute.xlu1 %5358  ;;  %v5285_v49 = vmul.f32 %v12854_v17, %v11942_v43  ;;  %v5190_v46 = vmul.f32 %v13151_v44, %v11953_v21  ;;  %v5317_v58 = vmul.f32 %v13155_v13, %v11945_v31  ;;  %v5283_v51 = vmul.f32 %v12876_v4, %v11942_v43 }
 0xd02   :  { %v13198_v11 = vadd.f32 %v5319_v36, %v5295_v18  ;;  %v5322_v34 = vadd.f32 %v5314_v54, %v5290_v22  ;;  %v5269_v20 = vadd.f32 %v5261_v37, %v5237_v29  ;;  %v5203_v25 = vadd.f32 %v5195_v50, %v5187_v62  ;;  %v5361_v55 = vpop.permute.xlu2 %5360 }
 0xd03   :  { %v5183_v53 = vpop.permute.xlu0 %5182  ;;  %v5198_v22 = vmul.f32 %v12979_v35, %v11961_v28  ;;  %v5288_v13 = vmul.f32 %v12884_v47, %v11942_v43  ;;  %v5262_v35 = vmul.f32 %v13078_v33, %v11936_v59  ;;  %v5389_v33 = vmul.f32 %v13059_v45, %v11928_v27 }
 0xd04   :  { %v5192_v19 = vmul.f32 %v5183_v53, %v11953_v21  ;;  %v5378_v36 = vadd.f32 %v5370_v8, %v5322_v34  ;;  %v5293_v18 = vadd.f32 %v5285_v49, %v5269_v20  ;;  %v5373_v34 = vmul.f32 %v5361_v55, %v11926_v15 }
 0xd05   :  { %v5206_v62 = vadd.f32 %v5198_v22, %v5190_v46  ;;  %v5193_v49 = vmul.f32 %v13160_v52, %v11953_v21  ;;  %v5320_v55 = vmul.f32 %v13164_v0, %v11945_v31  ;;  %v5201_v52 = vmul.f32 %v12996_v26, %v11961_v28 }
 0xd06   :  { %v5208_v39 = vadd.f32 %v5200_v1, %v5192_v19  ;;  %v5394_v44 = vadd.f32 %v5386_v14, %v5378_v36  ;;  %v5325_v37 = vadd.f32 %v5317_v58, %v5293_v18  ;;  %v5318_v18 = vmul.f32 %v13127_v10, %v11945_v31 }
 0xd07   :  { %v5265_v10 = vmul.f32 %v13096_v61, %v11936_v59 }
 0xd08   :  { %v5240_v63 = vadd.f32 %v5232_v9, %v5208_v39  ;;  %v5381_v9 = vadd.f32 %v5373_v34, %v5325_v37  ;;  %v5392_v37 = vmul.f32 %v13072_v24, %v11928_v27 }
 0xd09   :  { %v13210_v23 = vpop.permute.xlu1 %5364 }
 0xd0a   :  { %v5272_v19 = vadd.f32 %v5264_v7, %v5240_v63  ;;  %v5209_v7 = vadd.f32 %v5201_v52, %v5193_v49 }
 0xd0b   :  { %v5213_v38 = vpop.permute.xlu0 %5212 }
 0xd0c   :  { %v5227_v3 = vmul.f32 %v5213_v38, %v11970_v41  ;;  %v5296_v39 = vadd.f32 %v5288_v13, %v5272_v19  ;;  %v15258_v38 = vld [vmem:[#allocation59_spill] sm:$0xff] }
 0xd0e   :  { %v5235_v32 = vadd.f32 %v5227_v3, %v5203_v25  ;;  %v5367_v3 = vpop.permute.xlu2 %5366  ;;  %v5328_v46 = vadd.f32 %v5320_v55, %v5296_v39  ;;  %v15262_v55 = vld [vmem:[#allocation55_spill] sm:$0xff] }
 0xd10   :  { %v5267_v53 = vadd.f32 %v5259_v5, %v5235_v32  ;;  %v5286_v5 = vmul.f32 %v12907_v42, %v11942_v43  ;;  %v5397_v32 = vadd.f32 %v5389_v33, %v5381_v9  ;;  %v15261_v9 = vld [vmem:[#allocation65_spill] sm:$0xff] }
 0xd11   :  { %v5411_v29 = vpop.permute.xlu1 %5410  ;;  %v5387_v49 = vmul.f32 %v15261_v9, %v11928_v27 }
 0xd12   :  { %v5426_v54 = vmul.f32 %v5411_v29, %v11934_v12  ;;  %v5291_v40 = vadd.f32 %v5283_v51, %v5267_v53  ;;  %v5376_v53 = vmul.f32 %v5367_v3, %v11926_v15  ;;  %v15259_v29 = vld [vmem:[#allocation50_spill] sm:$0xff] }
 0xd13   :  { %v5219_v1 = vpop.permute.xlu0 %5218 }
 0xd14   :  { %v5230_v50 = vmul.f32 %v5219_v1, %v11970_v41  ;;  %v5434_v56 = vadd.f32 %v5426_v54, %v5394_v44  ;;  %v5323_v20 = vadd.f32 %v5315_v2, %v5291_v40  ;;  %v5384_v19 = vadd.f32 %v5376_v53, %v5328_v46  ;;  %v15260_v1 = vld [vmem:[#allocation93_spill] sm:$0xff] }
 0xd15   :  { %v5289_v40 = vmul.f32 %v12930_v48, %v11942_v43  ;;  %v5321_v61 = vmul.f32 %v15260_v1, %v11945_v31 }
 0xd16   :  { %v5238_v8 = vadd.f32 %v5230_v50, %v5206_v62  ;;  %v13243_v25 = vmul.f32 %v5434_v56, %v15258_v38  ;;  %v5413_v62 = vpop.permute.xlu2 %5412  ;;  %v5400_v34 = vadd.f32 %v5392_v37, %v5384_v19  ;;  %v5372_v37 = vmul.f32 %v13196_v6, %v11926_v15 }
 0xd17   :  { %v5427_v33 = vmul.f32 %v5413_v62, %v11934_v12  ;;  %v15266_v62 = vld [vmem:[#allocation46_spill] sm:$0xff] }
 0xd18   :  { %v5270_v36 = vadd.f32 %v5262_v35, %v5238_v8  ;;  %5538 = vrot.lane.b32.xlu1 %v13243_v25, %s6360_s1 }
 0xd19   :  { %v5417_v63 = vpop.permute.xlu1 %5416 }
 0xd1a   :  { %v5429_v0 = vmul.f32 %v5417_v63, %v11934_v12  ;;  %v5294_v14 = vadd.f32 %v5286_v5, %v5270_v36 }
 0xd1b   :  { %v5225_v58 = vpop.permute.xlu0 %5224 }
 0xd1c   :  { %v5233_v51 = vmul.f32 %v5225_v58, %v11970_v41  ;;  %v5437_v2 = vadd.f32 %v5429_v0, %v5397_v32  ;;  %v5326_v22 = vadd.f32 %v5318_v18, %v5294_v14  ;;  %v15263_v32 = vld [vmem:[#allocation52_spill] sm:$0xff]  ;;  %v15264_v14 = vld [vmem:[#allocation89_spill] sm:$0xff] }
 0xd1e   :  { %v5241_v44 = vadd.f32 %v5233_v51, %v5209_v7  ;;  %v13265_v26 = vmul.f32 %v5437_v2, %v15259_v29  ;;  %v5419_v52 = vpop.permute.xlu2 %5418  ;;  %v5450_v7 = vrot.slane %v13243_v25, 7  ;;  %v5618_v51 = vrot.slane %v13243_v25, 1 }
 0xd20   :  { %v5273_v54 = vadd.f32 %v5265_v10, %v5241_v44  ;;  %5544 = vrot.lane.b32.xlu1 %v13265_v26, %s6360_s1  ;;  %v5430_v10 = vmul.f32 %v5419_v52, %v11934_v12  ;;  %v5621_v6 = vrot.slane %v13265_v26, 1 }
 0xd21   :  { %v5423_v13 = vpop.permute.xlu1 %5422 }
 0xd22   :  { %v5432_v50 = vmul.f32 %v5423_v13, %v11934_v12  ;;  %v5297_v56 = vadd.f32 %v5289_v40, %v5273_v54 }
 0xd23   :  { %v5357_v35 = vpop.permute.xlu0 %5356 }
 0xd24   :  { %v5371_v39 = vmul.f32 %v5357_v35, %v11926_v15  ;;  %v5440_v8 = vadd.f32 %v5432_v50, %v5400_v34  ;;  %v5329_v38 = vadd.f32 %v5321_v61, %v5297_v56  ;;  %v15267_v34 = vld [vmem:[#allocation88_spill] sm:$0xff]  ;;  %v5453_v56 = vrot.slane %v13265_v26, 7 }
 0xd25   :  { %v5393_v50 = vmul.f32 %v15267_v34, %v11928_v27 }
 0xd26   :  { %v5379_v3 = vadd.f32 %v5371_v39, %v5323_v20  ;;  %v13280_v36 = vmul.f32 %v5440_v8, %v15262_v55  ;;  %v5390_v20 = vmul.f32 %v15264_v14, %v11928_v27  ;;  %v5425_v61 = vpop.permute.xlu2 %5424 }
 0xd28   :  { %v5395_v5 = vadd.f32 %v5387_v49, %v5379_v3  ;;  %5550 = vrot.lane.b32.xlu1 %v13280_v36, %s6360_s1  ;;  %v5380_v49 = vadd.f32 %v5372_v37, %v13184_v57  ;;  %v5433_v3 = vmul.f32 %v5425_v61, %v11934_v12  ;;  %v5375_v57 = vmul.f32 %v13210_v23, %v11926_v15 }
 0xd29   :  { %v5624_v37 = vrot.slane %v13280_v36, 1 }
 0xd2a   :  { %v5435_v18 = vadd.f32 %v5427_v33, %v5395_v5  ;;  %v5383_v23 = vadd.f32 %v5375_v57, %v13198_v11  ;;  %v15273_v11 = vld [vmem:[#allocation86_spill] sm:$0xff] }
 0xd2b   :  { %v5363_v63 = vpop.permute.xlu0 %5362 }
 0xd2c   :  { %v13286_v0 = vmul.f32 %v5435_v18, %v15263_v32  ;;  %v5374_v46 = vmul.f32 %v5363_v63, %v11926_v15  ;;  %v15268_v18 = vld [vmem:[#allocation63_spill] sm:$0xff] }
 0xd2d   :  { %v5388_v52 = vmul.f32 %v15268_v18, %v11928_v27  ;;  %v15269_v32 = vld [vmem:[#allocation51_spill] sm:$0xff] }
 0xd2e   :  { %v5382_v58 = vadd.f32 %v5374_v46, %v5326_v22  ;;  %5540 = vrot.lane.b32.xlu2 %v13286_v0, %s6360_s1  ;;  %v5451_v53 = vrot.slane %v13286_v0, 7  ;;  %v5619_v2 = vrot.slane %v13286_v0, 1 }
 0xd30   :  { %v5398_v44 = vadd.f32 %v5390_v20, %v5382_v58  ;;  %5588 = vrot.lane.b32.xlu1 %v13286_v0, %s6361_s2  ;;  %v13302_v19 = vsel %vm351_vm0, %v5450_v7, %v5451_v53  ;;  %v13306_v22 = vsel %vm575_vm1, %v5618_v51, %v5619_v2  ;;  %v5396_v20 = vadd.f32 %v5388_v52, %v5380_v49 }
 0xd31   :  { %v5391_v49 = vmul.f32 %v15273_v11, %v11928_v27 }
 0xd32   :  { %v5438_v54 = vadd.f32 %v5430_v10, %v5398_v44  ;;  %v5456_v10 = vrot.slane %v13280_v36, 7 }
 0xd33   :  { %v5369_v40 = vpop.permute.xlu0 %5368  ;;  %v5399_v52 = vadd.f32 %v5391_v49, %v5383_v23 }
 0xd34   :  { %v13311_v13 = vmul.f32 %v5438_v54, %v15266_v62  ;;  %v5377_v1 = vmul.f32 %v5369_v40, %v11926_v15  ;;  %v15271_v62 = vld [vmem:[#allocation40_spill] sm:$0xff] }
 0xd36   :  { %v5385_v35 = vadd.f32 %v5377_v1, %v5329_v38  ;;  %5546 = vrot.lane.b32.xlu2 %v13311_v13, %s6360_s1  ;;  %v5454_v39 = vrot.slane %v13311_v13, 7  ;;  %v5622_v8 = vrot.slane %v13311_v13, 1 }
 0xd38   :  { %v5401_v55 = vadd.f32 %v5393_v50, %v5385_v35  ;;  %5594 = vrot.lane.b32.xlu1 %v13311_v13, %s6361_s2  ;;  %v13328_v38 = vsel %vm351_vm0, %v5453_v56, %v5454_v39  ;;  %v13332_v33 = vsel %vm575_vm1, %v5621_v6, %v5622_v8 }
 0xd3a   :  { %v5441_v5 = vadd.f32 %v5433_v3, %v5401_v55 }
 0xd3b   :  { %v5415_v63 = vpop.permute.xlu0 %5414 }
 0xd3c   :  { %v13339_v46 = vmul.f32 %v5441_v5, %v15269_v32  ;;  %v5428_v58 = vmul.f32 %v5415_v63, %v11934_v12 }
 0xd3e   :  { %15270 = vst [vmem:[#allocation92_spill] sm:$0xff] %v13339_v46  ;;  %v5436_v44 = vadd.f32 %v5428_v58, %v5396_v20  ;;  %5552 = vrot.lane.b32.xlu2 %v13339_v46, %s6360_s1  ;;  %v5457_v54 = vrot.slane %v13339_v46, 7  ;;  %v5625_v40 = vrot.slane %v13339_v46, 1 }
 0xd40   :  { %v13350_v1 = vmul.f32 %v5436_v44, %v15271_v62  ;;  %5600 = vrot.lane.b32.xlu1 %v13339_v46, %s6361_s2  ;;  %v13356_v61 = vsel %vm351_vm0, %v5456_v10, %v5457_v54  ;;  %v13360_v50 = vsel %vm351_vm0, %v5457_v54, %v5450_v7  ;;  %v13364_v35 = vsel %vm575_vm1, %v5624_v37, %v5625_v40  ;;  %v15277_v44 = vld [vmem:[#allocation61_spill] sm:$0xff] }
 0xd41   :  { %15272 = vst [vmem:[#allocation34_spill] sm:$0xff] %v13356_v61  ;;  %v13370_v3 = vsel %vm575_vm1, %v5625_v40, %v5618_v51 }
 0xd42   :  { %15274 = vst [vmem:[#allocation103_spill] sm:$0xff] %v13370_v3  ;;  %5542 = vrot.lane.b32.xlu0 %v13350_v1, %s6360_s1  ;;  %v5452_v55 = vrot.slane %v13350_v1, 7  ;;  %v5620_v5 = vrot.slane %v13350_v1, 1 }
 0xd43   :  { %v5421_v7 = vpop.permute.xlu0 %5420 }
 0xd44   :  { %v5431_v57 = vmul.f32 %v5421_v7, %v11934_v12  ;;  %v5463_v63 = vsel %vm351_vm0, %v5451_v53, %v5452_v55  ;;  %v13381_v32 = vsel %vm351_vm0, %v5452_v55, %v5453_v56  ;;  %v13385_v51 = vsel %vm575_vm1, %v5620_v5, %v5621_v6 }
 0xd45   :  { %15275 = vst [vmem:[#allocation105_spill] sm:$0xff] %v13385_v51  ;;  %v13389_v20 = vsel %vm575_vm1, %v5619_v2, %v5620_v5 }
 0xd46   :  { %15276 = vst [vmem:[#allocation117_spill] sm:$0xff] %v13389_v20  ;;  %v5439_v58 = vadd.f32 %v5431_v57, %v5399_v52  ;;  %5590 = vrot.lane.b32.xlu2 %v13350_v1, %s6361_s2  ;;  %v5492_v57 = vmul.f32 %v5463_v63, %v11928_v27 }
 0xd48   :  { %v13394_v54 = vmul.f32 %v5439_v58, %v15277_v44  ;;  %5468 = vrot.lane.b32.xlu1 %v13302_v19, %s6360_s1 }
 0xd4a   :  { %5548 = vrot.lane.b32.xlu0 %v13394_v54, %s6360_s1  ;;  %v5455_v53 = vrot.slane %v13394_v54, 7  ;;  %v5623_v56 = vrot.slane %v13394_v54, 1 }
 0xd4c   :  { %v5460_v2 = vsel %vm351_vm0, %v5454_v39, %v5455_v53  ;;  %v13406_v6 = vsel %vm351_vm0, %v5455_v53, %v5456_v10  ;;  %v13410_v40 = vsel %vm575_vm1, %v5623_v56, %v5624_v37  ;;  %v13414_v23 = vsel %vm575_vm1, %v5622_v8, %v5623_v56 }
 0xd4d   :  { %15278 = vst [vmem:[#allocation94_spill] sm:$0xff] %v13410_v40  ;;  %v5495_v18 = vmul.f32 %v5460_v2, %v11928_v27 }
 0xd4e   :  { %15279 = vst [vmem:[#allocation32_spill] sm:$0xff] %v13414_v23  ;;  %5596 = vrot.lane.b32.xlu2 %v13394_v54, %s6361_s2 }
 0xd50   :  { %5474 = vrot.lane.b32.xlu1 %v13328_v38, %s6360_s1 }
 0xd52   :  { %5586 = vrot.lane.b32.xlu0 %v13243_v25, %s6361_s2 }
 0xd56   :  { %5470 = vrot.lane.b32.xlu2 %v5463_v63, %s6360_s1 }
 0xd58   :  { %5480 = vrot.lane.b32.xlu1 %v13356_v61, %s6360_s1 }
 0xd5a   :  { %5592 = vrot.lane.b32.xlu0 %v13265_v26, %s6361_s2 }
 0xd5e   :  { %5476 = vrot.lane.b32.xlu2 %v5460_v2, %s6360_s1 }
 0xd60   :  { %5510 = vrot.lane.b32.xlu1 %v5463_v63, %s6361_s2 }
 0xd62   :  { %5598 = vrot.lane.b32.xlu0 %v13280_v36, %s6361_s2 }
 0xd66   :  { %5506 = vrot.lane.b32.xlu2 %v13360_v50, %s6361_s2 }
 0xd68   :  { %5516 = vrot.lane.b32.xlu1 %v5460_v2, %s6361_s2 }
 0xd6a   :  { %5466 = vrot.lane.b32.xlu0 %v13360_v50, %s6360_s1 }
 0xd6e   :  { %5512 = vrot.lane.b32.xlu2 %v13381_v32, %s6361_s2 }
 0xd70   :  { %5638 = vrot.lane.b32.xlu1 %v13385_v51, %s6360_s1 }
 0xd72   :  { %5472 = vrot.lane.b32.xlu0 %v13381_v32, %s6360_s1 }
 0xd76   :  { %5518 = vrot.lane.b32.xlu2 %v13406_v6, %s6361_s2 }
 0xd78   :  { %5644 = vrot.lane.b32.xlu1 %v13410_v40, %s6360_s1 }
 0xd7a   :  { %5478 = vrot.lane.b32.xlu0 %v13406_v6, %s6360_s1 }
 0xd7e   :  { %5634 = vrot.lane.b32.xlu2 %v13306_v22, %s6360_s1 }
 0xd80   :  { %5682 = vrot.lane.b32.xlu1 %v13306_v22, %s6361_s2 }
 0xd82   :  { %5508 = vrot.lane.b32.xlu0 %v13302_v19, %s6361_s2 }
 0xd86   :  { %5640 = vrot.lane.b32.xlu2 %v13332_v33, %s6360_s1 }
 0xd88   :  { %v13456_v29 = vpop.permute.xlu2 %5540  ;;  %5688 = vrot.lane.b32.xlu1 %v13332_v33, %s6361_s2 }
 0xd8a   :  { %5514 = vrot.lane.b32.xlu0 %v13328_v38, %s6361_s2  ;;  %v5539_v39 = vpop.permute.xlu1 %5538 }
 0xd8e   :  { %5646 = vrot.lane.b32.xlu2 %v13364_v35, %s6360_s1 }
 0xd90   :  { %v13464_v8 = vpop.permute.xlu2 %5546  ;;  %5694 = vrot.lane.b32.xlu1 %v13364_v35, %s6361_s2 }
 0xd92   :  { %5520 = vrot.lane.b32.xlu0 %v13356_v61, %s6361_s2  ;;  %v13470_v10 = vpop.permute.xlu1 %5544 }
 0xd96   :  { %5684 = vrot.lane.b32.xlu2 %v13389_v20, %s6361_s2 }
 0xd98   :  { %v13474_v37 = vpop.permute.xlu2 %5552 }
 0xd99   :  { %15280 = vst [vmem:[#allocation101_spill] sm:$0xff] %v13474_v37 }
 0xd9a   :  { %5636 = vrot.lane.b32.xlu0 %v13389_v20, %s6360_s1  ;;  %v13478_v62 = vpop.permute.xlu1 %5550 }
 0xd9e   :  { %5690 = vrot.lane.b32.xlu2 %v13414_v23, %s6361_s2 }
 0xda0   :  { %v5591_v49 = vpop.permute.xlu2 %5590 }
 0xda2   :  { %5642 = vrot.lane.b32.xlu0 %v13414_v23, %s6360_s1  ;;  %v13484_v55 = vpop.permute.xlu1 %5588 }
 0xda6   :  { %5696 = vrot.lane.b32.xlu2 %v13370_v3, %s6361_s2 }
 0xda8   :  { %v5597_v5 = vpop.permute.xlu2 %5596 }
 0xdaa   :  { %5648 = vrot.lane.b32.xlu0 %v13370_v3, %s6360_s1  ;;  %v13490_v7 = vpop.permute.xlu1 %5594  ;;  %s6362_s1 = smov [#allocation14]  }
 0xdb0   :  { %v5471_v52 = vpop.permute.xlu2 %5470 }
 0xdb1   :  { %v5484_v58 = vmul.f32 %v5471_v52, %v11926_v15 }
 0xdb2   :  { %5686 = vrot.lane.b32.xlu0 %v13385_v51, %s6361_s2  ;;  %v13496_v44 = vpop.permute.xlu1 %5600 }
 0xdb3   :  { %15281 = vst [vmem:[#allocation96_spill] sm:$0xff] %v13496_v44  ;;  %v5500_v53 = vadd.f32 %v5492_v57, %v5484_v58 }
 0xdb4   :  { %v5543_v56 = vpop.permute.xlu0 %5542 }
 0xdb5   :  { %v5556_v2 = vmul.f32 %v5543_v56, %v11936_v59  ;;  %v5490_v56 = vmul.f32 %v13360_v50, %v11928_v27  ;;  %v5570_v50 = vmul.f32 %v13243_v25, %v11942_v43 }
 0xdb8   :  { %v5477_v16 = vpop.permute.xlu2 %5476 }
 0xdb9   :  { %v5487_v11 = vmul.f32 %v5477_v16, %v11926_v15 }
 0xdba   :  { %5692 = vrot.lane.b32.xlu0 %v13410_v40, %s6361_s2  ;;  %v13502_v48 = vpop.permute.xlu1 %5468  ;;  %s6135_s2 = sshll.u32 %s6362_s1, 4  ;;  %s6136_s2 = int_to_ptr.vmem [resolvable:$true] %s6135_s2 }
 0xdbb   :  { %v5503_v63 = vadd.f32 %v5495_v18, %v5487_v11  ;;  %v5572_v18 = vmul.f32 %v13350_v1, %v11942_v43  ;;  %v5604_v11 = vmul.f32 %v5591_v49, %v11945_v31 }
 0xdbc   :  { %v5549_v3 = vpop.permute.xlu0 %5548 }
 0xdc0   :  { %v5507_v51 = vpop.permute.xlu2 %5506 }
 0xdc1   :  { %v5522_v1 = vmul.f32 %v5507_v51, %v11934_v12 }
 0xdc2   :  { %v13504_v52 = vpop.permute.xlu1 %5474 }
 0xdc4   :  { %v5587_v34 = vpop.permute.xlu0 %5586 }
 0xdc8   :  { %v5513_v58 = vpop.permute.xlu2 %5512 }
 0xdca   :  { %v13506_v42 = vpop.permute.xlu1 %5480 }
 0xdcc   :  { %v5593_v57 = vpop.permute.xlu0 %5592 }
 0xdd0   :  { %v5519_v44 = vpop.permute.xlu2 %5518 }
 0xdd2   :  { %v5511_v23 = vpop.permute.xlu1 %5510 }
 0xdd3   :  { %v5524_v16 = vmul.f32 %v5511_v23, %v11934_v12  ;;  %v5559_v23 = vmul.f32 %v5549_v3, %v11936_v59 }
 0xdd4   :  { %v13509_v14 = vpop.permute.xlu0 %5598 }
 0xdd5   :  { %v5532_v40 = vadd.f32 %v5524_v16, %v5500_v53 }
 0xdd7   :  { %v5564_v4 = vadd.f32 %v5556_v2, %v5532_v40 }
 0xdd9   :  { %v5580_v20 = vadd.f32 %v5572_v18, %v5564_v4  ;;  %v5575_v4 = vmul.f32 %v13394_v54, %v11942_v43  ;;  %v5493_v54 = vmul.f32 %v13381_v32, %v11928_v27  ;;  %v5496_v32 = vmul.f32 %v13406_v6, %v11928_v27 }
 0xdda   :  { %v5517_v9 = vpop.permute.xlu1 %5516  ;;  %v5666_v6 = vmul.f32 %v13306_v22, %v11961_v28  ;;  %v5608_v22 = vmul.f32 %v13509_v14, %v11945_v31 }
 0xddb   :  { %v5527_v46 = vmul.f32 %v5517_v9, %v11934_v12  ;;  %v13516_v37 = vadd.f32 %v5604_v11, %v5580_v20  ;;  %v5554_v9 = vmul.f32 %v5539_v39, %v11936_v59  ;;  %v5607_v20 = vmul.f32 %v5597_v5, %v11945_v31 }
 0xddc   :  { %v5467_v61 = vpop.permute.xlu0 %5466  ;;  %v5525_v5 = vmul.f32 %v5513_v58, %v11934_v12  ;;  %v5605_v58 = vmul.f32 %v5593_v57, %v11945_v31  ;;  %v5560_v57 = vmul.f32 %v13478_v62, %v11936_v59 }
 0xddd   :  { %v5482_v40 = vmul.f32 %v5467_v61, %v11926_v15  ;;  %v5535_v53 = vadd.f32 %v5527_v46, %v5503_v63  ;;  %v5635_v63 = vpop.permute.xlu2 %5634 }
 0xddf   :  { %v5498_v16 = vadd.f32 %v5490_v56, %v5482_v40  ;;  %v5567_v49 = vadd.f32 %v5559_v23, %v5535_v53  ;;  %v5557_v56 = vmul.f32 %v13470_v10, %v11936_v59  ;;  %v5602_v40 = vmul.f32 %v5587_v34, %v11945_v31 }
 0xde0   :  { %v5528_v34 = vmul.f32 %v5519_v44, %v11934_v12  ;;  %v5491_v44 = vmul.f32 %v13302_v19, %v11928_v27 }
 0xde1   :  { %v5530_v2 = vadd.f32 %v5522_v1, %v5498_v16  ;;  %v5583_v18 = vadd.f32 %v5575_v4, %v5567_v49  ;;  %v5573_v1 = vmul.f32 %v13265_v26, %v11942_v43  ;;  %v15282_v26 = vld [vmem:[#allocation56_spill] sm:$0xff] }
 0xde2   :  { %v13527_v3 = vpop.permute.xlu1 %5638 }
 0xde3   :  { %v5562_v61 = vadd.f32 %v5554_v9, %v5530_v2  ;;  %v13531_v46 = vadd.f32 %v5607_v20, %v5583_v18  ;;  %v5650_v9 = vmul.f32 %v5635_v63, %v11953_v21 }
 0xde4   :  { %v5473_v51 = vpop.permute.xlu0 %5472 }
 0xde5   :  { %v5578_v11 = vadd.f32 %v5570_v50, %v5562_v61  ;;  %v5485_v39 = vmul.f32 %v5473_v51, %v11926_v15  ;;  %v5641_v2 = vpop.permute.xlu2 %5640  ;;  %v5402_v51 = vadd.f32 %v13043_v30, %v15282_v26 }
 0xde7   :  { %v5501_v23 = vadd.f32 %v5493_v54, %v5485_v39  ;;  %v5610_v49 = vadd.f32 %v5602_v40, %v5578_v11  ;;  %v5483_v11 = vmul.f32 %v13502_v48, %v11926_v15  ;;  %v5714_v54 = vmul.f32 4.0, %v12829_v60 }
 0xde9   :  { %v5533_v25 = vadd.f32 %v5525_v5, %v5501_v23  ;;  %v5658_v50 = vadd.f32 %v5650_v9, %v5610_v49  ;;  %v5576_v5 = vmul.f32 %v13280_v36, %v11942_v43  ;;  %v5499_v40 = vadd.f32 %v5491_v44, %v5483_v11 }
 0xdea   :  { %v13540_v53 = vpop.permute.xlu1 %5644  ;;  %v5555_v49 = vmul.f32 %v13456_v29, %v11936_v59  ;;  %v5603_v11 = vmul.f32 %v13484_v55, %v11945_v31 }
 0xdeb   :  { %v5565_v16 = vadd.f32 %v5557_v56, %v5533_v25  ;;  %v5674_v23 = vadd.f32 %v5666_v6, %v5658_v50  ;;  %v5722_v56 = vsub.f32 %v5714_v54, %v5402_v51  ;;  %v5653_v25 = vmul.f32 %v5641_v2, %v11953_v21 }
 0xdec   :  { %v5479_v4 = vpop.permute.xlu0 %5478  ;;  %v5486_v2 = vmul.f32 %v13504_v52, %v11926_v15  ;;  %v5571_v51 = vmul.f32 %v13286_v0, %v11942_v43 }
 0xded   :  { %v5581_v20 = vadd.f32 %v5573_v1, %v5565_v16  ;;  %v5488_v10 = vmul.f32 %v5479_v4, %v11926_v15  ;;  %v15283_v4 = vld [vmem:[#allocation22_spill] sm:$0xff]  ;;  %v5647_v50 = vpop.permute.xlu2 %5646 }
 0xdef   :  { %v5504_v18 = vadd.f32 %v5496_v32, %v5488_v10  ;;  %v5613_v61 = vadd.f32 %v5605_v58, %v5581_v20  ;;  %v15284_v20 = vld [vmem:[#allocation47_spill] sm:$0xff] }
 0xdf0   :  { %v5746_v10 = vmul.f32 %v5722_v56, %v15284_v20 }
 0xdf1   :  { %v5536_v63 = vadd.f32 %v5528_v34, %v5504_v18  ;;  %v5661_v58 = vadd.f32 %v5653_v25, %v5613_v61  ;;  %v15285_v34 = vld [vmem:[#allocation142_spill] sm:$0xff]  ;;  %v5669_v18 = vmul.f32 %v13332_v33, %v11961_v28  ;;  %v5717_v61 = vmul.f32 4.0, %v12854_v17 }
 0xdf2   :  { %v5683_v39 = vpop.permute.xlu1 %5682  ;;  %v5405_v14 = vadd.f32 %v13059_v45, %v15285_v34  ;;  %v5494_v45 = vmul.f32 %v13328_v38, %v11928_v27  ;;  %v5558_v38 = vmul.f32 %v13464_v8, %v11936_v59  ;;  %v5489_v8 = vmul.f32 %v13506_v42, %v11926_v15 }
 0xdf3   :  { %v5568_v30 = vadd.f32 %v5560_v57, %v5536_v63  ;;  %v5698_v48 = vmul.f32 %v5683_v39, %v11970_v41  ;;  %v5677_v52 = vadd.f32 %v5669_v18, %v5661_v58  ;;  %v15288_v58 = vld [vmem:[#allocation34_spill] sm:$0xff] }
 0xdf4   :  { %v5509_v62 = vpop.permute.xlu0 %5508  ;;  %v5725_v54 = vsub.f32 %v5717_v61, %v5405_v14  ;;  %v5502_v44 = vadd.f32 %v5494_v45, %v5486_v2 }
 0xdf5   :  { %v5584_v1 = vadd.f32 %v5576_v5, %v5568_v30  ;;  %v5523_v16 = vmul.f32 %v5509_v62, %v11934_v12  ;;  %v5706_v19 = vadd.f32 %v5698_v48, %v5674_v23  ;;  %v15286_v30 = vld [vmem:[#allocation24_spill] sm:$0xff]  ;;  %v15287_v62 = vld [vmem:[#allocation102_spill] sm:$0xff] }
 0xdf6   :  { %v5408_v25 = vadd.f32 %v13072_v24, %v15287_v62  ;;  %v5497_v24 = vmul.f32 %v15288_v58, %v11928_v27  ;;  %v15299_v58 = vld [vmem:[#allocation54_spill] sm:$0xff] }
 0xdf7   :  { %v5531_v36 = vadd.f32 %v5523_v16, %v5499_v40  ;;  %v5730_v32 = vmul.f32 %v5706_v19, %v15283_v4  ;;  %v5616_v9 = vadd.f32 %v5608_v22, %v5584_v1  ;;  %v5749_v22 = vmul.f32 %v5725_v54, %v15284_v20 }
 0xdf8   :  { %v5574_v1 = vmul.f32 %v13311_v13, %v11942_v43  ;;  %v5672_v16 = vmul.f32 %v13364_v35, %v11961_v28  ;;  %v5505_v42 = vadd.f32 %v5497_v24, %v5489_v8  ;;  %v5718_v24 = vmul.f32 4.0, %v15299_v58 }
 0xdf9   :  { %v5563_v26 = vadd.f32 %v5555_v49, %v5531_v36  ;;  %v5738_v29 = vsub.f32 %v12829_v60, %v5730_v32  ;;  %v5656_v60 = vmul.f32 %v5647_v50, %v11953_v21  ;;  %v5720_v36 = vmul.f32 4.0, %v12884_v47  ;;  %v15289_v50 = vld [vmem:[#allocation101_spill] sm:$0xff] }
 0xdfa   :  { %v5689_v6 = vpop.permute.xlu1 %5688  ;;  %v5606_v32 = vmul.f32 %v13490_v7, %v11945_v31  ;;  %v5561_v7 = vmul.f32 %v15289_v50, %v11936_v59 }
 0xdfb   :  { %v5701_v57 = vmul.f32 %v5689_v6, %v11970_v41  ;;  %v5754_v33 = vsub.f32 %v5738_v29, %v5746_v10  ;;  %v5579_v63 = vadd.f32 %v5571_v51, %v5563_v26  ;;  %v5664_v40 = vadd.f32 %v5656_v60, %v5616_v9  ;;  %v5685_v6 = vpop.permute.xlu2 %5684  ;;  %v15293_v60 = vld [vmem:[#allocation65_spill] sm:$0xff] }
 0xdfc   :  { %v5515_v39 = vpop.permute.xlu0 %5514  ;;  %v5728_v14 = vsub.f32 %v5720_v36, %v5408_v25 }
 0xdfd   :  { %v5526_v0 = vmul.f32 %v5515_v39, %v11934_v12  ;;  %v5709_v5 = vadd.f32 %v5701_v57, %v5677_v52  ;;  %v13590_v23 = vsub.f32 %v15286_v30, %v5754_v33  ;;  %v5611_v55 = vadd.f32 %v5603_v11, %v5579_v63  ;;  %v15290_v11 = vld [vmem:[#allocation92_spill] sm:$0xff]  ;;  %v15295_v30 = vld [vmem:[#allocation82_spill] sm:$0xff] }
 0xdfe   :  { %v5680_v10 = vadd.f32 %v5672_v16, %v5664_v40  ;;  %v5752_v29 = vmul.f32 %v5728_v14, %v15284_v20  ;;  %v5577_v45 = vmul.f32 %v15290_v11, %v11942_v43  ;;  %v15291_v52 = vld [vmem:[#allocation96_spill] sm:$0xff]  ;;  %v5715_v43 = vmul.f32 4.0, %v15295_v30  ;;  %v15297_v16 = vld [vmem:[#allocation89_spill] sm:$0xff] }
 0xdff   :  { %v5534_v48 = vadd.f32 %v5526_v0, %v5502_v44  ;;  %v5733_v56 = vmul.f32 %v5709_v5, %v15283_v4  ;;  %6034 = vmin.xlane.f32.xlu0 %v13590_v23  ;;  %v15292_v44 = vld [vmem:[#allocation60_spill] sm:$0xff]  ;;  %v15294_v0 = vld [vmem:[#allocation117_spill] sm:$0xff] }
 0xe00   :  { %v5403_v39 = vadd.f32 %v15293_v60, %v15292_v44  ;;  %v15305_v44 = vld [vmem:[#allocation95_spill] sm:$0xff] }
 0xe01   :  { %v5566_v19 = vadd.f32 %v5558_v38, %v5534_v48  ;;  %v5741_v49 = vsub.f32 %v12854_v17, %v5733_v56  ;;  %v5699_v38 = vmul.f32 %v5685_v6, %v11970_v41  ;;  %v15306_v60 = vld [vmem:[#allocation63_spill] sm:$0xff] }
 0xe02   :  { %v5695_v9 = vpop.permute.xlu1 %5694 }
 0xe03   :  { %v5704_v13 = vmul.f32 %v5695_v9, %v11970_v41  ;;  %v5582_v34 = vadd.f32 %v5574_v1, %v5566_v19  ;;  %v13612_v35 = vsub.f32 %v5741_v49, %v5749_v22  ;;  %v5691_v40 = vpop.permute.xlu2 %5690  ;;  %v15296_v1 = vld [vmem:[#allocation113_spill] sm:$0xff] }
 0xe04   :  { %v5521_v15 = vpop.permute.xlu0 %5520  ;;  %v5406_v8 = vadd.f32 %v15297_v16, %v15296_v1  ;;  %v5702_v9 = vmul.f32 %v5691_v40, %v11970_v41 }
 0xe05   :  { %v5529_v17 = vmul.f32 %v5521_v15, %v11934_v12  ;;  %v5712_v2 = vadd.f32 %v5704_v13, %v5680_v10  ;;  %v5614_v18 = vadd.f32 %v5606_v32, %v5582_v34  ;;  %v5609_v12 = vmul.f32 %v15291_v52, %v11945_v31  ;;  %v15300_v15 = vld [vmem:[#allocation123_spill] sm:$0xff]  ;;  %v15304_v52 = vld [vmem:[#allocation58_spill] sm:$0xff] }
 0xe06   :  { %v5723_v31 = vsub.f32 %v5715_v43, %v5403_v39  ;;  %v5726_v34 = vsub.f32 %v5718_v24, %v5406_v8  ;;  %v5404_v39 = vadd.f32 %v15306_v60, %v15305_v44  ;;  %v15308_v43 = vld [vmem:[#allocation43_spill] sm:$0xff] }
 0xe07   :  { %v5537_v26 = vadd.f32 %v5529_v17, %v5505_v42  ;;  %v5736_v27 = vmul.f32 %v5712_v2, %v15283_v4  ;;  %v5652_v2 = vmul.f32 %v13527_v3, %v11953_v21  ;;  %v5721_v3 = vmul.f32 4.0, %v15304_v52 }
 0xe08   :  { %v5747_v19 = vmul.f32 %v5723_v31, %v15284_v20 }
 0xe09   :  { %v5569_v51 = vadd.f32 %v5561_v7, %v5537_v26  ;;  %v5744_v61 = vsub.f32 %v12884_v47, %v5736_v27  ;;  %v5667_v47 = vmul.f32 %v15294_v0, %v11961_v28  ;;  %v5750_v7 = vmul.f32 %v5726_v34, %v15284_v20  ;;  %v15301_v27 = vld [vmem:[#allocation131_spill] sm:$0xff]  ;;  %v15314_v34 = vld [vmem:[#allocation62_spill] sm:$0xff] }
 0xe0b   :  { %v5585_v57 = vadd.f32 %v5577_v45, %v5569_v51  ;;  %v13624_v33 = vsub.f32 %v5744_v61, %v5752_v29  ;;  %v5697_v26 = vpop.permute.xlu2 %5696  ;;  %v15302_v29 = vld [vmem:[#allocation88_spill] sm:$0xff]  ;;  %v15303_v61 = vld [vmem:[#allocation103_spill] sm:$0xff] }
 0xe0c   :  { %v5637_v63 = vpop.permute.xlu0 %5636  ;;  %v5409_v51 = vadd.f32 %v15302_v29, %v15301_v27  ;;  %v5673_v11 = vmul.f32 %v15303_v61, %v11961_v28  ;;  %v15317_v61 = vld [vmem:[#allocation72_spill] sm:$0xff] }
 0xe0d   :  { %v5651_v59 = vmul.f32 %v5637_v63, %v11953_v21  ;;  %v5617_v54 = vadd.f32 %v5609_v12, %v5585_v57  ;;  %v5660_v12 = vadd.f32 %v5652_v2, %v13516_v37  ;;  %v5705_v57 = vmul.f32 %v5697_v26, %v11970_v41 }
 0xe0e   :  { %v5729_v0 = vsub.f32 %v5721_v3, %v5409_v51  ;;  %v5655_v37 = vmul.f32 %v13540_v53, %v11953_v21  ;;  %v15310_v53 = vld [vmem:[#allocation80_spill] sm:$0xff] }
 0xe0f   :  { %v5659_v5 = vadd.f32 %v5651_v59, %v5611_v55  ;;  %v15298_v55 = vld [vmem:[#allocation32_spill] sm:$0xff] }
 0xe10   :  { %v5670_v49 = vmul.f32 %v15298_v55, %v11961_v28  ;;  %v5663_v8 = vadd.f32 %v5655_v37, %v13531_v46 }
 0xe11   :  { %v5675_v48 = vadd.f32 %v5667_v47, %v5659_v5  ;;  %v15307_v47 = vld [vmem:[#allocation105_spill] sm:$0xff] }
 0xe12   :  { %v5668_v5 = vmul.f32 %v15307_v47, %v11961_v28 }
 0xe13   :  { %v5707_v56 = vadd.f32 %v5699_v38, %v5675_v48  ;;  %v15309_v38 = vld [vmem:[#allocation79_spill] sm:$0xff] }
 0xe14   :  { %v5643_v22 = vpop.permute.xlu0 %5642  ;;  %v5716_v48 = vmul.f32 4.0, %v15309_v38  ;;  %v5676_v40 = vadd.f32 %v5668_v5, %v5660_v12 }
 0xe15   :  { %v5731_v62 = vmul.f32 %v5707_v56, %v15283_v4  ;;  %v5654_v25 = vmul.f32 %v5643_v22, %v11953_v21 }
 0xe17   :  { %v5662_v36 = vadd.f32 %v5654_v25, %v5614_v18  ;;  %v5739_v32 = vsub.f32 %v15295_v30, %v5731_v62  ;;  %v5724_v62 = vsub.f32 %v5716_v48, %v5404_v39  ;;  %v5753_v25 = vmul.f32 %v5729_v0, %v15284_v20 }
 0xe19   :  { %v5678_v10 = vadd.f32 %v5670_v49, %v5662_v36  ;;  %v5755_v13 = vsub.f32 %v5739_v32, %v5747_v19  ;;  %v15311_v49 = vld [vmem:[#allocation86_spill] sm:$0xff] }
 0xe1a   :  { %v5407_v36 = vadd.f32 %v15311_v49, %v15310_v53  ;;  %v15312_v32 = vld [vmem:[#allocation94_spill] sm:$0xff] }
 0xe1b   :  { %v5710_v14 = vadd.f32 %v5702_v9, %v5678_v10  ;;  %v13644_v42 = vsub.f32 %v15300_v15, %v5755_v13  ;;  %v15313_v9 = vld [vmem:[#allocation124_spill] sm:$0xff] }
 0xe1c   :  { %v5649_v17 = vpop.permute.xlu0 %5648 }
 0xe1d   :  { %v5734_v50 = vmul.f32 %v5710_v14, %v15283_v4  ;;  %v5657_v18 = vmul.f32 %v5649_v17, %v11953_v21  ;;  %6036 = vmin.xlane.f32.xlu1 %v13644_v42  ;;  %v5748_v21 = vmul.f32 %v5724_v62, %v15284_v20  ;;  %v5719_v14 = vmul.f32 4.0, %v15314_v34 }
 0xe1f   :  { %v5665_v45 = vadd.f32 %v5657_v18, %v5617_v54  ;;  %v5742_v6 = vsub.f32 %v15299_v58, %v5734_v50  ;;  %v5671_v58 = vmul.f32 %v15312_v32, %v11961_v28  ;;  %v5727_v2 = vsub.f32 %v5719_v14, %v5407_v36  ;;  %v15315_v18 = vld [vmem:[#allocation76_spill] sm:$0xff] }
 0xe21   :  { %v5681_v63 = vadd.f32 %v5673_v11, %v5665_v45  ;;  %v5758_v59 = vsub.f32 %v5742_v6, %v5750_v7  ;;  %v5679_v46 = vadd.f32 %v5671_v58, %v5663_v8  ;;  %v5751_v27 = vmul.f32 %v5727_v2, %v15284_v20 }
 0xe22   :  { %v13702_v11 = vsub.f32 %v15317_v61, %v13612_v35 }
 0xe23   :  { %v5713_v30 = vadd.f32 %v5705_v57, %v5681_v63  ;;  %v13665_v54 = vsub.f32 %v15308_v43, %v5758_v59 }
 0xe24   :  { %v5687_v31 = vpop.permute.xlu0 %5686 }
 0xe25   :  { %v5737_v56 = vmul.f32 %v5713_v30, %v15283_v4  ;;  %v5700_v22 = vmul.f32 %v5687_v31, %v11970_v41  ;;  %6042 = vmin.xlane.f32.xlu0 %v13665_v54 }
 0xe27   :  { %v5708_v1 = vadd.f32 %v5700_v22, %v5676_v40  ;;  %v5745_v16 = vsub.f32 %v15304_v52, %v5737_v56 }
 0xe29   :  { %v5732_v19 = vmul.f32 %v5708_v1, %v15283_v4  ;;  %v5761_v55 = vsub.f32 %v5745_v16, %v5753_v25 }
 0xe2b   :  { %v5740_v24 = vsub.f32 %v15309_v38, %v5732_v19  ;;  %v13684_v10 = vsub.f32 %v15313_v9, %v5761_v55 }
 0xe2c   :  { %v5693_v13 = vpop.permute.xlu0 %5692 }
 0xe2d   :  { %v5703_v15 = vmul.f32 %v5693_v13, %v11970_v41  ;;  %6048 = vmin.xlane.f32.xlu0 %v13684_v10  ;;  %v5756_v17 = vsub.f32 %v5740_v24, %v5748_v21  ;;  %v15316_v41 = vld [vmem:[#allocation53_spill] sm:$0xff] }
 0xe2f   :  { %v5711_v50 = vadd.f32 %v5703_v15, %v5679_v46  ;;  %v13690_v7 = vsub.f32 %v15315_v18, %v5756_v17 }
 0xe31   :  { %v5735_v28 = vmul.f32 %v5711_v50, %v15283_v4  ;;  %6038 = vmin.xlane.f32.xlu2 %v13690_v7  ;;  %v15318_v4 = vld [vmem:[#allocation130_spill] sm:$0xff] }
 0xe32   :  { %v13709_v45 = vsub.f32 %v15318_v4, %v13624_v33 }
 0xe33   :  { %v5743_v26 = vsub.f32 %v15314_v34, %v5735_v28 }
 0xe35   :  { %6067 = vmax.xlane.f32.xlu0 %v13690_v7  ;;  %v5759_v29 = vsub.f32 %v5743_v26, %v5751_v27 }
 0xe37   :  { %v13698_v51 = vsub.f32 %v15316_v41, %v5759_v29 }
 0xe39   :  { %6044 = vmin.xlane.f32.xlu1 %v13698_v51  ;;  %6040 = vmin.xlane.f32.xlu2 %v13702_v11 }
 0xe3d   :  { %6073 = vmax.xlane.f32.xlu0 %v13698_v51 }
 0xe41   :  { %6063 = vmax.xlane.f32.xlu1 %v13590_v23  ;;  %6046 = vmin.xlane.f32.xlu2 %v13709_v45 }
 0xe49   :  { %6069 = vmax.xlane.f32.xlu1 %v13702_v11  ;;  %6065 = vmax.xlane.f32.xlu2 %v13644_v42 }
 0xe51   :  { %6075 = vmax.xlane.f32.xlu1 %v13709_v45  ;;  %6071 = vmax.xlane.f32.xlu2 %v13665_v54 }
 0xe59   :  { %6077 = vmax.xlane.f32.xlu2 %v13684_v10 }
 0xe72   :  { %v6035_v6 = vpop.xlane.xlu0 %6034 }
 0xe90   :  { %v6037_v20 = vpop.xlane.xlu1 %6036 }
 0xe98   :  { %v6043_v3 = vpop.xlane.xlu0 %6042 }
 0xe99   :  { %v6050_v47 = vmin.f32 %v6035_v6, %v6043_v3 }
 0xea0   :  { %v6049_v63 = vpop.xlane.xlu0 %6048 }
 0xea4   :  { %v6039_v35 = vpop.xlane.xlu2 %6038 }
 0xea8   :  { %v6068_v30 = vpop.xlane.xlu0 %6067 }
 0xeac   :  { %v6041_v52 = vpop.xlane.xlu2 %6040  ;;  %v6045_v33 = vpop.xlane.xlu1 %6044 }
 0xead   :  { %v6053_v60 = vmin.f32 %v6041_v52, %v6049_v63  ;;  %v6051_v39 = vmin.f32 %v6037_v20, %v6045_v33 }
 0xeaf   :  { %v6054_v43 = vmin.f32 %v6050_v47, %v6051_v39 }
 0xeb0   :  { %v6074_v40 = vpop.xlane.xlu0 %6073 }
 0xeb4   :  { %v6047_v12 = vpop.xlane.xlu2 %6046  ;;  %v6064_v57 = vpop.xlane.xlu1 %6063 }
 0xeb5   :  { %v6052_v44 = vmin.f32 %v6039_v35, %v6047_v12 }
 0xeb7   :  { %v6055_v5 = vmin.f32 %v6052_v44, %v6053_v60 }
 0xeb9   :  { %v6056_v48 = vmin.f32 %v6054_v43, %v6055_v5 }
 0xebb   :  { %v6057_v31 = vrot.slane %v6056_v48, 4 }
 0xebc   :  { %v6066_v59 = vpop.xlane.xlu2 %6065  ;;  %v6070_v0 = vpop.xlane.xlu1 %6069 }
 0xebd   :  { %v6058_v62 = vmin.f32 %v6056_v48, %v6057_v31  ;;  %v6080_v25 = vmax.f32 %v6066_v59, %v6074_v40 }
 0xebf   :  { %v6059_v55 = vrot.slane %v6058_v62, 2 }
 0xec1   :  { %v6060_v49 = vmin.f32 %v6058_v62, %v6059_v55 }
 0xec3   :  { %v6061_v58 = vrot.slane %v6060_v49, 1 }
 0xec4   :  { %v6072_v38 = vpop.xlane.xlu2 %6071  ;;  %v6076_v37 = vpop.xlane.xlu1 %6075 }
 0xec5   :  { %v6079_v56 = vmax.f32 %v6064_v57, %v6072_v38  ;;  %v6081_v1 = vmax.f32 %v6068_v30, %v6076_v37  ;;  %v6062_v13 = vmin.f32 %v6060_v49, %v6061_v58 }
 0xec7   :  { %v6083_v8 = vmax.f32 %v6079_v56, %v6080_v25  ;;  %v6107_v27 = vsub.f32 %v13590_v23, %v6062_v13  ;;  %v6108_v41 = vsub.f32 %v13644_v42, %v6062_v13  ;;  %v6109_v61 = vsub.f32 %v13690_v7, %v6062_v13 }
 0xec8   :  { %v6110_v20 = vsub.f32 %v13702_v11, %v6062_v13  ;;  %v6111_v35 = vsub.f32 %v13665_v54, %v6062_v13  ;;  %v6112_v3 = vsub.f32 %v13698_v51, %v6062_v13  ;;  %v6113_v57 = vsub.f32 %v13709_v45, %v6062_v13 }
 0xec9   :  { %v6114_v63 = vsub.f32 %v13684_v10, %v6062_v13 }
 0xecc   :  { %v6078_v22 = vpop.xlane.xlu2 %6077 }
 0xecd   :  { %v6082_v16 = vmax.f32 %v6070_v0, %v6078_v22 }
 0xecf   :  { %v6084_v19 = vmax.f32 %v6081_v1, %v6082_v16 }
 0xed1   :  { %v6085_v21 = vmax.f32 %v6083_v8, %v6084_v19 }
 0xed3   :  { %v6086_v53 = vrot.slane %v6085_v21, 4 }
 0xed5   :  { %v6087_v36 = vmax.f32 %v6085_v21, %v6086_v53 }
 0xed7   :  { %v6088_v32 = vrot.slane %v6087_v36, 2 }
 0xed9   :  { %v6089_v24 = vmax.f32 %v6087_v36, %v6088_v32 }
 0xedb   :  { %v6090_v9 = vrot.slane %v6089_v24, 1 }
 0xedd   :  { %v6091_v34 = vmax.f32 %v6089_v24, %v6090_v9 }
 0xedf   :  { %v6092_v14 = vsub.f32 %v6091_v34, %v6062_v13 }
 0xee1   :  { %6246 = vrcp.f32 %v6092_v14  ;;  %v6104_v2 = vand.u32 2147483648, %v6092_v14  ;;  %v6102_v18 = vand.u32 2147483647, %v6092_v14  ;;  %vm6098_vm1 = vweird.f32 %v6092_v14 }
 0xee3   :  { %v6105_v26 = vor.u32 1.1754944e-38, %v6104_v2  ;;  %vm6103_vm2 = vcmp.eq.f32.partialorder %v6102_v18, 8.507059e+37 }
 0xee7   :  { %v6247_v46 = vpop.eup %6246 }
 0xee8   :  { %v6094_v15 = vmul.f32 %v6247_v46, %v6092_v14  ;;  %vm6099_vm0 = vweird.f32 %v6247_v46 }
 0xee9   :  { %vm6100_vm15 = vmor %vm6098_vm1, %vm6099_vm0 }
 0xeea   :  { %v6095_v17 = vsub.f32 1.0, %v6094_v15 }
 0xeec   :  { %v6096_v50 = vmul.f32 %v6247_v46, %v6095_v17 }
 0xeee   :  { %v6097_v28 = vadd.f32 %v6247_v46, %v6096_v50 }
 0xef0   :  { %v6101_v29 = vsel %vm6100_vm15, %v6247_v46, %v6097_v28 }
 0xef1   :  { %v6106_v4 = vsel %vm6103_vm2, %v6105_v26, %v6101_v29 }
 0xef2   :  { %v6115_v6 = vmul.f32 %v6107_v27, %v6106_v4  ;;  %v6116_v52 = vmul.f32 %v6108_v41, %v6106_v4  ;;  %v6117_v33 = vmul.f32 %v6109_v61, %v6106_v4  ;;  %v6118_v12 = vmul.f32 %v6110_v20, %v6106_v4 }
 0xef3   :  { %v6119_v23 = vmul.f32 %v6111_v35, %v6106_v4  ;;  %v6120_v42 = vmul.f32 %v6112_v3, %v6106_v4  ;;  %v6121_v7 = vmul.f32 %v6113_v57, %v6106_v4  ;;  %v6122_v54 = vmul.f32 %v6114_v63, %v6106_v4 }
 0xef4   :  { %6123 = vst [vmem:[#allocation14] sm:$0xff] %v6115_v6 }
 0xef5   :  { %6124 = vst [vmem:[#allocation14 + $0x8] sm:$0xff] %v6116_v52 }
 0xef6   :  { %6125 = vst [vmem:[#allocation14 + $0x10] sm:$0xff] %v6117_v33 }
 0xef7   :  { %6126 = vst [vmem:[#allocation14 + $0x18] sm:$0xff] %v6118_v12 }
 0xef8   :  { %6127 = vst [vmem:[#allocation14 + $0x20] sm:$0xff] %v6119_v23 }
 0xef9   :  { %6128 = vst [vmem:[#allocation14 + $0x28] sm:$0xff] %v6120_v42 }
 0xefa   :  { %6129 = vst [vmem:[#allocation14 + $0x30] sm:$0xff] %v6121_v7 }
 0xefb   :  { %6130 = vst [vmem:[#allocation14 + $0x38] sm:$0xff] %v6122_v54 }
 0xefc   :  { %6143 = dma.vmem_to_hbm [thread:$0]  %s6136_s2, 1024, %s6138_s9, [#allocation9], %s6357_s25, %s6357_s25, %s6358_s0  }
 0xefd   :  { %6352 = dma.done.wait [#allocation9], 1024  }
 0xefe   :  { %6353 = vsyncadd [#allocation9], 4294966272 }
 0xeff   :  { %6148 = vsyncpa [#allocation8], 1 }
 0xf00   :  { %6149 = vsyncpa [#allocation9], 1 }
 0xf01   :  { %6150 = vsyncpa [#allocation10], 1 }
 0xf02   :  { %6151 = vsyncpa [#allocation12], 1 }

</bundles_post_ra>
